<compile_context>
chip_gen: v6e
topology: v6e:2x2x1
jax: 0.10.0
libtpu: 0.0.40
codegen_flags: <defaults>
</compile_context>

<pallas_src>
import functools

import jax
import jax.numpy as jnp
from jax.experimental import pallas as pl
from jax.experimental.pallas import tpu as pltpu

LANE = 128                      # lane-dense output width
_TILE_CAP = 512                 # M-tile cap (sized for v7x 64 MiB VMEM)
_VMEM_LIMIT = 32 * 1024 * 1024  # explicit scoped-VMEM budget (safe on v5e/v6e/v7x)


def _round_up(x, m):
    return (x + m - 1) // m * m


def _pick_tile(m, cap=_TILE_CAP):
    # multiple of 8 (f32 sublane), capped so 2 pipeline buffers fit v7x VMEM
    return min(cap, _round_up(m, 8))


def _compiler_params():
    return pltpu.CompilerParams(
        dimension_semantics=("parallel",),      # shard M-tiles across TCs on v7x
        vmem_limit_bytes=_VMEM_LIMIT,
    )


# ----------------------------------------------------------------------------
# Pallas kernels
# ----------------------------------------------------------------------------
def _conv_pool_kernel(p_ref, w_ref, b_ref, o_ref):
    """Fused conv(as matmul) + bias + ReLU + 2x2 maxpool.

    p_ref: (2, 2, TM, K) bf16   -- leading (2,2) are the pooling phases
    w_ref: (K, NP)        bf16  -- NP = 128 lane-dense padded output channels
    b_ref: (1, NP)        f32
    o_ref: (TM, NP)       f32   -- pooled, ReLU'd output rows
    """
    w = w_ref[...]
    b = b_ref[...]

    def head(p):
        y = jnp.dot(p, w, preferred_element_type=jnp.float32) + b
        return jnp.maximum(y, 0.0)

    m0 = jnp.maximum(head(p_ref[0, 0]), head(p_ref[0, 1]))
    m1 = jnp.maximum(head(p_ref[1, 0]), head(p_ref[1, 1]))
    o_ref[...] = jnp.maximum(m0, m1)


def _fc_fused_kernel(x_ref, w1_ref, b1_ref, w2_ref, b2_ref, o_ref):
    """h = relu(x @ W1 + b1); o = h @ W2 + b2 (all in one call, h stays in VMEM)."""
    h = jnp.dot(x_ref[...], w1_ref[...], preferred_element_type=jnp.float32)
    h = jnp.maximum(h + b1_ref[...], 0.0).astype(jnp.bfloat16)
    o_ref[...] = jnp.dot(h, w2_ref[...], preferred_element_type=jnp.float32) + b2_ref[...]


# ----------------------------------------------------------------------------
# Wrappers (JAX glue: im2col / padding / phase rearrangement only)
# ----------------------------------------------------------------------------
def conv_pool(x_nhwc, wcol, bias, *, k, pad, k_total):
    """conv(k x k, stride 1) + bias + ReLU + 2x2/2 maxpool, NHWC in/out."""
    B, H, W, C = x_nhwc.shape
    x = x_nhwc
    if pad:
        x = jnp.pad(x, ((0, 0), (pad, pad), (pad, pad), (0, 0)))
    Hp, Wp = x.shape[1], x.shape[2]
    Ho, Wo = Hp - k + 1, Wp - k + 1
    assert Ho % 2 == 0 and Wo % 2 == 0

    # im2col: (B, Ho, Wo, k*k*C), patch index ordered (di, dj, c)
    cols = [x[:, di:di + Ho, dj:dj + Wo, :] for di in range(k) for dj in range(k)]
    pat = jnp.concatenate(cols, axis=-1)
    kk = k * k * C
    if k_total > kk:                       # pad ragged K (e.g. 25 -> 32) with zeros
        pat = jnp.pad(pat, ((0, 0), (0, 0), (0, 0), (0, k_total - kk)))

    # put the 4 pooling phases in leading dims, channels stay in the lane dim
    Hq, Wq = Ho // 2, Wo // 2
    pat = pat.reshape(B, Hq, 2, Wq, 2, k_total)
    pat = jnp.transpose(pat, (2, 4, 0, 1, 3, 5)).reshape(2, 2, B * Hq * Wq, k_total)
    pat = pat.astype(jnp.bfloat16)

    M = B * Hq * Wq
    tm = _pick_tile(M)
    Mp = _round_up(M, tm)
    if Mp > M:
        pat = jnp.pad(pat, ((0, 0), (0, 0), (0, Mp - M), (0, 0)))

    npad = wcol.shape[1]
    out = pl.pallas_call(
        _conv_pool_kernel,
        out_shape=jax.ShapeDtypeStruct((Mp, npad), jnp.float32),
        grid=(Mp // tm,),
        in_specs=[
            pl.BlockSpec((2, 2, tm, k_total), lambda i: (0, 0, i, 0)),
            pl.BlockSpec((k_total, npad), lambda i: (0, 0)),
            pl.BlockSpec((1, npad), lambda i: (0, 0)),
        ],
        out_specs=pl.BlockSpec((tm, npad), lambda i: (i, 0)),
        compiler_params=_compiler_params(),
    )(pat, wcol, bias)
    return out[:M].reshape(B, Hq, Wq, npad)


def fc_fused(x, w1, b1, w2, b2):
    """relu(x @ w1 + b1) @ w2 + b2, lane-dense padded widths."""
    M, K1 = x.shape
    H1, N2 = w1.shape[1], w2.shape[1]
    tm = _pick_tile(M, cap=256)
    Mp = _round_up(M, tm)
    xb = x.astype(jnp.bfloat16)
    if Mp > M:
        xb = jnp.pad(xb, ((0, Mp - M), (0, 0)))
    out = pl.pallas_call(
        _fc_fused_kernel,
        out_shape=jax.ShapeDtypeStruct((Mp, N2), jnp.float32),
        grid=(Mp // tm,),
        in_specs=[
            pl.BlockSpec((tm, K1), lambda i: (i, 0)),
            pl.BlockSpec((K1, H1), lambda i: (0, 0)),
            pl.BlockSpec((1, H1), lambda i: (0, 0)),
            pl.BlockSpec((H1, N2), lambda i: (0, 0)),
            pl.BlockSpec((1, N2), lambda i: (0, 0)),
        ],
        out_specs=pl.BlockSpec((tm, N2), lambda i: (i, 0)),
        compiler_params=_compiler_params(),
    )(xb, w1, b1, w2, b2)
    return out[:M]


# ----------------------------------------------------------------------------
# Tensor-ring parameter construction (deterministic, synthetic)
# ----------------------------------------------------------------------------
def tr_cores(key, mode_dims, rank):
    keys = jax.random.split(key, len(mode_dims))
    s = 0.5 / jnp.sqrt(jnp.float32(rank))
    return [jax.random.normal(k, (rank, n, rank), jnp.float32) * s
            for k, n in zip(keys, mode_dims)]


def tr_gates(key, num_bonds, rank):
    # TODO(synk): REINFORCE gates sample Bernoulli masks during training; here we
    # use deterministic sigmoid(logit) scalings (the expected gate) at build time.
    keys = jax.random.split(key, num_bonds)
    return [jax.nn.sigmoid(jax.random.normal(k, (rank,), jnp.float32)) for k in keys]


def tr_to_dense(cores, gates):
    """Contract a gated tensor ring into its full dense tensor."""
    cg = [c * g[:, None, None] for c, g in zip(cores, gates)]

    def chain(cs):
        t = cs[0]
        for g in cs[1:]:
            r0 = t.shape[0]
            t = jnp.einsum('anb,bmc->anmc', t, g).reshape(r0, -1, g.shape[2])
        return t

    half = max(1, len(cg) // 2)
    left, right = chain(cg[:half]), chain(cg[half:])
    full = jnp.einsum('aib,bja->ij', left, right)
    return full.reshape(tuple(c.shape[1] for c in cores))


def _conv_wcol(w_oihw, k, cin_pad, k_total, n_pad):
    """(O,I,k,k) -> (k_total, n_pad) bf16 column weight matching im2col (di,dj,c)."""
    O, I = w_oihw.shape[0], w_oihw.shape[1]
    w = jnp.transpose(w_oihw, (2, 3, 1, 0))                       # (k,k,I,O)
    w = jnp.pad(w, ((0, 0), (0, 0), (0, cin_pad - I), (0, n_pad - O)))
    w = w.reshape(k * k * cin_pad, n_pad)
    if k_total > k * k * cin_pad:
        w = jnp.pad(w, ((0, k_total - k * k * cin_pad), (0, 0)))
    return w.astype(jnp.bfloat16)


def _pad_bias(b, n_pad):
    return jnp.pad(b, (0, n_pad - b.shape[0])).reshape(1, n_pad).astype(jnp.float32)


# layout constants
C1_KEEP = 32                # channels carried from pool1 into conv2 im2col (20 real)
K1_PAD = 32                 # conv1 K: 25 -> 32
K2_PAD = 25 * C1_KEEP       # conv2 K: 800
C2_PAD = LANE               # conv2 output channels carried into fc1 (50 real)
K_FC1 = 5 * 5 * C2_PAD      # fc1 K after NHWC flatten of padded channels: 3200
H1_PAD = 384                # fc1 out: 320 -> 384
N2_PAD = LANE               # fc2 out: 10 -> 128


def make_params(key, layer_ranks=(20, 20, 20, 20)):
    r0, r1, r2, r3 = layer_ranks
    ks = jax.random.split(key, 12)

    # conv1: TR_Conv2d(in=[1], out=[4,5], kernel 5x5) -> effective (20,1,5,5)
    full1 = tr_to_dense(tr_cores(ks[0], [1, 4, 5, 25], r0), tr_gates(ks[1], 4, r0))
    W1 = jnp.transpose(full1, (1, 2, 0, 3)).reshape(20, 1, 5, 5)
    b1 = 0.01 * jax.random.normal(ks[2], (20,), jnp.float32)

    # conv2: TR_Conv2d(in=[4,5], out=[5,10], kernel 5x5) -> effective (50,20,5,5)
    full2 = tr_to_dense(tr_cores(ks[3], [4, 5, 5, 10, 25], r1), tr_gates(ks[4], 5, r1))
    W2 = jnp.transpose(full2, (2, 3, 0, 1, 4)).reshape(50, 20, 5, 5)
    b2 = 0.01 * jax.random.normal(ks[5], (50,), jnp.float32)

    # fc1: TR_Linear(in=[5,5,5,10]=1250, out=[5,8,8]=320)
    full3 = tr_to_dense(tr_cores(ks[6], [5, 5, 5, 10, 5, 8, 8], r2), tr_gates(ks[7], 7, r2))
    Wf1 = jnp.transpose(full3, (4, 5, 6, 0, 1, 2, 3)).reshape(320, 1250)
    bf1 = 0.01 * jax.random.normal(ks[8], (320,), jnp.float32)

    # fc2: TR_Linear(in=[5,8,8]=320, out=[10])
    full4 = tr_to_dense(tr_cores(ks[9], [5, 8, 8, 10], r3), tr_gates(ks[10], 4, r3))
    Wf2 = jnp.transpose(full4, (3, 0, 1, 2)).reshape(10, 320)
    bf2 = 0.01 * jax.random.normal(ks[11], (10,), jnp.float32)

    # --- pack into lane-dense / K-padded / bf16 layouts (one-time, free) ---
    w1col = _conv_wcol(W1, 5, cin_pad=1, k_total=K1_PAD, n_pad=LANE)       # (32,128)
    w2col = _conv_wcol(W2, 5, cin_pad=C1_KEEP, k_total=K2_PAD, n_pad=LANE)  # (800,128)

    # fc1: fold the PyTorch NCHW flatten (c*25 + h*5 + w) into the weight rows so
    # the runtime input is the natural NHWC flatten of the 128-padded pool2 output.
    wf1 = Wf1.reshape(320, 50, 5, 5)                  # (O, c, h, w)
    wf1 = jnp.transpose(wf1, (2, 3, 1, 0))            # (h, w, c, O)
    wf1 = jnp.pad(wf1, ((0, 0), (0, 0), (0, C2_PAD - 50), (0, H1_PAD - 320)))
    wf1 = wf1.reshape(K_FC1, H1_PAD).astype(jnp.bfloat16)                  # (3200,384)

    wf2 = jnp.pad(Wf2.T, ((0, H1_PAD - 320), (0, N2_PAD - 10))).astype(jnp.bfloat16)

    return dict(
        w1col=w1col, b1=_pad_bias(b1, LANE),
        w2col=w2col, b2=_pad_bias(b2, LANE),
        wf1=wf1, bf1=_pad_bias(bf1, H1_PAD),
        wf2=wf2, bf2=_pad_bias(bf2, N2_PAD),
    )


# ----------------------------------------------------------------------------
# Forward pass (LeNet5_TR_REINFORCE.forward)
# ----------------------------------------------------------------------------
@jax.jit
def lenet5_forward(x_nchw, params):
    B = x_nchw.shape[0]
    x = jnp.transpose(x_nchw, (0, 2, 3, 1)).astype(jnp.float32)       # NHWC (B,28,28,1)

    # conv1 (pad=2, 1->20) + ReLU + pool1, fused                      -> (B,14,14,128)
    y = conv_pool(x, params['w1col'], params['b1'], k=5, pad=2, k_total=K1_PAD)
    y = y[..., :C1_KEEP]          # keep 32 channels (20 real + 12 zero) for conv2's K

    # conv2 (pad=0, 20->50) + ReLU + pool2, fused                     -> (B,5,5,128)
    y = conv_pool(y, params['w2col'], params['b2'], k=5, pad=0, k_total=K2_PAD)

    # NHWC flatten of the padded channels; the NCHW permutation is folded into wf1
    flat = y.reshape(B, K_FC1)                                        # (B,3200)

    # fc1 + ReLU + fc2, fused                                          -> (B,128)
    out = fc_fused(flat, params['wf1'], params['bf1'], params['wf2'], params['bf2'])
    return out[:, :10]

# TODO(synk): count()/structure()/regularizer()/logit_prob() are training-time
# bookkeeping on gate logits with no forward-pass Pallas equivalent; omitted.


if __name__ == "__main__":
    key = jax.random.PRNGKey(0)
    k_params, k_x = jax.random.split(key)
    params = make_params(k_params)
    # Architecture forces 28x28 single-channel input (fc1 expects 50*5*5=1250).
    x = jax.random.normal(k_x, (2, 1, 28, 28), jnp.float32)
    out = lenet5_forward(x, params)
    out = jax.block_until_ready(out)
    assert out.shape == (2, 10) and out.dtype == jnp.float32
    assert bool(jnp.all(jnp.isfinite(out)))
    print("KERNEL_OK")
</pallas_src>

<mosaic_0001>
module attributes {stable_mosaic.version = 11 : i64} {
  func.func @_conv_pool_kernel(%arg0: i32, %arg1: memref<2x2x392x32xbf16, #tpu.memory_space<vmem>>, %arg2: memref<32x128xbf16, #tpu.memory_space<vmem>>, %arg3: memref<1x128xf32, #tpu.memory_space<vmem>>, %arg4: memref<392x128xf32, #tpu.memory_space<vmem>>) attributes {dimension_semantics = [#tpu.dimension_semantics<parallel>], iteration_bounds = array<i64: 1>, scalar_prefetch = 0 : i64, scratch_operands = 0 : i64, tpu.core_type = #tpu.core_type<tc>, window_params = [{transform_indices = @transform_0, window_bounds = array<i64: 2, 2, 392, 32>}, {pipeline_mode = #tpu.pipeline_mode<synchronous>, transform_indices = @transform_1, window_bounds = array<i64: 32, 128>}, {pipeline_mode = #tpu.pipeline_mode<synchronous>, transform_indices = @transform_2, window_bounds = array<i64: 1, 128>}, {transform_indices = @transform_3, window_bounds = array<i64: 392, 128>}]} {
    %c0 = arith.constant 0 : index
    %c0_0 = arith.constant 0 : index
    %0 = vector.load %arg2[%c0, %c0_0] : memref<32x128xbf16, #tpu.memory_space<vmem>>, vector<32x128xbf16>
    %c0_1 = arith.constant 0 : index
    %c0_2 = arith.constant 0 : index
    %1 = vector.load %arg3[%c0_1, %c0_2] : memref<1x128xf32, #tpu.memory_space<vmem>>, vector<1x128xf32>
    %c0_3 = arith.constant 0 : index
    %c0_4 = arith.constant 0 : index
    %c0_5 = arith.constant 0 : index
    %c0_6 = arith.constant 0 : index
    %2 = vector.load %arg1[%c0_3, %c0_4, %c0_5, %c0_6] : memref<2x2x392x32xbf16, #tpu.memory_space<vmem>>, vector<1x1x392x32xbf16>
    %3 = vector.shape_cast %2 : vector<1x1x392x32xbf16> to vector<392x32xbf16>
    %cst = arith.constant dense<0.000000e+00> : vector<392x128xf32>
    %4 = tpu.matmul %3, %0, %cst {dimension_numbers = #tpu.dot_dimension_numbers<[1], [0], [0], [1], [0, 0, 1, 1], [], []>} : vector<392x32xbf16>, vector<32x128xbf16>, vector<392x128xf32> -> vector<392x128xf32>
    %5 = vector.broadcast %1 : vector<1x128xf32> to vector<392x128xf32>
    %6 = arith.addf %4, %5 : vector<392x128xf32>
    %cst_7 = arith.constant 0.000000e+00 : f32
    %7 = vector.broadcast %cst_7 : f32 to vector<392x128xf32>
    %8 = arith.maximumf %6, %7 : vector<392x128xf32>
    %c0_8 = arith.constant 0 : index
    %c1 = arith.constant 1 : index
    %c0_9 = arith.constant 0 : index
    %c0_10 = arith.constant 0 : index
    %9 = vector.load %arg1[%c0_8, %c1, %c0_9, %c0_10] : memref<2x2x392x32xbf16, #tpu.memory_space<vmem>>, vector<1x1x392x32xbf16>
    %10 = vector.shape_cast %9 : vector<1x1x392x32xbf16> to vector<392x32xbf16>
    %cst_11 = arith.constant dense<0.000000e+00> : vector<392x128xf32>
    %11 = tpu.matmul %10, %0, %cst_11 {dimension_numbers = #tpu.dot_dimension_numbers<[1], [0], [0], [1], [0, 0, 1, 1], [], []>} : vector<392x32xbf16>, vector<32x128xbf16>, vector<392x128xf32> -> vector<392x128xf32>
    %12 = vector.broadcast %1 : vector<1x128xf32> to vector<392x128xf32>
    %13 = arith.addf %11, %12 : vector<392x128xf32>
    %cst_12 = arith.constant 0.000000e+00 : f32
    %14 = vector.broadcast %cst_12 : f32 to vector<392x128xf32>
    %15 = arith.maximumf %13, %14 : vector<392x128xf32>
    %16 = arith.maximumf %8, %15 : vector<392x128xf32>
    %c1_13 = arith.constant 1 : index
    %c0_14 = arith.constant 0 : index
    %c0_15 = arith.constant 0 : index
    %c0_16 = arith.constant 0 : index
    %17 = vector.load %arg1[%c1_13, %c0_14, %c0_15, %c0_16] : memref<2x2x392x32xbf16, #tpu.memory_space<vmem>>, vector<1x1x392x32xbf16>
    %18 = vector.shape_cast %17 : vector<1x1x392x32xbf16> to vector<392x32xbf16>
    %cst_17 = arith.constant dense<0.000000e+00> : vector<392x128xf32>
    %19 = tpu.matmul %18, %0, %cst_17 {dimension_numbers = #tpu.dot_dimension_numbers<[1], [0], [0], [1], [0, 0, 1, 1], [], []>} : vector<392x32xbf16>, vector<32x128xbf16>, vector<392x128xf32> -> vector<392x128xf32>
    %20 = vector.broadcast %1 : vector<1x128xf32> to vector<392x128xf32>
    %21 = arith.addf %19, %20 : vector<392x128xf32>
    %cst_18 = arith.constant 0.000000e+00 : f32
    %22 = vector.broadcast %cst_18 : f32 to vector<392x128xf32>
    %23 = arith.maximumf %21, %22 : vector<392x128xf32>
    %c1_19 = arith.constant 1 : index
    %c1_20 = arith.constant 1 : index
    %c0_21 = arith.constant 0 : index
    %c0_22 = arith.constant 0 : index
    %24 = vector.load %arg1[%c1_19, %c1_20, %c0_21, %c0_22] : memref<2x2x392x32xbf16, #tpu.memory_space<vmem>>, vector<1x1x392x32xbf16>
    %25 = vector.shape_cast %24 : vector<1x1x392x32xbf16> to vector<392x32xbf16>
    %cst_23 = arith.constant dense<0.000000e+00> : vector<392x128xf32>
    %26 = tpu.matmul %25, %0, %cst_23 {dimension_numbers = #tpu.dot_dimension_numbers<[1], [0], [0], [1], [0, 0, 1, 1], [], []>} : vector<392x32xbf16>, vector<32x128xbf16>, vector<392x128xf32> -> vector<392x128xf32>
    %27 = vector.broadcast %1 : vector<1x128xf32> to vector<392x128xf32>
    %28 = arith.addf %26, %27 : vector<392x128xf32>
    %cst_24 = arith.constant 0.000000e+00 : f32
    %29 = vector.broadcast %cst_24 : f32 to vector<392x128xf32>
    %30 = arith.maximumf %28, %29 : vector<392x128xf32>
    %31 = arith.maximumf %23, %30 : vector<392x128xf32>
    %32 = arith.maximumf %16, %31 : vector<392x128xf32>
    %c0_25 = arith.constant 0 : index
    %c0_26 = arith.constant 0 : index
    %33 = vector.load %arg4[%c0_25, %c0_26] : memref<392x128xf32, #tpu.memory_space<vmem>>, vector<392x128xf32>
    tpu.vector_store %arg4[%c0_25, %c0_26], %32 {strides = array<i32>} : memref<392x128xf32, #tpu.memory_space<vmem>>, vector<392x128xf32>,
    return
  }
  func.func @transform_0(%arg0: i32) -> (i32, i32, i32, i32) {
    %c0_i32 = arith.constant 0 : i32
    %c0_i32_0 = arith.constant 0 : i32
    %c0_i32_1 = arith.constant 0 : i32
    %c0_i32_2 = arith.constant 0 : i32
    return %c0_i32, %c0_i32_0, %arg0, %c0_i32_1 : i32, i32, i32, i32
  }
  func.func @transform_1(%arg0: i32) -> (i32, i32) {
    %c0_i32 = arith.constant 0 : i32
    %c0_i32_0 = arith.constant 0 : i32
    %c0_i32_1 = arith.constant 0 : i32
    return %c0_i32, %c0_i32_0 : i32, i32
  }
  func.func @transform_2(%arg0: i32) -> (i32, i32) {
    %c0_i32 = arith.constant 0 : i32
    %c0_i32_0 = arith.constant 0 : i32
    %c0_i32_1 = arith.constant 0 : i32
    return %c0_i32, %c0_i32_0 : i32, i32
  }
  func.func @transform_3(%arg0: i32) -> (i32, i32) {
    %c0_i32 = arith.constant 0 : i32
    %c0_i32_0 = arith.constant 0 : i32
    return %arg0, %c0_i32 : i32, i32
  }
}

module attributes {stable_mosaic.version = 11 : i64} {
  func.func @_conv_pool_kernel(%arg0: i32, %arg1: memref<2x2x56x800xbf16, #tpu.memory_space<vmem>>, %arg2: memref<800x128xbf16, #tpu.memory_space<vmem>>, %arg3: memref<1x128xf32, #tpu.memory_space<vmem>>, %arg4: memref<56x128xf32, #tpu.memory_space<vmem>>) attributes {dimension_semantics = [#tpu.dimension_semantics<parallel>], iteration_bounds = array<i64: 1>, scalar_prefetch = 0 : i64, scratch_operands = 0 : i64, tpu.core_type = #tpu.core_type<tc>, window_params = [{transform_indices = @transform_0, window_bounds = array<i64: 2, 2, 56, 800>}, {pipeline_mode = #tpu.pipeline_mode<synchronous>, transform_indices = @transform_1, window_bounds = array<i64: 800, 128>}, {pipeline_mode = #tpu.pipeline_mode<synchronous>, transform_indices = @transform_2, window_bounds = array<i64: 1, 128>}, {transform_indices = @transform_3, window_bounds = array<i64: 56, 128>}]} {
    %c0 = arith.constant 0 : index
    %c0_0 = arith.constant 0 : index
    %0 = vector.load %arg2[%c0, %c0_0] : memref<800x128xbf16, #tpu.memory_space<vmem>>, vector<800x128xbf16>
    %c0_1 = arith.constant 0 : index
    %c0_2 = arith.constant 0 : index
    %1 = vector.load %arg3[%c0_1, %c0_2] : memref<1x128xf32, #tpu.memory_space<vmem>>, vector<1x128xf32>
    %c0_3 = arith.constant 0 : index
    %c0_4 = arith.constant 0 : index
    %c0_5 = arith.constant 0 : index
    %c0_6 = arith.constant 0 : index
    %2 = vector.load %arg1[%c0_3, %c0_4, %c0_5, %c0_6] : memref<2x2x56x800xbf16, #tpu.memory_space<vmem>>, vector<1x1x56x800xbf16>
    %3 = vector.shape_cast %2 : vector<1x1x56x800xbf16> to vector<56x800xbf16>
    %cst = arith.constant dense<0.000000e+00> : vector<56x128xf32>
    %4 = tpu.matmul %3, %0, %cst {dimension_numbers = #tpu.dot_dimension_numbers<[1], [0], [0], [1], [0, 0, 1, 1], [], []>} : vector<56x800xbf16>, vector<800x128xbf16>, vector<56x128xf32> -> vector<56x128xf32>
    %5 = vector.broadcast %1 : vector<1x128xf32> to vector<56x128xf32>
    %6 = arith.addf %4, %5 : vector<56x128xf32>
    %cst_7 = arith.constant 0.000000e+00 : f32
    %7 = vector.broadcast %cst_7 : f32 to vector<56x128xf32>
    %8 = arith.maximumf %6, %7 : vector<56x128xf32>
    %c0_8 = arith.constant 0 : index
    %c1 = arith.constant 1 : index
    %c0_9 = arith.constant 0 : index
    %c0_10 = arith.constant 0 : index
    %9 = vector.load %arg1[%c0_8, %c1, %c0_9, %c0_10] : memref<2x2x56x800xbf16, #tpu.memory_space<vmem>>, vector<1x1x56x800xbf16>
    %10 = vector.shape_cast %9 : vector<1x1x56x800xbf16> to vector<56x800xbf16>
    %cst_11 = arith.constant dense<0.000000e+00> : vector<56x128xf32>
    %11 = tpu.matmul %10, %0, %cst_11 {dimension_numbers = #tpu.dot_dimension_numbers<[1], [0], [0], [1], [0, 0, 1, 1], [], []>} : vector<56x800xbf16>, vector<800x128xbf16>, vector<56x128xf32> -> vector<56x128xf32>
    %12 = vector.broadcast %1 : vector<1x128xf32> to vector<56x128xf32>
    %13 = arith.addf %11, %12 : vector<56x128xf32>
    %cst_12 = arith.constant 0.000000e+00 : f32
    %14 = vector.broadcast %cst_12 : f32 to vector<56x128xf32>
    %15 = arith.maximumf %13, %14 : vector<56x128xf32>
    %16 = arith.maximumf %8, %15 : vector<56x128xf32>
    %c1_13 = arith.constant 1 : index
    %c0_14 = arith.constant 0 : index
    %c0_15 = arith.constant 0 : index
    %c0_16 = arith.constant 0 : index
    %17 = vector.load %arg1[%c1_13, %c0_14, %c0_15, %c0_16] : memref<2x2x56x800xbf16, #tpu.memory_space<vmem>>, vector<1x1x56x800xbf16>
    %18 = vector.shape_cast %17 : vector<1x1x56x800xbf16> to vector<56x800xbf16>
    %cst_17 = arith.constant dense<0.000000e+00> : vector<56x128xf32>
    %19 = tpu.matmul %18, %0, %cst_17 {dimension_numbers = #tpu.dot_dimension_numbers<[1], [0], [0], [1], [0, 0, 1, 1], [], []>} : vector<56x800xbf16>, vector<800x128xbf16>, vector<56x128xf32> -> vector<56x128xf32>
    %20 = vector.broadcast %1 : vector<1x128xf32> to vector<56x128xf32>
    %21 = arith.addf %19, %20 : vector<56x128xf32>
    %cst_18 = arith.constant 0.000000e+00 : f32
    %22 = vector.broadcast %cst_18 : f32 to vector<56x128xf32>
    %23 = arith.maximumf %21, %22 : vector<56x128xf32>
    %c1_19 = arith.constant 1 : index
    %c1_20 = arith.constant 1 : index
    %c0_21 = arith.constant 0 : index
    %c0_22 = arith.constant 0 : index
    %24 = vector.load %arg1[%c1_19, %c1_20, %c0_21, %c0_22] : memref<2x2x56x800xbf16, #tpu.memory_space<vmem>>, vector<1x1x56x800xbf16>
    %25 = vector.shape_cast %24 : vector<1x1x56x800xbf16> to vector<56x800xbf16>
    %cst_23 = arith.constant dense<0.000000e+00> : vector<56x128xf32>
    %26 = tpu.matmul %25, %0, %cst_23 {dimension_numbers = #tpu.dot_dimension_numbers<[1], [0], [0], [1], [0, 0, 1, 1], [], []>} : vector<56x800xbf16>, vector<800x128xbf16>, vector<56x128xf32> -> vector<56x128xf32>
    %27 = vector.broadcast %1 : vector<1x128xf32> to vector<56x128xf32>
    %28 = arith.addf %26, %27 : vector<56x128xf32>
    %cst_24 = arith.constant 0.000000e+00 : f32
    %29 = vector.broadcast %cst_24 : f32 to vector<56x128xf32>
    %30 = arith.maximumf %28, %29 : vector<56x128xf32>
    %31 = arith.maximumf %23, %30 : vector<56x128xf32>
    %32 = arith.maximumf %16, %31 : vector<56x128xf32>
    %c0_25 = arith.constant 0 : index
    %c0_26 = arith.constant 0 : index
    %33 = vector.load %arg4[%c0_25, %c0_26] : memref<56x128xf32, #tpu.memory_space<vmem>>, vector<56x128xf32>
    tpu.vector_store %arg4[%c0_25, %c0_26], %32 {strides = array<i32>} : memref<56x128xf32, #tpu.memory_space<vmem>>, vector<56x128xf32>,
    return
  }
  func.func @transform_0(%arg0: i32) -> (i32, i32, i32, i32) {
    %c0_i32 = arith.constant 0 : i32
    %c0_i32_0 = arith.constant 0 : i32
    %c0_i32_1 = arith.constant 0 : i32
    %c0_i32_2 = arith.constant 0 : i32
    return %c0_i32, %c0_i32_0, %arg0, %c0_i32_1 : i32, i32, i32, i32
  }
  func.func @transform_1(%arg0: i32) -> (i32, i32) {
    %c0_i32 = arith.constant 0 : i32
    %c0_i32_0 = arith.constant 0 : i32
    %c0_i32_1 = arith.constant 0 : i32
    return %c0_i32, %c0_i32_0 : i32, i32
  }
  func.func @transform_2(%arg0: i32) -> (i32, i32) {
    %c0_i32 = arith.constant 0 : i32
    %c0_i32_0 = arith.constant 0 : i32
    %c0_i32_1 = arith.constant 0 : i32
    return %c0_i32, %c0_i32_0 : i32, i32
  }
  func.func @transform_3(%arg0: i32) -> (i32, i32) {
    %c0_i32 = arith.constant 0 : i32
    %c0_i32_0 = arith.constant 0 : i32
    return %arg0, %c0_i32 : i32, i32
  }
}

module attributes {stable_mosaic.version = 11 : i64} {
  func.func @_fc_fused_kernel(%arg0: i32, %arg1: memref<8x3200xbf16, #tpu.memory_space<vmem>>, %arg2: memref<3200x384xbf16, #tpu.memory_space<vmem>>, %arg3: memref<1x384xf32, #tpu.memory_space<vmem>>, %arg4: memref<384x128xbf16, #tpu.memory_space<vmem>>, %arg5: memref<1x128xf32, #tpu.memory_space<vmem>>, %arg6: memref<8x128xf32, #tpu.memory_space<vmem>>) attributes {dimension_semantics = [#tpu.dimension_semantics<parallel>], iteration_bounds = array<i64: 1>, scalar_prefetch = 0 : i64, scratch_operands = 0 : i64, tpu.core_type = #tpu.core_type<tc>, window_params = [{transform_indices = @transform_0, window_bounds = array<i64: 8, 3200>}, {pipeline_mode = #tpu.pipeline_mode<synchronous>, transform_indices = @transform_1, window_bounds = array<i64: 3200, 384>}, {pipeline_mode = #tpu.pipeline_mode<synchronous>, transform_indices = @transform_2, window_bounds = array<i64: 1, 384>}, {pipeline_mode = #tpu.pipeline_mode<synchronous>, transform_indices = @transform_3, window_bounds = array<i64: 384, 128>}, {pipeline_mode = #tpu.pipeline_mode<synchronous>, transform_indices = @transform_4, window_bounds = array<i64: 1, 128>}, {transform_indices = @transform_5, window_bounds = array<i64: 8, 128>}]} {
    %c0 = arith.constant 0 : index
    %c0_0 = arith.constant 0 : index
    %0 = vector.load %arg1[%c0, %c0_0] : memref<8x3200xbf16, #tpu.memory_space<vmem>>, vector<8x3200xbf16>
    %c0_1 = arith.constant 0 : index
    %c0_2 = arith.constant 0 : index
    %1 = vector.load %arg2[%c0_1, %c0_2] : memref<3200x384xbf16, #tpu.memory_space<vmem>>, vector<3200x384xbf16>
    %cst = arith.constant dense<0.000000e+00> : vector<8x384xf32>
    %2 = tpu.matmul %0, %1, %cst {dimension_numbers = #tpu.dot_dimension_numbers<[1], [0], [0], [1], [0, 0, 1, 1], [], []>} : vector<8x3200xbf16>, vector<3200x384xbf16>, vector<8x384xf32> -> vector<8x384xf32>
    %c0_3 = arith.constant 0 : index
    %c0_4 = arith.constant 0 : index
    %3 = vector.load %arg3[%c0_3, %c0_4] : memref<1x384xf32, #tpu.memory_space<vmem>>, vector<1x384xf32>
    %4 = vector.broadcast %3 : vector<1x384xf32> to vector<8x384xf32>
    %5 = arith.addf %2, %4 : vector<8x384xf32>
    %cst_5 = arith.constant 0.000000e+00 : f32
    %6 = vector.broadcast %cst_5 : f32 to vector<8x384xf32>
    %7 = arith.maximumf %5, %6 : vector<8x384xf32>
    %8 = arith.truncf %7 : vector<8x384xf32> to vector<8x384xbf16>
    %c0_6 = arith.constant 0 : index
    %c0_7 = arith.constant 0 : index
    %9 = vector.load %arg4[%c0_6, %c0_7] : memref<384x128xbf16, #tpu.memory_space<vmem>>, vector<384x128xbf16>
    %cst_8 = arith.constant dense<0.000000e+00> : vector<8x128xf32>
    %10 = tpu.matmul %8, %9, %cst_8 {dimension_numbers = #tpu.dot_dimension_numbers<[1], [0], [0], [1], [0, 0, 1, 1], [], []>} : vector<8x384xbf16>, vector<384x128xbf16>, vector<8x128xf32> -> vector<8x128xf32>
    %c0_9 = arith.constant 0 : index
    %c0_10 = arith.constant 0 : index
    %11 = vector.load %arg5[%c0_9, %c0_10] : memref<1x128xf32, #tpu.memory_space<vmem>>, vector<1x128xf32>
    %12 = vector.broadcast %11 : vector<1x128xf32> to vector<8x128xf32>
    %13 = arith.addf %10, %12 : vector<8x128xf32>
    %c0_11 = arith.constant 0 : index
    %c0_12 = arith.constant 0 : index
    %14 = vector.load %arg6[%c0_11, %c0_12] : memref<8x128xf32, #tpu.memory_space<vmem>>, vector<8x128xf32>
    tpu.vector_store %arg6[%c0_11, %c0_12], %13 {strides = array<i32>} : memref<8x128xf32, #tpu.memory_space<vmem>>, vector<8x128xf32>,
    return
  }
  func.func @transform_0(%arg0: i32) -> (i32, i32) {
    %c0_i32 = arith.constant 0 : i32
    %c0_i32_0 = arith.constant 0 : i32
    return %arg0, %c0_i32 : i32, i32
  }
  func.func @transform_1(%arg0: i32) -> (i32, i32) {
    %c0_i32 = arith.constant 0 : i32
    %c0_i32_0 = arith.constant 0 : i32
    %c0_i32_1 = arith.constant 0 : i32
    return %c0_i32, %c0_i32_0 : i32, i32
  }
  func.func @transform_2(%arg0: i32) -> (i32, i32) {
    %c0_i32 = arith.constant 0 : i32
    %c0_i32_0 = arith.constant 0 : i32
    %c0_i32_1 = arith.constant 0 : i32
    return %c0_i32, %c0_i32_0 : i32, i32
  }
  func.func @transform_3(%arg0: i32) -> (i32, i32) {
    %c0_i32 = arith.constant 0 : i32
    %c0_i32_0 = arith.constant 0 : i32
    %c0_i32_1 = arith.constant 0 : i32
    return %c0_i32, %c0_i32_0 : i32, i32
  }
  func.func @transform_4(%arg0: i32) -> (i32, i32) {
    %c0_i32 = arith.constant 0 : i32
    %c0_i32_0 = arith.constant 0 : i32
    %c0_i32_1 = arith.constant 0 : i32
    return %c0_i32, %c0_i32_0 : i32, i32
  }
  func.func @transform_5(%arg0: i32) -> (i32, i32) {
    %c0_i32 = arith.constant 0 : i32
    %c0_i32_0 = arith.constant 0 : i32
    return %arg0, %c0_i32 : i32, i32
  }
}

</mosaic_0001>

<bundles_post_ra>
// kernel: lenet5_forward.3
= control target key start
LH: loop header
LB: loop body
LE: loop exit
PB: predicated region body
PF: predicated region fallthrough
CT: control target
= control target key end

     0   :  { %v4479_v0 = vmov 0.0   ;;  %vm3335_vm0 = vmmov 0   ;;  %vm210_vm1 = vcmask 261120   ;;  %s4475_s1 = inlined_call_operand.vmem [shape: bf16[32,128], index: 1, kind: input, shape index: {}]   ;;  %s4476_s0 = inlined_call_operand.vmem [shape: bf16[2,2,392,32], index: 0, kind: input, shape index: {}]   ;;  %s4477_s2 = inlined_call_operand.vmem [shape: f32[1,128], index: 2, kind: input, shape index: {}]   ;;  %s4478_s3 = inlined_call_operand.vmem [shape: f32[392,128], index: 3, kind: output, shape index: {}]  }
   0x1   :  { %2812 = vmatprep.subr.bf16.mxu0 %v4479_v0  ;;  %2916 = vmatprep.subr.bf16.mxu1 %v4479_v0  ;;  %v3230_v1 = vld [vmem:[%s4475_s1 + $0x8] sm:$0xff]   ;;  %v3231_v2 = vld [vmem:[%s4475_s1] sm:$0xff]   ;;  %v3236_v7 = vld [vmem:[%s4476_s0 + $0x10] sm:$0xff]  }
   0x2   :  { %2816 = vmatprep.mubr.msk.bf16.mxu0 %vm3335_vm0, %v4479_v0  ;;  %2920 = vmatprep.mubr.msk.bf16.mxu1 %vm3335_vm0, %v4479_v0  ;;  %v3232_v3 = vld [vmem:[%s4476_s0] sm:$0xff]   ;;  %v3234_v5 = vld [vmem:[%s4476_s0 + $0x8] sm:$0xff]   ;;  %v3237_v8 = vld [vmem:[%s4476_s0 + $0xd4] sm:$0xff]  }
   0x3   :  { %2813 = vmatpush3.bf16.msra.mxu0 %v3230_v1  ;;  %2917 = vmatpush3.bf16.msra.mxu1 %v3230_v1  ;;  %v3233_v4 = vld [vmem:[%s4476_s0 + $0xc4] sm:$0xff]   ;;  %v3235_v6 = vld [vmem:[%s4476_s0 + $0xcc] sm:$0xff]   ;;  %v3238_v9 = vld [vmem:[%s4476_s0 + $0x18] sm:$0xff]  }
   0x4   :  { %2814 = vmatprep.subr.bf16.mxu0 %v4479_v0  ;;  %2918 = vmatprep.subr.bf16.mxu1 %v4479_v0  ;;  %v3239_v10 = vld [vmem:[%s4476_s0 + $0xdc] sm:$0xff]   ;;  %v3241_v12 = vld [vmem:[%s4476_s0 + $0xe4] sm:$0xff]   ;;  %v3243_v14 = vld [vmem:[%s4476_s0 + $0xec] sm:$0xff]  }
   0x5   :  { %v3240_v11 = vld [vmem:[%s4476_s0 + $0x20] sm:$0xff]   ;;  %v3242_v13 = vld [vmem:[%s4476_s0 + $0x28] sm:$0xff]   ;;  %v3244_v15 = vld [vmem:[%s4476_s0 + $0x30] sm:$0xff]  }
   0x6   :  { %v3245_v16 = vld [vmem:[%s4476_s0 + $0xf4] sm:$0xff]   ;;  %v3247_v18 = vld [vmem:[%s4476_s0 + $0xfc] sm:$0xff]   ;;  %v3249_v20 = vld [vmem:[%s4476_s0 + $0x104] sm:$0xff]  }
   0x7   :  { %2815 = vmatpush3.bf16.msra.mxu0 %v3231_v2  ;;  %2919 = vmatpush3.bf16.msra.mxu1 %v3231_v2  ;;  %v3246_v17 = vld [vmem:[%s4476_s0 + $0x38] sm:$0xff]   ;;  %v3248_v19 = vld [vmem:[%s4476_s0 + $0x40] sm:$0xff]   ;;  %v3250_v21 = vld [vmem:[%s4476_s0 + $0x48] sm:$0xff]  }
   0x8   :  { %3020 = vmatprep.subr.bf16.mxu0 %v4479_v0  ;;  %3124 = vmatprep.subr.bf16.mxu1 %v4479_v0  ;;  %v3251_v22 = vld [vmem:[%s4476_s0 + $0x10c] sm:$0xff]   ;;  %v3253_v24 = vld [vmem:[%s4476_s0 + $0x114] sm:$0xff]   ;;  %v3255_v26 = vld [vmem:[%s4476_s0 + $0x11c] sm:$0xff]  }
   0x9   :  { %v3252_v23 = vld [vmem:[%s4476_s0 + $0x50] sm:$0xff]   ;;  %v3254_v25 = vld [vmem:[%s4476_s0 + $0x58] sm:$0xff]   ;;  %v3256_v27 = vld [vmem:[%s4476_s0 + $0x60] sm:$0xff]  }
   0xa   :  { %2817 = vmatmul.mubr.msk.bf16.vlgmr.msra.gmra.mxu0 %vm210_vm1, %v3232_v3  ;;  %2921 = vmatmul.mubr.msk.bf16.vlgmr.msra.gmra.mxu1 %vm210_vm1, %v3233_v4  ;;  %v3257_v28 = vld [vmem:[%s4476_s0 + $0x124] sm:$0xff]   ;;  %v3259_v30 = vld [vmem:[%s4476_s0 + $0x12c] sm:$0xff]   ;;  %v3261_v32 = vld [vmem:[%s4476_s0 + $0x134] sm:$0xff]  }
   0xb   :  { %3021 = vmatpush3.bf16.msra.mxu0 %v3230_v1  ;;  %3125 = vmatpush3.bf16.msra.mxu1 %v3230_v1  ;;  %v3258_v29 = vld [vmem:[%s4476_s0 + $0x68] sm:$0xff]   ;;  %v3260_v31 = vld [vmem:[%s4476_s0 + $0x70] sm:$0xff]   ;;  %v3262_v33 = vld [vmem:[%s4476_s0 + $0x78] sm:$0xff]  }
   0xc   :  { %2820 = vmatprep.mubr.msk.bf16.mxu0 %vm3335_vm0, %v4479_v0  ;;  %2924 = vmatprep.mubr.msk.bf16.mxu1 %vm3335_vm0, %v4479_v0  ;;  %v3263_v34 = vld [vmem:[%s4476_s0 + $0x13c] sm:$0xff]   ;;  %v3265_v36 = vld [vmem:[%s4476_s0 + $0x144] sm:$0xff]   ;;  %v3267_v38 = vld [vmem:[%s4476_s0 + $0x14c] sm:$0xff]  }
   0xd   :  { %3022 = vmatprep.subr.bf16.mxu0 %v4479_v0  ;;  %3126 = vmatprep.subr.bf16.mxu1 %v4479_v0  ;;  %v3264_v35 = vld [vmem:[%s4476_s0 + $0x80] sm:$0xff]   ;;  %v3266_v37 = vld [vmem:[%s4476_s0 + $0x88] sm:$0xff]   ;;  %v3268_v39 = vld [vmem:[%s4476_s0 + $0x90] sm:$0xff]  }
   0xe   :  { %v3269_v40 = vld [vmem:[%s4476_s0 + $0x154] sm:$0xff]   ;;  %v3271_v42 = vld [vmem:[%s4476_s0 + $0x15c] sm:$0xff]   ;;  %v3273_v44 = vld [vmem:[%s4476_s0 + $0x164] sm:$0xff]  }
   0xf   :  { %3023 = vmatpush3.bf16.msra.mxu0 %v3231_v2  ;;  %3127 = vmatpush3.bf16.msra.mxu1 %v3231_v2  ;;  %v3270_v41 = vld [vmem:[%s4476_s0 + $0x98] sm:$0xff]   ;;  %v3272_v43 = vld [vmem:[%s4476_s0 + $0xa0] sm:$0xff]   ;;  %v3274_v45 = vld [vmem:[%s4476_s0 + $0xa8] sm:$0xff]  }
  0x10   :  { %v3275_v46 = vld [vmem:[%s4476_s0 + $0x16c] sm:$0xff]   ;;  %v3277_v48 = vld [vmem:[%s4476_s0 + $0x174] sm:$0xff]   ;;  %v3279_v50 = vld [vmem:[%s4476_s0 + $0x17c] sm:$0xff]  }
  0x11   :  { %v3276_v47 = vld [vmem:[%s4476_s0 + $0xb0] sm:$0xff]   ;;  %v3278_v49 = vld [vmem:[%s4476_s0 + $0xb8] sm:$0xff]   ;;  %v3280_v51 = vld [vmem:[%s4476_s0 + $0xc0] ss:$0 sps:$4 sm:$0xff]  }
  0x12   :  { %2821 = vmatmul.mubr.msk.bf16.gmra.mxu0 %vm210_vm1, %v3234_v5  ;;  %2925 = vmatmul.mubr.msk.bf16.gmra.mxu1 %vm210_vm1, %v3235_v6  ;;  %v3281_v52 = vld [vmem:[%s4476_s0 + $0x184] ss:$0 sps:$4 sm:$0xff]   ;;  %v3671_v53 = vld [vmem:[%s4477_s2] ss:$0 sm:$0xff]  ;;  %v3282_v1 = vld [vmem:[%s4476_s0 + $0x188] sm:$0xff]  }
  0x13   :  { %2824 = vmatprep.mubr.msk.bf16.mxu0 %vm3335_vm0, %v4479_v0  ;;  %2928 = vmatprep.mubr.msk.bf16.mxu1 %vm3335_vm0, %v4479_v0  ;;  %v3283_v2 = vld [vmem:[%s4476_s0 + $0x24c] sm:$0xff]  }
  0x1a   :  { %2825 = vmatmul.mubr.msk.bf16.gmra.mxu0 %vm210_vm1, %v3236_v7  ;;  %2929 = vmatmul.mubr.msk.bf16.gmra.mxu1 %vm210_vm1, %v3237_v8 }
  0x1b   :  { %2828 = vmatprep.mubr.msk.bf16.mxu0 %vm3335_vm0, %v4479_v0  ;;  %2932 = vmatprep.mubr.msk.bf16.mxu1 %vm3335_vm0, %v4479_v0 }
  0x22   :  { %2829 = vmatmul.mubr.msk.bf16.gmra.mxu0 %vm210_vm1, %v3238_v9  ;;  %2933 = vmatmul.mubr.msk.bf16.gmra.mxu1 %vm210_vm1, %v3239_v10 }
  0x23   :  { %2832 = vmatprep.mubr.msk.bf16.mxu0 %vm3335_vm0, %v4479_v0  ;;  %2936 = vmatprep.mubr.msk.bf16.mxu1 %vm3335_vm0, %v4479_v0 }
  0x2a   :  { %2833 = vmatmul.mubr.msk.bf16.gmra.mxu0 %vm210_vm1, %v3240_v11  ;;  %2937 = vmatmul.mubr.msk.bf16.gmra.mxu1 %vm210_vm1, %v3241_v12 }
  0x2b   :  { %2836 = vmatprep.mubr.msk.bf16.mxu0 %vm3335_vm0, %v4479_v0  ;;  %2940 = vmatprep.mubr.msk.bf16.mxu1 %vm3335_vm0, %v4479_v0 }
  0x32   :  { %2837 = vmatmul.mubr.msk.bf16.gmra.mxu0 %vm210_vm1, %v3242_v13  ;;  %2941 = vmatmul.mubr.msk.bf16.gmra.mxu1 %vm210_vm1, %v3243_v14 }
  0x33   :  { %2840 = vmatprep.mubr.msk.bf16.mxu0 %vm3335_vm0, %v4479_v0  ;;  %2944 = vmatprep.mubr.msk.bf16.mxu1 %vm3335_vm0, %v4479_v0 }
  0x3a   :  { %2841 = vmatmul.mubr.msk.bf16.gmra.mxu0 %vm210_vm1, %v3244_v15  ;;  %2945 = vmatmul.mubr.msk.bf16.gmra.mxu1 %vm210_vm1, %v3245_v16 }
  0x3b   :  { %2844 = vmatprep.mubr.msk.bf16.mxu0 %vm3335_vm0, %v4479_v0  ;;  %2948 = vmatprep.mubr.msk.bf16.mxu1 %vm3335_vm0, %v4479_v0 }
  0x42   :  { %2845 = vmatmul.mubr.msk.bf16.gmra.mxu0 %vm210_vm1, %v3246_v17  ;;  %2949 = vmatmul.mubr.msk.bf16.gmra.mxu1 %vm210_vm1, %v3247_v18 }
  0x43   :  { %2848 = vmatprep.mubr.msk.bf16.mxu0 %vm3335_vm0, %v4479_v0  ;;  %2952 = vmatprep.mubr.msk.bf16.mxu1 %vm3335_vm0, %v4479_v0 }
  0x4a   :  { %2849 = vmatmul.mubr.msk.bf16.gmra.mxu0 %vm210_vm1, %v3248_v19  ;;  %2953 = vmatmul.mubr.msk.bf16.gmra.mxu1 %vm210_vm1, %v3249_v20 }
  0x4b   :  { %2852 = vmatprep.mubr.msk.bf16.mxu0 %vm3335_vm0, %v4479_v0  ;;  %2956 = vmatprep.mubr.msk.bf16.mxu1 %vm3335_vm0, %v4479_v0 }
  0x52   :  { %2853 = vmatmul.mubr.msk.bf16.gmra.mxu0 %vm210_vm1, %v3250_v21  ;;  %2957 = vmatmul.mubr.msk.bf16.gmra.mxu1 %vm210_vm1, %v3251_v22  ;;  %v3284_v21 = vld [vmem:[%s4476_s0 + $0x190] sm:$0xff]  }
  0x53   :  { %2856 = vmatprep.mubr.msk.bf16.mxu0 %vm3335_vm0, %v4479_v0  ;;  %2960 = vmatprep.mubr.msk.bf16.mxu1 %vm3335_vm0, %v4479_v0  ;;  %v3285_v22 = vld [vmem:[%s4476_s0 + $0x254] sm:$0xff]  }
  0x5a   :  { %2857 = vmatmul.mubr.msk.bf16.gmra.mxu0 %vm210_vm1, %v3252_v23  ;;  %2961 = vmatmul.mubr.msk.bf16.gmra.mxu1 %vm210_vm1, %v3253_v24 }
  0x5b   :  { %2860 = vmatprep.mubr.msk.bf16.mxu0 %vm3335_vm0, %v4479_v0  ;;  %2964 = vmatprep.mubr.msk.bf16.mxu1 %vm3335_vm0, %v4479_v0 }
  0x62   :  { %2861 = vmatmul.mubr.msk.bf16.gmra.mxu0 %vm210_vm1, %v3254_v25  ;;  %2965 = vmatmul.mubr.msk.bf16.gmra.mxu1 %vm210_vm1, %v3255_v26 }
  0x63   :  { %2864 = vmatprep.mubr.msk.bf16.mxu0 %vm3335_vm0, %v4479_v0  ;;  %2968 = vmatprep.mubr.msk.bf16.mxu1 %vm3335_vm0, %v4479_v0 }
  0x6a   :  { %2865 = vmatmul.mubr.msk.bf16.gmra.mxu0 %vm210_vm1, %v3256_v27  ;;  %2969 = vmatmul.mubr.msk.bf16.gmra.mxu1 %vm210_vm1, %v3257_v28 }
  0x6b   :  { %2868 = vmatprep.mubr.msk.bf16.mxu0 %vm3335_vm0, %v4479_v0  ;;  %2972 = vmatprep.mubr.msk.bf16.mxu1 %vm3335_vm0, %v4479_v0 }
  0x72   :  { %2869 = vmatmul.mubr.msk.bf16.gmra.mxu0 %vm210_vm1, %v3258_v29  ;;  %2973 = vmatmul.mubr.msk.bf16.gmra.mxu1 %vm210_vm1, %v3259_v30 }
  0x73   :  { %2872 = vmatprep.mubr.msk.bf16.mxu0 %vm3335_vm0, %v4479_v0  ;;  %2976 = vmatprep.mubr.msk.bf16.mxu1 %vm3335_vm0, %v4479_v0 }
  0x7a   :  { %2873 = vmatmul.mubr.msk.bf16.gmra.mxu0 %vm210_vm1, %v3260_v31  ;;  %2977 = vmatmul.mubr.msk.bf16.gmra.mxu1 %vm210_vm1, %v3261_v32 }
  0x7b   :  { %2876 = vmatprep.mubr.msk.bf16.mxu0 %vm3335_vm0, %v4479_v0  ;;  %2980 = vmatprep.mubr.msk.bf16.mxu1 %vm3335_vm0, %v4479_v0 }
  0x82   :  { %2877 = vmatmul.mubr.msk.bf16.gmra.mxu0 %vm210_vm1, %v3262_v33  ;;  %2981 = vmatmul.mubr.msk.bf16.gmra.mxu1 %vm210_vm1, %v3263_v34 }
  0x83   :  { %2880 = vmatprep.mubr.msk.bf16.mxu0 %vm3335_vm0, %v4479_v0  ;;  %2984 = vmatprep.mubr.msk.bf16.mxu1 %vm3335_vm0, %v4479_v0 }
  0x8a   :  { %2881 = vmatmul.mubr.msk.bf16.gmra.mxu0 %vm210_vm1, %v3264_v35  ;;  %2985 = vmatmul.mubr.msk.bf16.gmra.mxu1 %vm210_vm1, %v3265_v36 }
  0x8b   :  { %2884 = vmatprep.mubr.msk.bf16.mxu0 %vm3335_vm0, %v4479_v0  ;;  %2988 = vmatprep.mubr.msk.bf16.mxu1 %vm3335_vm0, %v4479_v0 }
  0x92   :  { %2885 = vmatmul.mubr.msk.bf16.gmra.mxu0 %vm210_vm1, %v3266_v37  ;;  %2989 = vmatmul.mubr.msk.bf16.gmra.mxu1 %vm210_vm1, %v3267_v38 }
  0x93   :  { %2888 = vmatprep.mubr.msk.bf16.mxu0 %vm3335_vm0, %v4479_v0  ;;  %2992 = vmatprep.mubr.msk.bf16.mxu1 %vm3335_vm0, %v4479_v0 }
  0x9a   :  { %2889 = vmatmul.mubr.msk.bf16.gmra.mxu0 %vm210_vm1, %v3268_v39  ;;  %2993 = vmatmul.mubr.msk.bf16.gmra.mxu1 %vm210_vm1, %v3269_v40 }
  0x9b   :  { %2892 = vmatprep.mubr.msk.bf16.mxu0 %vm3335_vm0, %v4479_v0  ;;  %2996 = vmatprep.mubr.msk.bf16.mxu1 %vm3335_vm0, %v4479_v0 }
  0xa2   :  { %2893 = vmatmul.mubr.msk.bf16.gmra.mxu0 %vm210_vm1, %v3270_v41  ;;  %2997 = vmatmul.mubr.msk.bf16.gmra.mxu1 %vm210_vm1, %v3271_v42  ;;  %v3286_v41 = vld [vmem:[%s4476_s0 + $0x198] sm:$0xff]  }
  0xa3   :  { %2896 = vmatprep.mubr.msk.bf16.mxu0 %vm3335_vm0, %v4479_v0  ;;  %3000 = vmatprep.mubr.msk.bf16.mxu1 %vm3335_vm0, %v4479_v0  ;;  %v3287_v42 = vld [vmem:[%s4476_s0 + $0x25c] sm:$0xff]  }
  0xaa   :  { %2897 = vmatmul.mubr.msk.bf16.gmra.mxu0 %vm210_vm1, %v3272_v43  ;;  %3001 = vmatmul.mubr.msk.bf16.gmra.mxu1 %vm210_vm1, %v3273_v44 }
  0xab   :  { %2900 = vmatprep.mubr.msk.bf16.mxu0 %vm3335_vm0, %v4479_v0  ;;  %3004 = vmatprep.mubr.msk.bf16.mxu1 %vm3335_vm0, %v4479_v0 }
  0xb2   :  { %2901 = vmatmul.mubr.msk.bf16.gmra.mxu0 %vm210_vm1, %v3274_v45  ;;  %3005 = vmatmul.mubr.msk.bf16.gmra.mxu1 %vm210_vm1, %v3275_v46 }
  0xb3   :  { %2904 = vmatprep.mubr.msk.bf16.mxu0 %vm3335_vm0, %v4479_v0  ;;  %3008 = vmatprep.mubr.msk.bf16.mxu1 %vm3335_vm0, %v4479_v0 }
  0xba   :  { %2905 = vmatmul.mubr.msk.bf16.gmra.mxu0 %vm210_vm1, %v3276_v47  ;;  %3009 = vmatmul.mubr.msk.bf16.gmra.mxu1 %vm210_vm1, %v3277_v48 }
  0xbb   :  { %2908 = vmatprep.mubr.msk.bf16.mxu0 %vm3335_vm0, %v4479_v0  ;;  %3012 = vmatprep.mubr.msk.bf16.mxu1 %vm3335_vm0, %v4479_v0 }
  0xc2   :  { %2909 = vmatmul.mubr.msk.bf16.gmra.mxu0 %vm210_vm1, %v3278_v49  ;;  %3013 = vmatmul.mubr.msk.bf16.gmra.mxu1 %vm210_vm1, %v3279_v50 }
  0xc3   :  { %2912 = vmatprep.mubr.msk.bf16.mxu0 %vm3335_vm0, %v4479_v0  ;;  %3016 = vmatprep.mubr.msk.bf16.mxu1 %vm3335_vm0, %v4479_v0 }
  0xca   :  { %v320_v54 = vpop.f32.mrf.mxu0  ;;  %2913 = vmatmul.mubr.msk.bf16.gmra.mxu0 %vm210_vm1, %v3280_v51  ;;  %v849_v55 = vpop.f32.mrf.mxu1  ;;  %3017 = vmatmul.mubr.msk.bf16.gmra.mxu1 %vm210_vm1, %v3281_v52 }
  0xcb   :  { %v321_v56 = vadd.f32 %v3671_v53, %v320_v54  ;;  %v850_v57 = vadd.f32 %v3671_v53, %v849_v55  ;;  %3024 = vmatprep.mubr.msk.bf16.mxu0 %vm3335_vm0, %v4479_v0  ;;  %3128 = vmatprep.mubr.msk.bf16.mxu1 %vm3335_vm0, %v4479_v0 }
  0xcc   :  { %v2818_v58 = vpop.f32.mrf.mxu0  ;;  %v2922_v59 = vpop.f32.mrf.mxu1 }
  0xcd   :  { %v518_v60 = vmax.f32 %v321_v56, 0.0  ;;  %v1047_v61 = vmax.f32 %v850_v57, 0.0 }
  0xce   :  { %v323_v62 = vpop.f32.mrf.mxu0  ;;  %v852_v63 = vpop.f32.mrf.mxu1 }
  0xcf   :  { %v3687_v3 = vmax.f32 %v518_v60, %v1047_v61  ;;  %v324_v4 = vadd.f32 %v3671_v53, %v323_v62  ;;  %v853_v5 = vadd.f32 %v3671_v53, %v852_v63  ;;  %v3288_v62 = vld [vmem:[%s4476_s0 + $0x1a0] sm:$0xff]  }
  0xd0   :  { %v2819_v6 = vpop.f32.mrf.mxu0  ;;  %v2923_v7 = vpop.f32.mrf.mxu1  ;;  %v3289_v63 = vld [vmem:[%s4476_s0 + $0x264] sm:$0xff]  }
  0xd1   :  { %v519_v8 = vmax.f32 %v324_v4, 0.0  ;;  %v1048_v9 = vmax.f32 %v853_v5, 0.0 }
  0xd2   :  { %v328_v10 = vpop.f32.mrf.mxu0  ;;  %v857_v11 = vpop.f32.mrf.mxu1  ;;  %3025 = vmatmul.mubr.msk.bf16.vlgmr.msra.gmra.mxu0 %vm210_vm1, %v3282_v1  ;;  %3129 = vmatmul.mubr.msk.bf16.vlgmr.msra.gmra.mxu1 %vm210_vm1, %v3283_v2 }
  0xd3   :  { %v3693_v12 = vmax.f32 %v519_v8, %v1048_v9  ;;  %v329_v13 = vadd.f32 %v3671_v53, %v328_v10  ;;  %v858_v14 = vadd.f32 %v3671_v53, %v857_v11  ;;  %3028 = vmatprep.mubr.msk.bf16.mxu0 %vm3335_vm0, %v4479_v0  ;;  %3132 = vmatprep.mubr.msk.bf16.mxu1 %vm3335_vm0, %v4479_v0 }
  0xd4   :  { %v2822_v15 = vpop.f32.mrf.mxu0  ;;  %v2926_v16 = vpop.f32.mrf.mxu1 }
  0xd5   :  { %v520_v17 = vmax.f32 %v329_v13, 0.0  ;;  %v1049_v18 = vmax.f32 %v858_v14, 0.0 }
  0xd6   :  { %v331_v19 = vpop.f32.mrf.mxu0  ;;  %v860_v20 = vpop.f32.mrf.mxu1 }
  0xd7   :  { %v3707_v23 = vmax.f32 %v520_v17, %v1049_v18  ;;  %v332_v24 = vadd.f32 %v3671_v53, %v331_v19  ;;  %v861_v25 = vadd.f32 %v3671_v53, %v860_v20 }
  0xd8   :  { %v2823_v26 = vpop.f32.mrf.mxu0  ;;  %v2927_v27 = vpop.f32.mrf.mxu1 }
  0xd9   :  { %v521_v28 = vmax.f32 %v332_v24, 0.0  ;;  %v1050_v29 = vmax.f32 %v861_v25, 0.0 }
  0xda   :  { %v336_v30 = vpop.f32.mrf.mxu0  ;;  %v865_v31 = vpop.f32.mrf.mxu1  ;;  %3029 = vmatmul.mubr.msk.bf16.gmra.mxu0 %vm210_vm1, %v3284_v21  ;;  %3133 = vmatmul.mubr.msk.bf16.gmra.mxu1 %vm210_vm1, %v3285_v22  ;;  %v3290_v21 = vld [vmem:[%s4476_s0 + $0x1a8] sm:$0xff]  }
  0xdb   :  { %v3713_v32 = vmax.f32 %v521_v28, %v1050_v29  ;;  %v337_v33 = vadd.f32 %v3671_v53, %v336_v30  ;;  %v866_v34 = vadd.f32 %v3671_v53, %v865_v31  ;;  %3032 = vmatprep.mubr.msk.bf16.mxu0 %vm3335_vm0, %v4479_v0  ;;  %3136 = vmatprep.mubr.msk.bf16.mxu1 %vm3335_vm0, %v4479_v0  ;;  %v3291_v22 = vld [vmem:[%s4476_s0 + $0x26c] sm:$0xff]  }
  0xdc   :  { %v2826_v35 = vpop.f32.mrf.mxu0  ;;  %v2930_v36 = vpop.f32.mrf.mxu1 }
  0xdd   :  { %v522_v37 = vmax.f32 %v337_v33, 0.0  ;;  %v1051_v38 = vmax.f32 %v866_v34, 0.0 }
  0xde   :  { %v339_v39 = vpop.f32.mrf.mxu0  ;;  %v868_v40 = vpop.f32.mrf.mxu1 }
  0xdf   :  { %v3727_v43 = vmax.f32 %v522_v37, %v1051_v38  ;;  %v340_v44 = vadd.f32 %v3671_v53, %v339_v39  ;;  %v869_v45 = vadd.f32 %v3671_v53, %v868_v40 }
  0xe0   :  { %v2827_v46 = vpop.f32.mrf.mxu0  ;;  %v2931_v47 = vpop.f32.mrf.mxu1 }
  0xe1   :  { %v523_v48 = vmax.f32 %v340_v44, 0.0  ;;  %v1052_v49 = vmax.f32 %v869_v45, 0.0  ;;  %v3292_v44 = vld [vmem:[%s4476_s0 + $0x1b0] sm:$0xff]  }
  0xe2   :  { %v344_v50 = vpop.f32.mrf.mxu0  ;;  %v873_v51 = vpop.f32.mrf.mxu1  ;;  %3033 = vmatmul.mubr.msk.bf16.gmra.mxu0 %vm210_vm1, %v3286_v41  ;;  %3137 = vmatmul.mubr.msk.bf16.gmra.mxu1 %vm210_vm1, %v3287_v42  ;;  %v3293_v45 = vld [vmem:[%s4476_s0 + $0x274] sm:$0xff]  }
  0xe3   :  { %v3733_v52 = vmax.f32 %v523_v48, %v1052_v49  ;;  %v345_v54 = vadd.f32 %v3671_v53, %v344_v50  ;;  %v874_v55 = vadd.f32 %v3671_v53, %v873_v51  ;;  %3036 = vmatprep.mubr.msk.bf16.mxu0 %vm3335_vm0, %v4479_v0  ;;  %3140 = vmatprep.mubr.msk.bf16.mxu1 %vm3335_vm0, %v4479_v0 }
  0xe4   :  { %v2830_v56 = vpop.f32.mrf.mxu0  ;;  %v2934_v57 = vpop.f32.mrf.mxu1 }
  0xe5   :  { %v524_v58 = vmax.f32 %v345_v54, 0.0  ;;  %v1053_v59 = vmax.f32 %v874_v55, 0.0 }
  0xe6   :  { %v347_v60 = vpop.f32.mrf.mxu0  ;;  %v876_v61 = vpop.f32.mrf.mxu1 }
  0xe7   :  { %v3747_v1 = vmax.f32 %v524_v58, %v1053_v59  ;;  %v348_v2 = vadd.f32 %v3671_v53, %v347_v60  ;;  %v877_v4 = vadd.f32 %v3671_v53, %v876_v61 }
  0xe8   :  { %v2831_v5 = vpop.f32.mrf.mxu0  ;;  %v2935_v6 = vpop.f32.mrf.mxu1 }
  0xe9   :  { %v525_v7 = vmax.f32 %v348_v2, 0.0  ;;  %v1054_v8 = vmax.f32 %v877_v4, 0.0  ;;  %v3294_v5 = vld [vmem:[%s4476_s0 + $0x1b8] sm:$0xff]  }
  0xea   :  { %v352_v9 = vpop.f32.mrf.mxu0  ;;  %v881_v10 = vpop.f32.mrf.mxu1  ;;  %3037 = vmatmul.mubr.msk.bf16.gmra.mxu0 %vm210_vm1, %v3288_v62  ;;  %3141 = vmatmul.mubr.msk.bf16.gmra.mxu1 %vm210_vm1, %v3289_v63  ;;  %v3295_v6 = vld [vmem:[%s4476_s0 + $0x27c] sm:$0xff]  }
  0xeb   :  { %v3753_v11 = vmax.f32 %v525_v7, %v1054_v8  ;;  %v353_v13 = vadd.f32 %v3671_v53, %v352_v9  ;;  %v882_v14 = vadd.f32 %v3671_v53, %v881_v10  ;;  %3040 = vmatprep.mubr.msk.bf16.mxu0 %vm3335_vm0, %v4479_v0  ;;  %3144 = vmatprep.mubr.msk.bf16.mxu1 %vm3335_vm0, %v4479_v0 }
  0xec   :  { %v2834_v15 = vpop.f32.mrf.mxu0  ;;  %v2938_v16 = vpop.f32.mrf.mxu1 }
  0xed   :  { %v526_v17 = vmax.f32 %v353_v13, 0.0  ;;  %v1055_v18 = vmax.f32 %v882_v14, 0.0 }
  0xee   :  { %v355_v19 = vpop.f32.mrf.mxu0  ;;  %v884_v20 = vpop.f32.mrf.mxu1 }
  0xef   :  { %v3767_v24 = vmax.f32 %v526_v17, %v1055_v18  ;;  %v356_v25 = vadd.f32 %v3671_v53, %v355_v19  ;;  %v885_v26 = vadd.f32 %v3671_v53, %v884_v20 }
  0xf0   :  { %v2835_v27 = vpop.f32.mrf.mxu0  ;;  %v2939_v28 = vpop.f32.mrf.mxu1 }
  0xf1   :  { %v527_v29 = vmax.f32 %v356_v25, 0.0  ;;  %v1056_v30 = vmax.f32 %v885_v26, 0.0 }
  0xf2   :  { %v360_v31 = vpop.f32.mrf.mxu0  ;;  %v889_v33 = vpop.f32.mrf.mxu1  ;;  %3041 = vmatmul.mubr.msk.bf16.gmra.mxu0 %vm210_vm1, %v3290_v21  ;;  %3145 = vmatmul.mubr.msk.bf16.gmra.mxu1 %vm210_vm1, %v3291_v22 }
  0xf3   :  { %v3773_v34 = vmax.f32 %v527_v29, %v1056_v30  ;;  %v361_v35 = vadd.f32 %v3671_v53, %v360_v31  ;;  %v890_v36 = vadd.f32 %v3671_v53, %v889_v33  ;;  %3044 = vmatprep.mubr.msk.bf16.mxu0 %vm3335_vm0, %v4479_v0  ;;  %3148 = vmatprep.mubr.msk.bf16.mxu1 %vm3335_vm0, %v4479_v0  ;;  %v3296_v29 = vld [vmem:[%s4476_s0 + $0x1c0] sm:$0xff]  }
  0xf4   :  { %v2838_v37 = vpop.f32.mrf.mxu0  ;;  %v2942_v38 = vpop.f32.mrf.mxu1  ;;  %v3297_v30 = vld [vmem:[%s4476_s0 + $0x284] sm:$0xff]  }
  0xf5   :  { %v528_v39 = vmax.f32 %v361_v35, 0.0  ;;  %v1057_v40 = vmax.f32 %v890_v36, 0.0 }
  0xf6   :  { %v363_v41 = vpop.f32.mrf.mxu0  ;;  %v892_v42 = vpop.f32.mrf.mxu1 }
  0xf7   :  { %v3787_v46 = vmax.f32 %v528_v39, %v1057_v40  ;;  %v364_v47 = vadd.f32 %v3671_v53, %v363_v41  ;;  %v893_v48 = vadd.f32 %v3671_v53, %v892_v42 }
  0xf8   :  { %v2839_v49 = vpop.f32.mrf.mxu0  ;;  %v2943_v50 = vpop.f32.mrf.mxu1 }
  0xf9   :  { %v529_v51 = vmax.f32 %v364_v47, 0.0  ;;  %v1058_v54 = vmax.f32 %v893_v48, 0.0 }
  0xfa   :  { %v368_v55 = vpop.f32.mrf.mxu0  ;;  %v897_v56 = vpop.f32.mrf.mxu1  ;;  %3045 = vmatmul.mubr.msk.bf16.gmra.mxu0 %vm210_vm1, %v3292_v44  ;;  %3149 = vmatmul.mubr.msk.bf16.gmra.mxu1 %vm210_vm1, %v3293_v45 }
  0xfb   :  { %v3793_v57 = vmax.f32 %v529_v51, %v1058_v54  ;;  %v369_v58 = vadd.f32 %v3671_v53, %v368_v55  ;;  %v898_v59 = vadd.f32 %v3671_v53, %v897_v56  ;;  %3048 = vmatprep.mubr.msk.bf16.mxu0 %vm3335_vm0, %v4479_v0  ;;  %3152 = vmatprep.mubr.msk.bf16.mxu1 %vm3335_vm0, %v4479_v0  ;;  %v3298_v55 = vld [vmem:[%s4476_s0 + $0x1c8] sm:$0xff]  }
  0xfc   :  { %v2842_v60 = vpop.f32.mrf.mxu0  ;;  %v2946_v61 = vpop.f32.mrf.mxu1  ;;  %v3299_v56 = vld [vmem:[%s4476_s0 + $0x28c] sm:$0xff]  }
  0xfd   :  { %v530_v62 = vmax.f32 %v369_v58, 0.0  ;;  %v1059_v63 = vmax.f32 %v898_v59, 0.0 }
  0xfe   :  { %v371_v2 = vpop.f32.mrf.mxu0  ;;  %v900_v4 = vpop.f32.mrf.mxu1 }
  0xff   :  { %v3807_v7 = vmax.f32 %v530_v62, %v1059_v63  ;;  %v372_v8 = vadd.f32 %v3671_v53, %v371_v2  ;;  %v901_v9 = vadd.f32 %v3671_v53, %v900_v4 }
 0x100   :  { %v2843_v10 = vpop.f32.mrf.mxu0  ;;  %v2947_v13 = vpop.f32.mrf.mxu1 }
 0x101   :  { %v531_v14 = vmax.f32 %v372_v8, 0.0  ;;  %v1060_v15 = vmax.f32 %v901_v9, 0.0 }
 0x102   :  { %v376_v16 = vpop.f32.mrf.mxu0  ;;  %v905_v17 = vpop.f32.mrf.mxu1  ;;  %3049 = vmatmul.mubr.msk.bf16.gmra.mxu0 %vm210_vm1, %v3294_v5  ;;  %3153 = vmatmul.mubr.msk.bf16.gmra.mxu1 %vm210_vm1, %v3295_v6 }
 0x103   :  { %v3813_v18 = vmax.f32 %v531_v14, %v1060_v15  ;;  %v377_v19 = vadd.f32 %v3671_v53, %v376_v16  ;;  %v906_v20 = vadd.f32 %v3671_v53, %v905_v17  ;;  %3052 = vmatprep.mubr.msk.bf16.mxu0 %vm3335_vm0, %v4479_v0  ;;  %3156 = vmatprep.mubr.msk.bf16.mxu1 %vm3335_vm0, %v4479_v0 }
 0x104   :  { %v2846_v21 = vpop.f32.mrf.mxu0  ;;  %v2950_v22 = vpop.f32.mrf.mxu1 }
 0x105   :  { %v532_v25 = vmax.f32 %v377_v19, 0.0  ;;  %v1061_v26 = vmax.f32 %v906_v20, 0.0  ;;  %v3300_v19 = vld [vmem:[%s4476_s0 + $0x1d0] sm:$0xff]  }
 0x106   :  { %v379_v27 = vpop.f32.mrf.mxu0  ;;  %v908_v28 = vpop.f32.mrf.mxu1  ;;  %v3301_v20 = vld [vmem:[%s4476_s0 + $0x294] sm:$0xff]  }
 0x107   :  { %v3827_v31 = vmax.f32 %v532_v25, %v1061_v26  ;;  %v380_v33 = vadd.f32 %v3671_v53, %v379_v27  ;;  %v909_v35 = vadd.f32 %v3671_v53, %v908_v28 }
 0x108   :  { %v2847_v36 = vpop.f32.mrf.mxu0  ;;  %v2951_v37 = vpop.f32.mrf.mxu1 }
 0x109   :  { %v533_v38 = vmax.f32 %v380_v33, 0.0  ;;  %v1062_v39 = vmax.f32 %v909_v35, 0.0 }
 0x10a   :  { %v384_v40 = vpop.f32.mrf.mxu0  ;;  %v913_v41 = vpop.f32.mrf.mxu1  ;;  %3053 = vmatmul.mubr.msk.bf16.gmra.mxu0 %vm210_vm1, %v3296_v29  ;;  %3157 = vmatmul.mubr.msk.bf16.gmra.mxu1 %vm210_vm1, %v3297_v30 }
 0x10b   :  { %v3833_v42 = vmax.f32 %v533_v38, %v1062_v39  ;;  %v385_v44 = vadd.f32 %v3671_v53, %v384_v40  ;;  %v914_v45 = vadd.f32 %v3671_v53, %v913_v41  ;;  %3056 = vmatprep.mubr.msk.bf16.mxu0 %vm3335_vm0, %v4479_v0  ;;  %3160 = vmatprep.mubr.msk.bf16.mxu1 %vm3335_vm0, %v4479_v0 }
 0x10c   :  { %v2850_v47 = vpop.f32.mrf.mxu0  ;;  %v2954_v48 = vpop.f32.mrf.mxu1 }
 0x10d   :  { %v534_v49 = vmax.f32 %v385_v44, 0.0  ;;  %v1063_v50 = vmax.f32 %v914_v45, 0.0  ;;  %v3302_v47 = vld [vmem:[%s4476_s0 + $0x1d8] sm:$0xff]  }
 0x10e   :  { %v387_v51 = vpop.f32.mrf.mxu0  ;;  %v916_v54 = vpop.f32.mrf.mxu1  ;;  %v3303_v48 = vld [vmem:[%s4476_s0 + $0x29c] sm:$0xff]  }
 0x10f   :  { %v3847_v58 = vmax.f32 %v534_v49, %v1063_v50  ;;  %v388_v59 = vadd.f32 %v3671_v53, %v387_v51  ;;  %v917_v60 = vadd.f32 %v3671_v53, %v916_v54 }
 0x110   :  { %v2851_v61 = vpop.f32.mrf.mxu0  ;;  %v2955_v62 = vpop.f32.mrf.mxu1 }
 0x111   :  { %v535_v63 = vmax.f32 %v388_v59, 0.0  ;;  %v1064_v2 = vmax.f32 %v917_v60, 0.0 }
 0x112   :  { %v392_v4 = vpop.f32.mrf.mxu0  ;;  %v921_v5 = vpop.f32.mrf.mxu1  ;;  %3057 = vmatmul.mubr.msk.bf16.gmra.mxu0 %vm210_vm1, %v3298_v55  ;;  %3161 = vmatmul.mubr.msk.bf16.gmra.mxu1 %vm210_vm1, %v3299_v56 }
 0x113   :  { %v3853_v6 = vmax.f32 %v535_v63, %v1064_v2  ;;  %v393_v8 = vadd.f32 %v3671_v53, %v392_v4  ;;  %v922_v9 = vadd.f32 %v3671_v53, %v921_v5  ;;  %3060 = vmatprep.mubr.msk.bf16.mxu0 %vm3335_vm0, %v4479_v0  ;;  %3164 = vmatprep.mubr.msk.bf16.mxu1 %vm3335_vm0, %v4479_v0 }
 0x114   :  { %v2854_v10 = vpop.f32.mrf.mxu0  ;;  %v2958_v13 = vpop.f32.mrf.mxu1 }
 0x115   :  { %v536_v14 = vmax.f32 %v393_v8, 0.0  ;;  %v1065_v15 = vmax.f32 %v922_v9, 0.0 }
 0x116   :  { %v395_v16 = vpop.f32.mrf.mxu0  ;;  %v924_v17 = vpop.f32.mrf.mxu1 }
 0x117   :  { %v3867_v21 = vmax.f32 %v536_v14, %v1065_v15  ;;  %v396_v22 = vadd.f32 %v3671_v53, %v395_v16  ;;  %v925_v25 = vadd.f32 %v3671_v53, %v924_v17  ;;  %v3304_v14 = vld [vmem:[%s4476_s0 + $0x1e0] sm:$0xff]  }
 0x118   :  { %v2855_v26 = vpop.f32.mrf.mxu0  ;;  %v2959_v27 = vpop.f32.mrf.mxu1  ;;  %v3305_v15 = vld [vmem:[%s4476_s0 + $0x2a4] sm:$0xff]  }
 0x119   :  { %v537_v28 = vmax.f32 %v396_v22, 0.0  ;;  %v1066_v29 = vmax.f32 %v925_v25, 0.0 }
 0x11a   :  { %v400_v30 = vpop.f32.mrf.mxu0  ;;  %v929_v33 = vpop.f32.mrf.mxu1  ;;  %3061 = vmatmul.mubr.msk.bf16.gmra.mxu0 %vm210_vm1, %v3300_v19  ;;  %3165 = vmatmul.mubr.msk.bf16.gmra.mxu1 %vm210_vm1, %v3301_v20 }
 0x11b   :  { %v3873_v35 = vmax.f32 %v537_v28, %v1066_v29  ;;  %v401_v36 = vadd.f32 %v3671_v53, %v400_v30  ;;  %v930_v37 = vadd.f32 %v3671_v53, %v929_v33  ;;  %3064 = vmatprep.mubr.msk.bf16.mxu0 %vm3335_vm0, %v4479_v0  ;;  %3168 = vmatprep.mubr.msk.bf16.mxu1 %vm3335_vm0, %v4479_v0 }
 0x11c   :  { %v2858_v38 = vpop.f32.mrf.mxu0  ;;  %v2962_v39 = vpop.f32.mrf.mxu1 }
 0x11d   :  { %v538_v40 = vmax.f32 %v401_v36, 0.0  ;;  %v1067_v41 = vmax.f32 %v930_v37, 0.0 }
 0x11e   :  { %v403_v44 = vpop.f32.mrf.mxu0  ;;  %v932_v45 = vpop.f32.mrf.mxu1 }
 0x11f   :  { %v3887_v49 = vmax.f32 %v538_v40, %v1067_v41  ;;  %v404_v50 = vadd.f32 %v3671_v53, %v403_v44  ;;  %v933_v51 = vadd.f32 %v3671_v53, %v932_v45  ;;  %v3306_v44 = vld [vmem:[%s4476_s0 + $0x1e8] sm:$0xff]  }
 0x120   :  { %v2859_v54 = vpop.f32.mrf.mxu0  ;;  %v2963_v55 = vpop.f32.mrf.mxu1  ;;  %v3307_v45 = vld [vmem:[%s4476_s0 + $0x2ac] sm:$0xff]  }
 0x121   :  { %v539_v56 = vmax.f32 %v404_v50, 0.0  ;;  %v1068_v59 = vmax.f32 %v933_v51, 0.0 }
 0x122   :  { %v408_v60 = vpop.f32.mrf.mxu0  ;;  %v937_v61 = vpop.f32.mrf.mxu1  ;;  %3065 = vmatmul.mubr.msk.bf16.gmra.mxu0 %vm210_vm1, %v3302_v47  ;;  %3169 = vmatmul.mubr.msk.bf16.gmra.mxu1 %vm210_vm1, %v3303_v48 }
 0x123   :  { %v3893_v62 = vmax.f32 %v539_v56, %v1068_v59  ;;  %v409_v63 = vadd.f32 %v3671_v53, %v408_v60  ;;  %v938_v2 = vadd.f32 %v3671_v53, %v937_v61  ;;  %3068 = vmatprep.mubr.msk.bf16.mxu0 %vm3335_vm0, %v4479_v0  ;;  %3172 = vmatprep.mubr.msk.bf16.mxu1 %vm3335_vm0, %v4479_v0 }
 0x124   :  { %v2862_v4 = vpop.f32.mrf.mxu0  ;;  %v2966_v5 = vpop.f32.mrf.mxu1 }
 0x125   :  { %v540_v8 = vmax.f32 %v409_v63, 0.0  ;;  %v1069_v9 = vmax.f32 %v938_v2, 0.0 }
 0x126   :  { %v411_v10 = vpop.f32.mrf.mxu0  ;;  %v940_v13 = vpop.f32.mrf.mxu1 }
 0x127   :  { %v3907_v16 = vmax.f32 %v540_v8, %v1069_v9  ;;  %v412_v17 = vadd.f32 %v3671_v53, %v411_v10  ;;  %v941_v19 = vadd.f32 %v3671_v53, %v940_v13 }
 0x128   :  { %v2863_v20 = vpop.f32.mrf.mxu0  ;;  %v2967_v22 = vpop.f32.mrf.mxu1 }
 0x129   :  { %v541_v25 = vmax.f32 %v412_v17, 0.0  ;;  %v1070_v26 = vmax.f32 %v941_v19, 0.0 }
 0x12a   :  { %v416_v27 = vpop.f32.mrf.mxu0  ;;  %v945_v28 = vpop.f32.mrf.mxu1  ;;  %3069 = vmatmul.mubr.msk.bf16.gmra.mxu0 %vm210_vm1, %v3304_v14  ;;  %3173 = vmatmul.mubr.msk.bf16.gmra.mxu1 %vm210_vm1, %v3305_v15  ;;  %v3308_v14 = vld [vmem:[%s4476_s0 + $0x1f0] sm:$0xff]  }
 0x12b   :  { %v3913_v29 = vmax.f32 %v541_v25, %v1070_v26  ;;  %v417_v30 = vadd.f32 %v3671_v53, %v416_v27  ;;  %v946_v33 = vadd.f32 %v3671_v53, %v945_v28  ;;  %3072 = vmatprep.mubr.msk.bf16.mxu0 %vm3335_vm0, %v4479_v0  ;;  %3176 = vmatprep.mubr.msk.bf16.mxu1 %vm3335_vm0, %v4479_v0  ;;  %v3309_v15 = vld [vmem:[%s4476_s0 + $0x2b4] sm:$0xff]  }
 0x12c   :  { %v2866_v36 = vpop.f32.mrf.mxu0  ;;  %v2970_v37 = vpop.f32.mrf.mxu1 }
 0x12d   :  { %v542_v38 = vmax.f32 %v417_v30, 0.0  ;;  %v1071_v39 = vmax.f32 %v946_v33, 0.0 }
 0x12e   :  { %v419_v40 = vpop.f32.mrf.mxu0  ;;  %v948_v41 = vpop.f32.mrf.mxu1 }
 0x12f   :  { %v3927_v47 = vmax.f32 %v542_v38, %v1071_v39  ;;  %v420_v48 = vadd.f32 %v3671_v53, %v419_v40  ;;  %v949_v50 = vadd.f32 %v3671_v53, %v948_v41 }
 0x130   :  { %v2867_v51 = vpop.f32.mrf.mxu0  ;;  %v2971_v54 = vpop.f32.mrf.mxu1 }
 0x131   :  { %v543_v55 = vmax.f32 %v420_v48, 0.0  ;;  %v1072_v56 = vmax.f32 %v949_v50, 0.0  ;;  %v3310_v48 = vld [vmem:[%s4476_s0 + $0x1f8] sm:$0xff]  }
 0x132   :  { %v424_v59 = vpop.f32.mrf.mxu0  ;;  %v953_v60 = vpop.f32.mrf.mxu1  ;;  %3073 = vmatmul.mubr.msk.bf16.gmra.mxu0 %vm210_vm1, %v3306_v44  ;;  %3177 = vmatmul.mubr.msk.bf16.gmra.mxu1 %vm210_vm1, %v3307_v45  ;;  %v3311_v50 = vld [vmem:[%s4476_s0 + $0x2bc] sm:$0xff]  }
 0x133   :  { %v3933_v61 = vmax.f32 %v543_v55, %v1072_v56  ;;  %v425_v63 = vadd.f32 %v3671_v53, %v424_v59  ;;  %v954_v2 = vadd.f32 %v3671_v53, %v953_v60  ;;  %3076 = vmatprep.mubr.msk.bf16.mxu0 %vm3335_vm0, %v4479_v0  ;;  %3180 = vmatprep.mubr.msk.bf16.mxu1 %vm3335_vm0, %v4479_v0 }
 0x134   :  { %v2870_v4 = vpop.f32.mrf.mxu0  ;;  %v2974_v5 = vpop.f32.mrf.mxu1 }
 0x135   :  { %v544_v8 = vmax.f32 %v425_v63, 0.0  ;;  %v1073_v9 = vmax.f32 %v954_v2, 0.0 }
 0x136   :  { %v427_v10 = vpop.f32.mrf.mxu0  ;;  %v956_v13 = vpop.f32.mrf.mxu1 }
 0x137   :  { %v3947_v17 = vmax.f32 %v544_v8, %v1073_v9  ;;  %v428_v19 = vadd.f32 %v3671_v53, %v427_v10  ;;  %v957_v20 = vadd.f32 %v3671_v53, %v956_v13 }
 0x138   :  { %v2871_v22 = vpop.f32.mrf.mxu0  ;;  %v2975_v25 = vpop.f32.mrf.mxu1 }
 0x139   :  { %v545_v26 = vmax.f32 %v428_v19, 0.0  ;;  %v1074_v27 = vmax.f32 %v957_v20, 0.0  ;;  %v3312_v22 = vld [vmem:[%s4476_s0 + $0x200] sm:$0xff]  }
 0x13a   :  { %v432_v28 = vpop.f32.mrf.mxu0  ;;  %v961_v30 = vpop.f32.mrf.mxu1  ;;  %3077 = vmatmul.mubr.msk.bf16.gmra.mxu0 %vm210_vm1, %v3308_v14  ;;  %3181 = vmatmul.mubr.msk.bf16.gmra.mxu1 %vm210_vm1, %v3309_v15  ;;  %v3313_v25 = vld [vmem:[%s4476_s0 + $0x2c4] sm:$0xff]  }
 0x13b   :  { %v3953_v33 = vmax.f32 %v545_v26, %v1074_v27  ;;  %v433_v36 = vadd.f32 %v3671_v53, %v432_v28  ;;  %v962_v37 = vadd.f32 %v3671_v53, %v961_v30  ;;  %3080 = vmatprep.mubr.msk.bf16.mxu0 %vm3335_vm0, %v4479_v0  ;;  %3184 = vmatprep.mubr.msk.bf16.mxu1 %vm3335_vm0, %v4479_v0 }
 0x13c   :  { %v2874_v38 = vpop.f32.mrf.mxu0  ;;  %v2978_v39 = vpop.f32.mrf.mxu1 }
 0x13d   :  { %v546_v40 = vmax.f32 %v433_v36, 0.0  ;;  %v1075_v41 = vmax.f32 %v962_v37, 0.0 }
 0x13e   :  { %v435_v44 = vpop.f32.mrf.mxu0  ;;  %v964_v45 = vpop.f32.mrf.mxu1 }
 0x13f   :  { %v3967_v51 = vmax.f32 %v546_v40, %v1075_v41  ;;  %v436_v54 = vadd.f32 %v3671_v53, %v435_v44  ;;  %v965_v55 = vadd.f32 %v3671_v53, %v964_v45 }
 0x140   :  { %v2875_v56 = vpop.f32.mrf.mxu0  ;;  %v2979_v59 = vpop.f32.mrf.mxu1 }
 0x141   :  { %v547_v60 = vmax.f32 %v436_v54, 0.0  ;;  %v1076_v63 = vmax.f32 %v965_v55, 0.0 }
 0x142   :  { %v440_v2 = vpop.f32.mrf.mxu0  ;;  %v969_v4 = vpop.f32.mrf.mxu1  ;;  %3081 = vmatmul.mubr.msk.bf16.gmra.mxu0 %vm210_vm1, %v3310_v48  ;;  %3185 = vmatmul.mubr.msk.bf16.gmra.mxu1 %vm210_vm1, %v3311_v50 }
 0x143   :  { %v3973_v5 = vmax.f32 %v547_v60, %v1076_v63  ;;  %v441_v8 = vadd.f32 %v3671_v53, %v440_v2  ;;  %v970_v9 = vadd.f32 %v3671_v53, %v969_v4  ;;  %3084 = vmatprep.mubr.msk.bf16.mxu0 %vm3335_vm0, %v4479_v0  ;;  %3188 = vmatprep.mubr.msk.bf16.mxu1 %vm3335_vm0, %v4479_v0  ;;  %v3314_v60 = vld [vmem:[%s4476_s0 + $0x208] sm:$0xff]  }
 0x144   :  { %v2878_v10 = vpop.f32.mrf.mxu0  ;;  %v2982_v13 = vpop.f32.mrf.mxu1  ;;  %v3315_v63 = vld [vmem:[%s4476_s0 + $0x2cc] sm:$0xff]  }
 0x145   :  { %v548_v14 = vmax.f32 %v441_v8, 0.0  ;;  %v1077_v15 = vmax.f32 %v970_v9, 0.0 }
 0x146   :  { %v443_v19 = vpop.f32.mrf.mxu0  ;;  %v972_v20 = vpop.f32.mrf.mxu1 }
 0x147   :  { %v3987_v26 = vmax.f32 %v548_v14, %v1077_v15  ;;  %v444_v27 = vadd.f32 %v3671_v53, %v443_v19  ;;  %v973_v28 = vadd.f32 %v3671_v53, %v972_v20 }
 0x148   :  { %v2879_v30 = vpop.f32.mrf.mxu0  ;;  %v2983_v36 = vpop.f32.mrf.mxu1 }
 0x149   :  { %v549_v37 = vmax.f32 %v444_v27, 0.0  ;;  %v1078_v38 = vmax.f32 %v973_v28, 0.0 }
 0x14a   :  { %v448_v39 = vpop.f32.mrf.mxu0  ;;  %v977_v40 = vpop.f32.mrf.mxu1  ;;  %3085 = vmatmul.mubr.msk.bf16.gmra.mxu0 %vm210_vm1, %v3312_v22  ;;  %3189 = vmatmul.mubr.msk.bf16.gmra.mxu1 %vm210_vm1, %v3313_v25 }
 0x14b   :  { %v3993_v41 = vmax.f32 %v549_v37, %v1078_v38  ;;  %v449_v44 = vadd.f32 %v3671_v53, %v448_v39  ;;  %v978_v45 = vadd.f32 %v3671_v53, %v977_v40  ;;  %3088 = vmatprep.mubr.msk.bf16.mxu0 %vm3335_vm0, %v4479_v0  ;;  %3192 = vmatprep.mubr.msk.bf16.mxu1 %vm3335_vm0, %v4479_v0  ;;  %v3316_v39 = vld [vmem:[%s4476_s0 + $0x210] sm:$0xff]  }
 0x14c   :  { %v2882_v48 = vpop.f32.mrf.mxu0  ;;  %v2986_v50 = vpop.f32.mrf.mxu1  ;;  %v3317_v40 = vld [vmem:[%s4476_s0 + $0x2d4] sm:$0xff]  }
 0x14d   :  { %v550_v54 = vmax.f32 %v449_v44, 0.0  ;;  %v1079_v55 = vmax.f32 %v978_v45, 0.0 }
 0x14e   :  { %v451_v56 = vpop.f32.mrf.mxu0  ;;  %v980_v59 = vpop.f32.mrf.mxu1 }
 0x14f   :  { %v4007_v2 = vmax.f32 %v550_v54, %v1079_v55  ;;  %v452_v4 = vadd.f32 %v3671_v53, %v451_v56  ;;  %v981_v8 = vadd.f32 %v3671_v53, %v980_v59 }
 0x150   :  { %v2883_v9 = vpop.f32.mrf.mxu0  ;;  %v2987_v10 = vpop.f32.mrf.mxu1 }
 0x151   :  { %v551_v13 = vmax.f32 %v452_v4, 0.0  ;;  %v1080_v14 = vmax.f32 %v981_v8, 0.0 }
 0x152   :  { %v456_v15 = vpop.f32.mrf.mxu0  ;;  %v985_v19 = vpop.f32.mrf.mxu1  ;;  %3089 = vmatmul.mubr.msk.bf16.gmra.mxu0 %vm210_vm1, %v3314_v60  ;;  %3193 = vmatmul.mubr.msk.bf16.gmra.mxu1 %vm210_vm1, %v3315_v63 }
 0x153   :  { %v4013_v20 = vmax.f32 %v551_v13, %v1080_v14  ;;  %v457_v22 = vadd.f32 %v3671_v53, %v456_v15  ;;  %v986_v25 = vadd.f32 %v3671_v53, %v985_v19  ;;  %3092 = vmatprep.mubr.msk.bf16.mxu0 %vm3335_vm0, %v4479_v0  ;;  %3196 = vmatprep.mubr.msk.bf16.mxu1 %vm3335_vm0, %v4479_v0 }
 0x154   :  { %v2886_v27 = vpop.f32.mrf.mxu0  ;;  %v2990_v28 = vpop.f32.mrf.mxu1 }
 0x155   :  { %v552_v30 = vmax.f32 %v457_v22, 0.0  ;;  %v1081_v36 = vmax.f32 %v986_v25, 0.0  ;;  %v3318_v22 = vld [vmem:[%s4476_s0 + $0x218] sm:$0xff]  }
 0x156   :  { %v459_v37 = vpop.f32.mrf.mxu0  ;;  %v988_v38 = vpop.f32.mrf.mxu1  ;;  %v3319_v25 = vld [vmem:[%s4476_s0 + $0x2dc] sm:$0xff]  }
 0x157   :  { %v4027_v44 = vmax.f32 %v552_v30, %v1081_v36  ;;  %v460_v45 = vadd.f32 %v3671_v53, %v459_v37  ;;  %v989_v48 = vadd.f32 %v3671_v53, %v988_v38 }
 0x158   :  { %v2887_v50 = vpop.f32.mrf.mxu0  ;;  %v2991_v54 = vpop.f32.mrf.mxu1 }
 0x159   :  { %v553_v55 = vmax.f32 %v460_v45, 0.0  ;;  %v1082_v56 = vmax.f32 %v989_v48, 0.0 }
 0x15a   :  { %v464_v59 = vpop.f32.mrf.mxu0  ;;  %v993_v60 = vpop.f32.mrf.mxu1  ;;  %3093 = vmatmul.mubr.msk.bf16.gmra.mxu0 %vm210_vm1, %v3316_v39  ;;  %3197 = vmatmul.mubr.msk.bf16.gmra.mxu1 %vm210_vm1, %v3317_v40 }
 0x15b   :  { %v4033_v63 = vmax.f32 %v553_v55, %v1082_v56  ;;  %v465_v4 = vadd.f32 %v3671_v53, %v464_v59  ;;  %v994_v8 = vadd.f32 %v3671_v53, %v993_v60  ;;  %3096 = vmatprep.mubr.msk.bf16.mxu0 %vm3335_vm0, %v4479_v0  ;;  %3200 = vmatprep.mubr.msk.bf16.mxu1 %vm3335_vm0, %v4479_v0 }
 0x15c   :  { %v2890_v9 = vpop.f32.mrf.mxu0  ;;  %v2994_v10 = vpop.f32.mrf.mxu1 }
 0x15d   :  { %v554_v13 = vmax.f32 %v465_v4, 0.0  ;;  %v1083_v14 = vmax.f32 %v994_v8, 0.0  ;;  %v3320_v9 = vld [vmem:[%s4476_s0 + $0x220] sm:$0xff]  }
 0x15e   :  { %v467_v15 = vpop.f32.mrf.mxu0  ;;  %v996_v19 = vpop.f32.mrf.mxu1  ;;  %v3321_v10 = vld [vmem:[%s4476_s0 + $0x2e4] sm:$0xff]  }
 0x15f   :  { %v4047_v27 = vmax.f32 %v554_v13, %v1083_v14  ;;  %v468_v28 = vadd.f32 %v3671_v53, %v467_v15  ;;  %v997_v30 = vadd.f32 %v3671_v53, %v996_v19 }
 0x160   :  { %v2891_v36 = vpop.f32.mrf.mxu0  ;;  %v2995_v37 = vpop.f32.mrf.mxu1 }
 0x161   :  { %v555_v38 = vmax.f32 %v468_v28, 0.0  ;;  %v1084_v39 = vmax.f32 %v997_v30, 0.0 }
 0x162   :  { %v472_v40 = vpop.f32.mrf.mxu0  ;;  %v1001_v45 = vpop.f32.mrf.mxu1  ;;  %3097 = vmatmul.mubr.msk.bf16.gmra.mxu0 %vm210_vm1, %v3318_v22  ;;  %3201 = vmatmul.mubr.msk.bf16.gmra.mxu1 %vm210_vm1, %v3319_v25 }
 0x163   :  { %v4053_v48 = vmax.f32 %v555_v38, %v1084_v39  ;;  %v473_v50 = vadd.f32 %v3671_v53, %v472_v40  ;;  %v1002_v54 = vadd.f32 %v3671_v53, %v1001_v45  ;;  %3100 = vmatprep.mubr.msk.bf16.mxu0 %vm3335_vm0, %v4479_v0  ;;  %3204 = vmatprep.mubr.msk.bf16.mxu1 %vm3335_vm0, %v4479_v0 }
 0x164   :  { %v2894_v55 = vpop.f32.mrf.mxu0  ;;  %v2998_v56 = vpop.f32.mrf.mxu1 }
 0x165   :  { %v556_v59 = vmax.f32 %v473_v50, 0.0  ;;  %v1085_v60 = vmax.f32 %v1002_v54, 0.0 }
 0x166   :  { %v475_v4 = vpop.f32.mrf.mxu0  ;;  %v1004_v8 = vpop.f32.mrf.mxu1 }
 0x167   :  { %v4067_v13 = vmax.f32 %v556_v59, %v1085_v60  ;;  %v476_v14 = vadd.f32 %v3671_v53, %v475_v4  ;;  %v1005_v15 = vadd.f32 %v3671_v53, %v1004_v8  ;;  %v3322_v59 = vld [vmem:[%s4476_s0 + $0x228] sm:$0xff]  }
 0x168   :  { %v2895_v19 = vpop.f32.mrf.mxu0  ;;  %v2999_v22 = vpop.f32.mrf.mxu1  ;;  %v3323_v60 = vld [vmem:[%s4476_s0 + $0x2ec] sm:$0xff]  }
 0x169   :  { %v557_v25 = vmax.f32 %v476_v14, 0.0  ;;  %v1086_v28 = vmax.f32 %v1005_v15, 0.0 }
 0x16a   :  { %v480_v30 = vpop.f32.mrf.mxu0  ;;  %v1009_v36 = vpop.f32.mrf.mxu1  ;;  %3101 = vmatmul.mubr.msk.bf16.gmra.mxu0 %vm210_vm1, %v3320_v9  ;;  %3205 = vmatmul.mubr.msk.bf16.gmra.mxu1 %vm210_vm1, %v3321_v10 }
 0x16b   :  { %v4073_v37 = vmax.f32 %v557_v25, %v1086_v28  ;;  %v481_v38 = vadd.f32 %v3671_v53, %v480_v30  ;;  %v1010_v39 = vadd.f32 %v3671_v53, %v1009_v36  ;;  %3104 = vmatprep.mubr.msk.bf16.mxu0 %vm3335_vm0, %v4479_v0  ;;  %3208 = vmatprep.mubr.msk.bf16.mxu1 %vm3335_vm0, %v4479_v0 }
 0x16c   :  { %v2898_v40 = vpop.f32.mrf.mxu0  ;;  %v3002_v45 = vpop.f32.mrf.mxu1 }
 0x16d   :  { %v558_v50 = vmax.f32 %v481_v38, 0.0  ;;  %v1087_v54 = vmax.f32 %v1010_v39, 0.0 }
 0x16e   :  { %v483_v55 = vpop.f32.mrf.mxu0  ;;  %v1012_v56 = vpop.f32.mrf.mxu1 }
 0x16f   :  { %v4087_v4 = vmax.f32 %v558_v50, %v1087_v54  ;;  %v484_v8 = vadd.f32 %v3671_v53, %v483_v55  ;;  %v1013_v9 = vadd.f32 %v3671_v53, %v1012_v56  ;;  %v3324_v55 = vld [vmem:[%s4476_s0 + $0x230] sm:$0xff]  }
 0x170   :  { %v2899_v10 = vpop.f32.mrf.mxu0  ;;  %v3003_v14 = vpop.f32.mrf.mxu1 }
 0x171   :  { %v559_v15 = vmax.f32 %v484_v8, 0.0  ;;  %v1088_v19 = vmax.f32 %v1013_v9, 0.0 }
 0x172   :  { %v488_v22 = vpop.f32.mrf.mxu0  ;;  %v1017_v25 = vpop.f32.mrf.mxu1  ;;  %3105 = vmatmul.mubr.msk.bf16.gmra.mxu0 %vm210_vm1, %v3322_v59  ;;  %3209 = vmatmul.mubr.msk.bf16.gmra.mxu1 %vm210_vm1, %v3323_v60  ;;  %v4112_v59 = vld [vmem:[%s4477_s2] ss:$0 sm:$0xff] }
 0x173   :  { %v4093_v28 = vmax.f32 %v559_v15, %v1088_v19  ;;  %v489_v30 = vadd.f32 %v3671_v53, %v488_v22  ;;  %v1018_v36 = vadd.f32 %v3671_v53, %v1017_v25  ;;  %3108 = vmatprep.mubr.msk.bf16.mxu0 %vm3335_vm0, %v4479_v0  ;;  %3212 = vmatprep.mubr.msk.bf16.mxu1 %vm3335_vm0, %v4479_v0  ;;  %v3325_v53 = vld [vmem:[%s4476_s0 + $0x2f4] sm:$0xff]  }
 0x174   :  { %v2902_v38 = vpop.f32.mrf.mxu0  ;;  %v3006_v39 = vpop.f32.mrf.mxu1 }
 0x175   :  { %v560_v40 = vmax.f32 %v489_v30, 0.0  ;;  %v1089_v45 = vmax.f32 %v1018_v36, 0.0 }
 0x176   :  { %v491_v50 = vpop.f32.mrf.mxu0  ;;  %v1020_v54 = vpop.f32.mrf.mxu1 }
 0x177   :  { %v4107_v56 = vmax.f32 %v560_v40, %v1089_v45  ;;  %v492_v60 = vadd.f32 %v4112_v59, %v491_v50  ;;  %v1021_v8 = vadd.f32 %v4112_v59, %v1020_v54 }
 0x178   :  { %v2903_v9 = vpop.f32.mrf.mxu0  ;;  %v3007_v10 = vpop.f32.mrf.mxu1 }
 0x179   :  { %v561_v14 = vmax.f32 %v492_v60, 0.0  ;;  %v1090_v15 = vmax.f32 %v1021_v8, 0.0 }
 0x17a   :  { %v496_v19 = vpop.f32.mrf.mxu0  ;;  %v1025_v22 = vpop.f32.mrf.mxu1  ;;  %3109 = vmatmul.mubr.msk.bf16.gmra.mxu0 %vm210_vm1, %v3324_v55  ;;  %3213 = vmatmul.mubr.msk.bf16.gmra.mxu1 %vm210_vm1, %v3325_v53  ;;  %v3326_v55 = vld [vmem:[%s4476_s0 + $0x238] sm:$0xff]  }
 0x17b   :  { %v4118_v25 = vmax.f32 %v561_v14, %v1090_v15  ;;  %v497_v30 = vadd.f32 %v4112_v59, %v496_v19  ;;  %v1026_v36 = vadd.f32 %v4112_v59, %v1025_v22  ;;  %3112 = vmatprep.mubr.msk.bf16.mxu0 %vm3335_vm0, %v4479_v0  ;;  %3216 = vmatprep.mubr.msk.bf16.mxu1 %vm3335_vm0, %v4479_v0  ;;  %v3327_v53 = vld [vmem:[%s4476_s0 + $0x2fc] sm:$0xff]  }
 0x17c   :  { %v2906_v38 = vpop.f32.mrf.mxu0  ;;  %v3010_v39 = vpop.f32.mrf.mxu1 }
 0x17d   :  { %v562_v40 = vmax.f32 %v497_v30, 0.0  ;;  %v1091_v45 = vmax.f32 %v1026_v36, 0.0 }
 0x17e   :  { %v499_v50 = vpop.f32.mrf.mxu0  ;;  %v1028_v54 = vpop.f32.mrf.mxu1 }
 0x17f   :  { %v4132_v60 = vmax.f32 %v562_v40, %v1091_v45  ;;  %v500_v8 = vadd.f32 %v4112_v59, %v499_v50  ;;  %v1029_v9 = vadd.f32 %v4112_v59, %v1028_v54 }
 0x180   :  { %v2907_v10 = vpop.f32.mrf.mxu0  ;;  %v3011_v14 = vpop.f32.mrf.mxu1 }
 0x181   :  { %4481 = vst [vmem:[#allocation2_spill] sm:$0xff] %v4132_v60  ;;  %v563_v15 = vmax.f32 %v500_v8, 0.0  ;;  %v1092_v19 = vmax.f32 %v1029_v9, 0.0  ;;  %v3329_v9 = vld [vmem:[%s4476_s0 + $0x304] sm:$0xff]  }
 0x182   :  { %v504_v22 = vpop.f32.mrf.mxu0  ;;  %v1033_v30 = vpop.f32.mrf.mxu1  ;;  %3113 = vmatmul.mubr.msk.bf16.gmra.mxu0 %vm210_vm1, %v3326_v55  ;;  %3217 = vmatmul.mubr.msk.bf16.gmra.mxu1 %vm210_vm1, %v3327_v53  ;;  %v3328_v53 = vld [vmem:[%s4476_s0 + $0x240] sm:$0xff]  }
 0x183   :  { %v4138_v36 = vmax.f32 %v563_v15, %v1092_v19  ;;  %v505_v38 = vadd.f32 %v4112_v59, %v504_v22  ;;  %v1034_v39 = vadd.f32 %v4112_v59, %v1033_v30  ;;  %3116 = vmatprep.mubr.msk.bf16.mxu0 %vm3335_vm0, %v4479_v0  ;;  %3220 = vmatprep.mubr.msk.bf16.mxu1 %vm3335_vm0, %v4479_v0 }
 0x184   :  { %v2910_v40 = vpop.f32.mrf.mxu0  ;;  %v3014_v45 = vpop.f32.mrf.mxu1 }
 0x185   :  { %4482 = vst [vmem:[#allocation3_spill] sm:$0xff] %v4138_v36  ;;  %v564_v50 = vmax.f32 %v505_v38, 0.0  ;;  %v1093_v54 = vmax.f32 %v1034_v39, 0.0 }
 0x186   :  { %v507_v8 = vpop.f32.mrf.mxu0  ;;  %v1036_v55 = vpop.f32.mrf.mxu1 }
 0x187   :  { %v4152_v10 = vmax.f32 %v564_v50, %v1093_v54  ;;  %v508_v14 = vadd.f32 %v4112_v59, %v507_v8  ;;  %v1037_v15 = vadd.f32 %v4112_v59, %v1036_v55  ;;  %v4485_v54 = vmov 0.0  }
 0x188   :  { %v2911_v19 = vpop.f32.mrf.mxu0  ;;  %v3015_v22 = vpop.f32.mrf.mxu1 }
 0x189   :  { %4483 = vst [vmem:[#allocation4_spill] sm:$0xff] %v4152_v10  ;;  %v565_v30 = vmax.f32 %v508_v14, 0.0  ;;  %v1094_v38 = vmax.f32 %v1037_v15, 0.0  ;;  %v3331_v22 = vld [vmem:[%s4476_s0 + $0x30c] ss:$0 sps:$4 sm:$0xff]  }
 0x18a   :  { %v512_v39 = vpop.f32.mrf.mxu0  ;;  %v1041_v40 = vpop.f32.mrf.mxu1  ;;  %3117 = vmatmul.mubr.msk.bf16.gmra.mxu0 %vm210_vm1, %v3328_v53  ;;  %3221 = vmatmul.mubr.msk.bf16.gmra.mxu1 %vm210_vm1, %v3329_v9  ;;  %v3330_v9 = vld [vmem:[%s4476_s0 + $0x248] ss:$0 sps:$4 sm:$0xff]  }
 0x18b   :  { %v4158_v45 = vmax.f32 %v565_v30, %v1094_v38  ;;  %v513_v0 = vadd.f32 %v4112_v59, %v512_v39  ;;  %v1042_v50 = vadd.f32 %v4112_v59, %v1041_v40  ;;  %3120 = vmatprep.mubr.msk.bf16.mxu0 %vm3335_vm0, %v4485_v54  ;;  %3224 = vmatprep.mubr.msk.bf16.mxu1 %vm3335_vm0, %v4485_v54 }
 0x18c   :  { %v2914_v8 = vpop.f32.mrf.mxu0  ;;  %v3018_v55 = vpop.f32.mrf.mxu1 }
 0x18d   :  { %4484 = vst [vmem:[#allocation5_spill] sm:$0xff] %v4158_v45  ;;  %v566_v14 = vmax.f32 %v513_v0, 0.0  ;;  %v1095_v15 = vmax.f32 %v1042_v50, 0.0 }
 0x18e   :  { %v515_v19 = vpop.f32.mrf.mxu0  ;;  %v1044_v53 = vpop.f32.mrf.mxu1 }
 0x18f   :  { %v4172_v30 = vmax.f32 %v566_v14, %v1095_v15 }
 0x190   :  { %v2915_v38 = vpop.f32.mrf.mxu0  ;;  %v3019_v39 = vpop.f32.mrf.mxu1 }
 0x191   :  { %4486 = vst [vmem:[#allocation6_spill] sm:$0xff] %v4172_v30 }
 0x192   :  { %v1427_v40 = vpop.f32.mrf.mxu0  ;;  %3121 = vmatmul.mubr.msk.bf16.gmra.mxu0 %vm210_vm1, %v3330_v9  ;;  %v1956_v54 = vpop.f32.mrf.mxu1  ;;  %3225 = vmatmul.mubr.msk.bf16.gmra.mxu1 %vm210_vm1, %v3331_v22 }
 0x193   :  { %v1428_v0 = vadd.f32 %v4112_v59, %v1427_v40  ;;  %v1957_v50 = vadd.f32 %v4112_v59, %v1956_v54 }
 0x194   :  { %v3026_v8 = vpop.f32.mrf.mxu0  ;;  %v3130_v55 = vpop.f32.mrf.mxu1 }
 0x195   :  { %v1625_v19 = vmax.f32 %v1428_v0, 0.0  ;;  %v2154_v53 = vmax.f32 %v1957_v50, 0.0 }
 0x196   :  { %v1430_v45 = vpop.f32.mrf.mxu0  ;;  %v1959_v10 = vpop.f32.mrf.mxu1 }
 0x197   :  { %v2203_v14 = vmax.f32 %v1625_v19, %v2154_v53  ;;  %v1431_v15 = vadd.f32 %v4112_v59, %v1430_v45  ;;  %v1960_v38 = vadd.f32 %v4112_v59, %v1959_v10 }
 0x198   :  { %v3027_v39 = vpop.f32.mrf.mxu0  ;;  %v3131_v9 = vpop.f32.mrf.mxu1 }
 0x199   :  { %v2252_v30 = vmax.f32 %v3687_v3, %v2203_v14  ;;  %v1626_v22 = vmax.f32 %v1431_v15, 0.0  ;;  %v2155_v36 = vmax.f32 %v1960_v38, 0.0 }
 0x19a   :  { %v1435_v40 = vpop.f32.mrf.mxu0  ;;  %v1964_v60 = vpop.f32.mrf.mxu1 }
 0x19b   :  { %2301 = vst [vmem:[%s4478_s3] sm:$0xff] %v2252_v30  ;;  %v2204_v54 = vmax.f32 %v1626_v22, %v2155_v36  ;;  %v1436_v0 = vadd.f32 %v4112_v59, %v1435_v40  ;;  %v1965_v50 = vadd.f32 %v4112_v59, %v1964_v60 }
 0x19c   :  { %v3030_v45 = vpop.f32.mrf.mxu0  ;;  %v3134_v8 = vpop.f32.mrf.mxu1 }
 0x19d   :  { %v2253_v10 = vmax.f32 %v3693_v12, %v2204_v54  ;;  %v1627_v55 = vmax.f32 %v1436_v0, 0.0  ;;  %v2156_v19 = vmax.f32 %v1965_v50, 0.0 }
 0x19e   :  { %v1438_v3 = vpop.f32.mrf.mxu0  ;;  %v1967_v53 = vpop.f32.mrf.mxu1 }
 0x19f   :  { %2302 = vst [vmem:[%s4478_s3 + $0x8] sm:$0xff] %v2253_v10  ;;  %v2205_v14 = vmax.f32 %v1627_v55, %v2156_v19  ;;  %v1439_v30 = vadd.f32 %v4112_v59, %v1438_v3  ;;  %v1968_v36 = vadd.f32 %v4112_v59, %v1967_v53 }
 0x1a0   :  { %v3031_v15 = vpop.f32.mrf.mxu0  ;;  %v3135_v38 = vpop.f32.mrf.mxu1 }
 0x1a1   :  { %v2254_v60 = vmax.f32 %v3707_v23, %v2205_v14  ;;  %v1628_v39 = vmax.f32 %v1439_v30, 0.0  ;;  %v2157_v9 = vmax.f32 %v1968_v36, 0.0 }
 0x1a2   :  { %v1443_v12 = vpop.f32.mrf.mxu0  ;;  %v1972_v22 = vpop.f32.mrf.mxu1 }
 0x1a3   :  { %2303 = vst [vmem:[%s4478_s3 + $0x10] sm:$0xff] %v2254_v60  ;;  %v2206_v40 = vmax.f32 %v1628_v39, %v2157_v9  ;;  %v1444_v54 = vadd.f32 %v4112_v59, %v1443_v12  ;;  %v1973_v0 = vadd.f32 %v4112_v59, %v1972_v22 }
 0x1a4   :  { %v3034_v50 = vpop.f32.mrf.mxu0  ;;  %v3138_v45 = vpop.f32.mrf.mxu1 }
 0x1a5   :  { %v2255_v8 = vmax.f32 %v3713_v32, %v2206_v40  ;;  %v1629_v10 = vmax.f32 %v1444_v54, 0.0  ;;  %v2158_v55 = vmax.f32 %v1973_v0, 0.0 }
 0x1a6   :  { %v1446_v23 = vpop.f32.mrf.mxu0  ;;  %v1975_v19 = vpop.f32.mrf.mxu1 }
 0x1a7   :  { %2304 = vst [vmem:[%s4478_s3 + $0x18] sm:$0xff] %v2255_v8  ;;  %v2207_v3 = vmax.f32 %v1629_v10, %v2158_v55  ;;  %v1447_v53 = vadd.f32 %v4112_v59, %v1446_v23  ;;  %v1976_v14 = vadd.f32 %v4112_v59, %v1975_v19 }
 0x1a8   :  { %v3035_v30 = vpop.f32.mrf.mxu0  ;;  %v3139_v36 = vpop.f32.mrf.mxu1 }
 0x1a9   :  { %v2256_v15 = vmax.f32 %v3727_v43, %v2207_v3  ;;  %v1630_v38 = vmax.f32 %v1447_v53, 0.0  ;;  %v2159_v60 = vmax.f32 %v1976_v14, 0.0 }
 0x1aa   :  { %v1451_v32 = vpop.f32.mrf.mxu0  ;;  %v1980_v39 = vpop.f32.mrf.mxu1 }
 0x1ab   :  { %2305 = vst [vmem:[%s4478_s3 + $0x20] sm:$0xff] %v2256_v15  ;;  %v2208_v9 = vmax.f32 %v1630_v38, %v2159_v60  ;;  %v1452_v12 = vadd.f32 %v4112_v59, %v1451_v32  ;;  %v1981_v22 = vadd.f32 %v4112_v59, %v1980_v39 }
 0x1ac   :  { %v3038_v40 = vpop.f32.mrf.mxu0  ;;  %v3142_v54 = vpop.f32.mrf.mxu1 }
 0x1ad   :  { %v2257_v0 = vmax.f32 %v3733_v52, %v2208_v9  ;;  %v1631_v50 = vmax.f32 %v1452_v12, 0.0  ;;  %v2160_v45 = vmax.f32 %v1981_v22, 0.0 }
 0x1ae   :  { %v1454_v43 = vpop.f32.mrf.mxu0  ;;  %v1983_v8 = vpop.f32.mrf.mxu1 }
 0x1af   :  { %2306 = vst [vmem:[%s4478_s3 + $0x28] sm:$0xff] %v2257_v0  ;;  %v2209_v10 = vmax.f32 %v1631_v50, %v2160_v45  ;;  %v1455_v55 = vadd.f32 %v4112_v59, %v1454_v43  ;;  %v1984_v23 = vadd.f32 %v4112_v59, %v1983_v8 }
 0x1b0   :  { %v3039_v19 = vpop.f32.mrf.mxu0  ;;  %v3143_v3 = vpop.f32.mrf.mxu1 }
 0x1b1   :  { %v2258_v53 = vmax.f32 %v3747_v1, %v2209_v10  ;;  %v1632_v14 = vmax.f32 %v1455_v55, 0.0  ;;  %v2161_v30 = vmax.f32 %v1984_v23, 0.0 }
 0x1b2   :  { %v1459_v52 = vpop.f32.mrf.mxu0  ;;  %v1988_v36 = vpop.f32.mrf.mxu1 }
 0x1b3   :  { %2307 = vst [vmem:[%s4478_s3 + $0x30] sm:$0xff] %v2258_v53  ;;  %v2210_v15 = vmax.f32 %v1632_v14, %v2161_v30  ;;  %v1460_v38 = vadd.f32 %v4112_v59, %v1459_v52  ;;  %v1989_v60 = vadd.f32 %v4112_v59, %v1988_v36 }
 0x1b4   :  { %v3042_v32 = vpop.f32.mrf.mxu0  ;;  %v3146_v39 = vpop.f32.mrf.mxu1 }
 0x1b5   :  { %v2259_v9 = vmax.f32 %v3753_v11, %v2210_v15  ;;  %v1633_v12 = vmax.f32 %v1460_v38, 0.0  ;;  %v2162_v22 = vmax.f32 %v1989_v60, 0.0 }
 0x1b6   :  { %v1462_v1 = vpop.f32.mrf.mxu0  ;;  %v1991_v40 = vpop.f32.mrf.mxu1 }
 0x1b7   :  { %2308 = vst [vmem:[%s4478_s3 + $0x38] sm:$0xff] %v2259_v9  ;;  %v2211_v54 = vmax.f32 %v1633_v12, %v2162_v22  ;;  %v1463_v0 = vadd.f32 %v4112_v59, %v1462_v1  ;;  %v1992_v50 = vadd.f32 %v4112_v59, %v1991_v40 }
 0x1b8   :  { %v3043_v45 = vpop.f32.mrf.mxu0  ;;  %v3147_v43 = vpop.f32.mrf.mxu1 }
 0x1b9   :  { %v2260_v8 = vmax.f32 %v3767_v24, %v2211_v54  ;;  %v1634_v10 = vmax.f32 %v1463_v0, 0.0  ;;  %v2163_v55 = vmax.f32 %v1992_v50, 0.0 }
 0x1ba   :  { %v1467_v11 = vpop.f32.mrf.mxu0  ;;  %v1996_v23 = vpop.f32.mrf.mxu1 }
 0x1bb   :  { %2309 = vst [vmem:[%s4478_s3 + $0x40] sm:$0xff] %v2260_v8  ;;  %v2212_v19 = vmax.f32 %v1634_v10, %v2163_v55  ;;  %v1468_v3 = vadd.f32 %v4112_v59, %v1467_v11  ;;  %v1997_v53 = vadd.f32 %v4112_v59, %v1996_v23 }
 0x1bc   :  { %v3046_v14 = vpop.f32.mrf.mxu0  ;;  %v3150_v30 = vpop.f32.mrf.mxu1 }
 0x1bd   :  { %v2261_v52 = vmax.f32 %v3773_v34, %v2212_v19  ;;  %v1635_v36 = vmax.f32 %v1468_v3, 0.0  ;;  %v2164_v15 = vmax.f32 %v1997_v53, 0.0 }
 0x1be   :  { %v1470_v24 = vpop.f32.mrf.mxu0  ;;  %v1999_v38 = vpop.f32.mrf.mxu1 }
 0x1bf   :  { %2310 = vst [vmem:[%s4478_s3 + $0x48] sm:$0xff] %v2261_v52  ;;  %v2213_v60 = vmax.f32 %v1635_v36, %v2164_v15  ;;  %v1471_v32 = vadd.f32 %v4112_v59, %v1470_v24  ;;  %v2000_v39 = vadd.f32 %v4112_v59, %v1999_v38 }
 0x1c0   :  { %v3047_v9 = vpop.f32.mrf.mxu0  ;;  %v3151_v12 = vpop.f32.mrf.mxu1 }
 0x1c1   :  { %v2262_v22 = vmax.f32 %v3787_v46, %v2213_v60  ;;  %v1636_v1 = vmax.f32 %v1471_v32, 0.0  ;;  %v2165_v40 = vmax.f32 %v2000_v39, 0.0 }
 0x1c2   :  { %v1475_v34 = vpop.f32.mrf.mxu0  ;;  %v2004_v54 = vpop.f32.mrf.mxu1 }
 0x1c3   :  { %2311 = vst [vmem:[%s4478_s3 + $0x50] sm:$0xff] %v2262_v22  ;;  %v2214_v0 = vmax.f32 %v1636_v1, %v2165_v40  ;;  %v1476_v50 = vadd.f32 %v4112_v59, %v1475_v34  ;;  %v2005_v45 = vadd.f32 %v4112_v59, %v2004_v54 }
 0x1c4   :  { %v3050_v43 = vpop.f32.mrf.mxu0  ;;  %v3154_v8 = vpop.f32.mrf.mxu1 }
 0x1c5   :  { %v2263_v10 = vmax.f32 %v3793_v57, %v2214_v0  ;;  %v1637_v55 = vmax.f32 %v1476_v50, 0.0  ;;  %v2166_v11 = vmax.f32 %v2005_v45, 0.0 }
 0x1c6   :  { %v1478_v46 = vpop.f32.mrf.mxu0  ;;  %v2007_v23 = vpop.f32.mrf.mxu1 }
 0x1c7   :  { %2312 = vst [vmem:[%s4478_s3 + $0x58] sm:$0xff] %v2263_v10  ;;  %v2215_v19 = vmax.f32 %v1637_v55, %v2166_v11  ;;  %v1479_v3 = vadd.f32 %v4112_v59, %v1478_v46  ;;  %v2008_v53 = vadd.f32 %v4112_v59, %v2007_v23 }
 0x1c8   :  { %v3051_v14 = vpop.f32.mrf.mxu0  ;;  %v3155_v30 = vpop.f32.mrf.mxu1 }
 0x1c9   :  { %v2264_v52 = vmax.f32 %v3807_v7, %v2215_v19  ;;  %v1638_v36 = vmax.f32 %v1479_v3, 0.0  ;;  %v2167_v15 = vmax.f32 %v2008_v53, 0.0 }
 0x1ca   :  { %v1483_v57 = vpop.f32.mrf.mxu0  ;;  %v2012_v24 = vpop.f32.mrf.mxu1 }
 0x1cb   :  { %2313 = vst [vmem:[%s4478_s3 + $0x60] sm:$0xff] %v2264_v52  ;;  %v2216_v38 = vmax.f32 %v1638_v36, %v2167_v15  ;;  %v1484_v60 = vadd.f32 %v4112_v59, %v1483_v57  ;;  %v2013_v32 = vadd.f32 %v4112_v59, %v2012_v24 }
 0x1cc   :  { %v3054_v39 = vpop.f32.mrf.mxu0  ;;  %v3158_v9 = vpop.f32.mrf.mxu1 }
 0x1cd   :  { %v2265_v12 = vmax.f32 %v3813_v18, %v2216_v38  ;;  %v1639_v22 = vmax.f32 %v1484_v60, 0.0  ;;  %v2168_v1 = vmax.f32 %v2013_v32, 0.0 }
 0x1ce   :  { %v1486_v7 = vpop.f32.mrf.mxu0  ;;  %v2015_v40 = vpop.f32.mrf.mxu1 }
 0x1cf   :  { %2314 = vst [vmem:[%s4478_s3 + $0x68] sm:$0xff] %v2265_v12  ;;  %v2217_v34 = vmax.f32 %v1639_v22, %v2168_v1  ;;  %v1487_v54 = vadd.f32 %v4112_v59, %v1486_v7  ;;  %v2016_v0 = vadd.f32 %v4112_v59, %v2015_v40 }
 0x1d0   :  { %v3055_v50 = vpop.f32.mrf.mxu0  ;;  %v3159_v45 = vpop.f32.mrf.mxu1 }
 0x1d1   :  { %v2266_v43 = vmax.f32 %v3827_v31, %v2217_v34  ;;  %v1640_v8 = vmax.f32 %v1487_v54, 0.0  ;;  %v2169_v10 = vmax.f32 %v2016_v0, 0.0 }
 0x1d2   :  { %v1491_v18 = vpop.f32.mrf.mxu0  ;;  %v2020_v55 = vpop.f32.mrf.mxu1 }
 0x1d3   :  { %2315 = vst [vmem:[%s4478_s3 + $0x70] sm:$0xff] %v2266_v43  ;;  %v2218_v11 = vmax.f32 %v1640_v8, %v2169_v10  ;;  %v1492_v46 = vadd.f32 %v4112_v59, %v1491_v18  ;;  %v2021_v23 = vadd.f32 %v4112_v59, %v2020_v55 }
 0x1d4   :  { %v3058_v19 = vpop.f32.mrf.mxu0  ;;  %v3162_v3 = vpop.f32.mrf.mxu1 }
 0x1d5   :  { %v2267_v53 = vmax.f32 %v3833_v42, %v2218_v11  ;;  %v1641_v14 = vmax.f32 %v1492_v46, 0.0  ;;  %v2170_v30 = vmax.f32 %v2021_v23, 0.0 }
 0x1d6   :  { %v1494_v31 = vpop.f32.mrf.mxu0  ;;  %v2023_v52 = vpop.f32.mrf.mxu1 }
 0x1d7   :  { %2316 = vst [vmem:[%s4478_s3 + $0x78] sm:$0xff] %v2267_v53  ;;  %v2219_v36 = vmax.f32 %v1641_v14, %v2170_v30  ;;  %v1495_v15 = vadd.f32 %v4112_v59, %v1494_v31  ;;  %v2024_v57 = vadd.f32 %v4112_v59, %v2023_v52 }
 0x1d8   :  { %v3059_v24 = vpop.f32.mrf.mxu0  ;;  %v3163_v38 = vpop.f32.mrf.mxu1 }
 0x1d9   :  { %v2268_v60 = vmax.f32 %v3847_v58, %v2219_v36  ;;  %v1642_v32 = vmax.f32 %v1495_v15, 0.0  ;;  %v2171_v39 = vmax.f32 %v2024_v57, 0.0 }
 0x1da   :  { %v1499_v42 = vpop.f32.mrf.mxu0  ;;  %v2028_v9 = vpop.f32.mrf.mxu1 }
 0x1db   :  { %2317 = vst [vmem:[%s4478_s3 + $0x80] sm:$0xff] %v2268_v60  ;;  %v2220_v12 = vmax.f32 %v1642_v32, %v2171_v39  ;;  %v1500_v22 = vadd.f32 %v4112_v59, %v1499_v42  ;;  %v2029_v1 = vadd.f32 %v4112_v59, %v2028_v9 }
 0x1dc   :  { %v3062_v7 = vpop.f32.mrf.mxu0  ;;  %v3166_v40 = vpop.f32.mrf.mxu1 }
 0x1dd   :  { %v2269_v34 = vmax.f32 %v3853_v6, %v2220_v12  ;;  %v1643_v54 = vmax.f32 %v1500_v22, 0.0  ;;  %v2172_v0 = vmax.f32 %v2029_v1, 0.0 }
 0x1de   :  { %v1502_v58 = vpop.f32.mrf.mxu0  ;;  %v2031_v50 = vpop.f32.mrf.mxu1 }
 0x1df   :  { %2318 = vst [vmem:[%s4478_s3 + $0x88] sm:$0xff] %v2269_v34  ;;  %v2221_v45 = vmax.f32 %v1643_v54, %v2172_v0  ;;  %v1503_v43 = vadd.f32 %v4112_v59, %v1502_v58  ;;  %v2032_v8 = vadd.f32 %v4112_v59, %v2031_v50 }
 0x1e0   :  { %v3063_v10 = vpop.f32.mrf.mxu0  ;;  %v3167_v18 = vpop.f32.mrf.mxu1 }
 0x1e1   :  { %v2270_v55 = vmax.f32 %v3867_v21, %v2221_v45  ;;  %v1644_v11 = vmax.f32 %v1503_v43, 0.0  ;;  %v2173_v46 = vmax.f32 %v2032_v8, 0.0 }
 0x1e2   :  { %v1507_v6 = vpop.f32.mrf.mxu0  ;;  %v2036_v23 = vpop.f32.mrf.mxu1 }
 0x1e3   :  { %2319 = vst [vmem:[%s4478_s3 + $0x90] sm:$0xff] %v2270_v55  ;;  %v2222_v19 = vmax.f32 %v1644_v11, %v2173_v46  ;;  %v1508_v3 = vadd.f32 %v4112_v59, %v1507_v6  ;;  %v2037_v53 = vadd.f32 %v4112_v59, %v2036_v23 }
 0x1e4   :  { %v3066_v14 = vpop.f32.mrf.mxu0  ;;  %v3170_v30 = vpop.f32.mrf.mxu1 }
 0x1e5   :  { %v2271_v31 = vmax.f32 %v3873_v35, %v2222_v19  ;;  %v1645_v52 = vmax.f32 %v1508_v3, 0.0  ;;  %v2174_v36 = vmax.f32 %v2037_v53, 0.0 }
 0x1e6   :  { %v1510_v21 = vpop.f32.mrf.mxu0  ;;  %v2039_v15 = vpop.f32.mrf.mxu1 }
 0x1e7   :  { %2320 = vst [vmem:[%s4478_s3 + $0x98] sm:$0xff] %v2271_v31  ;;  %v2223_v57 = vmax.f32 %v1645_v52, %v2174_v36  ;;  %v1511_v24 = vadd.f32 %v4112_v59, %v1510_v21  ;;  %v2040_v38 = vadd.f32 %v4112_v59, %v2039_v15 }
 0x1e8   :  { %v3067_v60 = vpop.f32.mrf.mxu0  ;;  %v3171_v32 = vpop.f32.mrf.mxu1 }
 0x1e9   :  { %v2272_v39 = vmax.f32 %v3887_v49, %v2223_v57  ;;  %v1646_v42 = vmax.f32 %v1511_v24, 0.0  ;;  %v2175_v9 = vmax.f32 %v2040_v38, 0.0 }
 0x1ea   :  { %v1515_v35 = vpop.f32.mrf.mxu0  ;;  %v2044_v12 = vpop.f32.mrf.mxu1 }
 0x1eb   :  { %2321 = vst [vmem:[%s4478_s3 + $0xa0] sm:$0xff] %v2272_v39  ;;  %v2224_v22 = vmax.f32 %v1646_v42, %v2175_v9  ;;  %v1516_v1 = vadd.f32 %v4112_v59, %v1515_v35  ;;  %v2045_v7 = vadd.f32 %v4112_v59, %v2044_v12 }
 0x1ec   :  { %v3070_v40 = vpop.f32.mrf.mxu0  ;;  %v3174_v34 = vpop.f32.mrf.mxu1 }
 0x1ed   :  { %v2273_v54 = vmax.f32 %v3893_v62, %v2224_v22  ;;  %v1647_v0 = vmax.f32 %v1516_v1, 0.0  ;;  %v2176_v58 = vmax.f32 %v2045_v7, 0.0 }
 0x1ee   :  { %v1518_v49 = vpop.f32.mrf.mxu0  ;;  %v2047_v50 = vpop.f32.mrf.mxu1 }
 0x1ef   :  { %2322 = vst [vmem:[%s4478_s3 + $0xa8] sm:$0xff] %v2273_v54  ;;  %v2225_v45 = vmax.f32 %v1647_v0, %v2176_v58  ;;  %v1519_v43 = vadd.f32 %v4112_v59, %v1518_v49  ;;  %v2048_v8 = vadd.f32 %v4112_v59, %v2047_v50 }
 0x1f0   :  { %v3071_v10 = vpop.f32.mrf.mxu0  ;;  %v3175_v18 = vpop.f32.mrf.mxu1 }
 0x1f1   :  { %v2274_v55 = vmax.f32 %v3907_v16, %v2225_v45  ;;  %v1648_v11 = vmax.f32 %v1519_v43, 0.0  ;;  %v2177_v46 = vmax.f32 %v2048_v8, 0.0 }
 0x1f2   :  { %v1523_v62 = vpop.f32.mrf.mxu0  ;;  %v2052_v6 = vpop.f32.mrf.mxu1 }
 0x1f3   :  { %2323 = vst [vmem:[%s4478_s3 + $0xb0] sm:$0xff] %v2274_v55  ;;  %v2226_v23 = vmax.f32 %v1648_v11, %v2177_v46  ;;  %v1524_v19 = vadd.f32 %v4112_v59, %v1523_v62  ;;  %v2053_v3 = vadd.f32 %v4112_v59, %v2052_v6 }
 0x1f4   :  { %v3074_v53 = vpop.f32.mrf.mxu0  ;;  %v3178_v14 = vpop.f32.mrf.mxu1 }
 0x1f5   :  { %v2275_v30 = vmax.f32 %v3913_v29, %v2226_v23  ;;  %v1649_v31 = vmax.f32 %v1524_v19, 0.0  ;;  %v2178_v52 = vmax.f32 %v2053_v3, 0.0 }
 0x1f6   :  { %v1526_v16 = vpop.f32.mrf.mxu0  ;;  %v2055_v36 = vpop.f32.mrf.mxu1 }
 0x1f7   :  { %2324 = vst [vmem:[%s4478_s3 + $0xb8] sm:$0xff] %v2275_v30  ;;  %v2227_v21 = vmax.f32 %v1649_v31, %v2178_v52  ;;  %v1527_v15 = vadd.f32 %v4112_v59, %v1526_v16  ;;  %v2056_v57 = vadd.f32 %v4112_v59, %v2055_v36 }
 0x1f8   :  { %v3075_v24 = vpop.f32.mrf.mxu0  ;;  %v3179_v38 = vpop.f32.mrf.mxu1 }
 0x1f9   :  { %v2276_v60 = vmax.f32 %v3927_v47, %v2227_v21  ;;  %v1650_v32 = vmax.f32 %v1527_v15, 0.0  ;;  %v2179_v39 = vmax.f32 %v2056_v57, 0.0 }
 0x1fa   :  { %v1531_v29 = vpop.f32.mrf.mxu0  ;;  %v2060_v42 = vpop.f32.mrf.mxu1 }
 0x1fb   :  { %2325 = vst [vmem:[%s4478_s3 + $0xc0] sm:$0xff] %v2276_v60  ;;  %v2228_v9 = vmax.f32 %v1650_v32, %v2179_v39  ;;  %v1532_v35 = vadd.f32 %v4112_v59, %v1531_v29  ;;  %v2061_v12 = vadd.f32 %v4112_v59, %v2060_v42 }
 0x1fc   :  { %v3078_v22 = vpop.f32.mrf.mxu0  ;;  %v3182_v1 = vpop.f32.mrf.mxu1 }
 0x1fd   :  { %v2277_v7 = vmax.f32 %v3933_v61, %v2228_v9  ;;  %v1651_v40 = vmax.f32 %v1532_v35, 0.0  ;;  %v2180_v34 = vmax.f32 %v2061_v12, 0.0 }
 0x1fe   :  { %v1534_v47 = vpop.f32.mrf.mxu0  ;;  %v2063_v54 = vpop.f32.mrf.mxu1 }
 0x1ff   :  { %2326 = vst [vmem:[%s4478_s3 + $0xc8] sm:$0xff] %v2277_v7  ;;  %v2229_v0 = vmax.f32 %v1651_v40, %v2180_v34  ;;  %v1535_v58 = vadd.f32 %v4112_v59, %v1534_v47  ;;  %v2064_v49 = vadd.f32 %v4112_v59, %v2063_v54 }
 0x200   :  { %v3079_v50 = vpop.f32.mrf.mxu0  ;;  %v3183_v45 = vpop.f32.mrf.mxu1 }
 0x201   :  { %v2278_v43 = vmax.f32 %v3947_v17, %v2229_v0  ;;  %v1652_v8 = vmax.f32 %v1535_v58, 0.0  ;;  %v2181_v10 = vmax.f32 %v2064_v49, 0.0 }
 0x202   :  { %v1539_v61 = vpop.f32.mrf.mxu0  ;;  %v2068_v18 = vpop.f32.mrf.mxu1 }
 0x203   :  { %2327 = vst [vmem:[%s4478_s3 + $0xd0] sm:$0xff] %v2278_v43  ;;  %v2230_v55 = vmax.f32 %v1652_v8, %v2181_v10  ;;  %v1540_v11 = vadd.f32 %v4112_v59, %v1539_v61  ;;  %v2069_v46 = vadd.f32 %v4112_v59, %v2068_v18 }
 0x204   :  { %v3082_v62 = vpop.f32.mrf.mxu0  ;;  %v3186_v6 = vpop.f32.mrf.mxu1 }
 0x205   :  { %v2279_v23 = vmax.f32 %v3953_v33, %v2230_v55  ;;  %v1653_v19 = vmax.f32 %v1540_v11, 0.0  ;;  %v2182_v3 = vmax.f32 %v2069_v46, 0.0 }
 0x206   :  { %v1542_v17 = vpop.f32.mrf.mxu0  ;;  %v2071_v53 = vpop.f32.mrf.mxu1 }
 0x207   :  { %2328 = vst [vmem:[%s4478_s3 + $0xd8] sm:$0xff] %v2279_v23  ;;  %v2231_v14 = vmax.f32 %v1653_v19, %v2182_v3  ;;  %v1543_v30 = vadd.f32 %v4112_v59, %v1542_v17  ;;  %v2072_v31 = vadd.f32 %v4112_v59, %v2071_v53 }
 0x208   :  { %v3083_v52 = vpop.f32.mrf.mxu0  ;;  %v3187_v16 = vpop.f32.mrf.mxu1 }
 0x209   :  { %v2280_v36 = vmax.f32 %v3967_v51, %v2231_v14  ;;  %v1654_v21 = vmax.f32 %v1543_v30, 0.0  ;;  %v2183_v15 = vmax.f32 %v2072_v31, 0.0 }
 0x20a   :  { %v1547_v33 = vpop.f32.mrf.mxu0  ;;  %v2076_v57 = vpop.f32.mrf.mxu1 }
 0x20b   :  { %2329 = vst [vmem:[%s4478_s3 + $0xe0] sm:$0xff] %v2280_v36  ;;  %v2232_v24 = vmax.f32 %v1654_v21, %v2183_v15  ;;  %v1548_v38 = vadd.f32 %v4112_v59, %v1547_v33  ;;  %v2077_v60 = vadd.f32 %v4112_v59, %v2076_v57 }
 0x20c   :  { %v3086_v32 = vpop.f32.mrf.mxu0  ;;  %v3190_v39 = vpop.f32.mrf.mxu1 }
 0x20d   :  { %v2281_v29 = vmax.f32 %v3973_v5, %v2232_v24  ;;  %v1655_v42 = vmax.f32 %v1548_v38, 0.0  ;;  %v2184_v9 = vmax.f32 %v2077_v60, 0.0 }
 0x20e   :  { %v1550_v51 = vpop.f32.mrf.mxu0  ;;  %v2079_v35 = vpop.f32.mrf.mxu1 }
 0x20f   :  { %2330 = vst [vmem:[%s4478_s3 + $0xe8] sm:$0xff] %v2281_v29  ;;  %v2233_v12 = vmax.f32 %v1655_v42, %v2184_v9  ;;  %v1551_v22 = vadd.f32 %v4112_v59, %v1550_v51  ;;  %v2080_v1 = vadd.f32 %v4112_v59, %v2079_v35 }
 0x210   :  { %v3087_v7 = vpop.f32.mrf.mxu0  ;;  %v3191_v40 = vpop.f32.mrf.mxu1 }
 0x211   :  { %v2282_v34 = vmax.f32 %v3987_v26, %v2233_v12  ;;  %v1656_v47 = vmax.f32 %v1551_v22, 0.0  ;;  %v2185_v54 = vmax.f32 %v2080_v1, 0.0 }
 0x212   :  { %v1555_v5 = vpop.f32.mrf.mxu0  ;;  %v2084_v0 = vpop.f32.mrf.mxu1 }
 0x213   :  { %2331 = vst [vmem:[%s4478_s3 + $0xf0] sm:$0xff] %v2282_v34  ;;  %v2234_v58 = vmax.f32 %v1656_v47, %v2185_v54  ;;  %v1556_v49 = vadd.f32 %v4112_v59, %v1555_v5  ;;  %v2085_v50 = vadd.f32 %v4112_v59, %v2084_v0 }
 0x214   :  { %v3090_v45 = vpop.f32.mrf.mxu0  ;;  %v3194_v43 = vpop.f32.mrf.mxu1 }
 0x215   :  { %v2283_v8 = vmax.f32 %v3993_v41, %v2234_v58  ;;  %v1657_v10 = vmax.f32 %v1556_v49, 0.0  ;;  %v2186_v61 = vmax.f32 %v2085_v50, 0.0 }
 0x216   :  { %v1558_v26 = vpop.f32.mrf.mxu0  ;;  %v2087_v18 = vpop.f32.mrf.mxu1 }
 0x217   :  { %2332 = vst [vmem:[%s4478_s3 + $0xf8] sm:$0xff] %v2283_v8  ;;  %v2235_v55 = vmax.f32 %v1657_v10, %v2186_v61  ;;  %v1559_v11 = vadd.f32 %v4112_v59, %v1558_v26  ;;  %v2088_v46 = vadd.f32 %v4112_v59, %v2087_v18 }
 0x218   :  { %v3091_v62 = vpop.f32.mrf.mxu0  ;;  %v3195_v6 = vpop.f32.mrf.mxu1 }
 0x219   :  { %v2284_v23 = vmax.f32 %v4007_v2, %v2235_v55  ;;  %v1658_v19 = vmax.f32 %v1559_v11, 0.0  ;;  %v2187_v3 = vmax.f32 %v2088_v46, 0.0 }
 0x21a   :  { %v1563_v41 = vpop.f32.mrf.mxu0  ;;  %v2092_v17 = vpop.f32.mrf.mxu1 }
 0x21b   :  { %2333 = vst [vmem:[%s4478_s3 + $0x100] sm:$0xff] %v2284_v23  ;;  %v2236_v53 = vmax.f32 %v1658_v19, %v2187_v3  ;;  %v1564_v14 = vadd.f32 %v4112_v59, %v1563_v41  ;;  %v2093_v30 = vadd.f32 %v4112_v59, %v2092_v17 }
 0x21c   :  { %v3094_v31 = vpop.f32.mrf.mxu0  ;;  %v3198_v52 = vpop.f32.mrf.mxu1 }
 0x21d   :  { %v2285_v16 = vmax.f32 %v4013_v20, %v2236_v53  ;;  %v1659_v36 = vmax.f32 %v1564_v14, 0.0  ;;  %v2188_v21 = vmax.f32 %v2093_v30, 0.0  ;;  %v4415_v52 = vld [vmem:[%s4477_s2] ss:$0 sm:$0xff] }
 0x21e   :  { %v1566_v2 = vpop.f32.mrf.mxu0  ;;  %v2095_v15 = vpop.f32.mrf.mxu1 }
 0x21f   :  { %2334 = vst [vmem:[%s4478_s3 + $0x108] sm:$0xff] %v2285_v16  ;;  %v2237_v33 = vmax.f32 %v1659_v36, %v2188_v21  ;;  %v1567_v57 = vadd.f32 %v4112_v59, %v1566_v2  ;;  %v2096_v24 = vadd.f32 %v4112_v59, %v2095_v15 }
 0x220   :  { %v3095_v38 = vpop.f32.mrf.mxu0  ;;  %v3199_v60 = vpop.f32.mrf.mxu1 }
 0x221   :  { %v2286_v32 = vmax.f32 %v4027_v44, %v2237_v33  ;;  %v1660_v39 = vmax.f32 %v1567_v57, 0.0  ;;  %v2189_v29 = vmax.f32 %v2096_v24, 0.0 }
 0x222   :  { %v1571_v20 = vpop.f32.mrf.mxu0  ;;  %v2100_v42 = vpop.f32.mrf.mxu1 }
 0x223   :  { %2335 = vst [vmem:[%s4478_s3 + $0x110] sm:$0xff] %v2286_v32  ;;  %v2238_v9 = vmax.f32 %v1660_v39, %v2189_v29  ;;  %v1572_v51 = vadd.f32 %v4112_v59, %v1571_v20  ;;  %v2101_v35 = vadd.f32 %v4112_v59, %v2100_v42 }
 0x224   :  { %v3098_v12 = vpop.f32.mrf.mxu0  ;;  %v3202_v22 = vpop.f32.mrf.mxu1 }
 0x225   :  { %v2287_v1 = vmax.f32 %v4033_v63, %v2238_v9  ;;  %v1661_v7 = vmax.f32 %v1572_v51, 0.0  ;;  %v2190_v40 = vmax.f32 %v2101_v35, 0.0 }
 0x226   :  { %v1574_v44 = vpop.f32.mrf.mxu0  ;;  %v2103_v34 = vpop.f32.mrf.mxu1 }
 0x227   :  { %2336 = vst [vmem:[%s4478_s3 + $0x118] sm:$0xff] %v2287_v1  ;;  %v2239_v47 = vmax.f32 %v1661_v7, %v2190_v40  ;;  %v1575_v54 = vadd.f32 %v4112_v59, %v1574_v44  ;;  %v2104_v5 = vadd.f32 %v4112_v59, %v2103_v34 }
 0x228   :  { %v3099_v0 = vpop.f32.mrf.mxu0  ;;  %v3203_v58 = vpop.f32.mrf.mxu1 }
 0x229   :  { %v2288_v49 = vmax.f32 %v4047_v27, %v2239_v47  ;;  %v1662_v50 = vmax.f32 %v1575_v54, 0.0  ;;  %v2191_v45 = vmax.f32 %v2104_v5, 0.0 }
 0x22a   :  { %v1579_v63 = vpop.f32.mrf.mxu0  ;;  %v2108_v43 = vpop.f32.mrf.mxu1 }
 0x22b   :  { %2337 = vst [vmem:[%s4478_s3 + $0x120] sm:$0xff] %v2288_v49  ;;  %v2240_v8 = vmax.f32 %v1662_v50, %v2191_v45  ;;  %v1580_v10 = vadd.f32 %v4112_v59, %v1579_v63  ;;  %v2109_v61 = vadd.f32 %v4112_v59, %v2108_v43 }
 0x22c   :  { %v3102_v26 = vpop.f32.mrf.mxu0  ;;  %v3206_v18 = vpop.f32.mrf.mxu1 }
 0x22d   :  { %v2289_v55 = vmax.f32 %v4053_v48, %v2240_v8  ;;  %v1663_v11 = vmax.f32 %v1580_v10, 0.0  ;;  %v2192_v46 = vmax.f32 %v2109_v61, 0.0 }
 0x22e   :  { %v1582_v27 = vpop.f32.mrf.mxu0  ;;  %v2111_v62 = vpop.f32.mrf.mxu1 }
 0x22f   :  { %2338 = vst [vmem:[%s4478_s3 + $0x128] sm:$0xff] %v2289_v55  ;;  %v2241_v6 = vmax.f32 %v1663_v11, %v2192_v46  ;;  %v1583_v23 = vadd.f32 %v4112_v59, %v1582_v27  ;;  %v2112_v19 = vadd.f32 %v4112_v59, %v2111_v62 }
 0x230   :  { %v3103_v3 = vpop.f32.mrf.mxu0  ;;  %v3207_v41 = vpop.f32.mrf.mxu1 }
 0x231   :  { %v2290_v17 = vmax.f32 %v4067_v13, %v2241_v6  ;;  %v1664_v53 = vmax.f32 %v1583_v23, 0.0  ;;  %v2193_v14 = vmax.f32 %v2112_v19, 0.0  ;;  %v4487_v3 = vld [vmem:[#allocation2_spill] sm:$0xff] }
 0x232   :  { %v1587_v48 = vpop.f32.mrf.mxu0  ;;  %v2116_v30 = vpop.f32.mrf.mxu1 }
 0x233   :  { %2339 = vst [vmem:[%s4478_s3 + $0x130] sm:$0xff] %v2290_v17  ;;  %v2242_v31 = vmax.f32 %v1664_v53, %v2193_v14  ;;  %v1588_v59 = vadd.f32 %v4415_v52, %v1587_v48  ;;  %v2117_v16 = vadd.f32 %v4415_v52, %v2116_v30 }
 0x234   :  { %v3106_v36 = vpop.f32.mrf.mxu0  ;;  %v3210_v13 = vpop.f32.mrf.mxu1 }
 0x235   :  { %v2291_v21 = vmax.f32 %v4073_v37, %v2242_v31  ;;  %v1665_v2 = vmax.f32 %v1588_v59, 0.0  ;;  %v2194_v15 = vmax.f32 %v2117_v16, 0.0  ;;  %v4488_v36 = vld [vmem:[#allocation3_spill] sm:$0xff] }
 0x236   :  { %v1590_v33 = vpop.f32.mrf.mxu0  ;;  %v2119_v57 = vpop.f32.mrf.mxu1 }
 0x237   :  { %2340 = vst [vmem:[%s4478_s3 + $0x138] sm:$0xff] %v2291_v21  ;;  %v2243_v24 = vmax.f32 %v1665_v2, %v2194_v15  ;;  %v1591_v38 = vadd.f32 %v4415_v52, %v1590_v33  ;;  %v2120_v60 = vadd.f32 %v4415_v52, %v2119_v57 }
 0x238   :  { %v3107_v32 = vpop.f32.mrf.mxu0  ;;  %v3211_v39 = vpop.f32.mrf.mxu1 }
 0x239   :  { %v2292_v29 = vmax.f32 %v4087_v4, %v2243_v24  ;;  %v1666_v20 = vmax.f32 %v1591_v38, 0.0  ;;  %v2195_v42 = vmax.f32 %v2120_v60, 0.0  ;;  %v4489_v39 = vld [vmem:[#allocation4_spill] sm:$0xff] }
 0x23a   :  { %v1595_v37 = vpop.f32.mrf.mxu0  ;;  %v2124_v9 = vpop.f32.mrf.mxu1 }
 0x23b   :  { %2341 = vst [vmem:[%s4478_s3 + $0x140] sm:$0xff] %v2292_v29  ;;  %v2244_v51 = vmax.f32 %v1666_v20, %v2195_v42  ;;  %v1596_v35 = vadd.f32 %v4415_v52, %v1595_v37  ;;  %v2125_v12 = vadd.f32 %v4415_v52, %v2124_v9 }
 0x23c   :  { %v3110_v22 = vpop.f32.mrf.mxu0  ;;  %v3214_v1 = vpop.f32.mrf.mxu1 }
 0x23d   :  { %v2293_v7 = vmax.f32 %v4093_v28, %v2244_v51  ;;  %v1667_v40 = vmax.f32 %v1596_v35, 0.0  ;;  %v2196_v44 = vmax.f32 %v2125_v12, 0.0 }
 0x23e   :  { %v1598_v4 = vpop.f32.mrf.mxu0  ;;  %v2127_v34 = vpop.f32.mrf.mxu1 }
 0x23f   :  { %2342 = vst [vmem:[%s4478_s3 + $0x148] sm:$0xff] %v2293_v7  ;;  %v2245_v47 = vmax.f32 %v1667_v40, %v2196_v44  ;;  %v1599_v54 = vadd.f32 %v4415_v52, %v1598_v4  ;;  %v2128_v5 = vadd.f32 %v4415_v52, %v2127_v34  ;;  %v4490_v7 = vld [vmem:[#allocation5_spill] sm:$0xff] }
 0x240   :  { %v3111_v0 = vpop.f32.mrf.mxu0  ;;  %v3215_v58 = vpop.f32.mrf.mxu1 }
 0x241   :  { %v2294_v49 = vmax.f32 %v4107_v56, %v2245_v47  ;;  %v1668_v50 = vmax.f32 %v1599_v54, 0.0  ;;  %v2197_v45 = vmax.f32 %v2128_v5, 0.0  ;;  %v4491_v58 = vld [vmem:[#allocation6_spill] sm:$0xff] }
 0x242   :  { %v1603_v28 = vpop.f32.mrf.mxu0  ;;  %v2132_v63 = vpop.f32.mrf.mxu1 }
 0x243   :  { %2343 = vst [vmem:[%s4478_s3 + $0x150] sm:$0xff] %v2294_v49  ;;  %v2246_v43 = vmax.f32 %v1668_v50, %v2197_v45  ;;  %v1604_v8 = vadd.f32 %v4415_v52, %v1603_v28  ;;  %v2133_v10 = vadd.f32 %v4415_v52, %v2132_v63 }
 0x244   :  { %v3114_v61 = vpop.f32.mrf.mxu0  ;;  %v3218_v26 = vpop.f32.mrf.mxu1 }
 0x245   :  { %v2295_v18 = vmax.f32 %v4118_v25, %v2246_v43  ;;  %v1669_v55 = vmax.f32 %v1604_v8, 0.0  ;;  %v2198_v11 = vmax.f32 %v2133_v10, 0.0 }
 0x246   :  { %v1606_v56 = vpop.f32.mrf.mxu0  ;;  %v2135_v46 = vpop.f32.mrf.mxu1 }
 0x247   :  { %2344 = vst [vmem:[%s4478_s3 + $0x158] sm:$0xff] %v2295_v18  ;;  %v2247_v27 = vmax.f32 %v1669_v55, %v2198_v11  ;;  %v1607_v62 = vadd.f32 %v4415_v52, %v1606_v56  ;;  %v2136_v6 = vadd.f32 %v4415_v52, %v2135_v46 }
 0x248   :  { %v3115_v23 = vpop.f32.mrf.mxu0  ;;  %v3219_v19 = vpop.f32.mrf.mxu1 }
 0x249   :  { %v2296_v41 = vmax.f32 %v4487_v3, %v2247_v27  ;;  %v1670_v17 = vmax.f32 %v1607_v62, 0.0  ;;  %v2199_v53 = vmax.f32 %v2136_v6, 0.0 }
 0x24a   :  { %v1611_v25 = vpop.f32.mrf.mxu0  ;;  %v2140_v14 = vpop.f32.mrf.mxu1 }
 0x24b   :  { %2345 = vst [vmem:[%s4478_s3 + $0x160] sm:$0xff] %v2296_v41  ;;  %v2248_v48 = vmax.f32 %v1670_v17, %v2199_v53  ;;  %v1612_v30 = vadd.f32 %v4415_v52, %v1611_v25  ;;  %v2141_v31 = vadd.f32 %v4415_v52, %v2140_v14 }
 0x24c   :  { %v3118_v59 = vpop.f32.mrf.mxu0  ;;  %v3222_v16 = vpop.f32.mrf.mxu1 }
 0x24d   :  { %v2297_v13 = vmax.f32 %v4488_v36, %v2248_v48  ;;  %v1671_v21 = vmax.f32 %v1612_v30, 0.0  ;;  %v2200_v2 = vmax.f32 %v2141_v31, 0.0 }
 0x24e   :  { %v1614_v15 = vpop.f32.mrf.mxu0  ;;  %v2143_v33 = vpop.f32.mrf.mxu1 }
 0x24f   :  { %2346 = vst [vmem:[%s4478_s3 + $0x168] sm:$0xff] %v2297_v13  ;;  %v2249_v57 = vmax.f32 %v1671_v21, %v2200_v2  ;;  %v1615_v24 = vadd.f32 %v4415_v52, %v1614_v15  ;;  %v2144_v38 = vadd.f32 %v4415_v52, %v2143_v33 }
 0x250   :  { %v3119_v60 = vpop.f32.mrf.mxu0  ;;  %v3223_v32 = vpop.f32.mrf.mxu1 }
 0x251   :  { %v2298_v29 = vmax.f32 %v4489_v39, %v2249_v57  ;;  %v1672_v20 = vmax.f32 %v1615_v24, 0.0  ;;  %v2201_v42 = vmax.f32 %v2144_v38, 0.0 }
 0x252   :  { %v1619_v37 = vpop.f32.mrf.mxu0  ;;  %v2148_v9 = vpop.f32.mrf.mxu1 }
 0x253   :  { %2347 = vst [vmem:[%s4478_s3 + $0x170] sm:$0xff] %v2298_v29  ;;  %v2250_v51 = vmax.f32 %v1672_v20, %v2201_v42  ;;  %v1620_v35 = vadd.f32 %v4415_v52, %v1619_v37  ;;  %v2149_v12 = vadd.f32 %v4415_v52, %v2148_v9 }
 0x254   :  { %v3122_v22 = vpop.f32.mrf.mxu0  ;;  %v3226_v1 = vpop.f32.mrf.mxu1 }
 0x255   :  { %v2299_v40 = vmax.f32 %v4490_v7, %v2250_v51  ;;  %v1673_v44 = vmax.f32 %v1620_v35, 0.0  ;;  %v2202_v4 = vmax.f32 %v2149_v12, 0.0 }
 0x256   :  { %v1622_v34 = vpop.f32.mrf.mxu0  ;;  %v2151_v47 = vpop.f32.mrf.mxu1 }
 0x257   :  { %2348 = vst [vmem:[%s4478_s3 + $0x178] sm:$0xff] %v2299_v40  ;;  %v2251_v54 = vmax.f32 %v1673_v44, %v2202_v4 }
 0x258   :  { %v3123_v5 = vpop.f32.mrf.mxu0  ;;  %v3227_v0 = vpop.f32.mrf.mxu1 }
 0x259   :  { %v2300_v49 = vmax.f32 %v4491_v58, %v2251_v54 }
 0x25b   :  { %2349 = vst [vmem:[%s4478_s3 + $0x180] sm:$0xff] %v2300_v49 }

// kernel: lenet5_forward.4
= control target key start
LH: loop header
LB: loop body
LE: loop exit
PB: predicated region body
PF: predicated region fallthrough
CT: control target
= control target key end

     0   :  { %vm579_vm0 = vcmask 261120   ;;  %s4251_s1 = inlined_call_operand.vmem [shape: bf16[800,128], index: 1, kind: input, shape index: {}]   ;;  %s4252_s0 = inlined_call_operand.vmem [shape: bf16[2,2,56,800], index: 0, kind: input, shape index: {}]   ;;  %s4253_s2 = inlined_call_operand.vmem [shape: f32[1,128], index: 2, kind: input, shape index: {}]   ;;  %s4254_s3 = inlined_call_operand.vmem [shape: f32[56,128], index: 3, kind: output, shape index: {}]  }
   0x1   :  { %v3265_v0 = vld [vmem:[%s4251_s1 + $0x78] sm:$0xff]   ;;  %v3288_v4 = vld [vmem:[%s4251_s1 + $0x70] sm:$0xff]   ;;  %v3312_v8 = vld [vmem:[%s4251_s1 + $0x68] sm:$0xff]  }
   0x2   :  { %v3270_v1 = vld [vmem:[%s4251_s1 + $0xf8] sm:$0xff]   ;;  %2449 = vmatprep.subr.bf16.mxu0 %v3265_v0  ;;  %v3294_v5 = vld [vmem:[%s4251_s1 + $0xf0] sm:$0xff]   ;;  %v3318_v9 = vld [vmem:[%s4251_s1 + $0xe8] sm:$0xff]  }
   0x3   :  { %v3276_v2 = vld [vmem:[%s4251_s1 + $0x38] sm:$0xff]   ;;  %2489 = vmatprep.subr.bf16.mxu1 %v3270_v1  ;;  %v3300_v6 = vld [vmem:[%s4251_s1 + $0x30] sm:$0xff]   ;;  %v3324_v10 = vld [vmem:[%s4251_s1 + $0x28] sm:$0xff]  }
   0x4   :  { %v3282_v3 = vld [vmem:[%s4251_s1 + $0xb8] sm:$0xff]   ;;  %2450 = vmatpush3.bf16.msra.mxu0 %v3276_v2  ;;  %v3306_v7 = vld [vmem:[%s4251_s1 + $0xb0] sm:$0xff]   ;;  %v3330_v11 = vld [vmem:[%s4251_s1 + $0xa8] sm:$0xff]  }
   0x5   :  { %2490 = vmatpush3.bf16.msra.mxu1 %v3282_v3  ;;  %2451 = vmatprep.subr.bf16.mxu0 %v3288_v4  ;;  %v3336_v12 = vld [vmem:[%s4251_s1 + $0x60] sm:$0xff]   ;;  %v3360_v16 = vld [vmem:[%s4251_s1 + $0x58] sm:$0xff]   ;;  %v3384_v20 = vld [vmem:[%s4251_s1 + $0x50] sm:$0xff]  }
   0x6   :  { %2491 = vmatprep.subr.bf16.mxu1 %v3294_v5  ;;  %v3342_v13 = vld [vmem:[%s4251_s1 + $0xe0] sm:$0xff]   ;;  %v3366_v17 = vld [vmem:[%s4251_s1 + $0xd8] sm:$0xff]   ;;  %v3390_v21 = vld [vmem:[%s4251_s1 + $0xd0] sm:$0xff]  }
   0x7   :  { %v3348_v14 = vld [vmem:[%s4251_s1 + $0x20] sm:$0xff]   ;;  %v3372_v18 = vld [vmem:[%s4251_s1 + $0x18] sm:$0xff]   ;;  %v3396_v22 = vld [vmem:[%s4251_s1 + $0x10] sm:$0xff]  }
   0x8   :  { %2452 = vmatpush3.bf16.msra.mxu0 %v3300_v6  ;;  %v3354_v15 = vld [vmem:[%s4251_s1 + $0xa0] sm:$0xff]   ;;  %v3378_v19 = vld [vmem:[%s4251_s1 + $0x98] sm:$0xff]   ;;  %v3402_v23 = vld [vmem:[%s4251_s1 + $0x90] sm:$0xff]  }
   0x9   :  { %2492 = vmatpush3.bf16.msra.mxu1 %v3306_v7  ;;  %2453 = vmatprep.subr.bf16.mxu0 %v3312_v8  ;;  %v3408_v24 = vld [vmem:[%s4251_s1 + $0x48] sm:$0xff]   ;;  %v3432_v28 = vld [vmem:[%s4251_s1 + $0x40] sm:$0xff]   ;;  %v3469_v36 = vld [vmem:[%s4251_s1 + $0x178] sm:$0xff]  }
   0xa   :  { %2493 = vmatprep.subr.bf16.mxu1 %v3318_v9  ;;  %v3414_v25 = vld [vmem:[%s4251_s1 + $0xc8] sm:$0xff]   ;;  %v3438_v29 = vld [vmem:[%s4251_s1 + $0xc0] sm:$0xff]   ;;  %v3474_v37 = vld [vmem:[%s4251_s1 + $0x138] sm:$0xff]  }
   0xb   :  { %v3420_v26 = vld [vmem:[%s4251_s1 + $0x8] sm:$0xff]   ;;  %v3444_v30 = vld [vmem:[%s4251_s1] sm:$0xff]   ;;  %v3480_v38 = vld [vmem:[%s4251_s1 + $0x170] sm:$0xff]  }
   0xc   :  { %2454 = vmatpush3.bf16.msra.mxu0 %v3324_v10  ;;  %v3426_v27 = vld [vmem:[%s4251_s1 + $0x88] sm:$0xff]   ;;  %v3450_v31 = vld [vmem:[%s4251_s1 + $0x80] sm:$0xff]   ;;  %v3486_v39 = vld [vmem:[%s4251_s1 + $0x130] sm:$0xff]  }
   0xd   :  { %2494 = vmatpush3.bf16.msra.mxu1 %v3330_v11  ;;  %2455 = vmatprep.subr.bf16.mxu0 %v3336_v12  ;;  %v3049_v32 = vld [vmem:[%s4252_s0] ss:$28 sps:$4 sm:$0xff]   ;;  %v3052_v34 = vld [vmem:[%s4252_s0 + $0x8] ss:$28 sps:$4 sm:$0xff]   ;;  %v3064_v43 = vld [vmem:[%s4252_s0 + $0x38] ss:$28 sps:$4 sm:$0xff]  }
   0xe   :  { %2495 = vmatprep.subr.bf16.mxu1 %v3342_v13  ;;  %v3051_v33 = vld [vmem:[%s4252_s0 + $0x4] ss:$28 sps:$4 sm:$0xff]   ;;  %v3054_v35 = vld [vmem:[%s4252_s0 + $0xc] ss:$28 sps:$4 sm:$0xff]   ;;  %v3059_v40 = vld [vmem:[%s4252_s0 + $0x3c] ss:$28 sps:$4 sm:$0xff]  }
   0xf   :  { %624 = vmatprep.mubr.bf16.mxu0 %v3051_v33  ;;  %688 = vmatprep.mubr.bf16.mxu1 %v3054_v35  ;;  %v3061_v41 = vld [vmem:[%s4252_s0 + $0x44] ss:$28 sps:$4 sm:$0xff]   ;;  %v3498_v42 = vld [vmem:[%s4251_s1 + $0x188] sm:$0xff]   ;;  %v3070_v49 = vld [vmem:[%s4252_s0 + $0x74] ss:$28 sps:$4 sm:$0xff]  }
  0x10   :  { %2456 = vmatpush3.bf16.msra.mxu0 %v3348_v14  ;;  %v3065_v44 = vld [vmem:[%s4252_s0 + $0x40] ss:$28 sps:$4 sm:$0xff]   ;;  %v3511_v45 = vld [vmem:[%s4251_s1 + $0x168] sm:$0xff]   ;;  %v3075_v52 = vld [vmem:[%s4252_s0 + $0x78] ss:$28 sps:$4 sm:$0xff]  }
  0x11   :  { %2496 = vmatpush3.bf16.msra.mxu1 %v3354_v15  ;;  %2457 = vmatprep.subr.bf16.mxu0 %v3360_v16  ;;  %v3517_v46 = vld [vmem:[%s4251_s1 + $0x128] sm:$0xff]   ;;  %v3523_v47 = vld [vmem:[%s4251_s1 + $0x160] sm:$0xff]   ;;  %v3072_v50 = vld [vmem:[%s4252_s0 + $0x7c] ss:$28 sps:$4 sm:$0xff]  }
  0x12   :  { %2497 = vmatprep.subr.bf16.mxu1 %v3366_v17  ;;  %v3529_v48 = vld [vmem:[%s4251_s1 + $0x120] sm:$0xff]   ;;  %v3074_v51 = vld [vmem:[%s4252_s0 + $0x70] ss:$28 sps:$4 sm:$0xff]   ;;  %v3547_v53 = vld [vmem:[%s4251_s1 + $0x158] sm:$0xff]  }
  0x13   :  { %v3553_v54 = vld [vmem:[%s4251_s1 + $0x118] sm:$0xff]   ;;  %v3559_v55 = vld [vmem:[%s4251_s1 + $0x150] sm:$0xff]   ;;  %v140_v57 = vld [vmem:[%s4252_s0 + $0xa8] sm:$0xff] }
  0x14   :  { %2458 = vmatpush3.bf16.msra.mxu0 %v3372_v18  ;;  %v3564_v56 = vld [vmem:[%s4251_s1 + $0x110] sm:$0xff]   ;;  %v2209_v59 = vcombine.high %v140_v57, %v140_v57  ;;  %v3576_v61 = vld [vmem:[%s4251_s1 + $0x180] sm:$0xff]   ;;  %v3582_v62 = vld [vmem:[%s4251_s1 + $0x148] sm:$0xff]   ;;  %v2208_v63 = vcombine.low %v140_v57, %v140_v57 }
  0x15   :  { %2498 = vmatpush3.bf16.msra.mxu1 %v3378_v19  ;;  %2459 = vmatprep.subr.bf16.mxu0 %v3384_v20  ;;  %v141_v58 = vld [vmem:[%s4252_s0 + $0xb0] sm:$0xff]  ;;  %v3590_v33 = vld [vmem:[%s4251_s1 + $0x108] sm:$0xff]   ;;  %v3097_v57 = vld [vmem:[%s4252_s0 + $0x84] ss:$28 sps:$4 sm:$0xff]  }
  0x16   :  { %2499 = vmatprep.subr.bf16.mxu1 %v3390_v21  ;;  %v2211_v60 = vcombine.high %v141_v58, %v141_v58  ;;  %v3091_v35 = vld [vmem:[%s4252_s0 + $0x14] ss:$28 sps:$4 sm:$0xff]  }
  0x18   :  { %2460 = vmatpush3.bf16.msra.mxu0 %v3396_v22 }
  0x19   :  { %2500 = vmatpush3.bf16.msra.mxu1 %v3402_v23  ;;  %2461 = vmatprep.subr.bf16.mxu0 %v3408_v24 }
  0x1a   :  { %2501 = vmatprep.subr.bf16.mxu1 %v3414_v25 }
  0x1c   :  { %2462 = vmatpush3.bf16.msra.mxu0 %v3420_v26 }
  0x1d   :  { %2502 = vmatpush3.bf16.msra.mxu1 %v3426_v27  ;;  %2463 = vmatprep.subr.bf16.mxu0 %v3432_v28 }
  0x1e   :  { %2503 = vmatprep.subr.bf16.mxu1 %v3438_v29 }
  0x20   :  { %2464 = vmatpush3.bf16.msra.mxu0 %v3444_v30 }
  0x21   :  { %2504 = vmatpush3.bf16.msra.mxu1 %v3450_v31  ;;  %2529 = vmatprep.subr.bf16.mxu0 %v3469_v36 }
  0x22   :  { %2953 = vmatprep.subr.bf16.mxu1 %v3498_v42 }
  0x23   :  { %625 = vmatmul.mubr.bf16.vlgmr.msra.gmra.mxu0 %v3049_v32  ;;  %v2210_v32 = vcombine.low %v141_v58, %v141_v58  ;;  %v3106_v58 = vld [vmem:[%s4252_s0 + $0xd0] ss:$28 sps:$4 sm:$0xff]  }
  0x24   :  { %689 = vmatmul.mubr.bf16.vlgmr.msra.gmra.mxu1 %v3052_v34  ;;  %2530 = vmatpush3.bf16.msra.mxu0 %v3474_v37  ;;  %v3596_v34 = vld [vmem:[%s4251_s1 + $0x140] sm:$0xff]  }
  0x25   :  { %2531 = vmatprep.subr.bf16.mxu0 %v3480_v38  ;;  %632 = vmatprep.mubr.bf16.mxu0 %v3059_v40  ;;  %v3092_v40 = vld [vmem:[%s4252_s0 + $0x18] ss:$28 sps:$4 sm:$0xff]  }
  0x26   :  { %696 = vmatprep.mubr.bf16.mxu1 %v3061_v41  ;;  %2954 = vmatpush3.bf16.msra.mxu1 %v3498_v42  ;;  %v3609_v41 = vld [vmem:[%s4251_s1 + $0x100] sm:$0xff]  }
  0x27   :  { %2955 = vmatprep.subr.bf16.mxu1 %v3576_v61 }
  0x28   :  { %2532 = vmatpush3.bf16.msra.mxu0 %v3486_v39 }
  0x29   :  { %2533 = vmatprep.subr.bf16.mxu0 %v3511_v45 }
  0x2a   :  { %2956 = vmatpush3.bf16.msra.mxu1 %v3576_v61 }
  0x2b   :  { %633 = vmatmul.mubr.bf16.gmra.mxu0 %v3064_v43  ;;  %2615 = vmatprep.subr.bf16.mxu1 %v3270_v1  ;;  %v3089_v43 = vld [vmem:[%s4252_s0 + $0x10] ss:$28 sps:$4 sm:$0xff]  }
  0x2c   :  { %697 = vmatmul.mubr.bf16.gmra.mxu1 %v3065_v44  ;;  %2534 = vmatpush3.bf16.msra.mxu0 %v3517_v46  ;;  %v3093_v44 = vld [vmem:[%s4252_s0 + $0x50] ss:$28 sps:$4 sm:$0xff]  }
  0x2d   :  { %2535 = vmatprep.subr.bf16.mxu0 %v3523_v47  ;;  %640 = vmatprep.mubr.bf16.mxu0 %v3070_v49  ;;  %v3094_v49 = vld [vmem:[%s4252_s0 + $0x4c] ss:$28 sps:$4 sm:$0xff]  }
  0x2e   :  { %704 = vmatprep.mubr.bf16.mxu1 %v3072_v50  ;;  %v3100_v50 = vld [vmem:[%s4252_s0 + $0x88] ss:$28 sps:$4 sm:$0xff]  }
  0x30   :  { %2536 = vmatpush3.bf16.msra.mxu0 %v3529_v48 }
  0x31   :  { %2537 = vmatprep.subr.bf16.mxu0 %v3547_v53 }
  0x33   :  { %641 = vmatmul.mubr.bf16.gmra.mxu0 %v3074_v51  ;;  %v3096_v51 = vld [vmem:[%s4252_s0 + $0x48] ss:$28 sps:$4 sm:$0xff]  }
  0x34   :  { %705 = vmatmul.mubr.bf16.gmra.mxu1 %v3075_v52  ;;  %2538 = vmatpush3.bf16.msra.mxu0 %v3553_v54  ;;  %v3101_v52 = vld [vmem:[%s4252_s0 + $0xc0] ss:$0 sps:$4 sm:$0xff]  }
  0x35   :  { %2539 = vmatprep.subr.bf16.mxu0 %v3559_v55  ;;  %648 = vmatprep.mubr.bf16.mxu0 %v2209_v59  ;;  %v3099_v59 = vld [vmem:[%s4252_s0 + $0x80] ss:$28 sps:$4 sm:$0xff]  }
  0x36   :  { %712 = vmatprep.mubr.bf16.mxu1 %v2211_v60  ;;  %v142_v60 = vld [vmem:[%s4252_s0 + $0xb8] sm:$0xff] }
  0x38   :  { %2540 = vmatpush3.bf16.msra.mxu0 %v3564_v56 }
  0x39   :  { %2541 = vmatprep.subr.bf16.mxu0 %v3582_v62 }
  0x3b   :  { %649 = vmatmul.mubr.bf16.gmra.mxu0 %v2208_v63  ;;  %v2213_v63 = vcombine.high %v142_v60, %v142_v60 }
  0x3c   :  { %713 = vmatmul.mubr.bf16.gmra.mxu1 %v2210_v32  ;;  %752 = vmatprep.mubr.bf16.mxu0 %v3091_v35  ;;  %v2212_v32 = vcombine.low %v142_v60, %v142_v60  ;;  %v3109_v35 = vld [vmem:[%s4252_s0 + $0xc8] ss:$28 sps:$4 sm:$0xff]   ;;  %v3120_v60 = vld [vmem:[%s4252_s0 + $0x13c] ss:$28 sps:$4 sm:$0xff]  }
  0x3d   :  { %2542 = vmatpush3.bf16.msra.mxu0 %v3590_v33  ;;  %2957 = vmatprep.mubr.msk.bf16.mxu1 %vm579_vm0, %v3092_v40  ;;  %v3104_v40 = vld [vmem:[%s4252_s0 + $0xcc] ss:$28 sps:$4 sm:$0xff]  }
  0x3e   :  { %2543 = vmatprep.subr.bf16.mxu0 %v3596_v34 }
  0x41   :  { %2544 = vmatpush3.bf16.msra.mxu0 %v3609_v41 }
  0x42   :  { %2575 = vmatprep.subr.bf16.mxu0 %v3265_v0 }
  0x44   :  { %753 = vmatmul.mubr.bf16.vlgmr.msra.gmra.mxu0 %v3089_v43  ;;  %2958 = vmatmul.mubr.msk.bf16.vlgmr.msra.gmra.mxu1 %vm579_vm0, %v3093_v44  ;;  %v3107_v43 = vld [vmem:[%s4252_s0 + $0xc4] ss:$28 sps:$4 sm:$0xff]  }
  0x45   :  { %2616 = vmatpush3.bf16.msra.mxu1 %v3282_v3  ;;  %2576 = vmatpush3.bf16.msra.mxu0 %v3276_v2  ;;  %v3110_v44 = vld [vmem:[%s4252_s0 + $0x108] ss:$28 sps:$4 sm:$0xff]  }
  0x46   :  { %2617 = vmatprep.subr.bf16.mxu1 %v3294_v5  ;;  %2577 = vmatprep.subr.bf16.mxu0 %v3288_v4 }
  0x47   :  { %760 = vmatprep.mubr.bf16.mxu0 %v3094_v49  ;;  %2961 = vmatprep.mubr.msk.bf16.mxu1 %vm579_vm0, %v3100_v50  ;;  %v3112_v49 = vld [vmem:[%s4252_s0 + $0x100] ss:$28 sps:$4 sm:$0xff]  }
  0x48   :  { %v3114_v50 = vld [vmem:[%s4252_s0 + $0x104] ss:$28 sps:$4 sm:$0xff]  }
  0x49   :  { %2618 = vmatpush3.bf16.msra.mxu1 %v3306_v7  ;;  %2578 = vmatpush3.bf16.msra.mxu0 %v3300_v6 }
  0x4a   :  { %2619 = vmatprep.subr.bf16.mxu1 %v3318_v9  ;;  %2579 = vmatprep.subr.bf16.mxu0 %v3312_v8 }
  0x4c   :  { %761 = vmatmul.mubr.bf16.gmra.mxu0 %v3096_v51  ;;  %2962 = vmatmul.mubr.msk.bf16.gmra.mxu1 %vm579_vm0, %v3101_v52  ;;  %v3115_v51 = vld [vmem:[%s4252_s0 + $0xfc] ss:$28 sps:$4 sm:$0xff]  }
  0x4d   :  { %2620 = vmatpush3.bf16.msra.mxu1 %v3330_v11  ;;  %2580 = vmatpush3.bf16.msra.mxu0 %v3324_v10  ;;  %v3116_v52 = vld [vmem:[%s4252_s0 + $0x140] ss:$28 sps:$4 sm:$0xff]  }
  0x4e   :  { %2621 = vmatprep.subr.bf16.mxu1 %v3342_v13  ;;  %2581 = vmatprep.subr.bf16.mxu0 %v3336_v12 }
  0x4f   :  { %768 = vmatprep.mubr.bf16.mxu0 %v3097_v57  ;;  %1121 = vmatprep.mubr.bf16.mxu1 %v3106_v58  ;;  %v3118_v57 = vld [vmem:[%s4252_s0 + $0x138] ss:$28 sps:$4 sm:$0xff]  }
  0x50   :  { %v2294_v58 = vld [vmem:[%s4252_s0 + $0x174] sm:$0xff] }
  0x51   :  { %2622 = vmatpush3.bf16.msra.mxu1 %v3354_v15  ;;  %2582 = vmatpush3.bf16.msra.mxu0 %v3348_v14 }
  0x52   :  { %2623 = vmatprep.subr.bf16.mxu1 %v3366_v17  ;;  %2583 = vmatprep.subr.bf16.mxu0 %v3360_v16 }
  0x54   :  { %769 = vmatmul.mubr.bf16.gmra.mxu0 %v3099_v59  ;;  %v2293_v59 = vld [vmem:[%s4252_s0 + $0x16c] sm:$0xff] }
  0x55   :  { %2624 = vmatpush3.bf16.msra.mxu1 %v3378_v19  ;;  %2584 = vmatpush3.bf16.msra.mxu0 %v3372_v18 }
  0x56   :  { %2625 = vmatprep.subr.bf16.mxu1 %v3390_v21  ;;  %2585 = vmatprep.subr.bf16.mxu0 %v3384_v20 }
  0x57   :  { %776 = vmatprep.mubr.bf16.mxu0 %v2213_v63  ;;  %v3121_v63 = vld [vmem:[%s4252_s0 + $0x134] ss:$28 sps:$4 sm:$0xff]  }
  0x59   :  { %2626 = vmatpush3.bf16.msra.mxu1 %v3402_v23  ;;  %2586 = vmatpush3.bf16.msra.mxu0 %v3396_v22 }
  0x5a   :  { %2627 = vmatprep.subr.bf16.mxu1 %v3414_v25  ;;  %2587 = vmatprep.subr.bf16.mxu0 %v3408_v24 }
  0x5c   :  { %777 = vmatmul.mubr.bf16.gmra.mxu0 %v2212_v32  ;;  %v2321_v32 = vcombine.high %v2294_v58, %v2294_v58 }
  0x5d   :  { %2628 = vmatpush3.bf16.msra.mxu1 %v3426_v27  ;;  %2588 = vmatpush3.bf16.msra.mxu0 %v3420_v26 }
  0x5e   :  { %2629 = vmatprep.subr.bf16.mxu1 %v3438_v29  ;;  %2589 = vmatprep.subr.bf16.mxu0 %v3432_v28 }
  0x5f   :  { %1057 = vmatprep.mubr.bf16.mxu0 %v3109_v35  ;;  %v2319_v35 = vcombine.high %v2293_v59, %v2293_v59 }
  0x61   :  { %2630 = vmatpush3.bf16.msra.mxu1 %v3450_v31  ;;  %2590 = vmatpush3.bf16.msra.mxu0 %v3444_v30 }
  0x62   :  { %2655 = vmatprep.subr.bf16.mxu0 %v3469_v36  ;;  %2965 = vmatprep.subr.bf16.mxu1 %v3498_v42 }
  0x64   :  { %1122 = vmatmul.mubr.bf16.vlgmr.msra.gmra.mxu1 %v3104_v40  ;;  %1058 = vmatmul.mubr.bf16.vlgmr.msra.gmra.mxu0 %v3107_v43  ;;  %v2318_v40 = vcombine.low %v2293_v59, %v2293_v59  ;;  %v3126_v43 = vld [vmem:[%s4252_s0 + $0xdc] ss:$28 sps:$4 sm:$0xff]  }
  0x65   :  { %2656 = vmatpush3.bf16.msra.mxu0 %v3474_v37  ;;  %1129 = vmatprep.mubr.bf16.mxu1 %v3110_v44  ;;  %v3129_v44 = vld [vmem:[%s4252_s0 + $0xd8] ss:$28 sps:$4 sm:$0xff]  }
  0x66   :  { %2657 = vmatprep.subr.bf16.mxu0 %v3480_v38  ;;  %1065 = vmatprep.mubr.bf16.mxu0 %v3112_v49  ;;  %v3127_v49 = vld [vmem:[%s4252_s0 + $0xd4] ss:$28 sps:$4 sm:$0xff]  }
  0x67   :  { %2966 = vmatpush3.bf16.msra.mxu1 %v3498_v42  ;;  %v3164_v59 = vld [vmem:[%s4252_s0 + $0x1d8] ss:$28 sps:$4 sm:$0xff]  }
  0x68   :  { %2967 = vmatprep.subr.bf16.mxu1 %v3576_v61 }
  0x69   :  { %2658 = vmatpush3.bf16.msra.mxu0 %v3486_v39 }
  0x6a   :  { %2659 = vmatprep.subr.bf16.mxu0 %v3511_v45 }
  0x6b   :  { %2968 = vmatpush3.bf16.msra.mxu1 %v3576_v61 }
  0x6c   :  { %1130 = vmatmul.mubr.bf16.gmra.mxu1 %v3114_v50  ;;  %1066 = vmatmul.mubr.bf16.gmra.mxu0 %v3115_v51  ;;  %v3130_v50 = vld [vmem:[%s4252_s0 + $0x114] ss:$28 sps:$4 sm:$0xff]  }
  0x6d   :  { %2660 = vmatpush3.bf16.msra.mxu0 %v3517_v46  ;;  %1137 = vmatprep.mubr.bf16.mxu1 %v3116_v52  ;;  %v3131_v51 = vld [vmem:[%s4252_s0 + $0x110] ss:$28 sps:$4 sm:$0xff]  }
  0x6e   :  { %2661 = vmatprep.subr.bf16.mxu0 %v3523_v47  ;;  %1073 = vmatprep.mubr.bf16.mxu0 %v3118_v57  ;;  %v3137_v52 = vld [vmem:[%s4252_s0 + $0x14c] ss:$28 sps:$4 sm:$0xff]   ;;  %v3138_v57 = vld [vmem:[%s4252_s0 + $0x184] ss:$0 sps:$4 sm:$0xff]  }
  0x6f   :  { %2741 = vmatprep.subr.bf16.mxu1 %v3270_v1  ;;  %v2320_v1 = vcombine.low %v2294_v58, %v2294_v58  ;;  %v3167_v58 = vld [vmem:[%s4252_s0 + $0x19c] ss:$28 sps:$4 sm:$0xff]  }
  0x71   :  { %2662 = vmatpush3.bf16.msra.mxu0 %v3529_v48 }
  0x72   :  { %2663 = vmatprep.subr.bf16.mxu0 %v3547_v53 }
  0x74   :  { %1138 = vmatmul.mubr.bf16.gmra.mxu1 %v3120_v60  ;;  %1074 = vmatmul.mubr.bf16.gmra.mxu0 %v3121_v63  ;;  %v3165_v60 = vld [vmem:[%s4252_s0 + $0x198] ss:$28 sps:$4 sm:$0xff]  }
  0x75   :  { %2664 = vmatpush3.bf16.msra.mxu0 %v3553_v54  ;;  %1145 = vmatprep.mubr.bf16.mxu1 %v2321_v32  ;;  %v3216_v63 = vld [vmem:[%s4251_s1 + $0x78] sm:$0xff]   ;;  %v3168_v32 = vld [vmem:[%s4252_s0 + $0x1d4] ss:$28 sps:$4 sm:$0xff]  }
  0x76   :  { %2665 = vmatprep.subr.bf16.mxu0 %v3559_v55  ;;  %1081 = vmatprep.mubr.bf16.mxu0 %v2319_v35  ;;  %v3174_v35 = vld [vmem:[%s4252_s0 + $0x210] ss:$28 sps:$4 sm:$0xff]  }
  0x79   :  { %2666 = vmatpush3.bf16.msra.mxu0 %v3564_v56 }
  0x7a   :  { %2667 = vmatprep.subr.bf16.mxu0 %v3582_v62 }
  0x7c   :  { %1146 = vmatmul.mubr.bf16.gmra.mxu1 %v2320_v1  ;;  %1082 = vmatmul.mubr.bf16.gmra.mxu0 %v2318_v40  ;;  %v3217_v1 = vld [vmem:[%s4251_s1 + $0xb8] sm:$0xff]  }
  0x7d   :  { %2668 = vmatpush3.bf16.msra.mxu0 %v3590_v33  ;;  %2969 = vmatprep.mubr.msk.bf16.mxu1 %vm579_vm0, %v3126_v43  ;;  %v3218_v40 = vld [vmem:[%s4251_s1 + $0x38] sm:$0xff]   ;;  %v3219_v43 = vld [vmem:[%s4251_s1 + $0xf0] sm:$0xff]  }
  0x7e   :  { %2669 = vmatprep.subr.bf16.mxu0 %v3596_v34  ;;  %1185 = vmatprep.mubr.bf16.mxu0 %v3129_v44  ;;  %v3220_v44 = vld [vmem:[%s4251_s1 + $0x70] sm:$0xff]  }
  0x81   :  { %2670 = vmatpush3.bf16.msra.mxu0 %v3609_v41 }
  0x82   :  { %2701 = vmatprep.subr.bf16.mxu0 %v3265_v0  ;;  %v3133_v0 = vld [vmem:[%s4252_s0 + $0x10c] ss:$28 sps:$4 sm:$0xff]  }
  0x84   :  { %2970 = vmatmul.mubr.msk.bf16.vlgmr.msra.gmra.mxu1 %vm579_vm0, %v3130_v50  ;;  %1186 = vmatmul.mubr.bf16.vlgmr.msra.gmra.mxu0 %v3127_v49  ;;  %v3170_v49 = vld [vmem:[%s4252_s0 + $0x1d0] ss:$28 sps:$4 sm:$0xff]   ;;  %v3175_v50 = vld [vmem:[%s4252_s0 + $0x248] ss:$0 sps:$4 sm:$0xff]  }
  0x85   :  { %2742 = vmatpush3.bf16.msra.mxu1 %v3282_v3  ;;  %2702 = vmatpush3.bf16.msra.mxu0 %v3276_v2  ;;  %v3134_v2 = vld [vmem:[%s4252_s0 + $0x148] ss:$28 sps:$4 sm:$0xff]   ;;  %v3143_v3 = vld [vmem:[%s4252_s0 + $0x194] ss:$28 sps:$4 sm:$0xff]  }
  0x86   :  { %2743 = vmatprep.subr.bf16.mxu1 %v3294_v5  ;;  %2703 = vmatprep.subr.bf16.mxu0 %v3288_v4  ;;  %v3136_v4 = vld [vmem:[%s4252_s0 + $0x144] ss:$28 sps:$4 sm:$0xff]  }
  0x87   :  { %1193 = vmatprep.mubr.bf16.mxu0 %v3131_v51  ;;  %2973 = vmatprep.mubr.msk.bf16.mxu1 %vm579_vm0, %v3137_v52  ;;  %v2295_v5 = vld [vmem:[%s4252_s0 + $0x17c] sm:$0xff]  ;;  %v3221_v51 = vld [vmem:[%s4251_s1 + $0xb0] sm:$0xff]  }
  0x88   :  { %v3222_v52 = vld [vmem:[%s4251_s1 + $0x30] sm:$0xff]  }
  0x89   :  { %2744 = vmatpush3.bf16.msra.mxu1 %v3306_v7  ;;  %2704 = vmatpush3.bf16.msra.mxu0 %v3300_v6  ;;  %v2323_v6 = vcombine.high %v2295_v5, %v2295_v5  ;;  %v2322_v7 = vcombine.low %v2295_v5, %v2295_v5  ;;  %v3226_v5 = vld [vmem:[%s4251_s1 + $0x28] sm:$0xff]  }
  0x8a   :  { %2745 = vmatprep.subr.bf16.mxu1 %v3318_v9  ;;  %2705 = vmatprep.subr.bf16.mxu0 %v3312_v8  ;;  %v3146_v8 = vld [vmem:[%s4252_s0 + $0x18c] ss:$28 sps:$4 sm:$0xff]  }
  0x8b   :  { %v3141_v9 = vld [vmem:[%s4252_s0 + $0x190] ss:$28 sps:$4 sm:$0xff]  }
  0x8c   :  { %1194 = vmatmul.mubr.bf16.gmra.mxu0 %v3133_v0  ;;  %2974 = vmatmul.mubr.msk.bf16.gmra.mxu1 %vm579_vm0, %v3138_v57  ;;  %v3223_v0 = vld [vmem:[%s4251_s1 + $0xe8] sm:$0xff]  }
  0x8d   :  { %2746 = vmatpush3.bf16.msra.mxu1 %v3330_v11  ;;  %2706 = vmatpush3.bf16.msra.mxu0 %v3324_v10  ;;  %v3144_v10 = vld [vmem:[%s4252_s0 + $0x188] ss:$28 sps:$4 sm:$0xff]  }
  0x8e   :  { %2747 = vmatprep.subr.bf16.mxu1 %v3342_v13  ;;  %2707 = vmatprep.subr.bf16.mxu0 %v3336_v12  ;;  %v3147_v11 = vld [vmem:[%s4252_s0 + $0x1cc] ss:$28 sps:$4 sm:$0xff]   ;;  %v3150_v12 = vld [vmem:[%s4252_s0 + $0x1c4] ss:$28 sps:$4 sm:$0xff]  }
  0x8f   :  { %1201 = vmatprep.mubr.bf16.mxu0 %v3134_v2  ;;  %1561 = vmatprep.mubr.bf16.mxu1 %v3143_v3  ;;  %v3149_v13 = vld [vmem:[%s4252_s0 + $0x1c8] ss:$28 sps:$4 sm:$0xff]   ;;  %v3180_v3 = vld [vmem:[%s4252_s0 + $0x258] ss:$28 sps:$4 sm:$0xff]  }
  0x90   :  { %v3224_v57 = vld [vmem:[%s4251_s1 + $0x68] sm:$0xff]  }
  0x91   :  { %2748 = vmatpush3.bf16.msra.mxu1 %v3354_v15  ;;  %2708 = vmatpush3.bf16.msra.mxu0 %v3348_v14  ;;  %v3152_v14 = vld [vmem:[%s4252_s0 + $0x1c0] ss:$28 sps:$4 sm:$0xff]   ;;  %v3171_v2 = vld [vmem:[%s4252_s0 + $0x20c] ss:$28 sps:$4 sm:$0xff]  }
  0x92   :  { %2749 = vmatprep.subr.bf16.mxu1 %v3366_v17  ;;  %2709 = vmatprep.subr.bf16.mxu0 %v3360_v16  ;;  %v3153_v15 = vld [vmem:[%s4252_s0 + $0x204] ss:$28 sps:$4 sm:$0xff]   ;;  %v3156_v16 = vld [vmem:[%s4252_s0 + $0x1fc] ss:$28 sps:$4 sm:$0xff]  }
  0x93   :  { %v3215_v17 = vld [vmem:[%s4251_s1 + $0xf8] sm:$0xff]  }
  0x94   :  { %1202 = vmatmul.mubr.bf16.gmra.mxu0 %v3136_v4  ;;  %v3225_v4 = vld [vmem:[%s4251_s1 + $0xa8] sm:$0xff]  }
  0x95   :  { %2750 = vmatpush3.bf16.msra.mxu1 %v3378_v19  ;;  %2710 = vmatpush3.bf16.msra.mxu0 %v3372_v18  ;;  %v2354_v18 = vld [vmem:[%s4252_s0 + $0x238] sm:$0xff]  ;;  %v2353_v19 = vld [vmem:[%s4252_s0 + $0x230] sm:$0xff] }
  0x96   :  { %2751 = vmatprep.subr.bf16.mxu1 %v3390_v21  ;;  %2711 = vmatprep.subr.bf16.mxu0 %v3384_v20  ;;  %v3155_v20 = vld [vmem:[%s4252_s0 + $0x200] ss:$28 sps:$4 sm:$0xff]   ;;  %v3158_v21 = vld [vmem:[%s4252_s0 + $0x1f8] ss:$28 sps:$4 sm:$0xff]  }
  0x97   :  { %1209 = vmatprep.mubr.bf16.mxu0 %v2323_v6  ;;  %v3227_v6 = vld [vmem:[%s4251_s1 + $0xe0] sm:$0xff]  }
  0x99   :  { %2752 = vmatpush3.bf16.msra.mxu1 %v3402_v23  ;;  %2712 = vmatpush3.bf16.msra.mxu0 %v3396_v22  ;;  %v2381_v22 = vcombine.high %v2354_v18, %v2354_v18  ;;  %v2379_v23 = vcombine.high %v2353_v19, %v2353_v19 }
  0x9a   :  { %2753 = vmatprep.subr.bf16.mxu1 %v3414_v25  ;;  %2713 = vmatprep.subr.bf16.mxu0 %v3408_v24  ;;  %v2380_v24 = vcombine.low %v2354_v18, %v2354_v18  ;;  %v3236_v18 = vld [vmem:[%s4251_s1 + $0x50] sm:$0xff]  }
  0x9c   :  { %1210 = vmatmul.mubr.bf16.gmra.mxu0 %v2322_v7  ;;  %v3228_v7 = vld [vmem:[%s4251_s1 + $0x60] sm:$0xff]  }
  0x9d   :  { %2754 = vmatpush3.bf16.msra.mxu1 %v3426_v27  ;;  %2714 = vmatpush3.bf16.msra.mxu0 %v3420_v26 }
  0x9e   :  { %2755 = vmatprep.subr.bf16.mxu1 %v3438_v29  ;;  %2715 = vmatprep.subr.bf16.mxu0 %v3432_v28 }
  0x9f   :  { %1497 = vmatprep.mubr.bf16.mxu0 %v3146_v8  ;;  %v3173_v8 = vld [vmem:[%s4252_s0 + $0x208] ss:$28 sps:$4 sm:$0xff]  }
  0xa1   :  { %2756 = vmatpush3.bf16.msra.mxu1 %v3450_v31  ;;  %2716 = vmatpush3.bf16.msra.mxu0 %v3444_v30 }
  0xa2   :  { %2781 = vmatprep.subr.bf16.mxu0 %v3469_v36  ;;  %2977 = vmatprep.subr.bf16.mxu1 %v3498_v42 }
  0xa4   :  { %1562 = vmatmul.mubr.bf16.vlgmr.msra.gmra.mxu1 %v3141_v9  ;;  %1498 = vmatmul.mubr.bf16.vlgmr.msra.gmra.mxu0 %v3144_v10  ;;  %v2355_v9 = vld [vmem:[%s4252_s0 + $0x240] sm:$0xff] }
  0xa5   :  { %2782 = vmatpush3.bf16.msra.mxu0 %v3474_v37  ;;  %1569 = vmatprep.mubr.bf16.mxu1 %v3147_v11  ;;  %v3229_v10 = vld [vmem:[%s4251_s1 + $0xa0] sm:$0xff]  }
  0xa6   :  { %2783 = vmatprep.subr.bf16.mxu0 %v3480_v38  ;;  %2978 = vmatpush3.bf16.msra.mxu1 %v3498_v42  ;;  %v2378_v42 = vcombine.low %v2353_v19, %v2353_v19  ;;  %v3230_v11 = vld [vmem:[%s4251_s1 + $0x20] sm:$0xff]   ;;  %v2382_v19 = vcombine.low %v2355_v9, %v2355_v9 }
  0xa7   :  { %1505 = vmatprep.mubr.bf16.mxu0 %v3150_v12  ;;  %2979 = vmatprep.subr.bf16.mxu1 %v3576_v61  ;;  %v3231_v12 = vld [vmem:[%s4251_s1 + $0xd8] sm:$0xff]  }
  0xa9   :  { %2784 = vmatpush3.bf16.msra.mxu0 %v3486_v39 }
  0xaa   :  { %2785 = vmatprep.subr.bf16.mxu0 %v3511_v45  ;;  %2980 = vmatpush3.bf16.msra.mxu1 %v3576_v61  ;;  %v3163_v61 = vld [vmem:[%s4252_s0 + $0x1a0] ss:$28 sps:$4 sm:$0xff]  }
  0xab   :  { %2867 = vmatprep.subr.bf16.mxu1 %v3215_v17  ;;  %v3235_v17 = vld [vmem:[%s4251_s1 + $0xd0] sm:$0xff]  }
  0xac   :  { %1570 = vmatmul.mubr.bf16.gmra.mxu1 %v3149_v13  ;;  %1506 = vmatmul.mubr.bf16.gmra.mxu0 %v3152_v14  ;;  %v3232_v13 = vld [vmem:[%s4251_s1 + $0x58] sm:$0xff]   ;;  %v2383_v14 = vcombine.high %v2355_v9, %v2355_v9 }
  0xad   :  { %2786 = vmatpush3.bf16.msra.mxu0 %v3517_v46  ;;  %1577 = vmatprep.mubr.bf16.mxu1 %v3153_v15  ;;  %v3233_v15 = vld [vmem:[%s4251_s1 + $0x98] sm:$0xff]  }
  0xae   :  { %2787 = vmatprep.subr.bf16.mxu0 %v3523_v47  ;;  %1513 = vmatprep.mubr.bf16.mxu0 %v3156_v16  ;;  %v3234_v16 = vld [vmem:[%s4251_s1 + $0x18] sm:$0xff]  }
  0xb1   :  { %2788 = vmatpush3.bf16.msra.mxu0 %v3529_v48 }
  0xb2   :  { %2789 = vmatprep.subr.bf16.mxu0 %v3547_v53 }
  0xb4   :  { %1578 = vmatmul.mubr.bf16.gmra.mxu1 %v3155_v20  ;;  %1514 = vmatmul.mubr.bf16.gmra.mxu0 %v3158_v21  ;;  %v3237_v20 = vld [vmem:[%s4251_s1 + $0x90] sm:$0xff]  }
  0xb5   :  { %2790 = vmatpush3.bf16.msra.mxu0 %v3553_v54  ;;  %1585 = vmatprep.mubr.bf16.mxu1 %v2381_v22  ;;  %v3238_v21 = vld [vmem:[%s4251_s1 + $0x10] sm:$0xff]   ;;  %v3239_v22 = vld [vmem:[%s4251_s1 + $0x48] sm:$0xff]  }
  0xb6   :  { %2791 = vmatprep.subr.bf16.mxu0 %v3559_v55  ;;  %1521 = vmatprep.mubr.bf16.mxu0 %v2379_v23  ;;  %v3183_v23 = vld [vmem:[%s4252_s0 + $0x250] ss:$28 sps:$4 sm:$0xff]  }
  0xb9   :  { %2792 = vmatpush3.bf16.msra.mxu0 %v3564_v56 }
  0xba   :  { %2793 = vmatprep.subr.bf16.mxu0 %v3582_v62 }
  0xbc   :  { %1586 = vmatmul.mubr.bf16.gmra.mxu1 %v2380_v24  ;;  %1522 = vmatmul.mubr.bf16.gmra.mxu0 %v2378_v42  ;;  %v3181_v24 = vld [vmem:[%s4252_s0 + $0x24c] ss:$28 sps:$4 sm:$0xff]  }
  0xbd   :  { %2794 = vmatpush3.bf16.msra.mxu0 %v3590_v33  ;;  %2981 = vmatprep.mubr.msk.bf16.mxu1 %vm579_vm0, %v3163_v61 }
  0xbe   :  { %2795 = vmatprep.subr.bf16.mxu0 %v3596_v34  ;;  %1625 = vmatprep.mubr.bf16.mxu0 %v3167_v58 }
  0xc1   :  { %2796 = vmatpush3.bf16.msra.mxu0 %v3609_v41 }
  0xc2   :  { %2827 = vmatprep.subr.bf16.mxu0 %v3216_v63  ;;  %v3189_v63 = vld [vmem:[%s4252_s0 + $0x284] ss:$28 sps:$4 sm:$0xff]  }
  0xc4   :  { %2982 = vmatmul.mubr.msk.bf16.vlgmr.msra.gmra.mxu1 %vm579_vm0, %v3164_v59  ;;  %1626 = vmatmul.mubr.bf16.vlgmr.msra.gmra.mxu0 %v3165_v60 }
  0xc5   :  { %2868 = vmatpush3.bf16.msra.mxu1 %v3217_v1  ;;  %2828 = vmatpush3.bf16.msra.mxu0 %v3218_v40  ;;  %v3190_v40 = vld [vmem:[%s4252_s0 + $0x2c8] ss:$28 sps:$4 sm:$0xff]  }
  0xc6   :  { %2869 = vmatprep.subr.bf16.mxu1 %v3219_v43  ;;  %2829 = vmatprep.subr.bf16.mxu0 %v3220_v44 }
  0xc7   :  { %1633 = vmatprep.mubr.bf16.mxu0 %v3168_v32  ;;  %2985 = vmatprep.mubr.msk.bf16.mxu1 %vm579_vm0, %v3174_v35 }
  0xc9   :  { %2870 = vmatpush3.bf16.msra.mxu1 %v3221_v51  ;;  %2830 = vmatpush3.bf16.msra.mxu0 %v3222_v52 }
  0xca   :  { %2871 = vmatprep.subr.bf16.mxu1 %v3223_v0  ;;  %2831 = vmatprep.subr.bf16.mxu0 %v3224_v57 }
  0xcc   :  { %1634 = vmatmul.mubr.bf16.gmra.mxu0 %v3170_v49  ;;  %2986 = vmatmul.mubr.msk.bf16.gmra.mxu1 %vm579_vm0, %v3175_v50  ;;  %v3193_v49 = vld [vmem:[%s4252_s0 + $0x2c0] ss:$28 sps:$4 sm:$0xff]  }
  0xcd   :  { %2872 = vmatpush3.bf16.msra.mxu1 %v3225_v4  ;;  %2832 = vmatpush3.bf16.msra.mxu0 %v3226_v5  ;;  %v3192_v5 = vld [vmem:[%s4252_s0 + $0x2c4] ss:$28 sps:$4 sm:$0xff]  }
  0xce   :  { %2873 = vmatprep.subr.bf16.mxu1 %v3227_v6  ;;  %2833 = vmatprep.subr.bf16.mxu0 %v3228_v7  ;;  %v3195_v6 = vld [vmem:[%s4252_s0 + $0x2bc] ss:$28 sps:$4 sm:$0xff]  }
  0xcf   :  { %1641 = vmatprep.mubr.bf16.mxu0 %v3171_v2  ;;  %1994 = vmatprep.mubr.bf16.mxu1 %v3180_v3  ;;  %v2414_v3 = vld [vmem:[%s4252_s0 + $0x2fc] sm:$0xff] }
  0xd1   :  { %2874 = vmatpush3.bf16.msra.mxu1 %v3229_v10  ;;  %2834 = vmatpush3.bf16.msra.mxu0 %v3230_v11  ;;  %v2441_v11 = vcombine.high %v2414_v3, %v2414_v3 }
  0xd2   :  { %2875 = vmatprep.subr.bf16.mxu1 %v3231_v12  ;;  %2835 = vmatprep.subr.bf16.mxu0 %v3232_v13 }
  0xd4   :  { %1642 = vmatmul.mubr.bf16.gmra.mxu0 %v3173_v8 }
  0xd5   :  { %2876 = vmatpush3.bf16.msra.mxu1 %v3233_v15  ;;  %2836 = vmatpush3.bf16.msra.mxu0 %v3234_v16 }
  0xd6   :  { %2877 = vmatprep.subr.bf16.mxu1 %v3235_v17  ;;  %2837 = vmatprep.subr.bf16.mxu0 %v3236_v18 }
  0xd7   :  { %1649 = vmatprep.mubr.bf16.mxu0 %v2383_v14 }
  0xd9   :  { %2878 = vmatpush3.bf16.msra.mxu1 %v3237_v20  ;;  %2838 = vmatpush3.bf16.msra.mxu0 %v3238_v21 }
  0xda   :  { %2879 = vmatprep.subr.bf16.mxu1 %v3414_v25  ;;  %2839 = vmatprep.subr.bf16.mxu0 %v3239_v22  ;;  %v3178_v25 = vld [vmem:[%s4252_s0 + $0x254] ss:$28 sps:$4 sm:$0xff]  }
  0xdc   :  { %1650 = vmatmul.mubr.bf16.gmra.mxu0 %v2382_v19 }
  0xdd   :  { %2880 = vmatpush3.bf16.msra.mxu1 %v3426_v27  ;;  %2840 = vmatpush3.bf16.msra.mxu0 %v3420_v26  ;;  %v3184_v26 = vld [vmem:[%s4252_s0 + $0x290] ss:$28 sps:$4 sm:$0xff]  }
  0xde   :  { %2881 = vmatprep.subr.bf16.mxu1 %v3438_v29  ;;  %2841 = vmatprep.subr.bf16.mxu0 %v3432_v28  ;;  %v3187_v28 = vld [vmem:[%s4252_s0 + $0x288] ss:$28 sps:$4 sm:$0xff]  }
  0xdf   :  { %1930 = vmatprep.mubr.bf16.mxu0 %v3183_v23  ;;  %v2440_v23 = vcombine.low %v2414_v3, %v2414_v3  ;;  %v3206_v3 = vld [vmem:[%s4252_s0 + $0x29c] ss:$28 sps:$4 sm:$0xff]  }
  0xe1   :  { %2882 = vmatpush3.bf16.msra.mxu1 %v3450_v31  ;;  %2842 = vmatpush3.bf16.msra.mxu0 %v3444_v30  ;;  %v4012_v30 = vld [vmem:[%s4253_s2] ss:$0 sm:$0xff] }
  0xe2   :  { %3001 = vmatprep.subr.bf16.mxu1 %v3469_v36  ;;  %2907 = vmatprep.subr.bf16.mxu0 %v3469_v36 }
  0xe3   :  { %v2465_v27 = vpop.f32.mrf.mxu0 }
  0xe4   :  { %1995 = vmatmul.mubr.bf16.vlgmr.msra.gmra.mxu1 %v3178_v25  ;;  %1931 = vmatmul.mubr.bf16.vlgmr.msra.gmra.mxu0 %v3181_v24  ;;  %v2505_v29 = vpop.f32.mrf.mxu1 }
  0xe5   :  { %3009 = vmatpush3.bf16.msra.mxu1 %v3474_v37  ;;  %2908 = vmatpush3.bf16.msra.mxu0 %v3474_v37  ;;  %v2466_v31 = vpop.f32.mrf.mxu0  ;;  %v3186_v37 = vld [vmem:[%s4252_s0 + $0x28c] ss:$28 sps:$4 sm:$0xff]  }
  0xe6   :  { %3002 = vmatprep.subr.bf16.mxu1 %v3480_v38  ;;  %v2467_v36 = vadd.f32 %v2466_v31, %v2465_v27  ;;  %v2506_v42 = vpop.f32.mrf.mxu1  ;;  %2002 = vmatprep.mubr.bf16.mxu1 %v3184_v26 }
  0xe7   :  { %v2507_v61 = vadd.f32 %v2506_v42, %v2505_v29  ;;  %v2468_v58 = vpop.f32.mrf.mxu0  ;;  %2909 = vmatprep.subr.bf16.mxu0 %v3480_v38  ;;  %1938 = vmatprep.mubr.bf16.mxu0 %v3187_v28 }
  0xe8   :  { %v627_v59 = vadd.f32 %v2467_v36, %v4012_v30  ;;  %v2508_v60 = vpop.f32.mrf.mxu1  ;;  %v3204_v36 = vld [vmem:[%s4252_s0 + $0x260] ss:$28 sps:$4 sm:$0xff]  }
  0xe9   :  { %3010 = vmatpush3.bf16.msra.mxu1 %v3486_v39  ;;  %2910 = vmatpush3.bf16.msra.mxu0 %v3486_v39  ;;  %v2469_v32 = vpop.f32.mrf.mxu0 }
  0xea   :  { %v4025_v35 = vadd.f32 %v2507_v61, %v627_v59  ;;  %3003 = vmatprep.subr.bf16.mxu1 %v3511_v45  ;;  %v2470_v38 = vadd.f32 %v2469_v32, %v2468_v58  ;;  %v2509_v1 = vpop.f32.mrf.mxu1  ;;  %2911 = vmatprep.subr.bf16.mxu0 %v3511_v45 }
  0xeb   :  { %v2510_v43 = vadd.f32 %v2509_v1, %v2508_v60  ;;  %v2471_v44 = vpop.f32.mrf.mxu0 }
  0xec   :  { %2003 = vmatmul.mubr.bf16.gmra.mxu1 %v3186_v37  ;;  %v630_v39 = vadd.f32 %v2470_v38, %v4012_v30  ;;  %1939 = vmatmul.mubr.bf16.gmra.mxu0 %v3189_v63  ;;  %v2511_v50 = vpop.f32.mrf.mxu1 }
  0xed   :  { %3011 = vmatpush3.bf16.msra.mxu1 %v3517_v46  ;;  %2912 = vmatpush3.bf16.msra.mxu0 %v3517_v46  ;;  %v2472_v45 = vpop.f32.mrf.mxu0 }
  0xee   :  { %v4038_v51 = vadd.f32 %v2510_v43, %v630_v39  ;;  %3004 = vmatprep.subr.bf16.mxu1 %v3523_v47  ;;  %v2473_v52 = vadd.f32 %v2472_v45, %v2471_v44  ;;  %v2512_v0 = vpop.f32.mrf.mxu1  ;;  %2010 = vmatprep.mubr.bf16.mxu1 %v3190_v40  ;;  %v3240_v43 = vld [vmem:[%s4251_s1 + $0x188] sm:$0xff]  }
  0xef   :  { %v2513_v57 = vadd.f32 %v2512_v0, %v2511_v50  ;;  %v2474_v2 = vpop.f32.mrf.mxu0  ;;  %2913 = vmatprep.subr.bf16.mxu0 %v3523_v47  ;;  %1946 = vmatprep.mubr.bf16.mxu0 %v3193_v49  ;;  %v2413_v47 = vld [vmem:[%s4252_s0 + $0x2f4] sm:$0xff]  ;;  %v3241_v50 = vld [vmem:[%s4251_s1 + $0x180] sm:$0xff]  }
  0xf0   :  { %v635_v4 = vadd.f32 %v2473_v52, %v4012_v30  ;;  %v2514_v46 = vpop.f32.mrf.mxu1  ;;  %v2439_v14 = vcombine.high %v2413_v47, %v2413_v47  ;;  %v2438_v25 = vcombine.low %v2413_v47, %v2413_v47  ;;  %v3209_v49 = vld [vmem:[%s4252_s0 + $0x298] ss:$28 sps:$4 sm:$0xff]  }
  0xf1   :  { %3012 = vmatpush3.bf16.msra.mxu1 %v3529_v48  ;;  %2914 = vmatpush3.bf16.msra.mxu0 %v3529_v48  ;;  %v2475_v7 = vpop.f32.mrf.mxu0 }
  0xf2   :  { %v4057_v8 = vadd.f32 %v2513_v57, %v635_v4  ;;  %3005 = vmatprep.subr.bf16.mxu1 %v3547_v53  ;;  %v2476_v9 = vadd.f32 %v2475_v7, %v2474_v2  ;;  %v2515_v10 = vpop.f32.mrf.mxu1  ;;  %2915 = vmatprep.subr.bf16.mxu0 %v3547_v53  ;;  %v3207_v4 = vld [vmem:[%s4252_s0 + $0x294] ss:$28 sps:$4 sm:$0xff]  }
  0xf3   :  { %v2516_v12 = vadd.f32 %v2515_v10, %v2514_v46  ;;  %v2477_v13 = vpop.f32.mrf.mxu0 }
  0xf4   :  { %2011 = vmatmul.mubr.bf16.gmra.mxu1 %v3192_v5  ;;  %v638_v15 = vadd.f32 %v2476_v9, %v4012_v30  ;;  %1947 = vmatmul.mubr.bf16.gmra.mxu0 %v3195_v6  ;;  %v2517_v16 = vpop.f32.mrf.mxu1  ;;  %v3210_v5 = vld [vmem:[%s4252_s0 + $0x2d4] ss:$28 sps:$4 sm:$0xff]  }
  0xf5   :  { %3013 = vmatpush3.bf16.msra.mxu1 %v3553_v54  ;;  %2916 = vmatpush3.bf16.msra.mxu0 %v3553_v54  ;;  %v2478_v48 = vpop.f32.mrf.mxu0  ;;  %v2415_v54 = vld [vmem:[%s4252_s0 + $0x304] sm:$0xff]  ;;  %v3214_v6 = vld [vmem:[%s4252_s0 + $0x2d0] ss:$28 sps:$4 sm:$0xff]  }
  0xf6   :  { %v4064_v17 = vadd.f32 %v2516_v12, %v638_v15  ;;  %3006 = vmatprep.subr.bf16.mxu1 %v3559_v55  ;;  %v2479_v18 = vadd.f32 %v2478_v48, %v2477_v13  ;;  %v2518_v53 = vpop.f32.mrf.mxu1  ;;  %2018 = vmatprep.mubr.bf16.mxu1 %v2441_v11  ;;  %v2443_v31 = vcombine.high %v2415_v54, %v2415_v54 }
  0xf7   :  { %v2519_v19 = vadd.f32 %v2518_v53, %v2517_v16  ;;  %v2480_v20 = vpop.f32.mrf.mxu0  ;;  %2917 = vmatprep.subr.bf16.mxu0 %v3559_v55  ;;  %1954 = vmatprep.mubr.bf16.mxu0 %v2439_v14  ;;  %v2442_v32 = vcombine.low %v2415_v54, %v2415_v54  ;;  %v3212_v53 = vld [vmem:[%s4252_s0 + $0x2cc] ss:$28 sps:$4 sm:$0xff]  }
  0xf8   :  { %v643_v21 = vadd.f32 %v2479_v18, %v4012_v30  ;;  %v2520_v22 = vpop.f32.mrf.mxu1  ;;  %v3211_v18 = vld [vmem:[%s4252_s0 + $0x30c] ss:$0 sps:$4 sm:$0xff]  }
  0xf9   :  { %3014 = vmatpush3.bf16.msra.mxu1 %v3564_v56  ;;  %2918 = vmatpush3.bf16.msra.mxu0 %v3564_v56  ;;  %v2481_v24 = vpop.f32.mrf.mxu0 }
  0xfa   :  { %v4074_v26 = vadd.f32 %v2519_v19, %v643_v21  ;;  %3007 = vmatprep.subr.bf16.mxu1 %v3582_v62  ;;  %v2482_v55 = vadd.f32 %v2481_v24, %v2480_v20  ;;  %v2521_v27 = vpop.f32.mrf.mxu1  ;;  %2919 = vmatprep.subr.bf16.mxu0 %v3582_v62 }
  0xfb   :  { %v2522_v28 = vadd.f32 %v2521_v27, %v2520_v22  ;;  %v2483_v29 = vpop.f32.mrf.mxu0 }
  0xfc   :  { %2019 = vmatmul.mubr.bf16.gmra.mxu1 %v2440_v23  ;;  %v646_v42 = vadd.f32 %v2482_v55, %v4012_v30  ;;  %1955 = vmatmul.mubr.bf16.gmra.mxu0 %v2438_v25  ;;  %v2523_v56 = vpop.f32.mrf.mxu1 }
  0xfd   :  { %3015 = vmatpush3.bf16.msra.mxu1 %v3590_v33  ;;  %2920 = vmatpush3.bf16.msra.mxu0 %v3590_v33  ;;  %v2484_v61 = vpop.f32.mrf.mxu0  ;;  %v3202_v33 = vld [vmem:[%s4252_s0 + $0x25c] ss:$28 sps:$4 sm:$0xff]  }
  0xfe   :  { %v4084_v58 = vadd.f32 %v2522_v28, %v646_v42  ;;  %3008 = vmatprep.subr.bf16.mxu1 %v3596_v34  ;;  %v2485_v62 = vadd.f32 %v2484_v61, %v2483_v29  ;;  %v2524_v59 = vpop.f32.mrf.mxu1  ;;  %2921 = vmatprep.subr.bf16.mxu0 %v3596_v34  ;;  %v3205_v34 = vld [vmem:[%s4252_s0 + $0x264] ss:$28 sps:$4 sm:$0xff]  }
  0xff   :  { %v2525_v60 = vadd.f32 %v2524_v59, %v2523_v56  ;;  %v2486_v37 = vpop.f32.mrf.mxu0  ;;  %2082 = vmatprep.mubr.bf16.mxu1 %v2443_v31  ;;  %2058 = vmatprep.mubr.bf16.mxu0 %v3204_v36 }
 0x100   :  { %v651_v63 = vadd.f32 %v2485_v62, %v4012_v30  ;;  %v2526_v38 = vpop.f32.mrf.mxu1 }
 0x101   :  { %3016 = vmatpush3.bf16.msra.mxu1 %v3609_v41  ;;  %2922 = vmatpush3.bf16.msra.mxu0 %v3609_v41  ;;  %v2487_v1 = vpop.f32.mrf.mxu0 }
 0x102   :  { %v4097_v40 = vadd.f32 %v2525_v60, %v651_v63  ;;  %2989 = vmatprep.subr.bf16.mxu1 %v3240_v43  ;;  %v2527_v44 = vpop.f32.mrf.mxu1 }
 0x104   :  { %2083 = vmatmul.mubr.bf16.vlgmr.msra.gmra.mxu1 %v2442_v32  ;;  %v2545_v39 = vpop.f32.mrf.mxu0  ;;  %2059 = vmatmul.mubr.bf16.vlgmr.msra.gmra.mxu0 %v3202_v33  ;;  %v2959_v41 = vpop.f32.mrf.mxu1 }
 0x105   :  { %2990 = vmatpush3.bf16.msra.mxu1 %v3240_v43  ;;  %2993 = vmatprep.mubr.msk.bf16.mxu1 %vm579_vm0, %v3205_v34 }
 0x106   :  { %2991 = vmatprep.subr.bf16.mxu1 %v3241_v50  ;;  %v2546_v45 = vpop.f32.mrf.mxu0  ;;  %v818_v52 = vpop.f32.mrf.mxu1  ;;  %2066 = vmatprep.mubr.bf16.mxu0 %v3209_v49 }
 0x107   :  { %v2547_v0 = vadd.f32 %v2546_v45, %v2545_v39 }
 0x108   :  { %v2548_v57 = vpop.f32.mrf.mxu0  ;;  %v2960_v2 = vpop.f32.mrf.mxu1 }
 0x109   :  { %2992 = vmatpush3.bf16.msra.mxu1 %v3241_v50  ;;  %v755_v46 = vadd.f32 %v2547_v0, %v4025_v35 }
 0x10a   :  { %v2549_v47 = vpop.f32.mrf.mxu0  ;;  %v821_v7 = vpop.f32.mrf.mxu1 }
 0x10b   :  { %v4122_v9 = vadd.f32 %v818_v52, %v755_v46  ;;  %v2550_v10 = vadd.f32 %v2549_v47, %v2548_v57 }
 0x10c   :  { %2994 = vmatmul.mubr.msk.bf16.vlgmr.msra.gmra.mxu1 %vm579_vm0, %v3206_v3  ;;  %v2551_v11 = vpop.f32.mrf.mxu0  ;;  %2067 = vmatmul.mubr.bf16.gmra.mxu0 %v3207_v4  ;;  %v2963_v12 = vpop.f32.mrf.mxu1 }
 0x10d   :  { %v758_v35 = vadd.f32 %v2550_v10, %v4038_v51  ;;  %2997 = vmatprep.mubr.msk.bf16.mxu1 %vm579_vm0, %v3210_v5  ;;  %2074 = vmatprep.mubr.bf16.mxu0 %v3214_v6 }
 0x10e   :  { %v2552_v13 = vpop.f32.mrf.mxu0  ;;  %v834_v14 = vpop.f32.mrf.mxu1 }
 0x10f   :  { %v4127_v15 = vadd.f32 %v821_v7, %v758_v35  ;;  %v2553_v16 = vadd.f32 %v2552_v13, %v2551_v11 }
 0x110   :  { %v2554_v48 = vpop.f32.mrf.mxu0  ;;  %v2964_v19 = vpop.f32.mrf.mxu1 }
 0x111   :  { %v763_v51 = vadd.f32 %v2553_v16, %v4057_v8 }
 0x112   :  { %v2555_v20 = vpop.f32.mrf.mxu0  ;;  %v837_v42 = vpop.f32.mrf.mxu1 }
 0x113   :  { %v4136_v21 = vadd.f32 %v2959_v41, %v763_v51  ;;  %v2556_v22 = vadd.f32 %v2555_v20, %v2554_v48 }
 0x114   :  { %2998 = vmatmul.mubr.msk.bf16.gmra.mxu1 %vm579_vm0, %v3211_v18  ;;  %v2557_v23 = vpop.f32.mrf.mxu0  ;;  %2075 = vmatmul.mubr.bf16.gmra.mxu0 %v3212_v53 }
 0x115   :  { %v766_v25 = vadd.f32 %v2556_v22, %v4064_v17 }
 0x116   :  { %v2558_v54 = vpop.f32.mrf.mxu0 }
 0x117   :  { %v4140_v24 = vadd.f32 %v2960_v2, %v766_v25  ;;  %v2559_v55 = vadd.f32 %v2558_v54, %v2557_v23 }
 0x118   :  { %v2560_v27 = vpop.f32.mrf.mxu0 }
 0x119   :  { %v771_v28 = vadd.f32 %v2559_v55, %v4074_v26 }
 0x11a   :  { %v2561_v29 = vpop.f32.mrf.mxu0 }
 0x11b   :  { %v2562_v31 = vadd.f32 %v2561_v29, %v2560_v27  ;;  %v4143_v8 = vadd.f32 %v834_v14, %v771_v28 }
 0x11c   :  { %v2563_v36 = vpop.f32.mrf.mxu0 }
 0x11d   :  { %v774_v56 = vadd.f32 %v2562_v31, %v4084_v58 }
 0x11e   :  { %v2564_v61 = vpop.f32.mrf.mxu0 }
 0x11f   :  { %v2565_v62 = vadd.f32 %v2564_v61, %v2563_v36  ;;  %v4146_v59 = vadd.f32 %v837_v42, %v774_v56 }
 0x120   :  { %v2566_v17 = vpop.f32.mrf.mxu0 }
 0x121   :  { %v779_v60 = vadd.f32 %v2565_v62, %v4097_v40 }
 0x122   :  { %v2567_v37 = vpop.f32.mrf.mxu0 }
 0x123   :  { %v4149_v63 = vadd.f32 %v2963_v12, %v779_v60 }
 0x124   :  { %v2591_v32 = vpop.f32.mrf.mxu0  ;;  %v2631_v26 = vpop.f32.mrf.mxu1 }
 0x126   :  { %v2592_v38 = vpop.f32.mrf.mxu0  ;;  %v2632_v33 = vpop.f32.mrf.mxu1 }
 0x127   :  { %v2593_v1 = vadd.f32 %v2592_v38, %v2591_v32  ;;  %v2633_v34 = vadd.f32 %v2632_v33, %v2631_v26 }
 0x128   :  { %v2594_v43 = vpop.f32.mrf.mxu0  ;;  %v2634_v44 = vpop.f32.mrf.mxu1 }
 0x129   :  { %v1060_v58 = vadd.f32 %v2593_v1, %v4012_v30 }
 0x12a   :  { %v2595_v49 = vpop.f32.mrf.mxu0  ;;  %v2635_v39 = vpop.f32.mrf.mxu1 }
 0x12b   :  { %v1124_v41 = vadd.f32 %v2633_v34, %v1060_v58  ;;  %v2596_v50 = vadd.f32 %v2595_v49, %v2594_v43  ;;  %v2636_v45 = vadd.f32 %v2635_v39, %v2634_v44 }
 0x12c   :  { %v2597_v52 = vpop.f32.mrf.mxu0  ;;  %v2637_v40 = vpop.f32.mrf.mxu1 }
 0x12d   :  { %v1063_v0 = vadd.f32 %v2596_v50, %v4012_v30 }
 0x12e   :  { %v2598_v57 = vpop.f32.mrf.mxu0  ;;  %v2638_v2 = vpop.f32.mrf.mxu1 }
 0x12f   :  { %v1127_v3 = vadd.f32 %v2636_v45, %v1063_v0  ;;  %v2599_v4 = vadd.f32 %v2598_v57, %v2597_v52  ;;  %v2639_v46 = vadd.f32 %v2638_v2, %v2637_v40 }
 0x130   :  { %v2600_v5 = vpop.f32.mrf.mxu0  ;;  %v2640_v6 = vpop.f32.mrf.mxu1 }
 0x131   :  { %v1068_v47 = vadd.f32 %v2599_v4, %v4012_v30  ;;  %v848_v4 = vmax.f32 %v4122_v9, 0.0 }
 0x132   :  { %v2601_v7 = vpop.f32.mrf.mxu0  ;;  %v2641_v10 = vpop.f32.mrf.mxu1 }
 0x133   :  { %v1132_v11 = vadd.f32 %v2639_v46, %v1068_v47  ;;  %v2602_v12 = vadd.f32 %v2601_v7, %v2600_v5  ;;  %v2642_v35 = vadd.f32 %v2641_v10, %v2640_v6 }
 0x134   :  { %v2603_v13 = vpop.f32.mrf.mxu0  ;;  %v2643_v14 = vpop.f32.mrf.mxu1 }
 0x135   :  { %v1071_v16 = vadd.f32 %v2602_v12, %v4012_v30 }
 0x136   :  { %v2604_v48 = vpop.f32.mrf.mxu0  ;;  %v2644_v18 = vpop.f32.mrf.mxu1 }
 0x137   :  { %v1135_v53 = vadd.f32 %v2642_v35, %v1071_v16  ;;  %v2605_v19 = vadd.f32 %v2604_v48, %v2603_v13  ;;  %v2645_v51 = vadd.f32 %v2644_v18, %v2643_v14 }
 0x138   :  { %v2606_v20 = vpop.f32.mrf.mxu0  ;;  %v2646_v22 = vpop.f32.mrf.mxu1 }
 0x139   :  { %v1076_v23 = vadd.f32 %v2605_v19, %v4012_v30 }
 0x13a   :  { %v2607_v25 = vpop.f32.mrf.mxu0  ;;  %v2647_v54 = vpop.f32.mrf.mxu1 }
 0x13b   :  { %v1140_v55 = vadd.f32 %v2645_v51, %v1076_v23  ;;  %v2608_v27 = vadd.f32 %v2607_v25, %v2606_v20  ;;  %v2648_v28 = vadd.f32 %v2647_v54, %v2646_v22 }
 0x13c   :  { %v2609_v29 = vpop.f32.mrf.mxu0  ;;  %v2649_v31 = vpop.f32.mrf.mxu1 }
 0x13d   :  { %v1079_v36 = vadd.f32 %v2608_v27, %v4012_v30 }
 0x13e   :  { %v2610_v42 = vpop.f32.mrf.mxu0  ;;  %v2650_v56 = vpop.f32.mrf.mxu1 }
 0x13f   :  { %v1143_v61 = vadd.f32 %v2648_v28, %v1079_v36  ;;  %v2611_v62 = vadd.f32 %v2610_v42, %v2609_v29  ;;  %v2651_v17 = vadd.f32 %v2650_v56, %v2649_v31 }
 0x140   :  { %v2612_v60 = vpop.f32.mrf.mxu0  ;;  %v2652_v37 = vpop.f32.mrf.mxu1 }
 0x141   :  { %v1084_v32 = vadd.f32 %v2611_v62, %v4012_v30 }
 0x142   :  { %v2613_v26 = vpop.f32.mrf.mxu0  ;;  %v2653_v38 = vpop.f32.mrf.mxu1 }
 0x143   :  { %v1148_v33 = vadd.f32 %v2651_v17, %v1084_v32 }
 0x144   :  { %v2671_v1 = vpop.f32.mrf.mxu0  ;;  %v2971_v34 = vpop.f32.mrf.mxu1 }
 0x146   :  { %v2672_v43 = vpop.f32.mrf.mxu0  ;;  %v1251_v44 = vpop.f32.mrf.mxu1 }
 0x147   :  { %v2673_v58 = vadd.f32 %v2672_v43, %v2671_v1 }
 0x148   :  { %v2674_v49 = vpop.f32.mrf.mxu0  ;;  %v2972_v39 = vpop.f32.mrf.mxu1 }
 0x149   :  { %v1188_v50 = vadd.f32 %v2673_v58, %v1124_v41  ;;  %v849_v41 = vmax.f32 %v4127_v15, 0.0  ;;  %v851_v15 = vmax.f32 %v4140_v24, 0.0  ;;  %v853_v24 = vmax.f32 %v4146_v59, 0.0 }
 0x14a   :  { %v2675_v45 = vpop.f32.mrf.mxu0  ;;  %v1254_v52 = vpop.f32.mrf.mxu1 }
 0x14b   :  { %v1252_v40 = vadd.f32 %v1251_v44, %v1188_v50  ;;  %v2676_v0 = vadd.f32 %v2675_v45, %v2674_v49 }
 0x14c   :  { %v2677_v57 = vpop.f32.mrf.mxu0  ;;  %v2975_v2 = vpop.f32.mrf.mxu1 }
 0x14d   :  { %v1281_v46 = vmax.f32 %v1252_v40, 0.0  ;;  %v1191_v5 = vadd.f32 %v2676_v0, %v1127_v3  ;;  %v850_v3 = vmax.f32 %v4136_v21, 0.0  ;;  %v852_v21 = vmax.f32 %v4143_v8, 0.0 }
 0x14e   :  { %v2678_v6 = vpop.f32.mrf.mxu0  ;;  %v1267_v47 = vpop.f32.mrf.mxu1  ;;  %v854_v8 = vmax.f32 %v4149_v63, 0.0 }
 0x14f   :  { %v4159_v7 = vmax.f32 %v848_v4, %v1281_v46  ;;  %v1255_v10 = vadd.f32 %v1254_v52, %v1191_v5  ;;  %v2679_v12 = vadd.f32 %v2678_v6, %v2677_v57 }
 0x150   :  { %v2680_v35 = vpop.f32.mrf.mxu0  ;;  %v2976_v13 = vpop.f32.mrf.mxu1 }
 0x151   :  { %v1282_v14 = vmax.f32 %v1255_v10, 0.0  ;;  %v1196_v16 = vadd.f32 %v2679_v12, %v1132_v11 }
 0x152   :  { %v2681_v48 = vpop.f32.mrf.mxu0  ;;  %v1270_v17 = vpop.f32.mrf.mxu1 }
 0x153   :  { %v4162_v18 = vmax.f32 %v849_v41, %v1282_v14  ;;  %v1260_v19 = vadd.f32 %v2971_v34, %v1196_v16  ;;  %v2682_v51 = vadd.f32 %v2681_v48, %v2680_v35 }
 0x154   :  { %v2683_v9 = vpop.f32.mrf.mxu0 }
 0x155   :  { %v1283_v20 = vmax.f32 %v1260_v19, 0.0  ;;  %v1199_v22 = vadd.f32 %v2682_v51, %v1135_v53 }
 0x156   :  { %v2684_v23 = vpop.f32.mrf.mxu0 }
 0x157   :  { %v4165_v25 = vmax.f32 %v850_v3, %v1283_v20  ;;  %v1263_v54 = vadd.f32 %v2972_v39, %v1199_v22  ;;  %v2685_v27 = vadd.f32 %v2684_v23, %v2683_v9 }
 0x158   :  { %v2686_v28 = vpop.f32.mrf.mxu0 }
 0x159   :  { %v1284_v29 = vmax.f32 %v1263_v54, 0.0  ;;  %v1204_v11 = vadd.f32 %v2685_v27, %v1140_v55 }
 0x15a   :  { %v2687_v31 = vpop.f32.mrf.mxu0 }
 0x15b   :  { %v4168_v36 = vmax.f32 %v851_v15, %v1284_v29  ;;  %v2688_v42 = vadd.f32 %v2687_v31, %v2686_v28  ;;  %v1268_v56 = vadd.f32 %v1267_v47, %v1204_v11 }
 0x15c   :  { %v2689_v62 = vpop.f32.mrf.mxu0 }
 0x15d   :  { %v1285_v53 = vmax.f32 %v1268_v56, 0.0  ;;  %v1207_v60 = vadd.f32 %v2688_v42, %v1143_v61 }
 0x15e   :  { %v2690_v37 = vpop.f32.mrf.mxu0 }
 0x15f   :  { %v4171_v32 = vmax.f32 %v852_v21, %v1285_v53  ;;  %v2691_v26 = vadd.f32 %v2690_v37, %v2689_v62  ;;  %v1271_v38 = vadd.f32 %v1270_v17, %v1207_v60 }
 0x160   :  { %v2692_v1 = vpop.f32.mrf.mxu0 }
 0x161   :  { %v1212_v55 = vadd.f32 %v2691_v26, %v1148_v33  ;;  %v1286_v34 = vmax.f32 %v1271_v38, 0.0 }
 0x162   :  { %v2693_v43 = vpop.f32.mrf.mxu0 }
 0x163   :  { %v1276_v44 = vadd.f32 %v2975_v2, %v1212_v55  ;;  %v4174_v58 = vmax.f32 %v853_v24, %v1286_v34 }
 0x164   :  { %v2757_v49 = vpop.f32.mrf.mxu1  ;;  %v2717_v39 = vpop.f32.mrf.mxu0 }
 0x165   :  { %v1287_v50 = vmax.f32 %v1276_v44, 0.0 }
 0x166   :  { %v2758_v61 = vpop.f32.mrf.mxu1  ;;  %v2718_v45 = vpop.f32.mrf.mxu0 }
 0x167   :  { %v2759_v52 = vadd.f32 %v2758_v61, %v2757_v49  ;;  %v2719_v40 = vadd.f32 %v2718_v45, %v2717_v39  ;;  %v4177_v0 = vmax.f32 %v854_v8, %v1287_v50 }
 0x168   :  { %v2760_v57 = vpop.f32.mrf.mxu1  ;;  %v2720_v4 = vpop.f32.mrf.mxu0 }
 0x169   :  { %v1500_v59 = vadd.f32 %v2719_v40, %v4012_v30 }
 0x16a   :  { %v2761_v33 = vpop.f32.mrf.mxu1  ;;  %v2721_v46 = vpop.f32.mrf.mxu0 }
 0x16b   :  { %v2762_v2 = vadd.f32 %v2761_v33, %v2760_v57  ;;  %v2722_v5 = vadd.f32 %v2721_v46, %v2720_v4  ;;  %v1564_v6 = vadd.f32 %v2759_v52, %v1500_v59 }
 0x16c   :  { %v2763_v47 = vpop.f32.mrf.mxu1  ;;  %v2723_v10 = vpop.f32.mrf.mxu0 }
 0x16d   :  { %v1503_v63 = vadd.f32 %v2722_v5, %v4012_v30 }
 0x16e   :  { %v2764_v12 = vpop.f32.mrf.mxu1  ;;  %v2724_v35 = vpop.f32.mrf.mxu0 }
 0x16f   :  { %v2765_v13 = vadd.f32 %v2764_v12, %v2763_v47  ;;  %v2725_v41 = vadd.f32 %v2724_v35, %v2723_v10  ;;  %v1567_v14 = vadd.f32 %v2762_v2, %v1503_v63 }
 0x170   :  { %v2766_v16 = vpop.f32.mrf.mxu1  ;;  %v2726_v48 = vpop.f32.mrf.mxu0 }
 0x171   :  { %v1508_v19 = vadd.f32 %v2725_v41, %v4012_v30 }
 0x172   :  { %v2767_v51 = vpop.f32.mrf.mxu1  ;;  %v2727_v9 = vpop.f32.mrf.mxu0 }
 0x173   :  { %v2768_v3 = vadd.f32 %v2767_v51, %v2766_v16  ;;  %v2728_v20 = vadd.f32 %v2727_v9, %v2726_v48  ;;  %v1572_v22 = vadd.f32 %v2765_v13, %v1508_v19 }
 0x174   :  { %v2769_v23 = vpop.f32.mrf.mxu1  ;;  %v2729_v54 = vpop.f32.mrf.mxu0 }
 0x175   :  { %v1511_v27 = vadd.f32 %v2728_v20, %v4012_v30 }
 0x176   :  { %v2770_v28 = vpop.f32.mrf.mxu1  ;;  %v2730_v15 = vpop.f32.mrf.mxu0 }
 0x177   :  { %v2771_v29 = vadd.f32 %v2770_v28, %v2769_v23  ;;  %v2731_v11 = vadd.f32 %v2730_v15, %v2729_v54  ;;  %v1575_v31 = vadd.f32 %v2768_v3, %v1511_v27 }
 0x178   :  { %v2772_v42 = vpop.f32.mrf.mxu1  ;;  %v2732_v56 = vpop.f32.mrf.mxu0 }
 0x179   :  { %v1516_v62 = vadd.f32 %v2731_v11, %v4012_v30 }
 0x17a   :  { %v2773_v17 = vpop.f32.mrf.mxu1  ;;  %v2733_v21 = vpop.f32.mrf.mxu0 }
 0x17b   :  { %v2774_v53 = vadd.f32 %v2773_v17, %v2772_v42  ;;  %v2734_v60 = vadd.f32 %v2733_v21, %v2732_v56  ;;  %v1580_v37 = vadd.f32 %v2771_v29, %v1516_v62 }
 0x17c   :  { %v2775_v26 = vpop.f32.mrf.mxu1  ;;  %v2735_v38 = vpop.f32.mrf.mxu0 }
 0x17d   :  { %v1519_v1 = vadd.f32 %v2734_v60, %v4012_v30 }
 0x17e   :  { %v2776_v24 = vpop.f32.mrf.mxu1  ;;  %v2736_v55 = vpop.f32.mrf.mxu0 }
 0x17f   :  { %v2777_v34 = vadd.f32 %v2776_v24, %v2775_v26  ;;  %v2737_v43 = vadd.f32 %v2736_v55, %v2735_v38  ;;  %v1583_v44 = vadd.f32 %v2774_v53, %v1519_v1 }
 0x180   :  { %v2778_v49 = vpop.f32.mrf.mxu1  ;;  %v2738_v39 = vpop.f32.mrf.mxu0 }
 0x181   :  { %v1524_v8 = vadd.f32 %v2737_v43, %v4012_v30 }
 0x182   :  { %v2779_v50 = vpop.f32.mrf.mxu1  ;;  %v2739_v61 = vpop.f32.mrf.mxu0 }
 0x183   :  { %v1588_v45 = vadd.f32 %v2777_v34, %v1524_v8 }
 0x184   :  { %v2983_v52 = vpop.f32.mrf.mxu1  ;;  %v2797_v40 = vpop.f32.mrf.mxu0 }
 0x186   :  { %v1691_v57 = vpop.f32.mrf.mxu1  ;;  %v2798_v4 = vpop.f32.mrf.mxu0 }
 0x187   :  { %v2799_v59 = vadd.f32 %v2798_v4, %v2797_v40 }
 0x188   :  { %v2984_v33 = vpop.f32.mrf.mxu1  ;;  %v2800_v46 = vpop.f32.mrf.mxu0 }
 0x189   :  { %v1628_v2 = vadd.f32 %v2799_v59, %v1564_v6 }
 0x18a   :  { %v1694_v5 = vpop.f32.mrf.mxu1  ;;  %v2801_v47 = vpop.f32.mrf.mxu0 }
 0x18b   :  { %v4186_v10 = vadd.f32 %v1691_v57, %v1628_v2  ;;  %v2802_v63 = vadd.f32 %v2801_v47, %v2800_v46 }
 0x18c   :  { %v2803_v12 = vpop.f32.mrf.mxu0  ;;  %v2987_v35 = vpop.f32.mrf.mxu1 }
 0x18d   :  { %v1631_v13 = vadd.f32 %v2802_v63, %v1567_v14 }
 0x18e   :  { %v2804_v41 = vpop.f32.mrf.mxu0  ;;  %v1707_v16 = vpop.f32.mrf.mxu1 }
 0x18f   :  { %v4188_v48 = vadd.f32 %v1694_v5, %v1631_v13  ;;  %v2805_v19 = vadd.f32 %v2804_v41, %v2803_v12 }
 0x190   :  { %v2806_v51 = vpop.f32.mrf.mxu0  ;;  %v2988_v9 = vpop.f32.mrf.mxu1 }
 0x191   :  { %v1636_v3 = vadd.f32 %v2805_v19, %v1572_v22 }
 0x192   :  { %v2807_v20 = vpop.f32.mrf.mxu0  ;;  %v4198_v60 = vpop.f32.mrf.mxu1 }
 0x193   :  { %v4190_v23 = vadd.f32 %v2983_v52, %v1636_v3  ;;  %v2808_v6 = vadd.f32 %v2807_v20, %v2806_v51 }
 0x194   :  { %v2809_v54 = vpop.f32.mrf.mxu0 }
 0x195   :  { %v1639_v27 = vadd.f32 %v2808_v6, %v1575_v31 }
 0x196   :  { %v2810_v28 = vpop.f32.mrf.mxu0 }
 0x197   :  { %v4192_v15 = vadd.f32 %v2984_v33, %v1639_v27  ;;  %v2811_v29 = vadd.f32 %v2810_v28, %v2809_v54 }
 0x198   :  { %v2812_v11 = vpop.f32.mrf.mxu0 }
 0x199   :  { %v1644_v14 = vadd.f32 %v2811_v29, %v1580_v37 }
 0x19a   :  { %v2813_v42 = vpop.f32.mrf.mxu0 }
 0x19b   :  { %v2814_v56 = vadd.f32 %v2813_v42, %v2812_v11  ;;  %v4194_v62 = vadd.f32 %v1707_v16, %v1644_v14 }
 0x19c   :  { %v2815_v17 = vpop.f32.mrf.mxu0 }
 0x19d   :  { %v4196_v21 = vadd.f32 %v2814_v56, %v1583_v44 }
 0x19e   :  { %v2816_v22 = vpop.f32.mrf.mxu0 }
 0x19f   :  { %v2817_v53 = vadd.f32 %v2816_v22, %v2815_v17 }
 0x1a0   :  { %v2818_v26 = vpop.f32.mrf.mxu0 }
 0x1a1   :  { %v1652_v38 = vadd.f32 %v2817_v53, %v1588_v45 }
 0x1a2   :  { %v2819_v31 = vpop.f32.mrf.mxu0 }
 0x1a3   :  { %v4200_v1 = vadd.f32 %v2987_v35, %v1652_v38 }
 0x1a4   :  { %v2883_v24 = vpop.f32.mrf.mxu1  ;;  %v2843_v55 = vpop.f32.mrf.mxu0 }
 0x1a6   :  { %v2884_v34 = vpop.f32.mrf.mxu1  ;;  %v2844_v37 = vpop.f32.mrf.mxu0 }
 0x1a7   :  { %v2845_v9 = vadd.f32 %v2844_v37, %v2843_v55  ;;  %v2885_v27 = vadd.f32 %v2884_v34, %v2883_v24 }
 0x1a8   :  { %v2886_v43 = vpop.f32.mrf.mxu1  ;;  %v2846_v49 = vpop.f32.mrf.mxu0 }
 0x1a9   :  { %v1933_v28 = vadd.f32 %v2845_v9, %v4012_v30 }
 0x1aa   :  { %v2887_v39 = vpop.f32.mrf.mxu1  ;;  %v2847_v8 = vpop.f32.mrf.mxu0 }
 0x1ab   :  { %v2848_v29 = vadd.f32 %v2847_v8, %v2846_v49  ;;  %v1997_v38 = vadd.f32 %v2885_v27, %v1933_v28  ;;  %v2888_v31 = vadd.f32 %v2887_v39, %v2886_v43 }
 0x1ac   :  { %v2889_v50 = vpop.f32.mrf.mxu1  ;;  %v2849_v44 = vpop.f32.mrf.mxu0 }
 0x1ad   :  { %v1936_v26 = vadd.f32 %v2848_v29, %v4012_v30 }
 0x1ae   :  { %v2890_v61 = vpop.f32.mrf.mxu1  ;;  %v2850_v52 = vpop.f32.mrf.mxu0 }
 0x1af   :  { %v2851_v56 = vadd.f32 %v2850_v52, %v2849_v44  ;;  %v2891_v24 = vadd.f32 %v2890_v61, %v2889_v50  ;;  %v2000_v52 = vadd.f32 %v2888_v31, %v1936_v26  ;;  %v1722_v31 = vmax.f32 %v4188_v48, 0.0 }
 0x1b0   :  { %v2892_v40 = vpop.f32.mrf.mxu1  ;;  %v2852_v57 = vpop.f32.mrf.mxu0 }
 0x1b1   :  { %v1941_v34 = vadd.f32 %v2851_v56, %v4012_v30 }
 0x1b2   :  { %v2893_v4 = vpop.f32.mrf.mxu1  ;;  %v2853_v59 = vpop.f32.mrf.mxu0 }
 0x1b3   :  { %v2005_v39 = vadd.f32 %v2891_v24, %v1941_v34  ;;  %v2894_v29 = vadd.f32 %v2893_v4, %v2892_v40 }
 0x1b4   :  { %v2895_v45 = vpop.f32.mrf.mxu1  ;;  %v2855_v33 = vpop.f32.mrf.mxu0 }
 0x1b6   :  { %v2896_v46 = vpop.f32.mrf.mxu1  ;;  %v2856_v2 = vpop.f32.mrf.mxu0 }
 0x1b7   :  { %v2857_v9 = vadd.f32 %v2856_v2, %v2855_v33 }
 0x1b8   :  { %v4202_v5 = vpop.f32.mrf.mxu1  ;;  %v2858_v47 = vpop.f32.mrf.mxu0 }
 0x1b9   :  { %v1949_v33 = vadd.f32 %v2857_v9, %v4012_v30 }
 0x1ba   :  { %v4204_v63 = vpop.f32.mrf.mxu1  ;;  %v2859_v12 = vpop.f32.mrf.mxu0 }
 0x1bb   :  { %v2860_v2 = vadd.f32 %v2859_v12, %v2858_v47  ;;  %v1727_v12 = vmax.f32 %v4200_v1, 0.0 }
 0x1bc   :  { %v2901_v35 = vpop.f32.mrf.mxu1  ;;  %v2861_v13 = vpop.f32.mrf.mxu0 }
 0x1bd   :  { %v1952_v47 = vadd.f32 %v2860_v2, %v4012_v30 }
 0x1be   :  { %v2902_v41 = vpop.f32.mrf.mxu1  ;;  %v2862_v16 = vpop.f32.mrf.mxu0 }
 0x1bf   :  { %v2863_v11 = vadd.f32 %v2862_v16, %v2861_v13  ;;  %v2903_v55 = vadd.f32 %v2902_v41, %v2901_v35  ;;  %v2854_v13 = vadd.f32 %v2853_v59, %v2852_v57 }
 0x1c0   :  { %v2904_v19 = vpop.f32.mrf.mxu1  ;;  %v2864_v51 = vpop.f32.mrf.mxu0 }
 0x1c1   :  { %v1957_v37 = vadd.f32 %v2863_v11, %v4012_v30  ;;  %v1944_v28 = vadd.f32 %v2854_v13, %v4012_v30  ;;  %v1721_v11 = vmax.f32 %v4186_v10, 0.0 }
 0x1c2   :  { %v2905_v3 = vpop.f32.mrf.mxu1  ;;  %v2865_v20 = vpop.f32.mrf.mxu0 }
 0x1c3   :  { %v2021_v27 = vadd.f32 %v2903_v55, %v1957_v37  ;;  %v2008_v4 = vadd.f32 %v2894_v29, %v1944_v28 }
 0x1c4   :  { %v2941_v6 = vpop.f32.mrf.mxu1  ;;  %v2923_v54 = vpop.f32.mrf.mxu0 }
 0x1c6   :  { %v2942_v14 = vpop.f32.mrf.mxu1  ;;  %v2924_v42 = vpop.f32.mrf.mxu0 }
 0x1c7   :  { %v2925_v17 = vadd.f32 %v2924_v42, %v2923_v54  ;;  %v2943_v3 = vadd.f32 %v2942_v14, %v2941_v6  ;;  %v2897_v42 = vadd.f32 %v2896_v46, %v2895_v45 }
 0x1c8   :  { %v2944_v22 = vpop.f32.mrf.mxu1  ;;  %v2926_v53 = vpop.f32.mrf.mxu0 }
 0x1c9   :  { %v2061_v8 = vadd.f32 %v2925_v17, %v1997_v38  ;;  %v2085_v14 = vadd.f32 %v2943_v3, %v2021_v27  ;;  %v1723_v38 = vmax.f32 %v4190_v23, 0.0  ;;  %v2013_v24 = vadd.f32 %v2897_v42, %v1949_v33 }
 0x1ca   :  { %v2945_v19 = vpop.f32.mrf.mxu1  ;;  %v2927_v51 = vpop.f32.mrf.mxu0  ;;  %v1724_v3 = vmax.f32 %v4192_v15, 0.0  ;;  %v1711_v15 = vadd.f32 %v4198_v60, %v4196_v21 }
 0x1cb   :  { %v2928_v49 = vadd.f32 %v2927_v51, %v2926_v53 }
 0x1cc   :  { %v2995_v16 = vpop.f32.mrf.mxu1  ;;  %v2929_v44 = vpop.f32.mrf.mxu0 }
 0x1cd   :  { %v2064_v41 = vadd.f32 %v2928_v49, %v2000_v52 }
 0x1ce   :  { %v2124_v20 = vpop.f32.mrf.mxu1  ;;  %v2930_v54 = vpop.f32.mrf.mxu0 }
 0x1cf   :  { %v2125_v43 = vadd.f32 %v2124_v20, %v2061_v8  ;;  %v2931_v35 = vadd.f32 %v2930_v54, %v2929_v44 }
 0x1d0   :  { %v2996_v50 = vpop.f32.mrf.mxu1  ;;  %v2932_v61 = vpop.f32.mrf.mxu0 }
 0x1d1   :  { %v2154_v57 = vmax.f32 %v2125_v43, 0.0  ;;  %v2069_v59 = vadd.f32 %v2931_v35, %v2005_v39  ;;  %v1725_v43 = vmax.f32 %v4194_v62, 0.0 }
 0x1d2   :  { %v2127_v6 = vpop.f32.mrf.mxu1  ;;  %v2933_v56 = vpop.f32.mrf.mxu0 }
 0x1d3   :  { %v2161_v17 = vmax.f32 %v1721_v11, %v2154_v57  ;;  %v2133_v22 = vadd.f32 %v2995_v16, %v2069_v59  ;;  %v2128_v53 = vadd.f32 %v2127_v6, %v2064_v41  ;;  %v2934_v26 = vadd.f32 %v2933_v56, %v2932_v61 }
 0x1d4   :  { %v2999_v40 = vpop.f32.mrf.mxu1  ;;  %v2935_v10 = vpop.f32.mrf.mxu0  ;;  %v1726_v61 = vmax.f32 %v1711_v15, 0.0 }
 0x1d5   :  { %v2168_v55 = vmax.f32 %v4159_v7, %v2161_v17  ;;  %v2156_v45 = vmax.f32 %v2133_v22, 0.0  ;;  %v2155_v46 = vmax.f32 %v2128_v53, 0.0  ;;  %v2149_v37 = vadd.f32 %v2999_v40, %v2085_v14 }
 0x1d6   :  { %v2072_v19 = vadd.f32 %v2934_v26, %v2008_v4  ;;  %v2140_v51 = vpop.f32.mrf.mxu1  ;;  %v2936_v34 = vpop.f32.mrf.mxu0  ;;  %v2900_v7 = vadd.f32 %v4204_v63, %v4202_v5 }
 0x1d7   :  { %2175 = vst [vmem:[%s4254_s3] sm:$0xff] %v2168_v55  ;;  %v2163_v48 = vmax.f32 %v1723_v38, %v2156_v45  ;;  %v2162_v23 = vmax.f32 %v1722_v31, %v2155_v46  ;;  %v2160_v49 = vmax.f32 %v2149_v37, 0.0  ;;  %v2937_v8 = vadd.f32 %v2936_v34, %v2935_v10 }
 0x1d8   :  { %v2136_v13 = vadd.f32 %v2996_v50, %v2072_v19  ;;  %v3000_v16 = vpop.f32.mrf.mxu1  ;;  %v2938_v30 = vpop.f32.mrf.mxu0 }
 0x1d9   :  { %v2170_v1 = vmax.f32 %v4165_v25, %v2163_v48  ;;  %v2169_v44 = vmax.f32 %v4162_v18, %v2162_v23  ;;  %v2167_v52 = vmax.f32 %v1727_v12, %v2160_v49  ;;  %v2077_v9 = vadd.f32 %v2937_v8, %v2013_v24 }
 0x1da   :  { %v2157_v20 = vmax.f32 %v2136_v13, 0.0  ;;  %v2939_v54 = vpop.f32.mrf.mxu0  ;;  %v2016_v25 = vadd.f32 %v2900_v7, %v1952_v47  ;;  %v2143_v28 = vpop.f32.mrf.mxu1 }
 0x1db   :  { %2177 = vst [vmem:[%s4254_s3 + $0x10] sm:$0xff] %v2170_v1  ;;  %2176 = vst [vmem:[%s4254_s3 + $0x8] sm:$0xff] %v2169_v44  ;;  %v2174_v5 = vmax.f32 %v4177_v0, %v2167_v52  ;;  %v2141_v63 = vadd.f32 %v2140_v51, %v2077_v9  ;;  %v2940_v27 = vadd.f32 %v2939_v54, %v2938_v30 }
 0x1dc   :  { %v2164_v18 = vmax.f32 %v1724_v3, %v2157_v20 }
 0x1dd   :  { %2181 = vst [vmem:[%s4254_s3 + $0x30] sm:$0xff] %v2174_v5  ;;  %v2158_v39 = vmax.f32 %v2141_v63, 0.0  ;;  %v2080_v35 = vadd.f32 %v2940_v27, %v2016_v25 }
 0x1de   :  { %v2171_v41 = vmax.f32 %v4168_v36, %v2164_v18 }
 0x1df   :  { %v2165_v50 = vmax.f32 %v1725_v43, %v2158_v39  ;;  %v2144_v0 = vadd.f32 %v2143_v28, %v2080_v35 }
 0x1e0   :  { %2178 = vst [vmem:[%s4254_s3 + $0x18] sm:$0xff] %v2171_v41 }
 0x1e1   :  { %v2172_v62 = vmax.f32 %v4171_v32, %v2165_v50  ;;  %v2159_v29 = vmax.f32 %v2144_v0, 0.0 }
 0x1e3   :  { %2179 = vst [vmem:[%s4254_s3 + $0x20] sm:$0xff] %v2172_v62  ;;  %v2166_v21 = vmax.f32 %v1726_v61, %v2159_v29 }
 0x1e5   :  { %v2173_v60 = vmax.f32 %v4174_v58, %v2166_v21 }
 0x1e7   :  { %2180 = vst [vmem:[%s4254_s3 + $0x28] sm:$0xff] %v2173_v60 }

// kernel: lenet5_forward.5
= control target key start
LH: loop header
LB: loop body
LE: loop exit
PB: predicated region body
PF: predicated region fallthrough
CT: control target
= control target key end

     0   :  { %vm7332_vm0 = vmmov 0   ;;  %s9509_s1 = inlined_call_operand.vmem [shape: bf16[3200,384], index: 1, kind: input, shape index: {}]   ;;  %s9510_s0 = inlined_call_operand.vmem [shape: bf16[8,3200], index: 0, kind: input, shape index: {}]   ;;  %s9511_s2 = inlined_call_operand.vmem [shape: f32[1,384], index: 2, kind: input, shape index: {}]   ;;  %s9512_s3 = inlined_call_operand.vmem [shape: bf16[384,128], index: 3, kind: input, shape index: {}]   ;;  %s9513_s4 = inlined_call_operand.vmem [shape: f32[1,128], index: 4, kind: input, shape index: {}]   ;;  %s9514_s5 = inlined_call_operand.vmem [shape: f32[8,128], index: 5, kind: output, shape index: {}]  }
   0x1   :  { %v6479_v0 = vld [vmem:[%s9509_s1 + $0xac] ss:$12 sps:$4 sm:$0xff]   ;;  %v6483_v2 = vld [vmem:[%s9509_s1 + $0xa8] ss:$12 sps:$4 sm:$0xff]   ;;  %v6489_v6 = vld [vmem:[%s9509_s1 + $0x90] ss:$12 sps:$4 sm:$0xff]  }
   0x2   :  { %v6481_v1 = vld [vmem:[%s9509_s1 + $0x22c] ss:$12 sps:$4 sm:$0xff]   ;;  %4139 = vmatprep.subr.bf16.mxu0 %v6479_v0  ;;  %v6484_v3 = vld [vmem:[%s9509_s1 + $0x228] ss:$12 sps:$4 sm:$0xff]   ;;  %v6490_v7 = vld [vmem:[%s9509_s1 + $0x210] ss:$12 sps:$4 sm:$0xff]  }
   0x3   :  { %4180 = vmatprep.subr.bf16.mxu1 %v6481_v1  ;;  %v6485_v4 = vld [vmem:[%s9509_s1 + $0x94] ss:$12 sps:$4 sm:$0xff]   ;;  %4140 = vmatpush1.bf16.msra.mxu0 %v6483_v2  ;;  %v6491_v8 = vld [vmem:[%s9509_s1 + $0x7c] ss:$12 sps:$4 sm:$0xff]   ;;  %v6495_v10 = vld [vmem:[%s9509_s1 + $0x78] ss:$12 sps:$4 sm:$0xff]  }
   0x4   :  { %4181 = vmatpush1.bf16.msra.mxu1 %v6484_v3  ;;  %v6487_v5 = vld [vmem:[%s9509_s1 + $0x214] ss:$12 sps:$4 sm:$0xff]   ;;  %4141 = vmatprep.subr.bf16.mxu0 %v6485_v4  ;;  %v6493_v9 = vld [vmem:[%s9509_s1 + $0x1fc] ss:$12 sps:$4 sm:$0xff]   ;;  %v6496_v11 = vld [vmem:[%s9509_s1 + $0x1f8] ss:$12 sps:$4 sm:$0xff]  }
   0x5   :  { %4182 = vmatprep.subr.bf16.mxu1 %v6487_v5  ;;  %v6497_v12 = vld [vmem:[%s9509_s1 + $0x64] ss:$12 sps:$4 sm:$0xff]   ;;  %v6501_v14 = vld [vmem:[%s9509_s1 + $0x60] ss:$12 sps:$4 sm:$0xff]   ;;  %v6507_v18 = vld [vmem:[%s9509_s1 + $0x48] ss:$12 sps:$4 sm:$0xff]  }
   0x6   :  { %v6499_v13 = vld [vmem:[%s9509_s1 + $0x1e4] ss:$12 sps:$4 sm:$0xff]   ;;  %v6502_v15 = vld [vmem:[%s9509_s1 + $0x1e0] ss:$12 sps:$4 sm:$0xff]   ;;  %v6508_v19 = vld [vmem:[%s9509_s1 + $0x1c8] ss:$12 sps:$4 sm:$0xff]  }
   0x7   :  { %4142 = vmatpush1.bf16.msra.mxu0 %v6489_v6  ;;  %v6503_v16 = vld [vmem:[%s9509_s1 + $0x4c] ss:$12 sps:$4 sm:$0xff]   ;;  %v6509_v20 = vld [vmem:[%s9509_s1 + $0x34] ss:$12 sps:$4 sm:$0xff]   ;;  %v6513_v22 = vld [vmem:[%s9509_s1 + $0x30] ss:$12 sps:$4 sm:$0xff]  }
   0x8   :  { %4183 = vmatpush1.bf16.msra.mxu1 %v6490_v7  ;;  %4143 = vmatprep.subr.bf16.mxu0 %v6491_v8  ;;  %v6505_v17 = vld [vmem:[%s9509_s1 + $0x1cc] ss:$12 sps:$4 sm:$0xff]   ;;  %v6511_v21 = vld [vmem:[%s9509_s1 + $0x1b4] ss:$12 sps:$4 sm:$0xff]   ;;  %v6514_v23 = vld [vmem:[%s9509_s1 + $0x1b0] ss:$12 sps:$4 sm:$0xff]  }
   0x9   :  { %4184 = vmatprep.subr.bf16.mxu1 %v6493_v9  ;;  %v6515_v24 = vld [vmem:[%s9509_s1 + $0x1c] ss:$12 sps:$4 sm:$0xff]   ;;  %v6519_v26 = vld [vmem:[%s9509_s1 + $0x18] ss:$12 sps:$4 sm:$0xff]   ;;  %v6525_v30 = vld [vmem:[%s9509_s1] ss:$12 sps:$4 sm:$0xff]  }
   0xa   :  { %v6517_v25 = vld [vmem:[%s9509_s1 + $0x19c] ss:$12 sps:$4 sm:$0xff]   ;;  %v6520_v27 = vld [vmem:[%s9509_s1 + $0x198] ss:$12 sps:$4 sm:$0xff]   ;;  %v6526_v31 = vld [vmem:[%s9509_s1 + $0x180] ss:$12 sps:$4 sm:$0xff]  }
   0xb   :  { %4144 = vmatpush1.bf16.msra.mxu0 %v6495_v10  ;;  %v6521_v28 = vld [vmem:[%s9509_s1 + $0x4] ss:$12 sps:$4 sm:$0xff]   ;;  %v6527_v32 = vld [vmem:[%s9509_s1 + $0x16c] ss:$12 sps:$4 sm:$0xff]   ;;  %v6531_v34 = vld [vmem:[%s9509_s1 + $0x168] ss:$12 sps:$4 sm:$0xff]  }
   0xc   :  { %4185 = vmatpush1.bf16.msra.mxu1 %v6496_v11  ;;  %4145 = vmatprep.subr.bf16.mxu0 %v6497_v12  ;;  %v6523_v29 = vld [vmem:[%s9509_s1 + $0x184] ss:$12 sps:$4 sm:$0xff]   ;;  %v6529_v33 = vld [vmem:[%s9509_s1 + $0x2ec] ss:$12 sps:$4 sm:$0xff]   ;;  %v6532_v35 = vld [vmem:[%s9509_s1 + $0x2e8] ss:$12 sps:$4 sm:$0xff]  }
   0xd   :  { %4186 = vmatprep.subr.bf16.mxu1 %v6499_v13  ;;  %v6533_v36 = vld [vmem:[%s9509_s1 + $0x154] ss:$12 sps:$4 sm:$0xff]   ;;  %v6537_v38 = vld [vmem:[%s9509_s1 + $0x150] ss:$12 sps:$4 sm:$0xff]   ;;  %v6543_v42 = vld [vmem:[%s9509_s1 + $0x138] ss:$12 sps:$4 sm:$0xff]  }
   0xe   :  { %v6535_v37 = vld [vmem:[%s9509_s1 + $0x2d4] ss:$12 sps:$4 sm:$0xff]   ;;  %v6538_v39 = vld [vmem:[%s9509_s1 + $0x2d0] ss:$12 sps:$4 sm:$0xff]   ;;  %v6544_v43 = vld [vmem:[%s9509_s1 + $0x2b8] ss:$12 sps:$4 sm:$0xff]  }
   0xf   :  { %4146 = vmatpush1.bf16.msra.mxu0 %v6501_v14  ;;  %v6539_v40 = vld [vmem:[%s9509_s1 + $0x13c] ss:$12 sps:$4 sm:$0xff]   ;;  %v6545_v44 = vld [vmem:[%s9509_s1 + $0x124] ss:$12 sps:$4 sm:$0xff]   ;;  %v6549_v49 = vld [vmem:[%s9509_s1 + $0x120] ss:$12 sps:$4 sm:$0xff]  }
  0x10   :  { %4187 = vmatpush1.bf16.msra.mxu1 %v6502_v15  ;;  %4147 = vmatprep.subr.bf16.mxu0 %v6503_v16  ;;  %v6541_v41 = vld [vmem:[%s9509_s1 + $0x2bc] ss:$12 sps:$4 sm:$0xff]   ;;  %v6547_v45 = vld [vmem:[%s9509_s1 + $0x2a4] ss:$12 sps:$4 sm:$0xff]   ;;  %v6550_v50 = vld [vmem:[%s9509_s1 + $0x2a0] ss:$12 sps:$4 sm:$0xff]  }
  0x11   :  { %4188 = vmatprep.subr.bf16.mxu1 %v6505_v17  ;;  %v21_v46 = vld [vmem:[%s9510_s0] sm:$0xff]  ;;  %v22_v48 = vld [vmem:[%s9510_s0 + $0x8] sm:$0xff]  ;;  %v6561_v58 = vld [vmem:[%s9509_s1 + $0xf0] ss:$12 sps:$4 sm:$0xff]  }
  0x12   :  { %v7504_v47 = vcombine.high %v21_v46, %v21_v46  ;;  %v7515_v51 = vcombine.high %v22_v48, %v22_v48  ;;  %v6551_v52 = vld [vmem:[%s9509_s1 + $0x10c] ss:$12 sps:$4 sm:$0xff]   ;;  %v6555_v54 = vld [vmem:[%s9509_s1 + $0x108] ss:$12 sps:$4 sm:$0xff]   ;;  %v6562_v59 = vld [vmem:[%s9509_s1 + $0x270] ss:$12 sps:$4 sm:$0xff]   ;;  %v7573_v6 = vcombine.low %v21_v46, %v21_v46  ;;  %v7575_v7 = vcombine.low %v22_v48, %v22_v48 }
  0x13   :  { %4148 = vmatpush1.bf16.msra.mxu0 %v6507_v18  ;;  %v6553_v53 = vld [vmem:[%s9509_s1 + $0x28c] ss:$12 sps:$4 sm:$0xff]   ;;  %v6556_v55 = vld [vmem:[%s9509_s1 + $0x288] ss:$12 sps:$4 sm:$0xff]   ;;  %v6569_v0 = vld [vmem:[%s9509_s1 + $0xc4] ss:$12 sps:$4 sm:$0xff]  }
  0x14   :  { %4189 = vmatpush1.bf16.msra.mxu1 %v6508_v19  ;;  %4149 = vmatprep.subr.bf16.mxu0 %v6509_v20  ;;  %v6557_v56 = vld [vmem:[%s9509_s1 + $0xf4] ss:$12 sps:$4 sm:$0xff]   ;;  %v6563_v60 = vld [vmem:[%s9509_s1 + $0xdc] ss:$12 sps:$4 sm:$0xff]   ;;  %v6567_v62 = vld [vmem:[%s9509_s1 + $0xd8] ss:$12 sps:$4 sm:$0xff]  }
  0x15   :  { %4190 = vmatprep.subr.bf16.mxu1 %v6511_v21  ;;  %4171 = vmatprep.mubr.bf16.mxu0 %v7504_v47  ;;  %v6559_v57 = vld [vmem:[%s9509_s1 + $0x274] ss:$12 sps:$4 sm:$0xff]   ;;  %v6565_v61 = vld [vmem:[%s9509_s1 + $0x25c] ss:$12 sps:$4 sm:$0xff]   ;;  %v6568_v63 = vld [vmem:[%s9509_s1 + $0x258] ss:$12 sps:$4 sm:$0xff]  }
  0x16   :  { %4212 = vmatprep.mubr.bf16.mxu1 %v7515_v51  ;;  %v6571_v1 = vld [vmem:[%s9509_s1 + $0x244] ss:$12 sps:$4 sm:$0xff]   ;;  %v6573_v2 = vld [vmem:[%s9509_s1 + $0xc0] ss:$12 sps:$4 sm:$0xff]   ;;  %v6579_v8 = vld [vmem:[%s9509_s1 + $0x3a8] ss:$12 sps:$4 sm:$0xff]  }
  0x17   :  { %4150 = vmatpush1.bf16.msra.mxu0 %v6513_v22  ;;  %v6574_v3 = vld [vmem:[%s9509_s1 + $0x240] ss:$12 sps:$4 sm:$0xff]   ;;  %v6582_v9 = vld [vmem:[%s9509_s1 + $0x528] ss:$12 sps:$4 sm:$0xff]   ;;  %v6585_v12 = vld [vmem:[%s9509_s1 + $0x390] ss:$12 sps:$4 sm:$0xff]  }
  0x18   :  { %4191 = vmatpush1.bf16.msra.mxu1 %v6514_v23  ;;  %4151 = vmatprep.subr.bf16.mxu0 %v6515_v24  ;;  %v6581_v4 = vld [vmem:[%s9509_s1 + $0x3ac] ss:$12 sps:$4 sm:$0xff]   ;;  %v6587_v10 = vld [vmem:[%s9509_s1 + $0x394] ss:$12 sps:$4 sm:$0xff]   ;;  %v6588_v13 = vld [vmem:[%s9509_s1 + $0x510] ss:$12 sps:$4 sm:$0xff]  }
  0x19   :  { %4192 = vmatprep.subr.bf16.mxu1 %v6517_v25  ;;  %v6584_v5 = vld [vmem:[%s9509_s1 + $0x52c] ss:$12 sps:$4 sm:$0xff]   ;;  %v6590_v11 = vld [vmem:[%s9509_s1 + $0x514] ss:$12 sps:$4 sm:$0xff]   ;;  %v6593_v14 = vld [vmem:[%s9509_s1 + $0x37c] ss:$12 sps:$4 sm:$0xff]  }
  0x1a   :  { %v6596_v15 = vld [vmem:[%s9509_s1 + $0x4fc] ss:$12 sps:$4 sm:$0xff]   ;;  %v6591_v16 = vld [vmem:[%s9509_s1 + $0x378] ss:$12 sps:$4 sm:$0xff]   ;;  %v6597_v20 = vld [vmem:[%s9509_s1 + $0x360] ss:$12 sps:$4 sm:$0xff]  }
  0x1b   :  { %4152 = vmatpush1.bf16.msra.mxu0 %v6519_v26  ;;  %v6594_v17 = vld [vmem:[%s9509_s1 + $0x4f8] ss:$12 sps:$4 sm:$0xff]   ;;  %v6600_v21 = vld [vmem:[%s9509_s1 + $0x4e0] ss:$12 sps:$4 sm:$0xff]   ;;  %v6603_v24 = vld [vmem:[%s9509_s1 + $0x348] ss:$12 sps:$4 sm:$0xff]  }
  0x1c   :  { %4193 = vmatpush1.bf16.msra.mxu1 %v6520_v27  ;;  %4153 = vmatprep.subr.bf16.mxu0 %v6521_v28  ;;  %v6599_v18 = vld [vmem:[%s9509_s1 + $0x364] ss:$12 sps:$4 sm:$0xff]   ;;  %v6605_v22 = vld [vmem:[%s9509_s1 + $0x34c] ss:$12 sps:$4 sm:$0xff]   ;;  %v6606_v25 = vld [vmem:[%s9509_s1 + $0x4c8] ss:$12 sps:$4 sm:$0xff]  }
  0x1d   :  { %4194 = vmatprep.subr.bf16.mxu1 %v6523_v29  ;;  %v6602_v19 = vld [vmem:[%s9509_s1 + $0x4e4] ss:$12 sps:$4 sm:$0xff]   ;;  %v6608_v23 = vld [vmem:[%s9509_s1 + $0x4cc] ss:$12 sps:$4 sm:$0xff]   ;;  %v6611_v26 = vld [vmem:[%s9509_s1 + $0x334] ss:$12 sps:$4 sm:$0xff]  }
  0x1e   :  { %v6614_v27 = vld [vmem:[%s9509_s1 + $0x4b4] ss:$12 sps:$4 sm:$0xff]   ;;  %v6609_v28 = vld [vmem:[%s9509_s1 + $0x330] ss:$12 sps:$4 sm:$0xff]  }
  0x1f   :  { %4154 = vmatpush1.bf16.msra.mxu0 %v6525_v30  ;;  %v6612_v29 = vld [vmem:[%s9509_s1 + $0x4b0] ss:$12 sps:$4 sm:$0xff]   ;;  %v6635_v46 = vld [vmem:[%s9509_s1 + $0x454] ss:$12 sps:$4 sm:$0xff]  }
  0x20   :  { %4195 = vmatpush1.bf16.msra.mxu1 %v6526_v31  ;;  %4155 = vmatprep.subr.bf16.mxu0 %v6527_v32  ;;  %v6617_v30 = vld [vmem:[%s9509_s1 + $0x31c] ss:$12 sps:$4 sm:$0xff]   ;;  %v7654_v32 = vld [vmem:[%s9510_s0 + $0x10] sm:$0xff] }
  0x21   :  { %4196 = vmatprep.subr.bf16.mxu1 %v6529_v33  ;;  %v6620_v31 = vld [vmem:[%s9509_s1 + $0x49c] ss:$12 sps:$4 sm:$0xff]   ;;  %v6638_v48 = vld [vmem:[%s9509_s1 + $0x5d4] ss:$12 sps:$4 sm:$0xff]  }
  0x22   :  { %v7659_v33 = vld [vmem:[%s9510_s0 + $0x18] sm:$0xff] }
  0x23   :  { %4156 = vmatpush2.bf16.msra.mxu0 %v6531_v34  ;;  %v6615_v34 = vld [vmem:[%s9509_s1 + $0x318] ss:$12 sps:$4 sm:$0xff]  }
  0x24   :  { %4197 = vmatpush2.bf16.msra.mxu1 %v6532_v35  ;;  %4157 = vmatprep.subr.bf16.mxu0 %v6533_v36  ;;  %v6618_v35 = vld [vmem:[%s9509_s1 + $0x498] ss:$12 sps:$4 sm:$0xff]   ;;  %v7669_v36 = vcombine.high %v7654_v32, %v7654_v32 }
  0x25   :  { %4198 = vmatprep.subr.bf16.mxu1 %v6535_v37  ;;  %v7673_v37 = vcombine.high %v7659_v33, %v7659_v33 }
  0x27   :  { %4158 = vmatpush2.bf16.msra.mxu0 %v6537_v38  ;;  %v6623_v38 = vld [vmem:[%s9509_s1 + $0x304] ss:$12 sps:$4 sm:$0xff]  }
  0x28   :  { %4199 = vmatpush2.bf16.msra.mxu1 %v6538_v39  ;;  %4159 = vmatprep.subr.bf16.mxu0 %v6539_v40  ;;  %v6626_v39 = vld [vmem:[%s9509_s1 + $0x484] ss:$12 sps:$4 sm:$0xff]   ;;  %v6621_v40 = vld [vmem:[%s9509_s1 + $0x300] ss:$12 sps:$4 sm:$0xff]  }
  0x29   :  { %4200 = vmatprep.subr.bf16.mxu1 %v6541_v41  ;;  %v6624_v41 = vld [vmem:[%s9509_s1 + $0x480] ss:$12 sps:$4 sm:$0xff]  }
  0x2b   :  { %4160 = vmatpush2.bf16.msra.mxu0 %v6543_v42  ;;  %v6629_v42 = vld [vmem:[%s9509_s1 + $0x46c] ss:$12 sps:$4 sm:$0xff]  }
  0x2c   :  { %4201 = vmatpush2.bf16.msra.mxu1 %v6544_v43  ;;  %4161 = vmatprep.subr.bf16.mxu0 %v6545_v44  ;;  %v6632_v43 = vld [vmem:[%s9509_s1 + $0x5ec] ss:$12 sps:$4 sm:$0xff]   ;;  %v6627_v44 = vld [vmem:[%s9509_s1 + $0x468] ss:$12 sps:$4 sm:$0xff]  }
  0x2d   :  { %4202 = vmatprep.subr.bf16.mxu1 %v6547_v45  ;;  %v6630_v45 = vld [vmem:[%s9509_s1 + $0x5e8] ss:$12 sps:$4 sm:$0xff]  }
  0x2f   :  { %4162 = vmatpush2.bf16.msra.mxu0 %v6549_v49  ;;  %v6633_v49 = vld [vmem:[%s9509_s1 + $0x450] ss:$12 sps:$4 sm:$0xff]  }
  0x30   :  { %4203 = vmatpush2.bf16.msra.mxu1 %v6550_v50  ;;  %4163 = vmatprep.subr.bf16.mxu0 %v6551_v52  ;;  %v6636_v50 = vld [vmem:[%s9509_s1 + $0x5d0] ss:$12 sps:$4 sm:$0xff]  }
  0x31   :  { %4204 = vmatprep.subr.bf16.mxu1 %v6553_v53  ;;  %v6641_v52 = vld [vmem:[%s9509_s1 + $0x43c] ss:$12 sps:$4 sm:$0xff]  }
  0x32   :  { %v6644_v53 = vld [vmem:[%s9509_s1 + $0x5bc] ss:$12 sps:$4 sm:$0xff]  }
  0x33   :  { %4164 = vmatpush2.bf16.msra.mxu0 %v6555_v54  ;;  %v6639_v54 = vld [vmem:[%s9509_s1 + $0x438] ss:$12 sps:$4 sm:$0xff]  }
  0x34   :  { %4205 = vmatpush2.bf16.msra.mxu1 %v6556_v55  ;;  %4165 = vmatprep.subr.bf16.mxu0 %v6557_v56  ;;  %v6642_v55 = vld [vmem:[%s9509_s1 + $0x5b8] ss:$12 sps:$4 sm:$0xff]  }
  0x35   :  { %4206 = vmatprep.subr.bf16.mxu1 %v6559_v57  ;;  %v6647_v56 = vld [vmem:[%s9509_s1 + $0x424] ss:$12 sps:$4 sm:$0xff]  }
  0x36   :  { %v6650_v57 = vld [vmem:[%s9509_s1 + $0x5a4] ss:$12 sps:$4 sm:$0xff]  }
  0x37   :  { %4166 = vmatpush2.bf16.msra.mxu0 %v6561_v58  ;;  %v6645_v58 = vld [vmem:[%s9509_s1 + $0x420] ss:$12 sps:$4 sm:$0xff]  }
  0x38   :  { %4207 = vmatpush2.bf16.msra.mxu1 %v6562_v59  ;;  %4167 = vmatprep.subr.bf16.mxu0 %v6563_v60  ;;  %v6648_v59 = vld [vmem:[%s9509_s1 + $0x5a0] ss:$12 sps:$4 sm:$0xff]  }
  0x39   :  { %4208 = vmatprep.subr.bf16.mxu1 %v6565_v61  ;;  %v6653_v60 = vld [vmem:[%s9509_s1 + $0x40c] ss:$12 sps:$4 sm:$0xff]  }
  0x3a   :  { %v6656_v61 = vld [vmem:[%s9509_s1 + $0x58c] ss:$12 sps:$4 sm:$0xff]  }
  0x3b   :  { %4168 = vmatpush2.bf16.msra.mxu0 %v6567_v62  ;;  %v6651_v62 = vld [vmem:[%s9509_s1 + $0x408] ss:$12 sps:$4 sm:$0xff]  }
  0x3c   :  { %4209 = vmatpush2.bf16.msra.mxu1 %v6568_v63  ;;  %4169 = vmatprep.subr.bf16.mxu0 %v6569_v0  ;;  %v6654_v63 = vld [vmem:[%s9509_s1 + $0x588] ss:$12 sps:$4 sm:$0xff]  }
  0x3d   :  { %4210 = vmatprep.subr.bf16.mxu1 %v6571_v1  ;;  %v6659_v0 = vld [vmem:[%s9509_s1 + $0x3f4] ss:$12 sps:$4 sm:$0xff]  }
  0x3e   :  { %v6662_v1 = vld [vmem:[%s9509_s1 + $0x574] ss:$12 sps:$4 sm:$0xff]  }
  0x3f   :  { %4170 = vmatpush2.bf16.msra.mxu0 %v6573_v2  ;;  %v6657_v2 = vld [vmem:[%s9509_s1 + $0x3f0] ss:$12 sps:$4 sm:$0xff]  }
  0x40   :  { %4211 = vmatpush2.bf16.msra.mxu1 %v6574_v3  ;;  %4221 = vmatprep.subr.bf16.mxu0 %v6581_v4  ;;  %v6660_v3 = vld [vmem:[%s9509_s1 + $0x570] ss:$12 sps:$4 sm:$0xff]  }
  0x41   :  { %4262 = vmatprep.subr.bf16.mxu1 %v6584_v5  ;;  %v6665_v4 = vld [vmem:[%s9509_s1 + $0x3dc] ss:$12 sps:$4 sm:$0xff]  }
  0x42   :  { %4172 = vmatmul.mubr.bf16.vlgmr.msra.gmra.mxu0 %v7573_v6  ;;  %v6668_v5 = vld [vmem:[%s9509_s1 + $0x55c] ss:$12 sps:$4 sm:$0xff]  }
  0x43   :  { %4213 = vmatmul.mubr.bf16.vlgmr.msra.gmra.mxu1 %v7575_v7  ;;  %4222 = vmatpush1.bf16.msra.mxu0 %v6579_v8  ;;  %v6663_v8 = vld [vmem:[%s9509_s1 + $0x3d8] ss:$12 sps:$4 sm:$0xff]  }
  0x44   :  { %4263 = vmatpush1.bf16.msra.mxu1 %v6582_v9  ;;  %4223 = vmatprep.subr.bf16.mxu0 %v6587_v10  ;;  %v6666_v9 = vld [vmem:[%s9509_s1 + $0x558] ss:$12 sps:$4 sm:$0xff]  }
  0x45   :  { %4264 = vmatprep.subr.bf16.mxu1 %v6590_v11  ;;  %4253 = vmatprep.mubr.bf16.mxu0 %v7669_v36  ;;  %v6671_v10 = vld [vmem:[%s9509_s1 + $0x3c4] ss:$12 sps:$4 sm:$0xff]  }
  0x46   :  { %4294 = vmatprep.mubr.bf16.mxu1 %v7673_v37  ;;  %v6674_v11 = vld [vmem:[%s9509_s1 + $0x544] ss:$12 sps:$4 sm:$0xff]  }
  0x47   :  { %4224 = vmatpush1.bf16.msra.mxu0 %v6585_v12  ;;  %v6669_v12 = vld [vmem:[%s9509_s1 + $0x3c0] ss:$12 sps:$4 sm:$0xff]  }
  0x48   :  { %4265 = vmatpush1.bf16.msra.mxu1 %v6588_v13  ;;  %4225 = vmatprep.subr.bf16.mxu0 %v6593_v14  ;;  %v6672_v13 = vld [vmem:[%s9509_s1 + $0x540] ss:$12 sps:$4 sm:$0xff]  }
  0x49   :  { %4266 = vmatprep.subr.bf16.mxu1 %v6596_v15  ;;  %v6681_v14 = vld [vmem:[%s9509_s1 + $0x6ac] ss:$12 sps:$4 sm:$0xff]  }
  0x4a   :  { %v6684_v15 = vld [vmem:[%s9509_s1 + $0x82c] ss:$12 sps:$4 sm:$0xff]  }
  0x4b   :  { %4226 = vmatpush1.bf16.msra.mxu0 %v6591_v16  ;;  %v7793_v16 = vcombine.low %v7654_v32, %v7654_v32  ;;  %v6699_v32 = vld [vmem:[%s9509_s1 + $0x664] ss:$12 sps:$4 sm:$0xff]  }
  0x4c   :  { %4267 = vmatpush1.bf16.msra.mxu1 %v6594_v17  ;;  %4227 = vmatprep.subr.bf16.mxu0 %v6599_v18  ;;  %v7797_v17 = vcombine.low %v7659_v33, %v7659_v33  ;;  %v6679_v18 = vld [vmem:[%s9509_s1 + $0x6a8] ss:$12 sps:$4 sm:$0xff]   ;;  %v6702_v33 = vld [vmem:[%s9509_s1 + $0x7e4] ss:$12 sps:$4 sm:$0xff]  }
  0x4d   :  { %4268 = vmatprep.subr.bf16.mxu1 %v6602_v19  ;;  %v6682_v19 = vld [vmem:[%s9509_s1 + $0x828] ss:$12 sps:$4 sm:$0xff]  }
  0x4f   :  { %4228 = vmatpush1.bf16.msra.mxu0 %v6597_v20  ;;  %v6687_v20 = vld [vmem:[%s9509_s1 + $0x694] ss:$12 sps:$4 sm:$0xff]  }
  0x50   :  { %4269 = vmatpush1.bf16.msra.mxu1 %v6600_v21  ;;  %4229 = vmatprep.subr.bf16.mxu0 %v6605_v22  ;;  %v6690_v21 = vld [vmem:[%s9509_s1 + $0x814] ss:$12 sps:$4 sm:$0xff]  }
  0x51   :  { %4270 = vmatprep.subr.bf16.mxu1 %v6608_v23  ;;  %v7814_v22 = vld [vmem:[%s9510_s0 + $0x20] sm:$0xff]  ;;  %v7819_v23 = vld [vmem:[%s9510_s0 + $0x28] sm:$0xff] }
  0x53   :  { %4230 = vmatpush1.bf16.msra.mxu0 %v6603_v24  ;;  %v7823_v24 = vcombine.high %v7814_v22, %v7814_v22 }
  0x54   :  { %4271 = vmatpush1.bf16.msra.mxu1 %v6606_v25  ;;  %4231 = vmatprep.subr.bf16.mxu0 %v6611_v26  ;;  %v7827_v25 = vcombine.high %v7819_v23, %v7819_v23  ;;  %v6685_v26 = vld [vmem:[%s9509_s1 + $0x690] ss:$12 sps:$4 sm:$0xff]  }
  0x55   :  { %4272 = vmatprep.subr.bf16.mxu1 %v6614_v27  ;;  %v6688_v27 = vld [vmem:[%s9509_s1 + $0x810] ss:$12 sps:$4 sm:$0xff]  }
  0x57   :  { %4232 = vmatpush1.bf16.msra.mxu0 %v6609_v28  ;;  %v6693_v28 = vld [vmem:[%s9509_s1 + $0x67c] ss:$12 sps:$4 sm:$0xff]  }
  0x58   :  { %4273 = vmatpush1.bf16.msra.mxu1 %v6612_v29  ;;  %4233 = vmatprep.subr.bf16.mxu0 %v6617_v30  ;;  %v6696_v29 = vld [vmem:[%s9509_s1 + $0x7fc] ss:$12 sps:$4 sm:$0xff]   ;;  %v6691_v30 = vld [vmem:[%s9509_s1 + $0x678] ss:$12 sps:$4 sm:$0xff]  }
  0x59   :  { %4274 = vmatprep.subr.bf16.mxu1 %v6620_v31  ;;  %v6694_v31 = vld [vmem:[%s9509_s1 + $0x7f8] ss:$12 sps:$4 sm:$0xff]  }
  0x5b   :  { %4234 = vmatpush1.bf16.msra.mxu0 %v6615_v34  ;;  %v6697_v34 = vld [vmem:[%s9509_s1 + $0x660] ss:$12 sps:$4 sm:$0xff]  }
  0x5c   :  { %4275 = vmatpush1.bf16.msra.mxu1 %v6618_v35  ;;  %4235 = vmatprep.subr.bf16.mxu0 %v6623_v38  ;;  %v6700_v35 = vld [vmem:[%s9509_s1 + $0x7e0] ss:$12 sps:$4 sm:$0xff]  }
  0x5d   :  { %4276 = vmatprep.subr.bf16.mxu1 %v6626_v39  ;;  %v6705_v38 = vld [vmem:[%s9509_s1 + $0x64c] ss:$12 sps:$4 sm:$0xff]  }
  0x5e   :  { %v6708_v39 = vld [vmem:[%s9509_s1 + $0x7cc] ss:$12 sps:$4 sm:$0xff]  }
  0x5f   :  { %4236 = vmatpush1.bf16.msra.mxu0 %v6621_v40  ;;  %v6703_v40 = vld [vmem:[%s9509_s1 + $0x648] ss:$12 sps:$4 sm:$0xff]  }
  0x60   :  { %4277 = vmatpush1.bf16.msra.mxu1 %v6624_v41  ;;  %4237 = vmatprep.subr.bf16.mxu0 %v6629_v42  ;;  %v6706_v41 = vld [vmem:[%s9509_s1 + $0x7c8] ss:$12 sps:$4 sm:$0xff]  }
  0x61   :  { %4278 = vmatprep.subr.bf16.mxu1 %v6632_v43  ;;  %v6711_v42 = vld [vmem:[%s9509_s1 + $0x634] ss:$12 sps:$4 sm:$0xff]  }
  0x62   :  { %v6714_v43 = vld [vmem:[%s9509_s1 + $0x7b4] ss:$12 sps:$4 sm:$0xff]  }
  0x63   :  { %4238 = vmatpush2.bf16.msra.mxu0 %v6627_v44  ;;  %v6709_v44 = vld [vmem:[%s9509_s1 + $0x630] ss:$12 sps:$4 sm:$0xff]  }
  0x64   :  { %4279 = vmatpush2.bf16.msra.mxu1 %v6630_v45  ;;  %4239 = vmatprep.subr.bf16.mxu0 %v6635_v46  ;;  %v6712_v45 = vld [vmem:[%s9509_s1 + $0x7b0] ss:$12 sps:$4 sm:$0xff]  }
  0x65   :  { %4280 = vmatprep.subr.bf16.mxu1 %v6638_v48  ;;  %v6717_v46 = vld [vmem:[%s9509_s1 + $0x61c] ss:$12 sps:$4 sm:$0xff]  }
  0x66   :  { %v6720_v48 = vld [vmem:[%s9509_s1 + $0x79c] ss:$12 sps:$4 sm:$0xff]  }
  0x67   :  { %4240 = vmatpush2.bf16.msra.mxu0 %v6633_v49  ;;  %v6715_v49 = vld [vmem:[%s9509_s1 + $0x618] ss:$12 sps:$4 sm:$0xff]  }
  0x68   :  { %4281 = vmatpush2.bf16.msra.mxu1 %v6636_v50  ;;  %4241 = vmatprep.subr.bf16.mxu0 %v6641_v52  ;;  %v6718_v50 = vld [vmem:[%s9509_s1 + $0x798] ss:$12 sps:$4 sm:$0xff]  }
  0x69   :  { %4282 = vmatprep.subr.bf16.mxu1 %v6644_v53  ;;  %v6723_v52 = vld [vmem:[%s9509_s1 + $0x604] ss:$12 sps:$4 sm:$0xff]  }
  0x6a   :  { %v6726_v53 = vld [vmem:[%s9509_s1 + $0x784] ss:$12 sps:$4 sm:$0xff]  }
  0x6b   :  { %4242 = vmatpush2.bf16.msra.mxu0 %v6639_v54  ;;  %v6721_v54 = vld [vmem:[%s9509_s1 + $0x600] ss:$12 sps:$4 sm:$0xff]  }
  0x6c   :  { %4283 = vmatpush2.bf16.msra.mxu1 %v6642_v55  ;;  %4243 = vmatprep.subr.bf16.mxu0 %v6647_v56  ;;  %v6724_v55 = vld [vmem:[%s9509_s1 + $0x780] ss:$12 sps:$4 sm:$0xff]  }
  0x6d   :  { %4284 = vmatprep.subr.bf16.mxu1 %v6650_v57  ;;  %v6729_v56 = vld [vmem:[%s9509_s1 + $0x76c] ss:$12 sps:$4 sm:$0xff]  }
  0x6e   :  { %v6732_v57 = vld [vmem:[%s9509_s1 + $0x8ec] ss:$12 sps:$4 sm:$0xff]  }
  0x6f   :  { %4244 = vmatpush2.bf16.msra.mxu0 %v6645_v58  ;;  %v6727_v58 = vld [vmem:[%s9509_s1 + $0x768] ss:$12 sps:$4 sm:$0xff]  }
  0x70   :  { %4285 = vmatpush2.bf16.msra.mxu1 %v6648_v59  ;;  %4245 = vmatprep.subr.bf16.mxu0 %v6653_v60  ;;  %v6730_v59 = vld [vmem:[%s9509_s1 + $0x8e8] ss:$12 sps:$4 sm:$0xff]  }
  0x71   :  { %4286 = vmatprep.subr.bf16.mxu1 %v6656_v61  ;;  %v6735_v60 = vld [vmem:[%s9509_s1 + $0x754] ss:$12 sps:$4 sm:$0xff]  }
  0x72   :  { %v6738_v61 = vld [vmem:[%s9509_s1 + $0x8d4] ss:$12 sps:$4 sm:$0xff]  }
  0x73   :  { %4246 = vmatpush2.bf16.msra.mxu0 %v6651_v62  ;;  %v6733_v62 = vld [vmem:[%s9509_s1 + $0x750] ss:$12 sps:$4 sm:$0xff]  }
  0x74   :  { %4287 = vmatpush2.bf16.msra.mxu1 %v6654_v63  ;;  %4247 = vmatprep.subr.bf16.mxu0 %v6659_v0  ;;  %v6736_v63 = vld [vmem:[%s9509_s1 + $0x8d0] ss:$12 sps:$4 sm:$0xff]  }
  0x75   :  { %4288 = vmatprep.subr.bf16.mxu1 %v6662_v1  ;;  %v6741_v0 = vld [vmem:[%s9509_s1 + $0x73c] ss:$12 sps:$4 sm:$0xff]  }
  0x76   :  { %v6744_v1 = vld [vmem:[%s9509_s1 + $0x8bc] ss:$12 sps:$4 sm:$0xff]  }
  0x77   :  { %4248 = vmatpush2.bf16.msra.mxu0 %v6657_v2  ;;  %v6739_v2 = vld [vmem:[%s9509_s1 + $0x738] ss:$12 sps:$4 sm:$0xff]  }
  0x78   :  { %4289 = vmatpush2.bf16.msra.mxu1 %v6660_v3  ;;  %4249 = vmatprep.subr.bf16.mxu0 %v6665_v4  ;;  %v6742_v3 = vld [vmem:[%s9509_s1 + $0x8b8] ss:$12 sps:$4 sm:$0xff]  }
  0x79   :  { %4290 = vmatprep.subr.bf16.mxu1 %v6668_v5  ;;  %v6747_v4 = vld [vmem:[%s9509_s1 + $0x724] ss:$12 sps:$4 sm:$0xff]  }
  0x7a   :  { %v6750_v5 = vld [vmem:[%s9509_s1 + $0x8a4] ss:$12 sps:$4 sm:$0xff]  }
  0x7b   :  { %4250 = vmatpush2.bf16.msra.mxu0 %v6663_v8  ;;  %v6745_v8 = vld [vmem:[%s9509_s1 + $0x720] ss:$12 sps:$4 sm:$0xff]  }
  0x7c   :  { %4291 = vmatpush2.bf16.msra.mxu1 %v6666_v9  ;;  %4251 = vmatprep.subr.bf16.mxu0 %v6671_v10  ;;  %v6748_v9 = vld [vmem:[%s9509_s1 + $0x8a0] ss:$12 sps:$4 sm:$0xff]  }
  0x7d   :  { %4292 = vmatprep.subr.bf16.mxu1 %v6674_v11  ;;  %v6753_v10 = vld [vmem:[%s9509_s1 + $0x70c] ss:$12 sps:$4 sm:$0xff]  }
  0x7e   :  { %v6756_v11 = vld [vmem:[%s9509_s1 + $0x88c] ss:$12 sps:$4 sm:$0xff]  }
  0x7f   :  { %4252 = vmatpush2.bf16.msra.mxu0 %v6669_v12  ;;  %v6751_v12 = vld [vmem:[%s9509_s1 + $0x708] ss:$12 sps:$4 sm:$0xff]  }
  0x80   :  { %4293 = vmatpush2.bf16.msra.mxu1 %v6672_v13  ;;  %4303 = vmatprep.subr.bf16.mxu0 %v6681_v14  ;;  %v6754_v13 = vld [vmem:[%s9509_s1 + $0x888] ss:$12 sps:$4 sm:$0xff]  }
  0x81   :  { %4344 = vmatprep.subr.bf16.mxu1 %v6684_v15  ;;  %v6759_v14 = vld [vmem:[%s9509_s1 + $0x6f4] ss:$12 sps:$4 sm:$0xff]  }
  0x82   :  { %4254 = vmatmul.mubr.bf16.vlgmr.msra.gmra.mxu0 %v7793_v16  ;;  %v6762_v15 = vld [vmem:[%s9509_s1 + $0x874] ss:$12 sps:$4 sm:$0xff]  }
  0x83   :  { %4295 = vmatmul.mubr.bf16.vlgmr.msra.gmra.mxu1 %v7797_v17  ;;  %4304 = vmatpush1.bf16.msra.mxu0 %v6679_v18  ;;  %v6757_v18 = vld [vmem:[%s9509_s1 + $0x6f0] ss:$12 sps:$4 sm:$0xff]  }
  0x84   :  { %4345 = vmatpush1.bf16.msra.mxu1 %v6682_v19  ;;  %4305 = vmatprep.subr.bf16.mxu0 %v6687_v20  ;;  %v6760_v19 = vld [vmem:[%s9509_s1 + $0x870] ss:$12 sps:$4 sm:$0xff]  }
  0x85   :  { %4346 = vmatprep.subr.bf16.mxu1 %v6690_v21  ;;  %4335 = vmatprep.mubr.bf16.mxu0 %v7823_v24  ;;  %v6765_v20 = vld [vmem:[%s9509_s1 + $0x6dc] ss:$12 sps:$4 sm:$0xff]  }
  0x86   :  { %4376 = vmatprep.mubr.bf16.mxu1 %v7827_v25  ;;  %v6768_v21 = vld [vmem:[%s9509_s1 + $0x85c] ss:$12 sps:$4 sm:$0xff]  }
  0x87   :  { %4306 = vmatpush1.bf16.msra.mxu0 %v6685_v26  ;;  %v6763_v26 = vld [vmem:[%s9509_s1 + $0x6d8] ss:$12 sps:$4 sm:$0xff]  }
  0x88   :  { %4347 = vmatpush1.bf16.msra.mxu1 %v6688_v27  ;;  %4307 = vmatprep.subr.bf16.mxu0 %v6693_v28  ;;  %v6766_v27 = vld [vmem:[%s9509_s1 + $0x858] ss:$12 sps:$4 sm:$0xff]  }
  0x89   :  { %4348 = vmatprep.subr.bf16.mxu1 %v6696_v29  ;;  %v6771_v28 = vld [vmem:[%s9509_s1 + $0x6c4] ss:$12 sps:$4 sm:$0xff]  }
  0x8a   :  { %v6774_v29 = vld [vmem:[%s9509_s1 + $0x844] ss:$12 sps:$4 sm:$0xff]  }
  0x8b   :  { %4308 = vmatpush1.bf16.msra.mxu0 %v6691_v30  ;;  %v6769_v30 = vld [vmem:[%s9509_s1 + $0x6c0] ss:$12 sps:$4 sm:$0xff]  }
  0x8c   :  { %4349 = vmatpush1.bf16.msra.mxu1 %v6694_v31  ;;  %4309 = vmatprep.subr.bf16.mxu0 %v6699_v32  ;;  %v6772_v31 = vld [vmem:[%s9509_s1 + $0x840] ss:$12 sps:$4 sm:$0xff]  }
  0x8d   :  { %4350 = vmatprep.subr.bf16.mxu1 %v6702_v33  ;;  %v6781_v32 = vld [vmem:[%s9509_s1 + $0x9ac] ss:$12 sps:$4 sm:$0xff]  }
  0x8e   :  { %v6784_v33 = vld [vmem:[%s9509_s1 + $0xb2c] ss:$12 sps:$4 sm:$0xff]  }
  0x8f   :  { %4310 = vmatpush1.bf16.msra.mxu0 %v6697_v34  ;;  %v6779_v34 = vld [vmem:[%s9509_s1 + $0x9a8] ss:$12 sps:$4 sm:$0xff]  }
  0x90   :  { %4351 = vmatpush1.bf16.msra.mxu1 %v6700_v35  ;;  %4311 = vmatprep.subr.bf16.mxu0 %v6705_v38  ;;  %v8019_v35 = vld [vmem:[%s9510_s0 + $0x30] sm:$0xff]  ;;  %v8023_v38 = vcombine.low %v7814_v22, %v7814_v22 }
  0x91   :  { %4352 = vmatprep.subr.bf16.mxu1 %v6708_v39  ;;  %v8027_v39 = vcombine.low %v7819_v23, %v7819_v23  ;;  %v6787_v22 = vld [vmem:[%s9509_s1 + $0x994] ss:$12 sps:$4 sm:$0xff]  }
  0x92   :  { %v6790_v23 = vld [vmem:[%s9509_s1 + $0xb14] ss:$12 sps:$4 sm:$0xff]  }
  0x93   :  { %4312 = vmatpush1.bf16.msra.mxu0 %v6703_v40  ;;  %v8032_v40 = vld [vmem:[%s9510_s0 + $0x38] sm:$0xff] }
  0x94   :  { %4353 = vmatpush1.bf16.msra.mxu1 %v6706_v41  ;;  %4313 = vmatprep.subr.bf16.mxu0 %v6711_v42  ;;  %v6782_v41 = vld [vmem:[%s9509_s1 + $0xb28] ss:$12 sps:$4 sm:$0xff]   ;;  %v8045_v42 = vcombine.high %v8019_v35, %v8019_v35 }
  0x95   :  { %4354 = vmatprep.subr.bf16.mxu1 %v6714_v43  ;;  %v8049_v43 = vcombine.high %v8032_v40, %v8032_v40 }
  0x97   :  { %4314 = vmatpush1.bf16.msra.mxu0 %v6709_v44  ;;  %v6785_v44 = vld [vmem:[%s9509_s1 + $0x990] ss:$12 sps:$4 sm:$0xff]  }
  0x98   :  { %4355 = vmatpush1.bf16.msra.mxu1 %v6712_v45  ;;  %4315 = vmatprep.subr.bf16.mxu0 %v6717_v46  ;;  %v6788_v45 = vld [vmem:[%s9509_s1 + $0xb10] ss:$12 sps:$4 sm:$0xff]  }
  0x99   :  { %4356 = vmatprep.subr.bf16.mxu1 %v6720_v48  ;;  %v6793_v46 = vld [vmem:[%s9509_s1 + $0x97c] ss:$12 sps:$4 sm:$0xff]  }
  0x9a   :  { %v6796_v48 = vld [vmem:[%s9509_s1 + $0xafc] ss:$12 sps:$4 sm:$0xff]  }
  0x9b   :  { %4316 = vmatpush1.bf16.msra.mxu0 %v6715_v49  ;;  %v6791_v49 = vld [vmem:[%s9509_s1 + $0x978] ss:$12 sps:$4 sm:$0xff]  }
  0x9c   :  { %4357 = vmatpush1.bf16.msra.mxu1 %v6718_v50  ;;  %4317 = vmatprep.subr.bf16.mxu0 %v6723_v52  ;;  %v6794_v50 = vld [vmem:[%s9509_s1 + $0xaf8] ss:$12 sps:$4 sm:$0xff]  }
  0x9d   :  { %4358 = vmatprep.subr.bf16.mxu1 %v6726_v53  ;;  %v6799_v52 = vld [vmem:[%s9509_s1 + $0x964] ss:$12 sps:$4 sm:$0xff]  }
  0x9e   :  { %v6802_v53 = vld [vmem:[%s9509_s1 + $0xae4] ss:$12 sps:$4 sm:$0xff]  }
  0x9f   :  { %4318 = vmatpush1.bf16.msra.mxu0 %v6721_v54  ;;  %v6797_v54 = vld [vmem:[%s9509_s1 + $0x960] ss:$12 sps:$4 sm:$0xff]  }
  0xa0   :  { %4359 = vmatpush1.bf16.msra.mxu1 %v6724_v55  ;;  %4319 = vmatprep.subr.bf16.mxu0 %v6729_v56  ;;  %v6800_v55 = vld [vmem:[%s9509_s1 + $0xae0] ss:$12 sps:$4 sm:$0xff]  }
  0xa1   :  { %4360 = vmatprep.subr.bf16.mxu1 %v6732_v57  ;;  %v6805_v56 = vld [vmem:[%s9509_s1 + $0x94c] ss:$12 sps:$4 sm:$0xff]  }
  0xa2   :  { %v6808_v57 = vld [vmem:[%s9509_s1 + $0xacc] ss:$12 sps:$4 sm:$0xff]  }
  0xa3   :  { %4320 = vmatpush2.bf16.msra.mxu0 %v6727_v58  ;;  %v6803_v58 = vld [vmem:[%s9509_s1 + $0x948] ss:$12 sps:$4 sm:$0xff]  }
  0xa4   :  { %4361 = vmatpush2.bf16.msra.mxu1 %v6730_v59  ;;  %4321 = vmatprep.subr.bf16.mxu0 %v6735_v60  ;;  %v6806_v59 = vld [vmem:[%s9509_s1 + $0xac8] ss:$12 sps:$4 sm:$0xff]  }
  0xa5   :  { %4362 = vmatprep.subr.bf16.mxu1 %v6738_v61  ;;  %v6811_v60 = vld [vmem:[%s9509_s1 + $0x934] ss:$12 sps:$4 sm:$0xff]  }
  0xa6   :  { %v6814_v61 = vld [vmem:[%s9509_s1 + $0xab4] ss:$12 sps:$4 sm:$0xff]  }
  0xa7   :  { %4322 = vmatpush2.bf16.msra.mxu0 %v6733_v62  ;;  %v6809_v62 = vld [vmem:[%s9509_s1 + $0x930] ss:$12 sps:$4 sm:$0xff]  }
  0xa8   :  { %4363 = vmatpush2.bf16.msra.mxu1 %v6736_v63  ;;  %4323 = vmatprep.subr.bf16.mxu0 %v6741_v0  ;;  %v6812_v63 = vld [vmem:[%s9509_s1 + $0xab0] ss:$12 sps:$4 sm:$0xff]  }
  0xa9   :  { %4364 = vmatprep.subr.bf16.mxu1 %v6744_v1  ;;  %v6817_v0 = vld [vmem:[%s9509_s1 + $0x91c] ss:$12 sps:$4 sm:$0xff]  }
  0xaa   :  { %v6820_v1 = vld [vmem:[%s9509_s1 + $0xa9c] ss:$12 sps:$4 sm:$0xff]  }
  0xab   :  { %4324 = vmatpush2.bf16.msra.mxu0 %v6739_v2  ;;  %v6815_v2 = vld [vmem:[%s9509_s1 + $0x918] ss:$12 sps:$4 sm:$0xff]  }
  0xac   :  { %4365 = vmatpush2.bf16.msra.mxu1 %v6742_v3  ;;  %4325 = vmatprep.subr.bf16.mxu0 %v6747_v4  ;;  %v6818_v3 = vld [vmem:[%s9509_s1 + $0xa98] ss:$12 sps:$4 sm:$0xff]  }
  0xad   :  { %4366 = vmatprep.subr.bf16.mxu1 %v6750_v5  ;;  %v6823_v4 = vld [vmem:[%s9509_s1 + $0x904] ss:$12 sps:$4 sm:$0xff]  }
  0xae   :  { %v6826_v5 = vld [vmem:[%s9509_s1 + $0xa84] ss:$12 sps:$4 sm:$0xff]  }
  0xaf   :  { %4326 = vmatpush2.bf16.msra.mxu0 %v6745_v8  ;;  %v6821_v8 = vld [vmem:[%s9509_s1 + $0x900] ss:$12 sps:$4 sm:$0xff]  }
  0xb0   :  { %4367 = vmatpush2.bf16.msra.mxu1 %v6748_v9  ;;  %4327 = vmatprep.subr.bf16.mxu0 %v6753_v10  ;;  %v6824_v9 = vld [vmem:[%s9509_s1 + $0xa80] ss:$12 sps:$4 sm:$0xff]  }
  0xb1   :  { %4368 = vmatprep.subr.bf16.mxu1 %v6756_v11  ;;  %v6829_v10 = vld [vmem:[%s9509_s1 + $0xa6c] ss:$12 sps:$4 sm:$0xff]  }
  0xb2   :  { %v6832_v11 = vld [vmem:[%s9509_s1 + $0xbec] ss:$12 sps:$4 sm:$0xff]  }
  0xb3   :  { %4328 = vmatpush2.bf16.msra.mxu0 %v6751_v12  ;;  %v6827_v12 = vld [vmem:[%s9509_s1 + $0xa68] ss:$12 sps:$4 sm:$0xff]  }
  0xb4   :  { %4369 = vmatpush2.bf16.msra.mxu1 %v6754_v13  ;;  %4329 = vmatprep.subr.bf16.mxu0 %v6759_v14  ;;  %v6830_v13 = vld [vmem:[%s9509_s1 + $0xbe8] ss:$12 sps:$4 sm:$0xff]  }
  0xb5   :  { %4370 = vmatprep.subr.bf16.mxu1 %v6762_v15  ;;  %v6835_v14 = vld [vmem:[%s9509_s1 + $0xa54] ss:$12 sps:$4 sm:$0xff]  }
  0xb6   :  { %v6838_v15 = vld [vmem:[%s9509_s1 + $0xbd4] ss:$12 sps:$4 sm:$0xff]  }
  0xb7   :  { %4330 = vmatpush2.bf16.msra.mxu0 %v6757_v18  ;;  %v6833_v18 = vld [vmem:[%s9509_s1 + $0xa50] ss:$12 sps:$4 sm:$0xff]  }
  0xb8   :  { %4371 = vmatpush2.bf16.msra.mxu1 %v6760_v19  ;;  %4331 = vmatprep.subr.bf16.mxu0 %v6765_v20  ;;  %v6836_v19 = vld [vmem:[%s9509_s1 + $0xbd0] ss:$12 sps:$4 sm:$0xff]  }
  0xb9   :  { %4372 = vmatprep.subr.bf16.mxu1 %v6768_v21  ;;  %v6841_v20 = vld [vmem:[%s9509_s1 + $0xa3c] ss:$12 sps:$4 sm:$0xff]  }
  0xba   :  { %v6844_v21 = vld [vmem:[%s9509_s1 + $0xbbc] ss:$12 sps:$4 sm:$0xff]  }
  0xbb   :  { %4332 = vmatpush2.bf16.msra.mxu0 %v6763_v26  ;;  %v6839_v26 = vld [vmem:[%s9509_s1 + $0xa38] ss:$12 sps:$4 sm:$0xff]  }
  0xbc   :  { %4373 = vmatpush2.bf16.msra.mxu1 %v6766_v27  ;;  %4333 = vmatprep.subr.bf16.mxu0 %v6771_v28  ;;  %v6842_v27 = vld [vmem:[%s9509_s1 + $0xbb8] ss:$12 sps:$4 sm:$0xff]  }
  0xbd   :  { %4374 = vmatprep.subr.bf16.mxu1 %v6774_v29  ;;  %v6847_v28 = vld [vmem:[%s9509_s1 + $0xa24] ss:$12 sps:$4 sm:$0xff]  }
  0xbe   :  { %v6850_v29 = vld [vmem:[%s9509_s1 + $0xba4] ss:$12 sps:$4 sm:$0xff]  }
  0xbf   :  { %4334 = vmatpush2.bf16.msra.mxu0 %v6769_v30  ;;  %v6845_v30 = vld [vmem:[%s9509_s1 + $0xa20] ss:$12 sps:$4 sm:$0xff]  }
  0xc0   :  { %4375 = vmatpush2.bf16.msra.mxu1 %v6772_v31  ;;  %4385 = vmatprep.subr.bf16.mxu0 %v6781_v32  ;;  %v6848_v31 = vld [vmem:[%s9509_s1 + $0xba0] ss:$12 sps:$4 sm:$0xff]  }
  0xc1   :  { %4426 = vmatprep.subr.bf16.mxu1 %v6784_v33  ;;  %v6853_v32 = vld [vmem:[%s9509_s1 + $0xa0c] ss:$12 sps:$4 sm:$0xff]  }
  0xc2   :  { %4336 = vmatmul.mubr.bf16.vlgmr.msra.gmra.mxu0 %v8023_v38  ;;  %v6856_v33 = vld [vmem:[%s9509_s1 + $0xb8c] ss:$12 sps:$4 sm:$0xff]  }
  0xc3   :  { %4377 = vmatmul.mubr.bf16.vlgmr.msra.gmra.mxu1 %v8027_v39  ;;  %4386 = vmatpush1.bf16.msra.mxu0 %v6779_v34  ;;  %v6851_v34 = vld [vmem:[%s9509_s1 + $0xa08] ss:$12 sps:$4 sm:$0xff]  }
  0xc4   :  { %4427 = vmatpush1.bf16.msra.mxu1 %v6782_v41  ;;  %4387 = vmatprep.subr.bf16.mxu0 %v6787_v22  ;;  %v6854_v41 = vld [vmem:[%s9509_s1 + $0xb88] ss:$12 sps:$4 sm:$0xff]  }
  0xc5   :  { %4428 = vmatprep.subr.bf16.mxu1 %v6790_v23  ;;  %4417 = vmatprep.mubr.bf16.mxu0 %v8045_v42  ;;  %v6859_v22 = vld [vmem:[%s9509_s1 + $0x9f4] ss:$12 sps:$4 sm:$0xff]  }
  0xc6   :  { %4458 = vmatprep.mubr.bf16.mxu1 %v8049_v43  ;;  %v6862_v23 = vld [vmem:[%s9509_s1 + $0xb74] ss:$12 sps:$4 sm:$0xff]  }
  0xc7   :  { %4388 = vmatpush1.bf16.msra.mxu0 %v6785_v44  ;;  %v6857_v44 = vld [vmem:[%s9509_s1 + $0x9f0] ss:$12 sps:$4 sm:$0xff]  }
  0xc8   :  { %4429 = vmatpush1.bf16.msra.mxu1 %v6788_v45  ;;  %4389 = vmatprep.subr.bf16.mxu0 %v6793_v46  ;;  %v6860_v45 = vld [vmem:[%s9509_s1 + $0xb70] ss:$12 sps:$4 sm:$0xff]  }
  0xc9   :  { %4430 = vmatprep.subr.bf16.mxu1 %v6796_v48  ;;  %v6865_v46 = vld [vmem:[%s9509_s1 + $0x9dc] ss:$12 sps:$4 sm:$0xff]   ;;  %v836_v48 = vlaneseq }
  0xcb   :  { %4390 = vmatpush1.bf16.msra.mxu0 %v6791_v49  ;;  %v6868_v49 = vld [vmem:[%s9509_s1 + $0xb5c] ss:$12 sps:$4 sm:$0xff]  }
  0xcc   :  { %4431 = vmatpush1.bf16.msra.mxu1 %v6794_v50  ;;  %4391 = vmatprep.subr.bf16.mxu0 %v6799_v52  ;;  %v6863_v50 = vld [vmem:[%s9509_s1 + $0x9d8] ss:$12 sps:$4 sm:$0xff]  }
  0xcd   :  { %4432 = vmatprep.subr.bf16.mxu1 %v6802_v53  ;;  %v6866_v52 = vld [vmem:[%s9509_s1 + $0xb58] ss:$12 sps:$4 sm:$0xff]  }
  0xce   :  { %v6871_v53 = vld [vmem:[%s9509_s1 + $0x9c4] ss:$12 sps:$4 sm:$0xff]  }
  0xcf   :  { %4392 = vmatpush1.bf16.msra.mxu0 %v6797_v54  ;;  %v8220_v54 = vshrl.u32 %v836_v48, 7  ;;  %v6903_v48 = vld [vmem:[%s9509_s1 + $0xc48] ss:$12 sps:$4 sm:$0xff]  }
  0xd0   :  { %4433 = vmatpush1.bf16.msra.mxu1 %v6800_v55  ;;  %4393 = vmatprep.subr.bf16.mxu0 %v6805_v56  ;;  %v6874_v55 = vld [vmem:[%s9509_s1 + $0xb44] ss:$12 sps:$4 sm:$0xff]   ;;  %v6869_v56 = vld [vmem:[%s9509_s1 + $0x9c0] ss:$12 sps:$4 sm:$0xff]  }
  0xd1   :  { %4434 = vmatprep.subr.bf16.mxu1 %v6808_v57  ;;  %v6872_v57 = vld [vmem:[%s9509_s1 + $0xb40] ss:$12 sps:$4 sm:$0xff]  }
  0xd3   :  { %4394 = vmatpush1.bf16.msra.mxu0 %v6803_v58  ;;  %v834_v58 = vld [vmem:[%s9511_s2] sm:$0x7] }
  0xd4   :  { %4435 = vmatpush1.bf16.msra.mxu1 %v6806_v59  ;;  %4395 = vmatprep.subr.bf16.mxu0 %v6811_v60  ;;  %v838_v59 = vsub.s32 0, %v8220_v54  ;;  %v6881_v60 = vld [vmem:[%s9509_s1 + $0xcac] ss:$12 sps:$4 sm:$0xff]  }
  0xd5   :  { %4436 = vmatprep.subr.bf16.mxu1 %v6814_v61  ;;  %v6884_v61 = vld [vmem:[%s9509_s1 + $0xe2c] ss:$12 sps:$4 sm:$0xff]  }
  0xd7   :  { %4396 = vmatpush1.bf16.msra.mxu0 %v6809_v62  ;;  %v6879_v62 = vld [vmem:[%s9509_s1 + $0xca8] ss:$12 sps:$4 sm:$0xff]  }
  0xd8   :  { %4437 = vmatpush1.bf16.msra.mxu1 %v6812_v63  ;;  %4397 = vmatprep.subr.bf16.mxu0 %v6817_v0  ;;  %v842_v63 = vsub.s32 1, %v8220_v54  ;;  %v8247_v0 = vcombine.low %v8019_v35, %v8019_v35  ;;  %v6882_v35 = vld [vmem:[%s9509_s1 + $0xe28] ss:$12 sps:$4 sm:$0xff]  }
  0xd9   :  { %4438 = vmatprep.subr.bf16.mxu1 %v6820_v1  ;;  %v8251_v1 = vcombine.low %v8032_v40, %v8032_v40  ;;  %v6887_v40 = vld [vmem:[%s9509_s1 + $0xc94] ss:$12 sps:$4 sm:$0xff]  }
  0xdb   :  { %4398 = vmatpush1.bf16.msra.mxu0 %v6815_v2  ;;  %v8256_v2 = vld [vmem:[%s9510_s0 + $0x40] sm:$0xff] }
  0xdc   :  { %4439 = vmatpush1.bf16.msra.mxu1 %v6818_v3  ;;  %4399 = vmatprep.subr.bf16.mxu0 %v6823_v4  ;;  %v8261_v3 = vld [vmem:[%s9510_s0 + $0x48] sm:$0xff]  ;;  %v839_v4 = vrot.slane %v834_v58, %v838_v59  ;;  %v6918_v59 = vld [vmem:[%s9509_s1 + $0xd98] ss:$12 sps:$4 sm:$0xff]  }
  0xdd   :  { %4440 = vmatprep.subr.bf16.mxu1 %v6826_v5  ;;  %v6890_v5 = vld [vmem:[%s9509_s1 + $0xe14] ss:$12 sps:$4 sm:$0xff]  }
  0xdf   :  { %4400 = vmatpush1.bf16.msra.mxu0 %v6821_v8  ;;  %v843_v8 = vrot.slane %v834_v58, %v842_v63  ;;  %v6915_v58 = vld [vmem:[%s9509_s1 + $0xc18] ss:$12 sps:$4 sm:$0xff]   ;;  %v6924_v63 = vld [vmem:[%s9509_s1 + $0xd80] ss:$12 sps:$4 sm:$0xff]  }
  0xe0   :  { %4441 = vmatpush1.bf16.msra.mxu1 %v6824_v9  ;;  %4401 = vmatprep.subr.bf16.mxu0 %v6829_v10  ;;  %v8274_v9 = vcombine.high %v8256_v2, %v8256_v2  ;;  %v8278_v10 = vcombine.high %v8261_v3, %v8261_v3 }
  0xe1   :  { %4442 = vmatprep.subr.bf16.mxu1 %v6832_v11 }
  0xe3   :  { %4402 = vmatpush2.bf16.msra.mxu0 %v6827_v12 }
  0xe4   :  { %4443 = vmatpush2.bf16.msra.mxu1 %v6830_v13  ;;  %4403 = vmatprep.subr.bf16.mxu0 %v6835_v14  ;;  %v6885_v13 = vld [vmem:[%s9509_s1 + $0xc90] ss:$12 sps:$4 sm:$0xff]  }
  0xe5   :  { %4444 = vmatprep.subr.bf16.mxu1 %v6838_v15  ;;  %v6888_v15 = vld [vmem:[%s9509_s1 + $0xe10] ss:$12 sps:$4 sm:$0xff]  }
  0xe7   :  { %4404 = vmatpush2.bf16.msra.mxu0 %v6833_v18 }
  0xe8   :  { %4445 = vmatpush2.bf16.msra.mxu1 %v6836_v19  ;;  %4405 = vmatprep.subr.bf16.mxu0 %v6841_v20  ;;  %v6893_v20 = vld [vmem:[%s9509_s1 + $0xc7c] ss:$12 sps:$4 sm:$0xff]  }
  0xe9   :  { %4446 = vmatprep.subr.bf16.mxu1 %v6844_v21  ;;  %v6896_v21 = vld [vmem:[%s9509_s1 + $0xdfc] ss:$12 sps:$4 sm:$0xff]  }
  0xeb   :  { %4406 = vmatpush2.bf16.msra.mxu0 %v6839_v26 }
  0xec   :  { %4447 = vmatpush2.bf16.msra.mxu1 %v6842_v27  ;;  %4407 = vmatprep.subr.bf16.mxu0 %v6847_v28 }
  0xed   :  { %4448 = vmatprep.subr.bf16.mxu1 %v6850_v29 }
  0xef   :  { %4408 = vmatpush2.bf16.msra.mxu0 %v6845_v30  ;;  %v6891_v30 = vld [vmem:[%s9509_s1 + $0xc78] ss:$12 sps:$4 sm:$0xff]  }
  0xf0   :  { %4449 = vmatpush2.bf16.msra.mxu1 %v6848_v31  ;;  %4409 = vmatprep.subr.bf16.mxu0 %v6853_v32  ;;  %v6894_v32 = vld [vmem:[%s9509_s1 + $0xdf8] ss:$12 sps:$4 sm:$0xff]  }
  0xf1   :  { %4450 = vmatprep.subr.bf16.mxu1 %v6856_v33  ;;  %v6899_v33 = vld [vmem:[%s9509_s1 + $0xc64] ss:$12 sps:$4 sm:$0xff]  }
  0xf3   :  { %4410 = vmatpush2.bf16.msra.mxu0 %v6851_v34 }
  0xf4   :  { %4451 = vmatpush2.bf16.msra.mxu1 %v6854_v41  ;;  %4411 = vmatprep.subr.bf16.mxu0 %v6859_v22  ;;  %v6902_v22 = vld [vmem:[%s9509_s1 + $0xde4] ss:$12 sps:$4 sm:$0xff]  }
  0xf5   :  { %4452 = vmatprep.subr.bf16.mxu1 %v6862_v23  ;;  %v6897_v23 = vld [vmem:[%s9509_s1 + $0xc60] ss:$12 sps:$4 sm:$0xff]  }
  0xf7   :  { %4412 = vmatpush2.bf16.msra.mxu0 %v6857_v44  ;;  %v6900_v44 = vld [vmem:[%s9509_s1 + $0xde0] ss:$12 sps:$4 sm:$0xff]  }
  0xf8   :  { %4453 = vmatpush2.bf16.msra.mxu1 %v6860_v45  ;;  %4413 = vmatprep.subr.bf16.mxu0 %v6865_v46  ;;  %v6905_v45 = vld [vmem:[%s9509_s1 + $0xc4c] ss:$12 sps:$4 sm:$0xff]  }
  0xf9   :  { %4454 = vmatprep.subr.bf16.mxu1 %v6868_v49  ;;  %v6908_v46 = vld [vmem:[%s9509_s1 + $0xdcc] ss:$12 sps:$4 sm:$0xff]   ;;  %v6906_v49 = vld [vmem:[%s9509_s1 + $0xdc8] ss:$12 sps:$4 sm:$0xff]  }
  0xfb   :  { %4414 = vmatpush2.bf16.msra.mxu0 %v6863_v50  ;;  %v6911_v50 = vld [vmem:[%s9509_s1 + $0xc34] ss:$12 sps:$4 sm:$0xff]  }
  0xfc   :  { %4455 = vmatpush2.bf16.msra.mxu1 %v6866_v52  ;;  %4415 = vmatprep.subr.bf16.mxu0 %v6871_v53  ;;  %v6914_v52 = vld [vmem:[%s9509_s1 + $0xdb4] ss:$12 sps:$4 sm:$0xff]   ;;  %v6909_v53 = vld [vmem:[%s9509_s1 + $0xc30] ss:$12 sps:$4 sm:$0xff]  }
  0xfd   :  { %4456 = vmatprep.subr.bf16.mxu1 %v6874_v55  ;;  %v6912_v55 = vld [vmem:[%s9509_s1 + $0xdb0] ss:$12 sps:$4 sm:$0xff]  }
  0xff   :  { %4416 = vmatpush2.bf16.msra.mxu0 %v6869_v56  ;;  %v6917_v56 = vld [vmem:[%s9509_s1 + $0xc1c] ss:$12 sps:$4 sm:$0xff]  }
 0x100   :  { %4457 = vmatpush2.bf16.msra.mxu1 %v6872_v57  ;;  %4467 = vmatprep.subr.bf16.mxu0 %v6881_v60  ;;  %v6920_v57 = vld [vmem:[%s9509_s1 + $0xd9c] ss:$12 sps:$4 sm:$0xff]   ;;  %v6923_v60 = vld [vmem:[%s9509_s1 + $0xc04] ss:$12 sps:$4 sm:$0xff]  }
 0x101   :  { %4508 = vmatprep.subr.bf16.mxu1 %v6884_v61  ;;  %v6926_v61 = vld [vmem:[%s9509_s1 + $0xd84] ss:$12 sps:$4 sm:$0xff]  }
 0x102   :  { %v4173_v11 = vpop.f32.mrf.mxu0  ;;  %4418 = vmatmul.mubr.bf16.vlgmr.msra.gmra.mxu0 %v8247_v0 }
 0x103   :  { %v4214_v12 = vpop.f32.mrf.mxu1  ;;  %4459 = vmatmul.mubr.bf16.vlgmr.msra.gmra.mxu1 %v8251_v1  ;;  %v4174_v14 = vadd.f32 %v4173_v11, %v839_v4  ;;  %4468 = vmatpush1.bf16.msra.mxu0 %v6879_v62  ;;  %v6921_v62 = vld [vmem:[%s9509_s1 + $0xc00] ss:$12 sps:$4 sm:$0xff]  }
 0x104   :  { %4509 = vmatpush1.bf16.msra.mxu1 %v6882_v35  ;;  %v4175_v18 = vpop.f32.mrf.mxu0  ;;  %4469 = vmatprep.subr.bf16.mxu0 %v6887_v40  ;;  %v6929_v4 = vld [vmem:[%s9509_s1 + $0xd6c] ss:$12 sps:$4 sm:$0xff]   ;;  %v6927_v40 = vld [vmem:[%s9509_s1 + $0xd68] ss:$12 sps:$4 sm:$0xff]  }
 0x105   :  { %v4216_v19 = vpop.f32.mrf.mxu1  ;;  %4510 = vmatprep.subr.bf16.mxu1 %v6890_v5  ;;  %v8294_v26 = vadd.f32 %v4214_v12, %v4174_v14  ;;  %v4176_v27 = vadd.f32 %v4175_v18, %v843_v8  ;;  %4499 = vmatprep.mubr.bf16.mxu0 %v8274_v9  ;;  %v6932_v35 = vld [vmem:[%s9509_s1 + $0xeec] ss:$12 sps:$4 sm:$0xff]   ;;  %v6930_v5 = vld [vmem:[%s9509_s1 + $0xee8] ss:$12 sps:$4 sm:$0xff]   ;;  %v6933_v12 = vld [vmem:[%s9509_s1 + $0xd50] ss:$12 sps:$4 sm:$0xff]  }
 0x106   :  { %4540 = vmatprep.mubr.bf16.mxu1 %v8278_v10  ;;  %v4177_v28 = vpop.f32.mrf.mxu0  ;;  %v6935_v8 = vld [vmem:[%s9509_s1 + $0xd54] ss:$12 sps:$4 sm:$0xff]   ;;  %v6941_v14 = vld [vmem:[%s9509_s1 + $0xd3c] ss:$12 sps:$4 sm:$0xff]   ;;  %v6939_v18 = vld [vmem:[%s9509_s1 + $0xd38] ss:$12 sps:$4 sm:$0xff]  }
 0x107   :  { %v4218_v29 = vpop.f32.mrf.mxu1  ;;  %v8301_v31 = vadd.f32 %v4216_v19, %v4176_v27  ;;  %4470 = vmatpush1.bf16.msra.mxu0 %v6885_v13  ;;  %v6938_v11 = vld [vmem:[%s9509_s1 + $0xed4] ss:$12 sps:$4 sm:$0xff]   ;;  %v6936_v13 = vld [vmem:[%s9509_s1 + $0xed0] ss:$12 sps:$4 sm:$0xff]   ;;  %v6942_v19 = vld [vmem:[%s9509_s1 + $0xeb8] ss:$12 sps:$4 sm:$0xff]  }
 0x108   :  { %4511 = vmatpush1.bf16.msra.mxu1 %v6888_v15  ;;  %v4178_v34 = vpop.f32.mrf.mxu0  ;;  %4471 = vmatprep.subr.bf16.mxu0 %v6893_v20  ;;  %v6944_v15 = vld [vmem:[%s9509_s1 + $0xebc] ss:$12 sps:$4 sm:$0xff]   ;;  %v6947_v20 = vld [vmem:[%s9509_s1 + $0xd24] ss:$12 sps:$4 sm:$0xff]   ;;  %v6945_v27 = vld [vmem:[%s9509_s1 + $0xd20] ss:$12 sps:$4 sm:$0xff]  }
 0x109   :  { %v4219_v41 = vpop.f32.mrf.mxu1  ;;  %4512 = vmatprep.subr.bf16.mxu1 %v6896_v21  ;;  %v6950_v21 = vld [vmem:[%s9509_s1 + $0xea4] ss:$12 sps:$4 sm:$0xff]   ;;  %v6948_v28 = vld [vmem:[%s9509_s1 + $0xea0] ss:$12 sps:$4 sm:$0xff]  }
 0x10a   :  { %v6953_v29 = vld [vmem:[%s9509_s1 + $0xd0c] ss:$12 sps:$4 sm:$0xff]   ;;  %v6959_v34 = vld [vmem:[%s9509_s1 + $0xcf4] ss:$12 sps:$4 sm:$0xff]  }
 0x10b   :  { %4472 = vmatpush1.bf16.msra.mxu0 %v6891_v30  ;;  %v6956_v30 = vld [vmem:[%s9509_s1 + $0xe8c] ss:$12 sps:$4 sm:$0xff]   ;;  %v6962_v41 = vld [vmem:[%s9509_s1 + $0xe74] ss:$12 sps:$4 sm:$0xff]  }
 0x10c   :  { %4513 = vmatpush1.bf16.msra.mxu1 %v6894_v32  ;;  %4473 = vmatprep.subr.bf16.mxu0 %v6899_v33  ;;  %v6951_v32 = vld [vmem:[%s9509_s1 + $0xd08] ss:$12 sps:$4 sm:$0xff]  }
 0x10d   :  { %4514 = vmatprep.subr.bf16.mxu1 %v6902_v22  ;;  %v6954_v33 = vld [vmem:[%s9509_s1 + $0xe88] ss:$12 sps:$4 sm:$0xff]   ;;  %v6957_v22 = vld [vmem:[%s9509_s1 + $0xcf0] ss:$12 sps:$4 sm:$0xff]  }
 0x10f   :  { %4474 = vmatpush1.bf16.msra.mxu0 %v6897_v23  ;;  %v6960_v23 = vld [vmem:[%s9509_s1 + $0xe70] ss:$12 sps:$4 sm:$0xff]  }
 0x110   :  { %4515 = vmatpush1.bf16.msra.mxu1 %v6900_v44  ;;  %4475 = vmatprep.subr.bf16.mxu0 %v6905_v45  ;;  %v6965_v44 = vld [vmem:[%s9509_s1 + $0xcdc] ss:$12 sps:$4 sm:$0xff]  }
 0x111   :  { %4516 = vmatprep.subr.bf16.mxu1 %v6908_v46  ;;  %v6968_v45 = vld [vmem:[%s9509_s1 + $0xe5c] ss:$12 sps:$4 sm:$0xff]   ;;  %v6963_v46 = vld [vmem:[%s9509_s1 + $0xcd8] ss:$12 sps:$4 sm:$0xff]  }
 0x113   :  { %4476 = vmatpush1.bf16.msra.mxu0 %v6903_v48  ;;  %v6966_v48 = vld [vmem:[%s9509_s1 + $0xe58] ss:$12 sps:$4 sm:$0xff]  }
 0x114   :  { %4517 = vmatpush1.bf16.msra.mxu1 %v6906_v49  ;;  %4477 = vmatprep.subr.bf16.mxu0 %v6911_v50  ;;  %v6971_v49 = vld [vmem:[%s9509_s1 + $0xcc4] ss:$12 sps:$4 sm:$0xff]  }
 0x115   :  { %4518 = vmatprep.subr.bf16.mxu1 %v6914_v52  ;;  %v6974_v50 = vld [vmem:[%s9509_s1 + $0xe44] ss:$12 sps:$4 sm:$0xff]   ;;  %v6969_v52 = vld [vmem:[%s9509_s1 + $0xcc0] ss:$12 sps:$4 sm:$0xff]  }
 0x117   :  { %4478 = vmatpush1.bf16.msra.mxu0 %v6909_v53  ;;  %v6972_v53 = vld [vmem:[%s9509_s1 + $0xe40] ss:$12 sps:$4 sm:$0xff]  }
 0x118   :  { %4519 = vmatpush1.bf16.msra.mxu1 %v6912_v55  ;;  %4479 = vmatprep.subr.bf16.mxu0 %v6917_v56  ;;  %v6981_v55 = vld [vmem:[%s9509_s1 + $0xfac] ss:$12 sps:$4 sm:$0xff]  }
 0x119   :  { %4520 = vmatprep.subr.bf16.mxu1 %v6920_v57  ;;  %v6984_v56 = vld [vmem:[%s9509_s1 + $0x112c] ss:$12 sps:$4 sm:$0xff]   ;;  %v6979_v57 = vld [vmem:[%s9509_s1 + $0xfa8] ss:$12 sps:$4 sm:$0xff]  }
 0x11b   :  { %4480 = vmatpush1.bf16.msra.mxu0 %v6915_v58  ;;  %v6982_v58 = vld [vmem:[%s9509_s1 + $0x1128] ss:$12 sps:$4 sm:$0xff]  }
 0x11c   :  { %4521 = vmatpush1.bf16.msra.mxu1 %v6918_v59  ;;  %4481 = vmatprep.subr.bf16.mxu0 %v6923_v60  ;;  %v8477_v59 = vld [vmem:[%s9510_s0 + $0x50] sm:$0xff]  ;;  %v8481_v60 = vcombine.low %v8256_v2, %v8256_v2 }
 0x11d   :  { %4522 = vmatprep.subr.bf16.mxu1 %v6926_v61  ;;  %v8485_v61 = vcombine.low %v8261_v3, %v8261_v3  ;;  %v6990_v2 = vld [vmem:[%s9509_s1 + $0x1114] ss:$12 sps:$4 sm:$0xff]   ;;  %v6985_v3 = vld [vmem:[%s9509_s1 + $0xf90] ss:$12 sps:$4 sm:$0xff]  }
 0x11f   :  { %4482 = vmatpush1.bf16.msra.mxu0 %v6921_v62  ;;  %v8490_v62 = vld [vmem:[%s9510_s0 + $0x58] sm:$0xff] }
 0x120   :  { %4523 = vmatpush1.bf16.msra.mxu1 %v6924_v63  ;;  %4483 = vmatprep.subr.bf16.mxu0 %v6929_v4  ;;  %v6987_v63 = vld [vmem:[%s9509_s1 + $0xf94] ss:$12 sps:$4 sm:$0xff]   ;;  %v8503_v4 = vcombine.high %v8477_v59, %v8477_v59 }
 0x121   :  { %4524 = vmatprep.subr.bf16.mxu1 %v6932_v35  ;;  %v8507_v35 = vcombine.high %v8490_v62, %v8490_v62 }
 0x123   :  { %4484 = vmatpush2.bf16.msra.mxu0 %v6927_v40 }
 0x124   :  { %4525 = vmatpush2.bf16.msra.mxu1 %v6930_v5  ;;  %4485 = vmatprep.subr.bf16.mxu0 %v6935_v8  ;;  %v6988_v8 = vld [vmem:[%s9509_s1 + $0x1110] ss:$12 sps:$4 sm:$0xff]  }
 0x125   :  { %4526 = vmatprep.subr.bf16.mxu1 %v6938_v11 }
 0x127   :  { %4486 = vmatpush2.bf16.msra.mxu0 %v6933_v12 }
 0x128   :  { %4527 = vmatpush2.bf16.msra.mxu1 %v6936_v13  ;;  %4487 = vmatprep.subr.bf16.mxu0 %v6941_v14  ;;  %v6993_v14 = vld [vmem:[%s9509_s1 + $0xf7c] ss:$12 sps:$4 sm:$0xff]  }
 0x129   :  { %4528 = vmatprep.subr.bf16.mxu1 %v6944_v15  ;;  %v6996_v15 = vld [vmem:[%s9509_s1 + $0x10fc] ss:$12 sps:$4 sm:$0xff]  }
 0x12b   :  { %4488 = vmatpush2.bf16.msra.mxu0 %v6939_v18 }
 0x12c   :  { %4529 = vmatpush2.bf16.msra.mxu1 %v6942_v19  ;;  %4489 = vmatprep.subr.bf16.mxu0 %v6947_v20 }
 0x12d   :  { %4530 = vmatprep.subr.bf16.mxu1 %v6950_v21 }
 0x12f   :  { %4490 = vmatpush2.bf16.msra.mxu0 %v6945_v27  ;;  %v6994_v27 = vld [vmem:[%s9509_s1 + $0x10f8] ss:$12 sps:$4 sm:$0xff]  }
 0x130   :  { %4531 = vmatpush2.bf16.msra.mxu1 %v6948_v28  ;;  %4491 = vmatprep.subr.bf16.mxu0 %v6953_v29 }
 0x131   :  { %4532 = vmatprep.subr.bf16.mxu1 %v6956_v30  ;;  %v6999_v30 = vld [vmem:[%s9509_s1 + $0xf64] ss:$12 sps:$4 sm:$0xff]  }
 0x133   :  { %4492 = vmatpush2.bf16.msra.mxu0 %v6951_v32  ;;  %v7002_v32 = vld [vmem:[%s9509_s1 + $0x10e4] ss:$12 sps:$4 sm:$0xff]  }
 0x134   :  { %4533 = vmatpush2.bf16.msra.mxu1 %v6954_v33  ;;  %4493 = vmatprep.subr.bf16.mxu0 %v6959_v34  ;;  %v6997_v33 = vld [vmem:[%s9509_s1 + $0xf60] ss:$12 sps:$4 sm:$0xff]  }
 0x135   :  { %4534 = vmatprep.subr.bf16.mxu1 %v6962_v41  ;;  %v7000_v34 = vld [vmem:[%s9509_s1 + $0x10e0] ss:$12 sps:$4 sm:$0xff]  }
 0x136   :  { %v7005_v41 = vld [vmem:[%s9509_s1 + $0xf4c] ss:$12 sps:$4 sm:$0xff]  }
 0x137   :  { %4494 = vmatpush2.bf16.msra.mxu0 %v6957_v22  ;;  %v7008_v22 = vld [vmem:[%s9509_s1 + $0x10cc] ss:$12 sps:$4 sm:$0xff]  }
 0x138   :  { %4535 = vmatpush2.bf16.msra.mxu1 %v6960_v23  ;;  %4495 = vmatprep.subr.bf16.mxu0 %v6965_v44  ;;  %v7003_v23 = vld [vmem:[%s9509_s1 + $0xf48] ss:$12 sps:$4 sm:$0xff]  }
 0x139   :  { %4536 = vmatprep.subr.bf16.mxu1 %v6968_v45  ;;  %v7006_v44 = vld [vmem:[%s9509_s1 + $0x10c8] ss:$12 sps:$4 sm:$0xff]  }
 0x13a   :  { %v7011_v45 = vld [vmem:[%s9509_s1 + $0xf34] ss:$12 sps:$4 sm:$0xff]  }
 0x13b   :  { %4496 = vmatpush2.bf16.msra.mxu0 %v6963_v46  ;;  %v7014_v46 = vld [vmem:[%s9509_s1 + $0x10b4] ss:$12 sps:$4 sm:$0xff]  }
 0x13c   :  { %4537 = vmatpush2.bf16.msra.mxu1 %v6966_v48  ;;  %4497 = vmatprep.subr.bf16.mxu0 %v6971_v49  ;;  %v7009_v48 = vld [vmem:[%s9509_s1 + $0xf30] ss:$12 sps:$4 sm:$0xff]  }
 0x13d   :  { %4538 = vmatprep.subr.bf16.mxu1 %v6974_v50  ;;  %v7012_v49 = vld [vmem:[%s9509_s1 + $0x10b0] ss:$12 sps:$4 sm:$0xff]  }
 0x13e   :  { %v7017_v50 = vld [vmem:[%s9509_s1 + $0xf1c] ss:$12 sps:$4 sm:$0xff]  }
 0x13f   :  { %4498 = vmatpush2.bf16.msra.mxu0 %v6969_v52  ;;  %v7020_v52 = vld [vmem:[%s9509_s1 + $0x109c] ss:$12 sps:$4 sm:$0xff]  }
 0x140   :  { %4539 = vmatpush2.bf16.msra.mxu1 %v6972_v53  ;;  %4549 = vmatprep.subr.bf16.mxu0 %v6981_v55  ;;  %v7015_v53 = vld [vmem:[%s9509_s1 + $0xf18] ss:$12 sps:$4 sm:$0xff]  }
 0x141   :  { %4590 = vmatprep.subr.bf16.mxu1 %v6984_v56  ;;  %v7018_v55 = vld [vmem:[%s9509_s1 + $0x1098] ss:$12 sps:$4 sm:$0xff]  }
 0x142   :  { %v4255_v40 = vpop.f32.mrf.mxu0  ;;  %4500 = vmatmul.mubr.bf16.vlgmr.msra.gmra.mxu0 %v8481_v60  ;;  %v7023_v56 = vld [vmem:[%s9509_s1 + $0xf04] ss:$12 sps:$4 sm:$0xff]  }
 0x143   :  { %v4296_v5 = vpop.f32.mrf.mxu1  ;;  %4541 = vmatmul.mubr.bf16.vlgmr.msra.gmra.mxu1 %v8485_v61  ;;  %v4256_v11 = vadd.f32 %v4255_v40, %v8294_v26  ;;  %4550 = vmatpush1.bf16.msra.mxu0 %v6979_v57  ;;  %v6991_v26 = vld [vmem:[%s9509_s1 + $0xf78] ss:$12 sps:$4 sm:$0xff]   ;;  %v7027_v40 = vld [vmem:[%s9509_s1 + $0x1068] ss:$12 sps:$4 sm:$0xff]  }
 0x144   :  { %4591 = vmatpush1.bf16.msra.mxu1 %v6982_v58  ;;  %v4257_v12 = vpop.f32.mrf.mxu0  ;;  %4551 = vmatprep.subr.bf16.mxu0 %v6987_v63  ;;  %v7026_v57 = vld [vmem:[%s9509_s1 + $0x1084] ss:$12 sps:$4 sm:$0xff]   ;;  %v7021_v58 = vld [vmem:[%s9509_s1 + $0xf00] ss:$12 sps:$4 sm:$0xff]  }
 0x145   :  { %v4298_v13 = vpop.f32.mrf.mxu1  ;;  %4592 = vmatprep.subr.bf16.mxu1 %v6990_v2  ;;  %v8521_v18 = vadd.f32 %v4296_v5, %v4256_v11  ;;  %v4258_v19 = vadd.f32 %v4257_v12, %v8301_v31  ;;  %4581 = vmatprep.mubr.bf16.mxu0 %v8503_v4  ;;  %v7024_v63 = vld [vmem:[%s9509_s1 + $0x1080] ss:$12 sps:$4 sm:$0xff]   ;;  %v7030_v5 = vld [vmem:[%s9509_s1 + $0x11e8] ss:$12 sps:$4 sm:$0xff]   ;;  %v7033_v12 = vld [vmem:[%s9509_s1 + $0x1050] ss:$12 sps:$4 sm:$0xff]  }
 0x146   :  { %4622 = vmatprep.mubr.bf16.mxu1 %v8507_v35  ;;  %v4259_v20 = vpop.f32.mrf.mxu0  ;;  %v7029_v2 = vld [vmem:[%s9509_s1 + $0x106c] ss:$12 sps:$4 sm:$0xff]   ;;  %v7038_v11 = vld [vmem:[%s9509_s1 + $0x11d4] ss:$12 sps:$4 sm:$0xff]  }
 0x147   :  { %v4300_v21 = vpop.f32.mrf.mxu1  ;;  %v8532_v28 = vadd.f32 %v4298_v13, %v4258_v19  ;;  %4552 = vmatpush1.bf16.msra.mxu0 %v6985_v3  ;;  %v7032_v3 = vld [vmem:[%s9509_s1 + $0x11ec] ss:$12 sps:$4 sm:$0xff]   ;;  %v7036_v13 = vld [vmem:[%s9509_s1 + $0x11d0] ss:$12 sps:$4 sm:$0xff]  }
 0x148   :  { %4593 = vmatpush1.bf16.msra.mxu1 %v6988_v8  ;;  %v4260_v29 = vpop.f32.mrf.mxu0  ;;  %4553 = vmatprep.subr.bf16.mxu0 %v6993_v14  ;;  %v7035_v8 = vld [vmem:[%s9509_s1 + $0x1054] ss:$12 sps:$4 sm:$0xff]   ;;  %v7041_v14 = vld [vmem:[%s9509_s1 + $0x103c] ss:$12 sps:$4 sm:$0xff]   ;;  %v7039_v19 = vld [vmem:[%s9509_s1 + $0x1038] ss:$12 sps:$4 sm:$0xff]  }
 0x149   :  { %v4301_v31 = vpop.f32.mrf.mxu1  ;;  %4594 = vmatprep.subr.bf16.mxu1 %v6996_v15  ;;  %v7044_v15 = vld [vmem:[%s9509_s1 + $0x11bc] ss:$12 sps:$4 sm:$0xff]   ;;  %v7047_v20 = vld [vmem:[%s9509_s1 + $0x1024] ss:$12 sps:$4 sm:$0xff]   ;;  %v7048_v29 = vld [vmem:[%s9509_s1 + $0x11a0] ss:$12 sps:$4 sm:$0xff]  }
 0x14a   :  { %v7050_v21 = vld [vmem:[%s9509_s1 + $0x11a4] ss:$12 sps:$4 sm:$0xff]   ;;  %v7053_v31 = vld [vmem:[%s9509_s1 + $0x100c] ss:$12 sps:$4 sm:$0xff]  }
 0x14b   :  { %4554 = vmatpush1.bf16.msra.mxu0 %v6991_v26  ;;  %v7042_v26 = vld [vmem:[%s9509_s1 + $0x11b8] ss:$12 sps:$4 sm:$0xff]  }
 0x14c   :  { %4595 = vmatpush1.bf16.msra.mxu1 %v6994_v27  ;;  %4555 = vmatprep.subr.bf16.mxu0 %v6999_v30  ;;  %v7045_v27 = vld [vmem:[%s9509_s1 + $0x1020] ss:$12 sps:$4 sm:$0xff]  }
 0x14d   :  { %4596 = vmatprep.subr.bf16.mxu1 %v7002_v32  ;;  %v7056_v30 = vld [vmem:[%s9509_s1 + $0x118c] ss:$12 sps:$4 sm:$0xff]   ;;  %v7051_v32 = vld [vmem:[%s9509_s1 + $0x1008] ss:$12 sps:$4 sm:$0xff]  }
 0x14f   :  { %4556 = vmatpush1.bf16.msra.mxu0 %v6997_v33  ;;  %v7054_v33 = vld [vmem:[%s9509_s1 + $0x1188] ss:$12 sps:$4 sm:$0xff]  }
 0x150   :  { %4597 = vmatpush1.bf16.msra.mxu1 %v7000_v34  ;;  %4557 = vmatprep.subr.bf16.mxu0 %v7005_v41  ;;  %v7059_v34 = vld [vmem:[%s9509_s1 + $0xff4] ss:$12 sps:$4 sm:$0xff]  }
 0x151   :  { %4598 = vmatprep.subr.bf16.mxu1 %v7008_v22  ;;  %v7062_v41 = vld [vmem:[%s9509_s1 + $0x1174] ss:$12 sps:$4 sm:$0xff]   ;;  %v7057_v22 = vld [vmem:[%s9509_s1 + $0xff0] ss:$12 sps:$4 sm:$0xff]  }
 0x153   :  { %4558 = vmatpush1.bf16.msra.mxu0 %v7003_v23  ;;  %v7060_v23 = vld [vmem:[%s9509_s1 + $0x1170] ss:$12 sps:$4 sm:$0xff]  }
 0x154   :  { %4599 = vmatpush1.bf16.msra.mxu1 %v7006_v44  ;;  %4559 = vmatprep.subr.bf16.mxu0 %v7011_v45  ;;  %v7065_v44 = vld [vmem:[%s9509_s1 + $0xfdc] ss:$12 sps:$4 sm:$0xff]  }
 0x155   :  { %4600 = vmatprep.subr.bf16.mxu1 %v7014_v46  ;;  %v7068_v45 = vld [vmem:[%s9509_s1 + $0x115c] ss:$12 sps:$4 sm:$0xff]   ;;  %v7063_v46 = vld [vmem:[%s9509_s1 + $0xfd8] ss:$12 sps:$4 sm:$0xff]  }
 0x157   :  { %4560 = vmatpush1.bf16.msra.mxu0 %v7009_v48  ;;  %v7066_v48 = vld [vmem:[%s9509_s1 + $0x1158] ss:$12 sps:$4 sm:$0xff]  }
 0x158   :  { %4601 = vmatpush1.bf16.msra.mxu1 %v7012_v49  ;;  %4561 = vmatprep.subr.bf16.mxu0 %v7017_v50  ;;  %v7071_v49 = vld [vmem:[%s9509_s1 + $0xfc4] ss:$12 sps:$4 sm:$0xff]  }
 0x159   :  { %4602 = vmatprep.subr.bf16.mxu1 %v7020_v52  ;;  %v7074_v50 = vld [vmem:[%s9509_s1 + $0x1144] ss:$12 sps:$4 sm:$0xff]   ;;  %v7069_v52 = vld [vmem:[%s9509_s1 + $0xfc0] ss:$12 sps:$4 sm:$0xff]  }
 0x15b   :  { %4562 = vmatpush1.bf16.msra.mxu0 %v7015_v53  ;;  %v7072_v53 = vld [vmem:[%s9509_s1 + $0x1140] ss:$12 sps:$4 sm:$0xff]  }
 0x15c   :  { %4603 = vmatpush1.bf16.msra.mxu1 %v7018_v55  ;;  %4563 = vmatprep.subr.bf16.mxu0 %v7023_v56  ;;  %v7081_v55 = vld [vmem:[%s9509_s1 + $0x12ac] ss:$12 sps:$4 sm:$0xff]   ;;  %v7082_v56 = vld [vmem:[%s9509_s1 + $0x170] ss:$12 sps:$4 sm:$0xff]  }
 0x15d   :  { %4604 = vmatprep.subr.bf16.mxu1 %v7026_v57  ;;  %v7079_v57 = vld [vmem:[%s9509_s1 + $0x12a8] ss:$12 sps:$4 sm:$0xff]  }
 0x15f   :  { %4564 = vmatpush1.bf16.msra.mxu0 %v7021_v58  ;;  %v8701_v58 = vcombine.low %v8477_v59, %v8477_v59  ;;  %v7087_v59 = vld [vmem:[%s9509_s1 + $0x158] ss:$12 sps:$4 sm:$0xff]  }
 0x160   :  { %4605 = vmatpush1.bf16.msra.mxu1 %v7024_v63  ;;  %4565 = vmatprep.subr.bf16.mxu0 %v7029_v2  ;;  %v8705_v63 = vcombine.low %v8490_v62, %v8490_v62  ;;  %v7083_v2 = vld [vmem:[%s9509_s1 + $0xb0] ss:$12 sps:$4 sm:$0xff]  }
 0x161   :  { %4606 = vmatprep.subr.bf16.mxu1 %v7032_v3  ;;  %v7086_v3 = vld [vmem:[%s9509_s1 + $0x1294] ss:$12 sps:$4 sm:$0xff]   ;;  %v7084_v62 = vld [vmem:[%s9509_s1 + $0x1290] ss:$12 sps:$4 sm:$0xff]  }
 0x163   :  { %4566 = vmatpush2.bf16.msra.mxu0 %v7027_v40  ;;  %v7088_v40 = vld [vmem:[%s9509_s1 + $0x98] ss:$12 sps:$4 sm:$0xff]  }
 0x164   :  { %4607 = vmatpush2.bf16.msra.mxu1 %v7030_v5  ;;  %4567 = vmatprep.subr.bf16.mxu0 %v7035_v8 }
 0x165   :  { %4608 = vmatprep.subr.bf16.mxu1 %v7038_v11 }
 0x167   :  { %4568 = vmatpush2.bf16.msra.mxu0 %v7033_v12 }
 0x168   :  { %4609 = vmatpush2.bf16.msra.mxu1 %v7036_v13  ;;  %4569 = vmatprep.subr.bf16.mxu0 %v7041_v14  ;;  %v7091_v14 = vld [vmem:[%s9509_s1 + $0x127c] ss:$12 sps:$4 sm:$0xff]  }
 0x169   :  { %4610 = vmatprep.subr.bf16.mxu1 %v7044_v15  ;;  %v7092_v15 = vld [vmem:[%s9509_s1 + $0x140] ss:$12 sps:$4 sm:$0xff]  }
 0x16b   :  { %4570 = vmatpush2.bf16.msra.mxu0 %v7039_v19 }
 0x16c   :  { %4611 = vmatpush2.bf16.msra.mxu1 %v7042_v26  ;;  %4571 = vmatprep.subr.bf16.mxu0 %v7047_v20  ;;  %v7330_v20 = vmov 0  }
 0x16d   :  { %4612 = vmatprep.subr.bf16.mxu1 %v7050_v21 }
 0x16f   :  { %4572 = vmatpush2.bf16.msra.mxu0 %v7045_v27 }
 0x170   :  { %4613 = vmatpush2.bf16.msra.mxu1 %v7048_v29  ;;  %4573 = vmatprep.subr.bf16.mxu0 %v7053_v31  ;;  %v7093_v29 = vld [vmem:[%s9509_s1 + $0x80] ss:$12 sps:$4 sm:$0xff]  }
 0x171   :  { %4614 = vmatprep.subr.bf16.mxu1 %v7056_v30 }
 0x173   :  { %4574 = vmatpush2.bf16.msra.mxu0 %v7051_v32  ;;  %v7096_v32 = vld [vmem:[%s9509_s1 + $0x1264] ss:$12 sps:$4 sm:$0xff]  }
 0x174   :  { %4615 = vmatpush2.bf16.msra.mxu1 %v7054_v33  ;;  %4575 = vmatprep.subr.bf16.mxu0 %v7059_v34  ;;  %v7094_v33 = vld [vmem:[%s9509_s1 + $0x1260] ss:$12 sps:$4 sm:$0xff]   ;;  %v7098_v34 = vld [vmem:[%s9509_s1 + $0x68] ss:$12 sps:$4 sm:$0xff]  }
 0x175   :  { %4616 = vmatprep.subr.bf16.mxu1 %v7062_v41  ;;  %v7101_v41 = vld [vmem:[%s9509_s1 + $0x124c] ss:$12 sps:$4 sm:$0xff]  }
 0x177   :  { %4576 = vmatpush2.bf16.msra.mxu0 %v7057_v22  ;;  %v7102_v22 = vld [vmem:[%s9509_s1 + $0x110] ss:$12 sps:$4 sm:$0xff]  }
 0x178   :  { %4617 = vmatpush2.bf16.msra.mxu1 %v7060_v23  ;;  %4577 = vmatprep.subr.bf16.mxu0 %v7065_v44  ;;  %v7099_v23 = vld [vmem:[%s9509_s1 + $0x1248] ss:$12 sps:$4 sm:$0xff]   ;;  %v7103_v44 = vld [vmem:[%s9509_s1 + $0x50] ss:$12 sps:$4 sm:$0xff]  }
 0x179   :  { %4618 = vmatprep.subr.bf16.mxu1 %v7068_v45  ;;  %v7106_v45 = vld [vmem:[%s9509_s1 + $0x1234] ss:$12 sps:$4 sm:$0xff]  }
 0x17b   :  { %4578 = vmatpush2.bf16.msra.mxu0 %v7063_v46  ;;  %v7107_v46 = vld [vmem:[%s9509_s1 + $0xf8] ss:$12 sps:$4 sm:$0xff]  }
 0x17c   :  { %4619 = vmatpush2.bf16.msra.mxu1 %v7066_v48  ;;  %4579 = vmatprep.subr.bf16.mxu0 %v7071_v49  ;;  %v7104_v48 = vld [vmem:[%s9509_s1 + $0x1230] ss:$12 sps:$4 sm:$0xff]   ;;  %v7108_v49 = vld [vmem:[%s9509_s1 + $0x38] ss:$12 sps:$4 sm:$0xff]  }
 0x17d   :  { %4620 = vmatprep.subr.bf16.mxu1 %v7074_v50  ;;  %v7111_v50 = vld [vmem:[%s9509_s1 + $0x121c] ss:$12 sps:$4 sm:$0xff]  }
 0x17f   :  { %4580 = vmatpush2.bf16.msra.mxu0 %v7069_v52  ;;  %v7112_v52 = vld [vmem:[%s9509_s1 + $0xe0] ss:$12 sps:$4 sm:$0xff]  }
 0x180   :  { %4621 = vmatpush2.bf16.msra.mxu1 %v7072_v53  ;;  %4631 = vmatprep.subr.bf16.mxu0 %v7081_v55  ;;  %v7109_v53 = vld [vmem:[%s9509_s1 + $0x1218] ss:$12 sps:$4 sm:$0xff]   ;;  %v7113_v55 = vld [vmem:[%s9509_s1 + $0x20] ss:$12 sps:$4 sm:$0xff]  }
 0x181   :  { %6132 = vmatprep.subr.bf16.mxu1 %v7082_v56  ;;  %v7116_v56 = vld [vmem:[%s9509_s1 + $0x1204] ss:$12 sps:$4 sm:$0xff]  }
 0x182   :  { %v4337_v5 = vpop.f32.mrf.mxu0  ;;  %4582 = vmatmul.mubr.bf16.vlgmr.msra.gmra.mxu0 %v8701_v58 }
 0x183   :  { %v4378_v8 = vpop.f32.mrf.mxu1  ;;  %4623 = vmatmul.mubr.bf16.vlgmr.msra.gmra.mxu1 %v8705_v63  ;;  %v4338_v11 = vadd.f32 %v4337_v5, %v8521_v18  ;;  %4632 = vmatpush1.bf16.msra.mxu0 %v7079_v57  ;;  %v7089_v18 = vld [vmem:[%s9509_s1 + $0x1278] ss:$12 sps:$4 sm:$0xff]   ;;  %v7117_v57 = vld [vmem:[%s9509_s1 + $0xc8] ss:$12 sps:$4 sm:$0xff]   ;;  %v7122_v5 = vld [vmem:[%s9509_s1 + $0x230] ss:$12 sps:$4 sm:$0xff]  }
 0x184   :  { %6133 = vmatpush3.bf16.msra.mxu1 %v7083_v2  ;;  %v4339_v12 = vpop.f32.mrf.mxu0  ;;  %4633 = vmatprep.subr.bf16.mxu0 %v7086_v3  ;;  %v7114_v2 = vld [vmem:[%s9509_s1 + $0x1200] ss:$12 sps:$4 sm:$0xff]   ;;  %v7118_v3 = vld [vmem:[%s9509_s1 + $0x8] ss:$12 sps:$4 sm:$0xff]  }
 0x185   :  { %v4380_v13 = vpop.f32.mrf.mxu1  ;;  %6134 = vmatprep.subr.bf16.mxu1 %v7087_v59  ;;  %v8731_v19 = vadd.f32 %v4378_v8, %v4338_v11  ;;  %v4340_v26 = vadd.f32 %v4339_v12, %v8532_v28  ;;  %4663 = vmatprep.mubr.bf16.mxu0 %v7330_v20  ;;  %v7120_v59 = vld [vmem:[%s9509_s1 + $0x2f0] ss:$12 sps:$4 sm:$0xff]   ;;  %v7124_v11 = vld [vmem:[%s9509_s1 + $0x2d8] ss:$12 sps:$4 sm:$0xff]   ;;  %v7132_v20 = vld [vmem:[%s9509_s1 + $0x2a8] ss:$12 sps:$4 sm:$0xff]  }
 0x186   :  { %4704 = vmatprep.mubr.bf16.mxu1 %v7504_v47  ;;  %v4341_v21 = vpop.f32.mrf.mxu0  ;;  %v7097_v47 = vld [vmem:[%s9509_s1 + $0x128] ss:$12 sps:$4 sm:$0xff]   ;;  %v7123_v8 = vld [vmem:[%s9509_s1 + $0x3b0] ss:$12 sps:$4 sm:$0xff]   ;;  %v7125_v12 = vld [vmem:[%s9509_s1 + $0x458] ss:$12 sps:$4 sm:$0xff]  }
 0x187   :  { %v4382_v27 = vpop.f32.mrf.mxu1  ;;  %v8741_v31 = vadd.f32 %v4380_v13, %v4340_v26  ;;  %4634 = vmatpush1.bf16.msra.mxu0 %v7084_v62  ;;  %v7119_v62 = vld [vmem:[%s9510_s0 + $0x60] ss:$0 sps:$4 sm:$0xff]   ;;  %v7126_v13 = vld [vmem:[%s9509_s1 + $0x218] ss:$12 sps:$4 sm:$0xff]   ;;  %v7133_v21 = vld [vmem:[%s9509_s1 + $0x428] ss:$12 sps:$4 sm:$0xff]  }
 0x188   :  { %6135 = vmatpush3.bf16.msra.mxu1 %v7088_v40  ;;  %v4342_v30 = vpop.f32.mrf.mxu0  ;;  %4635 = vmatprep.subr.bf16.mxu0 %v7091_v14  ;;  %v7121_v40 = vld [vmem:[%s9509_s1 + $0x470] ss:$12 sps:$4 sm:$0xff]   ;;  %v7127_v14 = vld [vmem:[%s9509_s1 + $0x398] ss:$12 sps:$4 sm:$0xff]   ;;  %v7129_v26 = vld [vmem:[%s9509_s1 + $0x440] ss:$12 sps:$4 sm:$0xff]  }
 0x189   :  { %v4383_v28 = vpop.f32.mrf.mxu1  ;;  %6136 = vmatprep.subr.bf16.mxu1 %v7092_v15  ;;  %v7128_v15 = vld [vmem:[%s9509_s1 + $0x2c0] ss:$12 sps:$4 sm:$0xff]   ;;  %v7136_v27 = vld [vmem:[%s9509_s1 + $0x290] ss:$12 sps:$4 sm:$0xff]  }
 0x18a   :  { %v7138_v30 = vld [vmem:[%s9509_s1 + $0x1d0] ss:$12 sps:$4 sm:$0xff]  }
 0x18b   :  { %4636 = vmatpush1.bf16.msra.mxu0 %v7089_v18  ;;  %v7131_v18 = vld [vmem:[%s9509_s1 + $0x380] ss:$12 sps:$4 sm:$0xff]   ;;  %v7139_v28 = vld [vmem:[%s9509_s1 + $0x350] ss:$12 sps:$4 sm:$0xff]  }
 0x18c   :  { %6137 = vmatpush3.bf16.msra.mxu1 %v7093_v29  ;;  %4637 = vmatprep.subr.bf16.mxu0 %v7096_v32  ;;  %v7137_v29 = vld [vmem:[%s9509_s1 + $0x410] ss:$12 sps:$4 sm:$0xff]   ;;  %v7140_v32 = vld [vmem:[%s9509_s1 + $0x278] ss:$12 sps:$4 sm:$0xff]  }
 0x18d   :  { %6138 = vmatprep.subr.bf16.mxu1 %v7097_v47  ;;  %v7141_v47 = vld [vmem:[%s9509_s1 + $0x3f8] ss:$12 sps:$4 sm:$0xff]  }
 0x18f   :  { %4638 = vmatpush1.bf16.msra.mxu0 %v7094_v33  ;;  %v7142_v33 = vld [vmem:[%s9509_s1 + $0x1b8] ss:$12 sps:$4 sm:$0xff]  }
 0x190   :  { %6139 = vmatpush3.bf16.msra.mxu1 %v7098_v34  ;;  %4639 = vmatprep.subr.bf16.mxu0 %v7101_v41  ;;  %v7143_v34 = vld [vmem:[%s9509_s1 + $0x338] ss:$12 sps:$4 sm:$0xff]   ;;  %v7144_v41 = vld [vmem:[%s9509_s1 + $0x260] ss:$12 sps:$4 sm:$0xff]  }
 0x191   :  { %6140 = vmatprep.subr.bf16.mxu1 %v7102_v22  ;;  %v7145_v22 = vld [vmem:[%s9509_s1 + $0x3e0] ss:$12 sps:$4 sm:$0xff]  }
 0x193   :  { %4640 = vmatpush1.bf16.msra.mxu0 %v7099_v23  ;;  %v7146_v23 = vld [vmem:[%s9509_s1 + $0x1a0] ss:$12 sps:$4 sm:$0xff]  }
 0x194   :  { %6141 = vmatpush3.bf16.msra.mxu1 %v7103_v44  ;;  %4641 = vmatprep.subr.bf16.mxu0 %v7106_v45  ;;  %v7147_v44 = vld [vmem:[%s9509_s1 + $0x320] ss:$12 sps:$4 sm:$0xff]   ;;  %v7148_v45 = vld [vmem:[%s9509_s1 + $0x248] ss:$12 sps:$4 sm:$0xff]  }
 0x195   :  { %6142 = vmatprep.subr.bf16.mxu1 %v7107_v46  ;;  %v7149_v46 = vld [vmem:[%s9509_s1 + $0x3c8] ss:$12 sps:$4 sm:$0xff]  }
 0x197   :  { %4642 = vmatpush1.bf16.msra.mxu0 %v7104_v48  ;;  %v7150_v48 = vld [vmem:[%s9509_s1 + $0x188] ss:$12 sps:$4 sm:$0xff]  }
 0x198   :  { %6143 = vmatpush3.bf16.msra.mxu1 %v7108_v49  ;;  %4643 = vmatprep.subr.bf16.mxu0 %v7111_v50  ;;  %v7151_v49 = vld [vmem:[%s9509_s1 + $0x308] ss:$12 sps:$4 sm:$0xff]   ;;  %v7152_v50 = vld [vmem:[%s9509_s1 + $0x5f0] ss:$12 sps:$4 sm:$0xff]  }
 0x199   :  { %6144 = vmatprep.subr.bf16.mxu1 %v7112_v52  ;;  %v7153_v52 = vld [vmem:[%s9509_s1 + $0x770] ss:$12 sps:$4 sm:$0xff]  }
 0x19b   :  { %4644 = vmatpush1.bf16.msra.mxu0 %v7109_v53  ;;  %v7154_v53 = vld [vmem:[%s9509_s1 + $0x530] ss:$12 sps:$4 sm:$0xff]  }
 0x19c   :  { %6145 = vmatpush3.bf16.msra.mxu1 %v7113_v55  ;;  %4645 = vmatprep.subr.bf16.mxu0 %v7116_v56  ;;  %v7155_v55 = vld [vmem:[%s9509_s1 + $0x6b0] ss:$12 sps:$4 sm:$0xff]   ;;  %v7156_v56 = vld [vmem:[%s9509_s1 + $0x5d8] ss:$12 sps:$4 sm:$0xff]  }
 0x19d   :  { %6146 = vmatprep.subr.bf16.mxu1 %v7117_v57  ;;  %v7157_v57 = vld [vmem:[%s9509_s1 + $0x758] ss:$12 sps:$4 sm:$0xff]  }
 0x19f   :  { %4646 = vmatpush1.bf16.msra.mxu0 %v7114_v2  ;;  %v7158_v2 = vld [vmem:[%s9509_s1 + $0x518] ss:$12 sps:$4 sm:$0xff]  }
 0x1a0   :  { %6147 = vmatpush3.bf16.msra.mxu1 %v7118_v3  ;;  %6154 = vmatprep.subr.bf16.mxu0 %v7120_v59  ;;  %v7159_v3 = vld [vmem:[%s9509_s1 + $0x698] ss:$12 sps:$4 sm:$0xff]  }
 0x1a1   :  { %6176 = vmatprep.subr.bf16.mxu1 %v7121_v40  ;;  %v7160_v40 = vld [vmem:[%s9509_s1 + $0x5c0] ss:$12 sps:$4 sm:$0xff]  }
 0x1a2   :  { %4664 = vmatmul.mubr.bf16.vlgmr.msra.gmra.mxu0 %v7119_v62 }
 0x1a3   :  { %4705 = vmatmul.mubr.bf16.vlgmr.msra.gmra.mxu1 %v7573_v6  ;;  %6155 = vmatpush3.bf16.msra.mxu0 %v7122_v5  ;;  %v7130_v6 = vld [vmem:[%s9509_s1 + $0x200] ss:$12 sps:$4 sm:$0xff]  }
 0x1a4   :  { %6177 = vmatpush3.bf16.msra.mxu1 %v7123_v8  ;;  %6156 = vmatprep.subr.bf16.mxu0 %v7124_v11 }
 0x1a5   :  { %6178 = vmatprep.subr.bf16.mxu1 %v7125_v12  ;;  %4744 = vmatprep.mubr.bf16.mxu0 %v7515_v51  ;;  %v7134_v51 = vld [vmem:[%s9509_s1 + $0x1e8] ss:$12 sps:$4 sm:$0xff]   ;;  %v7161_v12 = vld [vmem:[%s9509_s1 + $0x740] ss:$12 sps:$4 sm:$0xff]  }
 0x1a6   :  { %4784 = vmatprep.mubr.bf16.mxu1 %v7669_v36  ;;  %v7135_v36 = vld [vmem:[%s9509_s1 + $0x368] ss:$12 sps:$4 sm:$0xff]  }
 0x1a7   :  { %6157 = vmatpush3.bf16.msra.mxu0 %v7126_v13  ;;  %v7162_v13 = vld [vmem:[%s9509_s1 + $0x500] ss:$12 sps:$4 sm:$0xff]  }
 0x1a8   :  { %6179 = vmatpush3.bf16.msra.mxu1 %v7127_v14  ;;  %6158 = vmatprep.subr.bf16.mxu0 %v7128_v15 }
 0x1a9   :  { %6180 = vmatprep.subr.bf16.mxu1 %v7129_v26 }
 0x1ab   :  { %6159 = vmatpush3.bf16.msra.mxu0 %v7130_v6 }
 0x1ac   :  { %6181 = vmatpush3.bf16.msra.mxu1 %v7131_v18  ;;  %6160 = vmatprep.subr.bf16.mxu0 %v7132_v20  ;;  %v7164_v18 = vld [vmem:[%s9509_s1 + $0x5a8] ss:$12 sps:$4 sm:$0xff]  }
 0x1ad   :  { %6182 = vmatprep.subr.bf16.mxu1 %v7133_v21  ;;  %v7167_v20 = vld [vmem:[%s9509_s1 + $0x668] ss:$12 sps:$4 sm:$0xff]   ;;  %v7168_v21 = vld [vmem:[%s9509_s1 + $0x590] ss:$12 sps:$4 sm:$0xff]  }
 0x1af   :  { %6161 = vmatpush3.bf16.msra.mxu0 %v7134_v51  ;;  %v7169_v51 = vld [vmem:[%s9509_s1 + $0x710] ss:$12 sps:$4 sm:$0xff]  }
 0x1b0   :  { %6183 = vmatpush3.bf16.msra.mxu1 %v7135_v36  ;;  %6162 = vmatprep.subr.bf16.mxu0 %v7136_v27  ;;  %v7170_v36 = vld [vmem:[%s9509_s1 + $0x4d0] ss:$12 sps:$4 sm:$0xff]  }
 0x1b1   :  { %6184 = vmatprep.subr.bf16.mxu1 %v7137_v29  ;;  %v7171_v27 = vld [vmem:[%s9509_s1 + $0x650] ss:$12 sps:$4 sm:$0xff]   ;;  %v7172_v29 = vld [vmem:[%s9509_s1 + $0x578] ss:$12 sps:$4 sm:$0xff]  }
 0x1b3   :  { %6163 = vmatpush3.bf16.msra.mxu0 %v7138_v30  ;;  %v7173_v30 = vld [vmem:[%s9509_s1 + $0x6f8] ss:$12 sps:$4 sm:$0xff]  }
 0x1b4   :  { %6185 = vmatpush3.bf16.msra.mxu1 %v7139_v28  ;;  %6164 = vmatprep.subr.bf16.mxu0 %v7140_v32  ;;  %v7174_v28 = vld [vmem:[%s9509_s1 + $0x4b8] ss:$12 sps:$4 sm:$0xff]  }
 0x1b5   :  { %6186 = vmatprep.subr.bf16.mxu1 %v7141_v47  ;;  %v7175_v32 = vld [vmem:[%s9509_s1 + $0x638] ss:$12 sps:$4 sm:$0xff]   ;;  %v7176_v47 = vld [vmem:[%s9509_s1 + $0x560] ss:$12 sps:$4 sm:$0xff]  }
 0x1b7   :  { %6165 = vmatpush3.bf16.msra.mxu0 %v7142_v33  ;;  %v7177_v33 = vld [vmem:[%s9509_s1 + $0x6e0] ss:$12 sps:$4 sm:$0xff]  }
 0x1b8   :  { %6187 = vmatpush3.bf16.msra.mxu1 %v7143_v34  ;;  %6166 = vmatprep.subr.bf16.mxu0 %v7144_v41  ;;  %v7178_v34 = vld [vmem:[%s9509_s1 + $0x4a0] ss:$12 sps:$4 sm:$0xff]  }
 0x1b9   :  { %6188 = vmatprep.subr.bf16.mxu1 %v7145_v22  ;;  %v7179_v41 = vld [vmem:[%s9509_s1 + $0x620] ss:$12 sps:$4 sm:$0xff]   ;;  %v7180_v22 = vld [vmem:[%s9509_s1 + $0x548] ss:$12 sps:$4 sm:$0xff]  }
 0x1bb   :  { %6167 = vmatpush3.bf16.msra.mxu0 %v7146_v23  ;;  %v7181_v23 = vld [vmem:[%s9509_s1 + $0x6c8] ss:$12 sps:$4 sm:$0xff]  }
 0x1bc   :  { %6189 = vmatpush3.bf16.msra.mxu1 %v7147_v44  ;;  %6168 = vmatprep.subr.bf16.mxu0 %v7148_v45  ;;  %v7182_v44 = vld [vmem:[%s9509_s1 + $0x488] ss:$12 sps:$4 sm:$0xff]  }
 0x1bd   :  { %6190 = vmatprep.subr.bf16.mxu1 %v7149_v46  ;;  %v7183_v45 = vld [vmem:[%s9509_s1 + $0x608] ss:$12 sps:$4 sm:$0xff]   ;;  %v7184_v46 = vld [vmem:[%s9509_s1 + $0x8f0] ss:$12 sps:$4 sm:$0xff]  }
 0x1bf   :  { %6169 = vmatpush3.bf16.msra.mxu0 %v7150_v48  ;;  %v7185_v48 = vld [vmem:[%s9509_s1 + $0xa70] ss:$12 sps:$4 sm:$0xff]  }
 0x1c0   :  { %6191 = vmatpush3.bf16.msra.mxu1 %v7151_v49  ;;  %6198 = vmatprep.subr.bf16.mxu0 %v7152_v50  ;;  %v7186_v49 = vld [vmem:[%s9509_s1 + $0x830] ss:$12 sps:$4 sm:$0xff]  }
 0x1c1   :  { %6220 = vmatprep.subr.bf16.mxu1 %v7153_v52  ;;  %v7187_v50 = vld [vmem:[%s9509_s1 + $0x9b0] ss:$12 sps:$4 sm:$0xff]   ;;  %v7188_v52 = vld [vmem:[%s9509_s1 + $0x8d8] ss:$12 sps:$4 sm:$0xff]  }
 0x1c2   :  { %v4419_v59 = vpop.f32.mrf.mxu0  ;;  %4745 = vmatmul.mubr.bf16.vlgmr.msra.gmra.mxu0 %v7575_v7 }
 0x1c3   :  { %v4460_v62 = vpop.f32.mrf.mxu1  ;;  %4785 = vmatmul.mubr.bf16.vlgmr.msra.gmra.mxu1 %v7793_v16  ;;  %v4420_v5 = vadd.f32 %v4419_v59, %v8731_v19  ;;  %6199 = vmatpush3.bf16.msra.mxu0 %v7154_v53  ;;  %v7163_v19 = vld [vmem:[%s9509_s1 + $0x680] ss:$12 sps:$4 sm:$0xff]   ;;  %v7189_v53 = vld [vmem:[%s9509_s1 + $0xa58] ss:$12 sps:$4 sm:$0xff]   ;;  %v7197_v59 = vld [vmem:[%s9509_s1 + $0xa28] ss:$12 sps:$4 sm:$0xff]  }
 0x1c4   :  { %6221 = vmatpush3.bf16.msra.mxu1 %v7155_v55  ;;  %v4421_v8 = vpop.f32.mrf.mxu0  ;;  %6200 = vmatprep.subr.bf16.mxu0 %v7156_v56  ;;  %v7190_v55 = vld [vmem:[%s9509_s1 + $0x818] ss:$12 sps:$4 sm:$0xff]  }
 0x1c5   :  { %v4462_v11 = vpop.f32.mrf.mxu1  ;;  %6222 = vmatprep.subr.bf16.mxu1 %v7157_v57  ;;  %v8938_v7 = vadd.f32 %v4460_v62, %v4420_v5  ;;  %v4422_v16 = vadd.f32 %v4421_v8, %v8741_v31  ;;  %4824 = vmatprep.mubr.bf16.mxu0 %v7673_v37  ;;  %v7165_v37 = vld [vmem:[%s9509_s1 + $0x728] ss:$12 sps:$4 sm:$0xff]   ;;  %v7191_v56 = vld [vmem:[%s9509_s1 + $0x998] ss:$12 sps:$4 sm:$0xff]   ;;  %v7192_v57 = vld [vmem:[%s9509_s1 + $0x8c0] ss:$12 sps:$4 sm:$0xff]  }
 0x1c6   :  { %4864 = vmatprep.mubr.bf16.mxu1 %v7823_v24  ;;  %v4423_v14 = vpop.f32.mrf.mxu0  ;;  %v7166_v24 = vld [vmem:[%s9509_s1 + $0x4e8] ss:$12 sps:$4 sm:$0xff]   ;;  %v7202_v5 = vld [vmem:[%s9509_s1 + $0x7d0] ss:$12 sps:$4 sm:$0xff]  }
 0x1c7   :  { %v4464_v15 = vpop.f32.mrf.mxu1  ;;  %v8949_v26 = vadd.f32 %v4462_v11, %v4422_v16  ;;  %6201 = vmatpush3.bf16.msra.mxu0 %v7158_v2  ;;  %v7193_v2 = vld [vmem:[%s9509_s1 + $0xa40] ss:$12 sps:$4 sm:$0xff]   ;;  %v7198_v62 = vld [vmem:[%s9509_s1 + $0x7e8] ss:$12 sps:$4 sm:$0xff]   ;;  %v7203_v8 = vld [vmem:[%s9509_s1 + $0x950] ss:$12 sps:$4 sm:$0xff]  }
 0x1c8   :  { %6223 = vmatpush3.bf16.msra.mxu1 %v7159_v3  ;;  %v4424_v6 = vpop.f32.mrf.mxu0  ;;  %6202 = vmatprep.subr.bf16.mxu0 %v7160_v40  ;;  %v7194_v3 = vld [vmem:[%s9509_s1 + $0x800] ss:$12 sps:$4 sm:$0xff]   ;;  %v7201_v40 = vld [vmem:[%s9509_s1 + $0xa10] ss:$12 sps:$4 sm:$0xff]   ;;  %v7204_v11 = vld [vmem:[%s9509_s1 + $0x878] ss:$12 sps:$4 sm:$0xff]  }
 0x1c9   :  { %v4465_v31 = vpop.f32.mrf.mxu1  ;;  %6224 = vmatprep.subr.bf16.mxu1 %v7161_v12  ;;  %v7205_v12 = vld [vmem:[%s9509_s1 + $0x9f8] ss:$12 sps:$4 sm:$0xff]   ;;  %v7209_v14 = vld [vmem:[%s9509_s1 + $0x9e0] ss:$12 sps:$4 sm:$0xff]  }
 0x1ca   :  { %v7206_v16 = vld [vmem:[%s9509_s1 + $0x7b8] ss:$12 sps:$4 sm:$0xff]   ;;  %v7210_v15 = vld [vmem:[%s9509_s1 + $0x7a0] ss:$12 sps:$4 sm:$0xff]   ;;  %v7212_v31 = vld [vmem:[%s9509_s1 + $0x848] ss:$12 sps:$4 sm:$0xff]  }
 0x1cb   :  { %6203 = vmatpush3.bf16.msra.mxu0 %v7162_v13  ;;  %v7207_v13 = vld [vmem:[%s9509_s1 + $0x938] ss:$12 sps:$4 sm:$0xff]   ;;  %v7211_v6 = vld [vmem:[%s9509_s1 + $0x920] ss:$12 sps:$4 sm:$0xff]  }
 0x1cc   :  { %6225 = vmatpush3.bf16.msra.mxu1 %v7163_v19  ;;  %6204 = vmatprep.subr.bf16.mxu0 %v7164_v18  ;;  %v7208_v19 = vld [vmem:[%s9509_s1 + $0x860] ss:$12 sps:$4 sm:$0xff]   ;;  %v7213_v18 = vld [vmem:[%s9509_s1 + $0x9c8] ss:$12 sps:$4 sm:$0xff]  }
 0x1cd   :  { %6226 = vmatprep.subr.bf16.mxu1 %v7165_v37  ;;  %v7214_v37 = vld [vmem:[%s9509_s1 + $0x788] ss:$12 sps:$4 sm:$0xff]  }
 0x1cf   :  { %6205 = vmatpush3.bf16.msra.mxu0 %v7166_v24  ;;  %v7215_v24 = vld [vmem:[%s9509_s1 + $0x908] ss:$12 sps:$4 sm:$0xff]  }
 0x1d0   :  { %6227 = vmatpush3.bf16.msra.mxu1 %v7167_v20  ;;  %6206 = vmatprep.subr.bf16.mxu0 %v7168_v21  ;;  %v7216_v20 = vld [vmem:[%s9509_s1 + $0xbf0] ss:$12 sps:$4 sm:$0xff]  }
 0x1d1   :  { %6228 = vmatprep.subr.bf16.mxu1 %v7169_v51  ;;  %v7217_v21 = vld [vmem:[%s9509_s1 + $0xd70] ss:$12 sps:$4 sm:$0xff]  }
 0x1d2   :  { %v7218_v51 = vld [vmem:[%s9509_s1 + $0xb30] ss:$12 sps:$4 sm:$0xff]  }
 0x1d3   :  { %6207 = vmatpush3.bf16.msra.mxu0 %v7170_v36  ;;  %v7219_v36 = vld [vmem:[%s9509_s1 + $0xcb0] ss:$12 sps:$4 sm:$0xff]  }
 0x1d4   :  { %6229 = vmatpush3.bf16.msra.mxu1 %v7171_v27  ;;  %6208 = vmatprep.subr.bf16.mxu0 %v7172_v29  ;;  %v7220_v27 = vld [vmem:[%s9509_s1 + $0xbd8] ss:$12 sps:$4 sm:$0xff]  }
 0x1d5   :  { %6230 = vmatprep.subr.bf16.mxu1 %v7173_v30  ;;  %v7221_v29 = vld [vmem:[%s9509_s1 + $0xd58] ss:$12 sps:$4 sm:$0xff]  }
 0x1d7   :  { %6209 = vmatpush3.bf16.msra.mxu0 %v7174_v28 }
 0x1d8   :  { %6231 = vmatpush3.bf16.msra.mxu1 %v7175_v32  ;;  %6210 = vmatprep.subr.bf16.mxu0 %v7176_v47  ;;  %v7222_v47 = vld [vmem:[%s9509_s1 + $0xb18] ss:$12 sps:$4 sm:$0xff]  }
 0x1d9   :  { %6232 = vmatprep.subr.bf16.mxu1 %v7177_v33  ;;  %v7223_v33 = vld [vmem:[%s9509_s1 + $0xc98] ss:$12 sps:$4 sm:$0xff]  }
 0x1db   :  { %6211 = vmatpush3.bf16.msra.mxu0 %v7178_v34 }
 0x1dc   :  { %6233 = vmatpush3.bf16.msra.mxu1 %v7179_v41  ;;  %6212 = vmatprep.subr.bf16.mxu0 %v7180_v22 }
 0x1dd   :  { %6234 = vmatprep.subr.bf16.mxu1 %v7181_v23 }
 0x1df   :  { %6213 = vmatpush3.bf16.msra.mxu0 %v7182_v44 }
 0x1e0   :  { %6235 = vmatpush3.bf16.msra.mxu1 %v7183_v45  ;;  %6242 = vmatprep.subr.bf16.mxu0 %v7184_v46  ;;  %v7226_v46 = vld [vmem:[%s9509_s1 + $0xb00] ss:$12 sps:$4 sm:$0xff]  }
 0x1e1   :  { %6264 = vmatprep.subr.bf16.mxu1 %v7185_v48  ;;  %v7227_v48 = vld [vmem:[%s9509_s1 + $0xc80] ss:$12 sps:$4 sm:$0xff]  }
 0x1e2   :  { %4825 = vmatmul.mubr.bf16.vlgmr.msra.gmra.mxu0 %v7797_v17  ;;  %v7195_v17 = vld [vmem:[%s9509_s1 + $0x980] ss:$12 sps:$4 sm:$0xff]  }
 0x1e3   :  { %4865 = vmatmul.mubr.bf16.vlgmr.msra.gmra.mxu1 %v8023_v38  ;;  %6243 = vmatpush3.bf16.msra.mxu0 %v7186_v49  ;;  %v7196_v38 = vld [vmem:[%s9509_s1 + $0x8a8] ss:$12 sps:$4 sm:$0xff]  }
 0x1e4   :  { %6265 = vmatpush3.bf16.msra.mxu1 %v7187_v50  ;;  %6244 = vmatprep.subr.bf16.mxu0 %v7188_v52  ;;  %v7230_v50 = vld [vmem:[%s9509_s1 + $0xae8] ss:$12 sps:$4 sm:$0xff]  }
 0x1e5   :  { %6266 = vmatprep.subr.bf16.mxu1 %v7189_v53  ;;  %4904 = vmatprep.mubr.bf16.mxu0 %v7827_v25  ;;  %v7199_v25 = vld [vmem:[%s9509_s1 + $0x968] ss:$12 sps:$4 sm:$0xff]   ;;  %v7232_v53 = vld [vmem:[%s9509_s1 + $0xb90] ss:$12 sps:$4 sm:$0xff]  }
 0x1e6   :  { %4944 = vmatprep.mubr.bf16.mxu1 %v8045_v42  ;;  %v7200_v42 = vld [vmem:[%s9509_s1 + $0x890] ss:$12 sps:$4 sm:$0xff]   ;;  %v7231_v52 = vld [vmem:[%s9509_s1 + $0xc68] ss:$12 sps:$4 sm:$0xff]  }
 0x1e7   :  { %6245 = vmatpush3.bf16.msra.mxu0 %v7190_v55  ;;  %v7233_v55 = vld [vmem:[%s9509_s1 + $0xd10] ss:$12 sps:$4 sm:$0xff]  }
 0x1e8   :  { %6267 = vmatpush3.bf16.msra.mxu1 %v7191_v56  ;;  %6246 = vmatprep.subr.bf16.mxu0 %v7192_v57  ;;  %v7234_v56 = vld [vmem:[%s9509_s1 + $0xad0] ss:$12 sps:$4 sm:$0xff]  }
 0x1e9   :  { %6268 = vmatprep.subr.bf16.mxu1 %v7193_v2  ;;  %v7235_v57 = vld [vmem:[%s9509_s1 + $0xc50] ss:$12 sps:$4 sm:$0xff]   ;;  %v7236_v2 = vld [vmem:[%s9509_s1 + $0xb78] ss:$12 sps:$4 sm:$0xff]  }
 0x1eb   :  { %6247 = vmatpush3.bf16.msra.mxu0 %v7194_v3  ;;  %v7237_v3 = vld [vmem:[%s9509_s1 + $0xcf8] ss:$12 sps:$4 sm:$0xff]  }
 0x1ec   :  { %6269 = vmatpush3.bf16.msra.mxu1 %v7195_v17  ;;  %6248 = vmatprep.subr.bf16.mxu0 %v7196_v38  ;;  %v7238_v17 = vld [vmem:[%s9509_s1 + $0xab8] ss:$12 sps:$4 sm:$0xff]  }
 0x1ed   :  { %6270 = vmatprep.subr.bf16.mxu1 %v7197_v59  ;;  %v7239_v38 = vld [vmem:[%s9509_s1 + $0xc38] ss:$12 sps:$4 sm:$0xff]   ;;  %v7240_v59 = vld [vmem:[%s9509_s1 + $0xb60] ss:$12 sps:$4 sm:$0xff]  }
 0x1ef   :  { %6249 = vmatpush3.bf16.msra.mxu0 %v7198_v62  ;;  %v7241_v62 = vld [vmem:[%s9509_s1 + $0xce0] ss:$12 sps:$4 sm:$0xff]  }
 0x1f0   :  { %6271 = vmatpush3.bf16.msra.mxu1 %v7199_v25  ;;  %6250 = vmatprep.subr.bf16.mxu0 %v7200_v42  ;;  %v7242_v25 = vld [vmem:[%s9509_s1 + $0xaa0] ss:$12 sps:$4 sm:$0xff]  }
 0x1f1   :  { %6272 = vmatprep.subr.bf16.mxu1 %v7201_v40  ;;  %v7243_v42 = vld [vmem:[%s9509_s1 + $0xc20] ss:$12 sps:$4 sm:$0xff]   ;;  %v7244_v40 = vld [vmem:[%s9509_s1 + $0xb48] ss:$12 sps:$4 sm:$0xff]  }
 0x1f3   :  { %6251 = vmatpush3.bf16.msra.mxu0 %v7202_v5  ;;  %v7245_v5 = vld [vmem:[%s9509_s1 + $0xcc8] ss:$12 sps:$4 sm:$0xff]  }
 0x1f4   :  { %6273 = vmatpush3.bf16.msra.mxu1 %v7203_v8  ;;  %6252 = vmatprep.subr.bf16.mxu0 %v7204_v11  ;;  %v7246_v8 = vld [vmem:[%s9509_s1 + $0xa88] ss:$12 sps:$4 sm:$0xff]  }
 0x1f5   :  { %6274 = vmatprep.subr.bf16.mxu1 %v7205_v12  ;;  %v7247_v11 = vld [vmem:[%s9509_s1 + $0xc08] ss:$12 sps:$4 sm:$0xff]   ;;  %v7248_v12 = vld [vmem:[%s9509_s1 + $0xef0] ss:$12 sps:$4 sm:$0xff]  }
 0x1f7   :  { %6253 = vmatpush3.bf16.msra.mxu0 %v7206_v16  ;;  %v7249_v16 = vld [vmem:[%s9509_s1 + $0x1070] ss:$12 sps:$4 sm:$0xff]  }
 0x1f8   :  { %6275 = vmatpush3.bf16.msra.mxu1 %v7207_v13  ;;  %6254 = vmatprep.subr.bf16.mxu0 %v7208_v19  ;;  %v7250_v13 = vld [vmem:[%s9509_s1 + $0xe30] ss:$12 sps:$4 sm:$0xff]  }
 0x1f9   :  { %6276 = vmatprep.subr.bf16.mxu1 %v7209_v14  ;;  %v7251_v19 = vld [vmem:[%s9509_s1 + $0xfb0] ss:$12 sps:$4 sm:$0xff]   ;;  %v7252_v14 = vld [vmem:[%s9509_s1 + $0xed8] ss:$12 sps:$4 sm:$0xff]  }
 0x1fb   :  { %6255 = vmatpush3.bf16.msra.mxu0 %v7210_v15  ;;  %v7253_v15 = vld [vmem:[%s9509_s1 + $0x1058] ss:$12 sps:$4 sm:$0xff]  }
 0x1fc   :  { %6277 = vmatpush3.bf16.msra.mxu1 %v7211_v6  ;;  %6256 = vmatprep.subr.bf16.mxu0 %v7212_v31  ;;  %v7254_v6 = vld [vmem:[%s9509_s1 + $0xe18] ss:$12 sps:$4 sm:$0xff]  }
 0x1fd   :  { %6278 = vmatprep.subr.bf16.mxu1 %v7213_v18  ;;  %v7255_v31 = vld [vmem:[%s9509_s1 + $0xf98] ss:$12 sps:$4 sm:$0xff]   ;;  %v7256_v18 = vld [vmem:[%s9509_s1 + $0xec0] ss:$12 sps:$4 sm:$0xff]  }
 0x1ff   :  { %6257 = vmatpush3.bf16.msra.mxu0 %v7214_v37  ;;  %v7259_v37 = vld [vmem:[%s9509_s1 + $0xf80] ss:$12 sps:$4 sm:$0xff]  }
 0x200   :  { %6279 = vmatpush3.bf16.msra.mxu1 %v7215_v24  ;;  %6286 = vmatprep.subr.bf16.mxu0 %v7216_v20  ;;  %v7260_v24 = vld [vmem:[%s9509_s1 + $0xea8] ss:$12 sps:$4 sm:$0xff]  }
 0x201   :  { %6308 = vmatprep.subr.bf16.mxu1 %v7217_v21  ;;  %v7263_v20 = vld [vmem:[%s9509_s1 + $0xf68] ss:$12 sps:$4 sm:$0xff]   ;;  %v7264_v21 = vld [vmem:[%s9509_s1 + $0xe90] ss:$12 sps:$4 sm:$0xff]  }
 0x202   :  { %v4501_v30 = vpop.f32.mrf.mxu0  ;;  %4905 = vmatmul.mubr.bf16.vlgmr.msra.gmra.mxu0 %v8027_v39  ;;  %v7224_v39 = vld [vmem:[%s9509_s1 + $0xbc0] ss:$12 sps:$4 sm:$0xff]  }
 0x203   :  { %v4542_v28 = vpop.f32.mrf.mxu1  ;;  %4945 = vmatmul.mubr.bf16.vlgmr.msra.gmra.mxu1 %v8247_v0  ;;  %v4502_v32 = vadd.f32 %v4501_v30, %v8938_v7  ;;  %6287 = vmatpush3.bf16.msra.mxu0 %v7218_v51  ;;  %v7225_v0 = vld [vmem:[%s9509_s1 + $0xd40] ss:$12 sps:$4 sm:$0xff]   ;;  %v7265_v51 = vld [vmem:[%s9509_s1 + $0x1010] ss:$12 sps:$4 sm:$0xff]   ;;  %v7269_v30 = vld [vmem:[%s9509_s1 + $0xff8] ss:$12 sps:$4 sm:$0xff]  }
 0x204   :  { %6309 = vmatpush3.bf16.msra.mxu1 %v7219_v36  ;;  %v4503_v34 = vpop.f32.mrf.mxu0  ;;  %6288 = vmatprep.subr.bf16.mxu0 %v7220_v27  ;;  %v7266_v36 = vld [vmem:[%s9509_s1 + $0xdd0] ss:$12 sps:$4 sm:$0xff]  }
 0x205   :  { %v4544_v41 = vpop.f32.mrf.mxu1  ;;  %6310 = vmatprep.subr.bf16.mxu1 %v7221_v29  ;;  %v9144_v7 = vadd.f32 %v4542_v28, %v4502_v32  ;;  %v4504_v22 = vadd.f32 %v4503_v34, %v8949_v26  ;;  %4984 = vmatprep.mubr.bf16.mxu0 %v8049_v43  ;;  %v7228_v43 = vld [vmem:[%s9509_s1 + $0xba8] ss:$12 sps:$4 sm:$0xff]   ;;  %v7267_v27 = vld [vmem:[%s9509_s1 + $0xf50] ss:$12 sps:$4 sm:$0xff]   ;;  %v7268_v29 = vld [vmem:[%s9509_s1 + $0xe78] ss:$12 sps:$4 sm:$0xff]  }
 0x206   :  { %5024 = vmatprep.mubr.bf16.mxu1 %v8274_v9  ;;  %v4505_v23 = vpop.f32.mrf.mxu0  ;;  %v7229_v9 = vld [vmem:[%s9509_s1 + $0xd28] ss:$12 sps:$4 sm:$0xff]   ;;  %v7270_v28 = vld [vmem:[%s9509_s1 + $0xdb8] ss:$12 sps:$4 sm:$0xff]   ;;  %v7274_v34 = vld [vmem:[%s9509_s1 + $0xda0] ss:$12 sps:$4 sm:$0xff]  }
 0x207   :  { %v4546_v44 = vpop.f32.mrf.mxu1  ;;  %v9149_v45 = vadd.f32 %v4544_v41, %v4504_v22  ;;  %6289 = vmatpush3.bf16.msra.mxu0 %v7222_v47  ;;  %v7271_v32 = vld [vmem:[%s9509_s1 + $0xf38] ss:$12 sps:$4 sm:$0xff]   ;;  %v7272_v47 = vld [vmem:[%s9509_s1 + $0xe60] ss:$12 sps:$4 sm:$0xff]   ;;  %v7278_v22 = vld [vmem:[%s9509_s1 + $0xd88] ss:$12 sps:$4 sm:$0xff]  }
 0x208   :  { %6311 = vmatpush3.bf16.msra.mxu1 %v7223_v33  ;;  %v4506_v49 = vpop.f32.mrf.mxu0  ;;  %6290 = vmatprep.subr.bf16.mxu0 %v7224_v39  ;;  %v7273_v33 = vld [vmem:[%s9509_s1 + $0xfe0] ss:$12 sps:$4 sm:$0xff]   ;;  %v7276_v39 = vld [vmem:[%s9509_s1 + $0xe48] ss:$12 sps:$4 sm:$0xff]   ;;  %v7280_v44 = vld [vmem:[%s9509_s1 + $0x11f0] ss:$12 sps:$4 sm:$0xff]  }
 0x209   :  { %v4547_v26 = vpop.f32.mrf.mxu1  ;;  %6312 = vmatprep.subr.bf16.mxu1 %v7225_v0  ;;  %v7275_v41 = vld [vmem:[%s9509_s1 + $0xf20] ss:$12 sps:$4 sm:$0xff]   ;;  %v7277_v0 = vld [vmem:[%s9509_s1 + $0xfc8] ss:$12 sps:$4 sm:$0xff]   ;;  %v7331_v49 = vmov 0.0  }
 0x20a   :  { %v7279_v23 = vld [vmem:[%s9509_s1 + $0xf08] ss:$12 sps:$4 sm:$0xff]   ;;  %v7283_v26 = vld [vmem:[%s9509_s1 + $0x11d8] ss:$12 sps:$4 sm:$0xff]  }
 0x20b   :  { %6291 = vmatpush3.bf16.msra.mxu0 %v7226_v46  ;;  %v7281_v46 = vld [vmem:[%s9509_s1 + $0x1130] ss:$12 sps:$4 sm:$0xff]  }
 0x20c   :  { %6313 = vmatpush3.bf16.msra.mxu1 %v7227_v48  ;;  %6292 = vmatprep.subr.bf16.mxu0 %v7228_v43  ;;  %v7282_v48 = vld [vmem:[%s9509_s1 + $0x12b0] ss:$12 sps:$4 sm:$0xff]  }
 0x20d   :  { %6314 = vmatprep.subr.bf16.mxu1 %v7229_v9 }
 0x20f   :  { %6293 = vmatpush3.bf16.msra.mxu0 %v7230_v50  ;;  %v7284_v50 = vld [vmem:[%s9509_s1 + $0x1118] ss:$12 sps:$4 sm:$0xff]  }
 0x210   :  { %6315 = vmatpush3.bf16.msra.mxu1 %v7231_v52  ;;  %6294 = vmatprep.subr.bf16.mxu0 %v7232_v53  ;;  %v7285_v52 = vld [vmem:[%s9509_s1 + $0x1298] ss:$12 sps:$4 sm:$0xff]  }
 0x211   :  { %6316 = vmatprep.subr.bf16.mxu1 %v7233_v55 }
 0x213   :  { %6295 = vmatpush3.bf16.msra.mxu0 %v7234_v56 }
 0x214   :  { %6317 = vmatpush3.bf16.msra.mxu1 %v7235_v57  ;;  %6296 = vmatprep.subr.bf16.mxu0 %v7236_v2  ;;  %v7287_v57 = vld [vmem:[%s9509_s1 + $0x1100] ss:$12 sps:$4 sm:$0xff]  }
 0x215   :  { %6318 = vmatprep.subr.bf16.mxu1 %v7237_v3  ;;  %v7288_v2 = vld [vmem:[%s9509_s1 + $0x1280] ss:$12 sps:$4 sm:$0xff]  }
 0x217   :  { %6297 = vmatpush3.bf16.msra.mxu0 %v7238_v17 }
 0x218   :  { %6319 = vmatpush3.bf16.msra.mxu1 %v7239_v38  ;;  %6298 = vmatprep.subr.bf16.mxu0 %v7240_v59  ;;  %v7290_v38 = vld [vmem:[%s9509_s1 + $0x10e8] ss:$12 sps:$4 sm:$0xff]  }
 0x219   :  { %6320 = vmatprep.subr.bf16.mxu1 %v7241_v62  ;;  %v7291_v59 = vld [vmem:[%s9509_s1 + $0x1268] ss:$12 sps:$4 sm:$0xff]   ;;  %v7292_v62 = vld [vmem:[%s9509_s1 + $0x1190] ss:$12 sps:$4 sm:$0xff]  }
 0x21b   :  { %6299 = vmatpush3.bf16.msra.mxu0 %v7242_v25  ;;  %v7293_v25 = vld [vmem:[%s9509_s1 + $0x10d0] ss:$12 sps:$4 sm:$0xff]  }
 0x21c   :  { %6321 = vmatpush3.bf16.msra.mxu1 %v7243_v42  ;;  %6300 = vmatprep.subr.bf16.mxu0 %v7244_v40  ;;  %v7294_v42 = vld [vmem:[%s9509_s1 + $0x1250] ss:$12 sps:$4 sm:$0xff]   ;;  %v7295_v40 = vld [vmem:[%s9509_s1 + $0x1178] ss:$12 sps:$4 sm:$0xff]  }
 0x21d   :  { %6322 = vmatprep.subr.bf16.mxu1 %v7245_v5  ;;  %v7296_v5 = vld [vmem:[%s9509_s1 + $0x10b8] ss:$12 sps:$4 sm:$0xff]  }
 0x21f   :  { %6301 = vmatpush3.bf16.msra.mxu0 %v7246_v8  ;;  %v7297_v8 = vld [vmem:[%s9509_s1 + $0x1238] ss:$12 sps:$4 sm:$0xff]  }
 0x220   :  { %6323 = vmatpush3.bf16.msra.mxu1 %v7247_v11  ;;  %6330 = vmatprep.subr.bf16.mxu0 %v7248_v12  ;;  %v7298_v11 = vld [vmem:[%s9509_s1 + $0x1160] ss:$12 sps:$4 sm:$0xff]  }
 0x221   :  { %6352 = vmatprep.subr.bf16.mxu1 %v7249_v16  ;;  %v7299_v12 = vld [vmem:[%s9509_s1 + $0x10a0] ss:$12 sps:$4 sm:$0xff]  }
 0x222   :  { %4985 = vmatmul.mubr.bf16.vlgmr.msra.gmra.mxu0 %v8251_v1  ;;  %v7257_v1 = vld [vmem:[%s9509_s1 + $0x1040] ss:$12 sps:$4 sm:$0xff]  }
 0x223   :  { %5025 = vmatmul.mubr.bf16.vlgmr.msra.gmra.mxu1 %v8481_v60  ;;  %6331 = vmatpush3.bf16.msra.mxu0 %v7250_v13  ;;  %v7258_v60 = vld [vmem:[%s9509_s1 + $0xe00] ss:$12 sps:$4 sm:$0xff]   ;;  %v7301_v13 = vld [vmem:[%s9509_s1 + $0x1148] ss:$12 sps:$4 sm:$0xff]  }
 0x224   :  { %6353 = vmatpush3.bf16.msra.mxu1 %v7251_v19  ;;  %6332 = vmatprep.subr.bf16.mxu0 %v7252_v14  ;;  %v7300_v16 = vld [vmem:[%s9509_s1 + $0x1220] ss:$12 sps:$4 sm:$0xff]   ;;  %v7302_v19 = vld [vmem:[%s9509_s1 + $0x1088] ss:$12 sps:$4 sm:$0xff]  }
 0x225   :  { %6354 = vmatprep.subr.bf16.mxu1 %v7253_v15  ;;  %5064 = vmatprep.mubr.bf16.mxu0 %v8278_v10  ;;  %v7261_v10 = vld [vmem:[%s9509_s1 + $0x1028] ss:$12 sps:$4 sm:$0xff]   ;;  %v7304_v15 = vld [vmem:[%s9512_s3 + $0x78] sm:$0xff]  }
 0x226   :  { %5104 = vmatprep.mubr.bf16.mxu1 %v8503_v4  ;;  %v7262_v4 = vld [vmem:[%s9509_s1 + $0xde8] ss:$12 sps:$4 sm:$0xff]  }
 0x227   :  { %6333 = vmatpush3.bf16.msra.mxu0 %v7254_v6  ;;  %v7303_v14 = vld [vmem:[%s9509_s1 + $0x1208] ss:$12 sps:$4 sm:$0xff]  }
 0x228   :  { %6355 = vmatpush3.bf16.msra.mxu1 %v7255_v31  ;;  %6334 = vmatprep.subr.bf16.mxu0 %v7256_v18  ;;  %v7305_v31 = vld [vmem:[%s9512_s3 + $0x38] sm:$0xff]   ;;  %v7306_v18 = vld [vmem:[%s9512_s3 + $0x70] sm:$0xff]  }
 0x229   :  { %6356 = vmatprep.subr.bf16.mxu1 %v7257_v1 }
 0x22b   :  { %6335 = vmatpush3.bf16.msra.mxu0 %v7258_v60 }
 0x22c   :  { %6357 = vmatpush3.bf16.msra.mxu1 %v7259_v37  ;;  %6336 = vmatprep.subr.bf16.mxu0 %v7260_v24  ;;  %v7307_v24 = vld [vmem:[%s9512_s3 + $0x30] sm:$0xff]  }
 0x22d   :  { %6358 = vmatprep.subr.bf16.mxu1 %v7261_v10 }
 0x22f   :  { %6337 = vmatpush3.bf16.msra.mxu0 %v7262_v4 }
 0x230   :  { %6359 = vmatpush3.bf16.msra.mxu1 %v7263_v20  ;;  %6338 = vmatprep.subr.bf16.mxu0 %v7264_v21 }
 0x231   :  { %6360 = vmatprep.subr.bf16.mxu1 %v7265_v51 }
 0x233   :  { %6339 = vmatpush3.bf16.msra.mxu0 %v7266_v36 }
 0x234   :  { %6361 = vmatpush3.bf16.msra.mxu1 %v7267_v27  ;;  %6340 = vmatprep.subr.bf16.mxu0 %v7268_v29  ;;  %v7309_v29 = vld [vmem:[%s9512_s3 + $0x28] sm:$0xff]  }
 0x235   :  { %6362 = vmatprep.subr.bf16.mxu1 %v7269_v30 }
 0x237   :  { %6341 = vmatpush3.bf16.msra.mxu0 %v7270_v28 }
 0x238   :  { %6363 = vmatpush3.bf16.msra.mxu1 %v7271_v32  ;;  %6342 = vmatprep.subr.bf16.mxu0 %v7272_v47  ;;  %v7310_v32 = vld [vmem:[%s9512_s3 + $0x60] sm:$0xff]  }
 0x239   :  { %6364 = vmatprep.subr.bf16.mxu1 %v7273_v33  ;;  %v7311_v33 = vld [vmem:[%s9512_s3 + $0x20] sm:$0xff]  }
 0x23b   :  { %6343 = vmatpush3.bf16.msra.mxu0 %v7274_v34  ;;  %v7312_v34 = vld [vmem:[%s9512_s3 + $0x58] sm:$0xff]  }
 0x23c   :  { %6365 = vmatpush3.bf16.msra.mxu1 %v7275_v41  ;;  %6344 = vmatprep.subr.bf16.mxu0 %v7276_v39  ;;  %v7313_v41 = vld [vmem:[%s9512_s3 + $0x18] sm:$0xff]   ;;  %v7314_v39 = vld [vmem:[%s9512_s3 + $0x50] sm:$0xff]  }
 0x23d   :  { %6366 = vmatprep.subr.bf16.mxu1 %v7277_v0 }
 0x23f   :  { %6345 = vmatpush3.bf16.msra.mxu0 %v7278_v22  ;;  %v7315_v22 = vld [vmem:[%s9512_s3 + $0x10] sm:$0xff]  }
 0x240   :  { %6367 = vmatpush3.bf16.msra.mxu1 %v7279_v23  ;;  %6374 = vmatprep.subr.bf16.mxu0 %v7280_v44  ;;  %v7316_v23 = vld [vmem:[%s9512_s3 + $0x48] sm:$0xff]  }
 0x241   :  { %6436 = vmatprep.subr.bf16.mxu1 %v7331_v49 }
 0x242   :  { %v9330_v43 = vpop.f32.mrf.mxu0  ;;  %5065 = vmatmul.mubr.bf16.vlgmr.msra.gmra.mxu0 %v8485_v61  ;;  %v7286_v61 = vld [vmem:[%s9509_s1 + $0x11c0] ss:$12 sps:$4 sm:$0xff]  }
 0x243   :  { %v9333_v9 = vpop.f32.mrf.mxu1  ;;  %5105 = vmatmul.mubr.bf16.vlgmr.msra.gmra.mxu1 %v8701_v58  ;;  %6375 = vmatpush3.bf16.msra.mxu0 %v7281_v46  ;;  %v4584_v0 = vadd.f32 %v9330_v43, %v9144_v7  ;;  %v7317_v46 = vld [vmem:[%s9512_s3 + $0x8] sm:$0xff]   ;;  %v7318_v7 = vld [vmem:[%s9512_s3 + $0x40] sm:$0xff]  }
 0x244   :  { %6437 = vmatpush3.bf16.msra.mxu1 %v7282_v48  ;;  %v4585_v53 = vpop.f32.mrf.mxu0  ;;  %6376 = vmatprep.subr.bf16.mxu0 %v7283_v26  ;;  %v7319_v26 = vld [vmem:[%s9512_s3] sm:$0xff]  }
 0x245   :  { %v9342_v55 = vpop.f32.mrf.mxu1  ;;  %6438 = vmatprep.subr.bf16.mxu1 %v7331_v49  ;;  %5144 = vmatprep.mubr.bf16.mxu0 %v8507_v35  ;;  %v7289_v35 = vld [vmem:[%s9509_s1 + $0x11a8] ss:$12 sps:$4 sm:$0xff]   ;;  %v4586_v6 = vadd.f32 %v4585_v53, %v9149_v45  ;;  %v7328_v45 = vld [vmem:[%s9510_s0 + $0x60] ss:$0 sps:$4 sm:$0xff]   ;;  %v4625_v44 = vadd.f32 %v9333_v9, %v4584_v0  ;;  %v846_v9 = vsub.s32 2, %v8220_v54 }
 0x246   :  { %6452 = vmatprep.mubr.msk.bf16.mxu1 %vm7332_vm0, %v7331_v49  ;;  %v4587_v58 = vpop.f32.mrf.mxu0 }
 0x247   :  { %v4628_v56 = vpop.f32.mrf.mxu1  ;;  %6377 = vmatpush3.bf16.msra.mxu0 %v7284_v50  ;;  %v4627_v37 = vadd.f32 %v9342_v55, %v4586_v6 }
 0x248   :  { %6439 = vmatpush3.bf16.msra.mxu1 %v7285_v52  ;;  %v4588_v3 = vpop.f32.mrf.mxu0  ;;  %6378 = vmatprep.subr.bf16.mxu0 %v7286_v61  ;;  %v7329_v52 = vld [vmem:[%s9511_s2] sm:$0x7] }
 0x249   :  { %v4629_v17 = vpop.f32.mrf.mxu1  ;;  %6440 = vmatprep.subr.bf16.mxu1 %v7331_v49  ;;  %v847_v53 = vrot.slane %v7329_v52, %v846_v9 }
 0x24b   :  { %6379 = vmatpush3.bf16.msra.mxu0 %v7287_v57 }
 0x24c   :  { %6441 = vmatpush3.bf16.msra.mxu1 %v7288_v2  ;;  %6380 = vmatprep.subr.bf16.mxu0 %v7289_v35 }
 0x24d   :  { %6442 = vmatprep.subr.bf16.mxu1 %v7331_v49 }
 0x24f   :  { %6381 = vmatpush3.bf16.msra.mxu0 %v7290_v38 }
 0x250   :  { %6443 = vmatpush3.bf16.msra.mxu1 %v7291_v59  ;;  %6382 = vmatprep.subr.bf16.mxu0 %v7292_v62 }
 0x251   :  { %6444 = vmatprep.subr.bf16.mxu1 %v7331_v49 }
 0x253   :  { %6383 = vmatpush3.bf16.msra.mxu0 %v7293_v25  ;;  %v7320_v25 = vld [vmem:[%s9512_s3 + $0xb8] sm:$0xff]  }
 0x254   :  { %6445 = vmatpush3.bf16.msra.mxu1 %v7294_v42  ;;  %6384 = vmatprep.subr.bf16.mxu0 %v7295_v40  ;;  %v7321_v42 = vld [vmem:[%s9512_s3 + $0xb0] sm:$0xff]   ;;  %v7322_v40 = vld [vmem:[%s9512_s3 + $0xa8] sm:$0xff]  }
 0x255   :  { %6446 = vmatprep.subr.bf16.mxu1 %v7331_v49 }
 0x257   :  { %6385 = vmatpush3.bf16.msra.mxu0 %v7296_v5  ;;  %v7323_v5 = vld [vmem:[%s9512_s3 + $0xa0] sm:$0xff]  }
 0x258   :  { %6447 = vmatpush3.bf16.msra.mxu1 %v7297_v8  ;;  %6386 = vmatprep.subr.bf16.mxu0 %v7298_v11  ;;  %v7324_v8 = vld [vmem:[%s9512_s3 + $0x98] sm:$0xff]  }
 0x259   :  { %6448 = vmatprep.subr.bf16.mxu1 %v7331_v49 }
 0x25b   :  { %6387 = vmatpush3.bf16.msra.mxu0 %v7299_v12 }
 0x25c   :  { %6449 = vmatpush3.bf16.msra.mxu1 %v7300_v16  ;;  %6388 = vmatprep.subr.bf16.mxu0 %v7301_v13  ;;  %v7325_v16 = vld [vmem:[%s9512_s3 + $0x90] sm:$0xff]  }
 0x25d   :  { %6450 = vmatprep.subr.bf16.mxu1 %v7331_v49 }
 0x25f   :  { %6389 = vmatpush3.bf16.msra.mxu0 %v7302_v19 }
 0x260   :  { %6451 = vmatpush3.bf16.msra.mxu1 %v7303_v14  ;;  %6405 = vmatprep.subr.bf16.mxu0 %v7304_v15 }
 0x261   :  { %6456 = vmatprep.subr.bf16.mxu1 %v7331_v49 }
 0x262   :  { %v4665_v1 = vpop.f32.mrf.mxu0  ;;  %5145 = vmatmul.mubr.bf16.vlgmr.msra.gmra.mxu0 %v8705_v63  ;;  %v7308_v63 = vld [vmem:[%s9512_s3 + $0x68] sm:$0xff]  }
 0x263   :  { %6453 = vmatmul.mubr.bf16.vlgmr.msra.gmra.mxu1 %v7328_v45  ;;  %v6148_v60 = vpop.f32.mrf.mxu1  ;;  %6406 = vmatpush3.bf16.msra.mxu0 %v7305_v31  ;;  %v4666_v48 = vadd.f32 %v4665_v1, %v4625_v44 }
 0x264   :  { %6472 = vmatprep.mubr.msk.bf16.mxu1 %vm7332_vm0, %v7331_v49  ;;  %v4667_v10 = vpop.f32.mrf.mxu0  ;;  %6407 = vmatprep.subr.bf16.mxu0 %v7306_v18  ;;  %v7326_v18 = vld [vmem:[%s9512_s3 + $0x88] sm:$0xff]  }
 0x265   :  { %v6149_v4 = vpop.f32.mrf.mxu1  ;;  %v4668_v20 = vadd.f32 %v4667_v10, %v4627_v37  ;;  %v5192_v43 = vmax.f32 %v4666_v48, 0.0  ;;  %6457 = vmatpush3.bf16.msra.mxu1 %v7320_v25 }
 0x266   :  { %v6150_v21 = vadd.f32 %v6149_v4, %v6148_v60  ;;  %v4669_v51 = vpop.f32.mrf.mxu0  ;;  %6458 = vmatprep.subr.bf16.mxu1 %v7331_v49 }
 0x267   :  { %v6151_v36 = vpop.f32.mrf.mxu1  ;;  %v5193_v27 = vmax.f32 %v4668_v20, 0.0  ;;  %6408 = vmatpush3.bf16.msra.mxu0 %v7307_v24  ;;  %v5195_v50 = vpack.c.bf16 %v5192_v43, %v5192_v43  ;;  %v7327_v24 = vld [vmem:[%s9512_s3 + $0x80] sm:$0xff]  }
 0x268   :  { %v4670_v30 = vpop.f32.mrf.mxu0  ;;  %6409 = vmatprep.subr.bf16.mxu0 %v7308_v63  ;;  %v4707_v57 = vadd.f32 %v6150_v21, %v847_v53 }
 0x269   :  { %v6152_v28 = vpop.f32.mrf.mxu1  ;;  %v5196_v47 = vpack.c.bf16 %v5193_v27, %v5193_v27  ;;  %6459 = vmatpush3.bf16.msra.mxu1 %v7321_v42 }
 0x26a   :  { %6460 = vmatprep.subr.bf16.mxu1 %v7331_v49 }
 0x26b   :  { %6410 = vmatpush3.bf16.msra.mxu0 %v7309_v29  ;;  %5429 = vmatprep.mubr.bf16.mxu0 %v5196_v47 }
 0x26c   :  { %6411 = vmatprep.subr.bf16.mxu0 %v7310_v32 }
 0x26d   :  { %6461 = vmatpush3.bf16.msra.mxu1 %v7322_v40 }
 0x26e   :  { %6462 = vmatprep.subr.bf16.mxu1 %v7331_v49 }
 0x26f   :  { %6412 = vmatpush3.bf16.msra.mxu0 %v7311_v33 }
 0x270   :  { %6413 = vmatprep.subr.bf16.mxu0 %v7312_v34 }
 0x271   :  { %6463 = vmatpush3.bf16.msra.mxu1 %v7323_v5 }
 0x272   :  { %6464 = vmatprep.subr.bf16.mxu1 %v7331_v49 }
 0x273   :  { %6414 = vmatpush3.bf16.msra.mxu0 %v7313_v41 }
 0x274   :  { %6415 = vmatprep.subr.bf16.mxu0 %v7314_v39 }
 0x275   :  { %6465 = vmatpush3.bf16.msra.mxu1 %v7324_v8 }
 0x276   :  { %6466 = vmatprep.subr.bf16.mxu1 %v7331_v49 }
 0x277   :  { %6416 = vmatpush3.bf16.msra.mxu0 %v7315_v22 }
 0x278   :  { %6417 = vmatprep.subr.bf16.mxu0 %v7316_v23 }
 0x279   :  { %6467 = vmatpush3.bf16.msra.mxu1 %v7325_v16 }
 0x27a   :  { %6468 = vmatprep.subr.bf16.mxu1 %v7331_v49 }
 0x27b   :  { %6418 = vmatpush3.bf16.msra.mxu0 %v7317_v46 }
 0x27c   :  { %6419 = vmatprep.subr.bf16.mxu0 %v7318_v7 }
 0x27d   :  { %6469 = vmatpush3.bf16.msra.mxu1 %v7326_v18 }
 0x27e   :  { %6470 = vmatprep.subr.bf16.mxu1 %v7331_v49 }
 0x27f   :  { %6420 = vmatpush3.bf16.msra.mxu0 %v7319_v26 }
 0x281   :  { %6471 = vmatpush3.bf16.msra.mxu1 %v7327_v24 }
 0x282   :  { %v6170_v55 = vpop.f32.mrf.mxu0  ;;  %5430 = vmatmul.mubr.bf16.vlgmr.msra.gmra.mxu0 %v5195_v50 }
 0x283   :  { %v6192_v61 = vpop.f32.mrf.mxu1 }
 0x284   :  { %v6171_v58 = vpop.f32.mrf.mxu0 }
 0x285   :  { %v6193_v56 = vpop.f32.mrf.mxu1  ;;  %v6172_v2 = vadd.f32 %v6171_v58, %v6170_v55 }
 0x286   :  { %v6194_v3 = vadd.f32 %v6193_v56, %v6192_v61  ;;  %v6173_v17 = vpop.f32.mrf.mxu0 }
 0x287   :  { %v6195_v35 = vpop.f32.mrf.mxu1  ;;  %v4747_v38 = vadd.f32 %v6172_v2, %v4707_v57 }
 0x288   :  { %v6174_v59 = vpop.f32.mrf.mxu0 }
 0x289   :  { %v6196_v54 = vpop.f32.mrf.mxu1  ;;  %v4787_v62 = vadd.f32 %v6194_v3, %v4747_v38 }
 0x2a2   :  { %v6214_v11 = vpop.f32.mrf.mxu0 }
 0x2a3   :  { %v6236_v12 = vpop.f32.mrf.mxu1 }
 0x2a4   :  { %v6215_v13 = vpop.f32.mrf.mxu0 }
 0x2a5   :  { %v6237_v19 = vpop.f32.mrf.mxu1  ;;  %v6216_v14 = vadd.f32 %v6215_v13, %v6214_v11 }
 0x2a6   :  { %v6238_v15 = vadd.f32 %v6237_v19, %v6236_v12  ;;  %v6217_v6 = vpop.f32.mrf.mxu0 }
 0x2a7   :  { %v6239_v31 = vpop.f32.mrf.mxu1  ;;  %v4827_v1 = vadd.f32 %v6216_v14, %v4787_v62  ;;  %v6107_v14 = vld [vmem:[%s9513_s4] ss:$0 sm:$0xff] }
 0x2a8   :  { %v6218_v45 = vpop.f32.mrf.mxu0 }
 0x2a9   :  { %v6240_v60 = vpop.f32.mrf.mxu1  ;;  %v4867_v37 = vadd.f32 %v6238_v15, %v4827_v1 }
 0x2c2   :  { %v6258_v10 = vpop.f32.mrf.mxu0 }
 0x2c3   :  { %v6280_v4 = vpop.f32.mrf.mxu1 }
 0x2c4   :  { %v6259_v63 = vpop.f32.mrf.mxu0 }
 0x2c5   :  { %v6281_v20 = vpop.f32.mrf.mxu1  ;;  %v6260_v21 = vadd.f32 %v6259_v63, %v6258_v10 }
 0x2c6   :  { %v6282_v51 = vadd.f32 %v6281_v20, %v6280_v4  ;;  %v6261_v36 = vpop.f32.mrf.mxu0 }
 0x2c7   :  { %v6283_v27 = vpop.f32.mrf.mxu1  ;;  %v4907_v29 = vadd.f32 %v6260_v21, %v4867_v37 }
 0x2c8   :  { %v6262_v30 = vpop.f32.mrf.mxu0 }
 0x2c9   :  { %v6284_v28 = vpop.f32.mrf.mxu1  ;;  %v4947_v32 = vadd.f32 %v6282_v51, %v4907_v29 }
 0x2e2   :  { %v6302_v47 = vpop.f32.mrf.mxu0 }
 0x2e3   :  { %v6324_v33 = vpop.f32.mrf.mxu1 }
 0x2e4   :  { %v6303_v49 = vpop.f32.mrf.mxu0 }
 0x2e5   :  { %v6325_v34 = vpop.f32.mrf.mxu1  ;;  %v6304_v50 = vadd.f32 %v6303_v49, %v6302_v47 }
 0x2e6   :  { %v6305_v41 = vpop.f32.mrf.mxu0  ;;  %v6326_v53 = vadd.f32 %v6325_v34, %v6324_v33 }
 0x2e7   :  { %v6327_v39 = vpop.f32.mrf.mxu1  ;;  %v4987_v52 = vadd.f32 %v6304_v50, %v4947_v32 }
 0x2e8   :  { %v6306_v0 = vpop.f32.mrf.mxu0 }
 0x2e9   :  { %v6328_v22 = vpop.f32.mrf.mxu1  ;;  %v5027_v61 = vadd.f32 %v6326_v53, %v4987_v52 }
 0x302   :  { %v6346_v23 = vpop.f32.mrf.mxu0 }
 0x303   :  { %v6368_v44 = vpop.f32.mrf.mxu1 }
 0x304   :  { %v6347_v46 = vpop.f32.mrf.mxu0 }
 0x305   :  { %v6369_v48 = vpop.f32.mrf.mxu1  ;;  %v6348_v55 = vadd.f32 %v6347_v46, %v6346_v23 }
 0x306   :  { %v6349_v7 = vpop.f32.mrf.mxu0  ;;  %v6370_v56 = vadd.f32 %v6369_v48, %v6368_v44 }
 0x307   :  { %v6371_v26 = vpop.f32.mrf.mxu1  ;;  %v5067_v58 = vadd.f32 %v6348_v55, %v5027_v61 }
 0x308   :  { %v6350_v43 = vpop.f32.mrf.mxu0 }
 0x309   :  { %v6372_v9 = vpop.f32.mrf.mxu1  ;;  %v5107_v35 = vadd.f32 %v6370_v56, %v5067_v58 }
 0x322   :  { %v6390_v57 = vpop.f32.mrf.mxu0 }
 0x323   :  { %v5186_v2 = vpop.f32.mrf.mxu1 }
 0x324   :  { %v6391_v3 = vpop.f32.mrf.mxu0 }
 0x325   :  { %v6454_v17 = vpop.f32.mrf.mxu1  ;;  %v6392_v38 = vadd.f32 %v6391_v3, %v6390_v57 }
 0x326   :  { %v6393_v59 = vpop.f32.mrf.mxu0 }
 0x327   :  { %v5189_v54 = vpop.f32.mrf.mxu1  ;;  %v5147_v62 = vadd.f32 %v6392_v38, %v5107_v35 }
 0x328   :  { %v6394_v25 = vpop.f32.mrf.mxu0 }
 0x329   :  { %v6455_v42 = vpop.f32.mrf.mxu1  ;;  %v5187_v40 = vadd.f32 %v5186_v2, %v5147_v62 }
 0x32b   :  { %v5194_v5 = vmax.f32 %v5187_v40, 0.0 }
 0x32d   :  { %v5197_v8 = vpack.c.bf16 %v5194_v5, %v5194_v5 }
 0x32f   :  { %6473 = vmatmul.mubr.bf16.vlgmr.msra.gmra.mxu1 %v5197_v8 }
 0x342   :  { %v6421_v11 = vpop.f32.mrf.mxu0 }
 0x344   :  { %v6422_v12 = vpop.f32.mrf.mxu0 }
 0x345   :  { %v6423_v16 = vadd.f32 %v6422_v12, %v6421_v11 }
 0x346   :  { %v6424_v13 = vpop.f32.mrf.mxu0 }
 0x347   :  { %v5432_v15 = vadd.f32 %v6423_v16, %v6107_v14 }
 0x348   :  { %v6425_v19 = vpop.f32.mrf.mxu0 }
 0x3ef   :  { %v5471_v6 = vpop.f32.mrf.mxu1 }
 0x3f0   :  { %v5472_v31 = vadd.f32 %v5471_v6, %v5432_v15 }
 0x3f1   :  { %v6474_v18 = vpop.f32.mrf.mxu1 }
 0x3f2   :  { %5477 = vst [vmem:[%s9514_s5] sm:$0xff] %v5472_v31 }
 0x3f3   :  { %v5474_v1 = vpop.f32.mrf.mxu1 }
 0x3f5   :  { %v6475_v45 = vpop.f32.mrf.mxu1 }

</bundles_post_ra>
